<compile_context>
chip_gen: v7x
topology: tpu7x:2x2x1
jax: 0.10.0
libtpu: 0.0.40
codegen_flags: <defaults>
</compile_context>

<pallas_src>
import functools

import jax
import jax.numpy as jnp
from jax.experimental import pallas as pl
from jax.experimental.pallas import tpu as pltpu

EMBEDDING_DIM = 2048

PH4 = ((0, 0), (0, 1), (1, 0), (1, 1))  # the four 2x2-pool window phases


# ---------------------------------------------------------------------------
# Pallas kernel: [max over pool phases of (patches @ W)] -> +bias -> ReLU,
# followed by a chain of fused 1x1 conv (+BN+ReLU) matmuls.
# ---------------------------------------------------------------------------
def make_stage_kernel(n_phases, n_chain):
    def kernel(*refs):
        p_ref, w_ref, b_ref = refs[0], refs[1], refs[2]
        chain_refs = refs[3:3 + 2 * n_chain]
        o_ref = refs[3 + 2 * n_chain]

        w = w_ref[...]
        acc = jnp.dot(p_ref[0], w, preferred_element_type=jnp.float32)
        for d in range(1, n_phases):  # fused MaxPool2d(2): max over the 4 phase matmuls
            acc = jnp.maximum(acc, jnp.dot(p_ref[d], w, preferred_element_type=jnp.float32))
        y = jnp.maximum(acc + b_ref[...], 0.0)  # folded-BN bias + ReLU (f32 epilogue)

        for t in range(n_chain):  # chained 1x1 conv + folded BN + ReLU
            wt = chain_refs[2 * t][...]
            bt = chain_refs[2 * t + 1][...]
            y = jnp.maximum(
                jnp.dot(y.astype(wt.dtype), wt, preferred_element_type=jnp.float32) + bt, 0.0)

        o_ref[...] = y.astype(o_ref.dtype)

    return kernel


def fused_conv_stage(patches, w, b, chain=(), *, out_dtype, n_m_blocks=1):
    """patches: (P, M, K) bf16 phase-stacked im2col rows; w: (K, N) bf16; b: (1, N) f32.
    chain: tuple of (w_i, b_i) for fused trailing 1x1 conv layers.  Returns (M, n_out)."""
    P, M, K = patches.shape
    N = w.shape[1]
    n_out = chain[-1][0].shape[1] if chain else N

    mult = 8 * n_m_blocks                     # f32/bf16 sublane alignment per M-block
    m_pad = ((M + mult - 1) // mult) * mult   # adaptive padding (no fixed TM=256 anymore)
    if m_pad != M:
        patches = jnp.pad(patches, ((0, 0), (0, m_pad - M), (0, 0)))
    tm = m_pad // n_m_blocks

    in_specs = [
        pl.BlockSpec((P, tm, K), lambda i: (0, i, 0)),
        pl.BlockSpec((K, N), lambda i: (0, 0)),
        pl.BlockSpec((1, N), lambda i: (0, 0)),
    ]
    args = [patches, w, b]
    for wc, bc in chain:
        in_specs.append(pl.BlockSpec(wc.shape, lambda i: (0, 0)))
        in_specs.append(pl.BlockSpec(bc.shape, lambda i: (0, 0)))
        args += [wc, bc]

    out = pl.pallas_call(
        make_stage_kernel(P, len(chain)),
        out_shape=jax.ShapeDtypeStruct((m_pad, n_out), out_dtype),
        grid=(n_m_blocks,),
        in_specs=in_specs,
        out_specs=pl.BlockSpec((tm, n_out), lambda i: (i, 0)),
        compiler_params=pltpu.CompilerParams(
            dimension_semantics=("parallel",),
            vmem_limit_bytes=32 * 1024 * 1024,
        ),
    )(*args)
    return out[:M]


# ---------------------------------------------------------------------------
# JAX glue: phase-grouped im2col (strided/dilated window gather, stays in XLA).
# ---------------------------------------------------------------------------
def conv_out(h, k, s, p, d):
    return (h + 2 * p - d * (k - 1) - 1) // s + 1


def build_phase_patches(x, *, k, stride, pad, dil, q, phases, hp, wp):
    """im2col evaluated only at conv-output positions (q*io+di, q*jo+dj), (di,dj) in `phases`
    -- i.e. rows are already grouped by the MaxPool2d(q) window that follows the conv.
    x: (B, H, W, C) NHWC.  Returns (len(phases), B*hp*wp, k*k*C) with K ordered (ki, kj, c)."""
    B, _, _, C = x.shape
    if pad:
        x = jnp.pad(x, ((0, 0), (pad, pad), (pad, pad), (0, 0)))
    out = []
    for di, dj in phases:
        taps = []
        for ki in range(k):
            for kj in range(k):
                r0 = stride * di + dil * ki
                c0 = stride * dj + dil * kj
                taps.append(jax.lax.slice(
                    x,
                    (0, r0, c0, 0),
                    (B, r0 + (hp - 1) * stride * q + 1, c0 + (wp - 1) * stride * q + 1, C),
                    (1, stride * q, stride * q, 1)))
        out.append(jnp.concatenate(taps, axis=-1).reshape(B * hp * wp, k * k * C))
    return jnp.stack(out, axis=0)


# ---------------------------------------------------------------------------
# Model definition (mirrors SmallDistilledModel)
# ---------------------------------------------------------------------------
#          (cin, cout,          k, pad, stride, dil)
LAYERS = [
    (3,    8,             4, 0, 2, 2),   # layer1
    (8,    16,            4, 0, 2, 2),   # layer2
    (16,   32,            3, 1, 2, 1),   # layer3
    (32,   16,            1, 0, 1, 1),   # layer4
    (16,   128,           3, 1, 1, 1),   # layer5
    (128,  32,            1, 0, 1, 1),   # layer6
    (32,   256,           3, 1, 1, 1),   # layer7
    (256,  256,           1, 0, 1, 1),   # layer8
    (256,  EMBEDDING_DIM, 1, 0, 1, 1),   # layer9
]


def init_params(key):
    """Deterministic synthetic parameters; BN (inference stats) folded into weight + bias.
    NOTE: real PyTorch conv weights (OIHW) must be permuted to HWIO before the reshape below
    so the (ki, kj, cin) im2col flatten order matches."""
    eps = 1e-5
    params = []
    for idx, (cin, cout, k, _p, _s, _d) in enumerate(LAYERS):
        kw, kb, kg, kbt, km, kv = jax.random.split(jax.random.fold_in(key, idx), 6)
        w = jax.random.normal(kw, (k, k, cin, cout), jnp.float32) / jnp.sqrt(float(k * k * cin))
        conv_b = 0.05 * jax.random.normal(kb, (cout,), jnp.float32)
        gamma = 1.0 + 0.1 * jax.random.normal(kg, (cout,), jnp.float32)
        beta = 0.1 * jax.random.normal(kbt, (cout,), jnp.float32)
        mean = 0.05 * jax.random.normal(km, (cout,), jnp.float32)
        var = 1.0 + 0.1 * jax.random.uniform(kv, (cout,), jnp.float32)
        scale = gamma / jnp.sqrt(var + eps)
        bias = (conv_b - mean) * scale + beta
        # Fold BN scale into the weight:  (P @ W) * s == P @ (W * s).
        wmat = (w * scale).reshape(k * k * cin, cout).astype(jnp.bfloat16)
        params.append((wmat, bias.reshape(1, cout).astype(jnp.float32)))
    return params


def forward(x_nchw, params):
    B = x_nchw.shape[0]
    x = jnp.transpose(x_nchw, (0, 2, 3, 1)).astype(jnp.bfloat16)  # NCHW -> NHWC, bf16 for MXU
    H, W = x.shape[1], x.shape[2]
    (w1, b1), (w2, b2), (w3, b3), (w4, b4), (w5, b5), (w6, b6), \
        (w7, b7), (w8, b8), (w9, b9) = params

    # Stage 1 -- layer1.  layer2 (k=4, stride=2, dilation=2) only reads even rows/cols of
    # layer1's output, so layer1 is evaluated on that even output grid only (exact rewrite).
    ho1, wo1 = conv_out(H, 4, 2, 0, 2), conv_out(W, 4, 2, 0, 2)
    hp1, wp1 = (ho1 + 1) // 2, (wo1 + 1) // 2
    p1 = build_phase_patches(x, k=4, stride=2, pad=0, dil=2, q=2,
                             phases=((0, 0),), hp=hp1, wp=wp1)
    y1 = fused_conv_stage(p1, w1, b1, (), out_dtype=jnp.bfloat16,
                          n_m_blocks=2 if p1.shape[1] > 2048 else 1)  # 2 TC split on v7x
    y1 = y1.reshape(B, hp1, wp1, -1)

    # Stage 2 -- layer2 (+ maxpool1 fused in-kernel).  On the even grid the dilated strided
    # conv becomes a plain k=4, stride=1, dilation=1 conv.
    ho2, wo2 = conv_out(hp1, 4, 1, 0, 1), conv_out(wp1, 4, 1, 0, 1)
    hp2, wp2 = ho2 // 2, wo2 // 2
    p2 = build_phase_patches(y1, k=4, stride=1, pad=0, dil=1, q=2, phases=PH4, hp=hp2, wp=wp2)
    y2 = fused_conv_stage(p2, w2, b2, (), out_dtype=jnp.bfloat16).reshape(B, hp2, wp2, -1)

    # Stage 3 -- layer3 (+ maxpool2) + layer4 (1x1), all in one kernel.
    ho3, wo3 = conv_out(hp2, 3, 2, 1, 1), conv_out(wp2, 3, 2, 1, 1)
    hp3, wp3 = ho3 // 2, wo3 // 2
    p3 = build_phase_patches(y2, k=3, stride=2, pad=1, dil=1, q=2, phases=PH4, hp=hp3, wp=wp3)
    y4 = fused_conv_stage(p3, w3, b3, ((w4, b4),),
                          out_dtype=jnp.bfloat16).reshape(B, hp3, wp3, -1)

    # Stage 4 -- layer5 (+ maxpool3) + layer6 (1x1).
    ho5, wo5 = conv_out(hp3, 3, 1, 1, 1), conv_out(wp3, 3, 1, 1, 1)
    hp5, wp5 = ho5 // 2, wo5 // 2
    p5 = build_phase_patches(y4, k=3, stride=1, pad=1, dil=1, q=2, phases=PH4, hp=hp5, wp=wp5)
    y6 = fused_conv_stage(p5, w5, b5, ((w6, b6),),
                          out_dtype=jnp.bfloat16).reshape(B, hp5, wp5, -1)

    # Stage 5 -- layer7 (+ maxpool4) + layer8 (1x1) + layer9 (1x1).
    ho7, wo7 = conv_out(hp5, 3, 1, 1, 1), conv_out(wp5, 3, 1, 1, 1)
    hp7, wp7 = ho7 // 2, wo7 // 2
    p7 = build_phase_patches(y6, k=3, stride=1, pad=1, dil=1, q=2, phases=PH4, hp=hp7, wp=wp7)
    y9 = fused_conv_stage(p7, w7, b7, ((w8, b8), (w9, b9)), out_dtype=jnp.float32)
    y9 = y9.reshape(B, hp7, wp7, -1)

    # Flatten in NCHW order to match PyTorch's x.view(B, -1).
    return jnp.transpose(y9, (0, 3, 1, 2)).reshape(B, -1)


if __name__ == "__main__":
    key = jax.random.PRNGKey(0)
    params = init_params(jax.random.fold_in(key, 1))
    # Smallest convenient input that survives the stride-2 / dilated convs and 4 pools (1x1 out).
    x = jax.random.normal(jax.random.fold_in(key, 2), (2, 3, 160, 160), jnp.float32)

    run = jax.jit(functools.partial(forward, params=params))
    out = jax.block_until_ready(run(x))

    assert out.shape == (2, EMBEDDING_DIM), out.shape
    assert out.dtype == jnp.float32
    print("KERNEL_OK")
</pallas_src>

<mosaic_0001>
module attributes {stable_mosaic.version = 11 : i64} {
  func.func @kernel(%arg0: i32, %arg1: memref<1x1528x48xbf16, #tpu.memory_space<vmem>>, %arg2: memref<48x8xbf16, #tpu.memory_space<vmem>>, %arg3: memref<1x8xf32, #tpu.memory_space<vmem>>, %arg4: memref<1528x8xbf16, #tpu.memory_space<vmem>>) attributes {dimension_semantics = [#tpu.dimension_semantics<parallel>], iteration_bounds = array<i64: 2>, scalar_prefetch = 0 : i64, scratch_operands = 0 : i64, tpu.core_type = #tpu.core_type<tc>, window_params = [{transform_indices = @transform_0, window_bounds = array<i64: 1, 1528, 48>}, {pipeline_mode = #tpu.pipeline_mode<synchronous>, transform_indices = @transform_1, window_bounds = array<i64: 48, 8>}, {pipeline_mode = #tpu.pipeline_mode<synchronous>, transform_indices = @transform_2, window_bounds = array<i64: 1, 8>}, {transform_indices = @transform_3, window_bounds = array<i64: 1528, 8>}]} {
    %c0 = arith.constant 0 : index
    %c0_0 = arith.constant 0 : index
    %0 = vector.load %arg2[%c0, %c0_0] : memref<48x8xbf16, #tpu.memory_space<vmem>>, vector<48x8xbf16>
    %c0_1 = arith.constant 0 : index
    %c0_2 = arith.constant 0 : index
    %c0_3 = arith.constant 0 : index
    %1 = vector.load %arg1[%c0_1, %c0_2, %c0_3] : memref<1x1528x48xbf16, #tpu.memory_space<vmem>>, vector<1x1528x48xbf16>
    %2 = vector.shape_cast %1 : vector<1x1528x48xbf16> to vector<1528x48xbf16>
    %cst = arith.constant dense<0.000000e+00> : vector<1528x8xf32>
    %3 = tpu.matmul %2, %0, %cst {dimension_numbers = #tpu.dot_dimension_numbers<[1], [0], [0], [1], [0, 0, 1, 1], [], []>} : vector<1528x48xbf16>, vector<48x8xbf16>, vector<1528x8xf32> -> vector<1528x8xf32>
    %c0_4 = arith.constant 0 : index
    %c0_5 = arith.constant 0 : index
    %4 = vector.load %arg3[%c0_4, %c0_5] : memref<1x8xf32, #tpu.memory_space<vmem>>, vector<1x8xf32>
    %5 = vector.broadcast %4 : vector<1x8xf32> to vector<1528x8xf32>
    %6 = arith.addf %3, %5 : vector<1528x8xf32>
    %cst_6 = arith.constant 0.000000e+00 : f32
    %7 = vector.broadcast %cst_6 : f32 to vector<1528x8xf32>
    %8 = arith.maximumf %6, %7 : vector<1528x8xf32>
    %9 = arith.truncf %8 : vector<1528x8xf32> to vector<1528x8xbf16>
    %c0_7 = arith.constant 0 : index
    %c0_8 = arith.constant 0 : index
    %10 = vector.load %arg4[%c0_7, %c0_8] : memref<1528x8xbf16, #tpu.memory_space<vmem>>, vector<1528x8xbf16>
    tpu.vector_store %arg4[%c0_7, %c0_8], %9 {strides = array<i32>} : memref<1528x8xbf16, #tpu.memory_space<vmem>>, vector<1528x8xbf16>,
    return
  }
  func.func @transform_0(%arg0: i32) -> (i32, i32, i32) {
    %c0_i32 = arith.constant 0 : i32
    %c0_i32_0 = arith.constant 0 : i32
    %c0_i32_1 = arith.constant 0 : i32
    return %c0_i32, %arg0, %c0_i32_0 : i32, i32, i32
  }
  func.func @transform_1(%arg0: i32) -> (i32, i32) {
    %c0_i32 = arith.constant 0 : i32
    %c0_i32_0 = arith.constant 0 : i32
    %c0_i32_1 = arith.constant 0 : i32
    return %c0_i32, %c0_i32_0 : i32, i32
  }
  func.func @transform_2(%arg0: i32) -> (i32, i32) {
    %c0_i32 = arith.constant 0 : i32
    %c0_i32_0 = arith.constant 0 : i32
    %c0_i32_1 = arith.constant 0 : i32
    return %c0_i32, %c0_i32_0 : i32, i32
  }
  func.func @transform_3(%arg0: i32) -> (i32, i32) {
    %c0_i32 = arith.constant 0 : i32
    %c0_i32_0 = arith.constant 0 : i32
    return %arg0, %c0_i32 : i32, i32
  }
}

module attributes {stable_mosaic.version = 11 : i64} {
  func.func @kernel(%arg0: i32, %arg1: memref<4x648x128xbf16, #tpu.memory_space<vmem>>, %arg2: memref<128x16xbf16, #tpu.memory_space<vmem>>, %arg3: memref<1x16xf32, #tpu.memory_space<vmem>>, %arg4: memref<648x16xbf16, #tpu.memory_space<vmem>>) attributes {dimension_semantics = [#tpu.dimension_semantics<parallel>], iteration_bounds = array<i64: 1>, scalar_prefetch = 0 : i64, scratch_operands = 0 : i64, tpu.core_type = #tpu.core_type<tc>, window_params = [{transform_indices = @transform_0, window_bounds = array<i64: 4, 648, 128>}, {pipeline_mode = #tpu.pipeline_mode<synchronous>, transform_indices = @transform_1, window_bounds = array<i64: 128, 16>}, {pipeline_mode = #tpu.pipeline_mode<synchronous>, transform_indices = @transform_2, window_bounds = array<i64: 1, 16>}, {transform_indices = @transform_3, window_bounds = array<i64: 648, 16>}]} {
    %c0 = arith.constant 0 : index
    %c0_0 = arith.constant 0 : index
    %0 = vector.load %arg2[%c0, %c0_0] : memref<128x16xbf16, #tpu.memory_space<vmem>>, vector<128x16xbf16>
    %c0_1 = arith.constant 0 : index
    %c0_2 = arith.constant 0 : index
    %c0_3 = arith.constant 0 : index
    %1 = vector.load %arg1[%c0_1, %c0_2, %c0_3] : memref<4x648x128xbf16, #tpu.memory_space<vmem>>, vector<1x648x128xbf16>
    %2 = vector.shape_cast %1 : vector<1x648x128xbf16> to vector<648x128xbf16>
    %cst = arith.constant dense<0.000000e+00> : vector<648x16xf32>
    %3 = tpu.matmul %2, %0, %cst {dimension_numbers = #tpu.dot_dimension_numbers<[1], [0], [0], [1], [0, 0, 1, 1], [], []>} : vector<648x128xbf16>, vector<128x16xbf16>, vector<648x16xf32> -> vector<648x16xf32>
    %c1 = arith.constant 1 : index
    %c0_4 = arith.constant 0 : index
    %c0_5 = arith.constant 0 : index
    %4 = vector.load %arg1[%c1, %c0_4, %c0_5] : memref<4x648x128xbf16, #tpu.memory_space<vmem>>, vector<1x648x128xbf16>
    %5 = vector.shape_cast %4 : vector<1x648x128xbf16> to vector<648x128xbf16>
    %cst_6 = arith.constant dense<0.000000e+00> : vector<648x16xf32>
    %6 = tpu.matmul %5, %0, %cst_6 {dimension_numbers = #tpu.dot_dimension_numbers<[1], [0], [0], [1], [0, 0, 1, 1], [], []>} : vector<648x128xbf16>, vector<128x16xbf16>, vector<648x16xf32> -> vector<648x16xf32>
    %7 = arith.maximumf %3, %6 : vector<648x16xf32>
    %c2 = arith.constant 2 : index
    %c0_7 = arith.constant 0 : index
    %c0_8 = arith.constant 0 : index
    %8 = vector.load %arg1[%c2, %c0_7, %c0_8] : memref<4x648x128xbf16, #tpu.memory_space<vmem>>, vector<1x648x128xbf16>
    %9 = vector.shape_cast %8 : vector<1x648x128xbf16> to vector<648x128xbf16>
    %cst_9 = arith.constant dense<0.000000e+00> : vector<648x16xf32>
    %10 = tpu.matmul %9, %0, %cst_9 {dimension_numbers = #tpu.dot_dimension_numbers<[1], [0], [0], [1], [0, 0, 1, 1], [], []>} : vector<648x128xbf16>, vector<128x16xbf16>, vector<648x16xf32> -> vector<648x16xf32>
    %11 = arith.maximumf %7, %10 : vector<648x16xf32>
    %c3 = arith.constant 3 : index
    %c0_10 = arith.constant 0 : index
    %c0_11 = arith.constant 0 : index
    %12 = vector.load %arg1[%c3, %c0_10, %c0_11] : memref<4x648x128xbf16, #tpu.memory_space<vmem>>, vector<1x648x128xbf16>
    %13 = vector.shape_cast %12 : vector<1x648x128xbf16> to vector<648x128xbf16>
    %cst_12 = arith.constant dense<0.000000e+00> : vector<648x16xf32>
    %14 = tpu.matmul %13, %0, %cst_12 {dimension_numbers = #tpu.dot_dimension_numbers<[1], [0], [0], [1], [0, 0, 1, 1], [], []>} : vector<648x128xbf16>, vector<128x16xbf16>, vector<648x16xf32> -> vector<648x16xf32>
    %15 = arith.maximumf %11, %14 : vector<648x16xf32>
    %c0_13 = arith.constant 0 : index
    %c0_14 = arith.constant 0 : index
    %16 = vector.load %arg3[%c0_13, %c0_14] : memref<1x16xf32, #tpu.memory_space<vmem>>, vector<1x16xf32>
    %17 = vector.broadcast %16 : vector<1x16xf32> to vector<648x16xf32>
    %18 = arith.addf %15, %17 : vector<648x16xf32>
    %cst_15 = arith.constant 0.000000e+00 : f32
    %19 = vector.broadcast %cst_15 : f32 to vector<648x16xf32>
    %20 = arith.maximumf %18, %19 : vector<648x16xf32>
    %21 = arith.truncf %20 : vector<648x16xf32> to vector<648x16xbf16>
    %c0_16 = arith.constant 0 : index
    %c0_17 = arith.constant 0 : index
    %22 = vector.load %arg4[%c0_16, %c0_17] : memref<648x16xbf16, #tpu.memory_space<vmem>>, vector<648x16xbf16>
    tpu.vector_store %arg4[%c0_16, %c0_17], %21 {strides = array<i32>} : memref<648x16xbf16, #tpu.memory_space<vmem>>, vector<648x16xbf16>,
    return
  }
  func.func @transform_0(%arg0: i32) -> (i32, i32, i32) {
    %c0_i32 = arith.constant 0 : i32
    %c0_i32_0 = arith.constant 0 : i32
    %c0_i32_1 = arith.constant 0 : i32
    return %c0_i32, %arg0, %c0_i32_0 : i32, i32, i32
  }
  func.func @transform_1(%arg0: i32) -> (i32, i32) {
    %c0_i32 = arith.constant 0 : i32
    %c0_i32_0 = arith.constant 0 : i32
    %c0_i32_1 = arith.constant 0 : i32
    return %c0_i32, %c0_i32_0 : i32, i32
  }
  func.func @transform_2(%arg0: i32) -> (i32, i32) {
    %c0_i32 = arith.constant 0 : i32
    %c0_i32_0 = arith.constant 0 : i32
    %c0_i32_1 = arith.constant 0 : i32
    return %c0_i32, %c0_i32_0 : i32, i32
  }
  func.func @transform_3(%arg0: i32) -> (i32, i32) {
    %c0_i32 = arith.constant 0 : i32
    %c0_i32_0 = arith.constant 0 : i32
    return %arg0, %c0_i32 : i32, i32
  }
}

module attributes {stable_mosaic.version = 11 : i64} {
  func.func @kernel(%arg0: i32, %arg1: memref<4x32x144xbf16, #tpu.memory_space<vmem>>, %arg2: memref<144x32xbf16, #tpu.memory_space<vmem>>, %arg3: memref<1x32xf32, #tpu.memory_space<vmem>>, %arg4: memref<32x16xbf16, #tpu.memory_space<vmem>>, %arg5: memref<1x16xf32, #tpu.memory_space<vmem>>, %arg6: memref<32x16xbf16, #tpu.memory_space<vmem>>) attributes {dimension_semantics = [#tpu.dimension_semantics<parallel>], iteration_bounds = array<i64: 1>, scalar_prefetch = 0 : i64, scratch_operands = 0 : i64, tpu.core_type = #tpu.core_type<tc>, window_params = [{transform_indices = @transform_0, window_bounds = array<i64: 4, 32, 144>}, {pipeline_mode = #tpu.pipeline_mode<synchronous>, transform_indices = @transform_1, window_bounds = array<i64: 144, 32>}, {pipeline_mode = #tpu.pipeline_mode<synchronous>, transform_indices = @transform_2, window_bounds = array<i64: 1, 32>}, {pipeline_mode = #tpu.pipeline_mode<synchronous>, transform_indices = @transform_3, window_bounds = array<i64: 32, 16>}, {pipeline_mode = #tpu.pipeline_mode<synchronous>, transform_indices = @transform_4, window_bounds = array<i64: 1, 16>}, {transform_indices = @transform_5, window_bounds = array<i64: 32, 16>}]} {
    %c0 = arith.constant 0 : index
    %c0_0 = arith.constant 0 : index
    %0 = vector.load %arg2[%c0, %c0_0] : memref<144x32xbf16, #tpu.memory_space<vmem>>, vector<144x32xbf16>
    %c0_1 = arith.constant 0 : index
    %c0_2 = arith.constant 0 : index
    %c0_3 = arith.constant 0 : index
    %1 = vector.load %arg1[%c0_1, %c0_2, %c0_3] : memref<4x32x144xbf16, #tpu.memory_space<vmem>>, vector<1x32x144xbf16>
    %2 = vector.shape_cast %1 : vector<1x32x144xbf16> to vector<32x144xbf16>
    %cst = arith.constant dense<0.000000e+00> : vector<32x32xf32>
    %3 = tpu.matmul %2, %0, %cst {dimension_numbers = #tpu.dot_dimension_numbers<[1], [0], [0], [1], [0, 0, 1, 1], [], []>} : vector<32x144xbf16>, vector<144x32xbf16>, vector<32x32xf32> -> vector<32x32xf32>
    %c1 = arith.constant 1 : index
    %c0_4 = arith.constant 0 : index
    %c0_5 = arith.constant 0 : index
    %4 = vector.load %arg1[%c1, %c0_4, %c0_5] : memref<4x32x144xbf16, #tpu.memory_space<vmem>>, vector<1x32x144xbf16>
    %5 = vector.shape_cast %4 : vector<1x32x144xbf16> to vector<32x144xbf16>
    %cst_6 = arith.constant dense<0.000000e+00> : vector<32x32xf32>
    %6 = tpu.matmul %5, %0, %cst_6 {dimension_numbers = #tpu.dot_dimension_numbers<[1], [0], [0], [1], [0, 0, 1, 1], [], []>} : vector<32x144xbf16>, vector<144x32xbf16>, vector<32x32xf32> -> vector<32x32xf32>
    %7 = arith.maximumf %3, %6 : vector<32x32xf32>
    %c2 = arith.constant 2 : index
    %c0_7 = arith.constant 0 : index
    %c0_8 = arith.constant 0 : index
    %8 = vector.load %arg1[%c2, %c0_7, %c0_8] : memref<4x32x144xbf16, #tpu.memory_space<vmem>>, vector<1x32x144xbf16>
    %9 = vector.shape_cast %8 : vector<1x32x144xbf16> to vector<32x144xbf16>
    %cst_9 = arith.constant dense<0.000000e+00> : vector<32x32xf32>
    %10 = tpu.matmul %9, %0, %cst_9 {dimension_numbers = #tpu.dot_dimension_numbers<[1], [0], [0], [1], [0, 0, 1, 1], [], []>} : vector<32x144xbf16>, vector<144x32xbf16>, vector<32x32xf32> -> vector<32x32xf32>
    %11 = arith.maximumf %7, %10 : vector<32x32xf32>
    %c3 = arith.constant 3 : index
    %c0_10 = arith.constant 0 : index
    %c0_11 = arith.constant 0 : index
    %12 = vector.load %arg1[%c3, %c0_10, %c0_11] : memref<4x32x144xbf16, #tpu.memory_space<vmem>>, vector<1x32x144xbf16>
    %13 = vector.shape_cast %12 : vector<1x32x144xbf16> to vector<32x144xbf16>
    %cst_12 = arith.constant dense<0.000000e+00> : vector<32x32xf32>
    %14 = tpu.matmul %13, %0, %cst_12 {dimension_numbers = #tpu.dot_dimension_numbers<[1], [0], [0], [1], [0, 0, 1, 1], [], []>} : vector<32x144xbf16>, vector<144x32xbf16>, vector<32x32xf32> -> vector<32x32xf32>
    %15 = arith.maximumf %11, %14 : vector<32x32xf32>
    %c0_13 = arith.constant 0 : index
    %c0_14 = arith.constant 0 : index
    %16 = vector.load %arg3[%c0_13, %c0_14] : memref<1x32xf32, #tpu.memory_space<vmem>>, vector<1x32xf32>
    %17 = vector.broadcast %16 : vector<1x32xf32> to vector<32x32xf32>
    %18 = arith.addf %15, %17 : vector<32x32xf32>
    %cst_15 = arith.constant 0.000000e+00 : f32
    %19 = vector.broadcast %cst_15 : f32 to vector<32x32xf32>
    %20 = arith.maximumf %18, %19 : vector<32x32xf32>
    %c0_16 = arith.constant 0 : index
    %c0_17 = arith.constant 0 : index
    %21 = vector.load %arg4[%c0_16, %c0_17] : memref<32x16xbf16, #tpu.memory_space<vmem>>, vector<32x16xbf16>
    %c0_18 = arith.constant 0 : index
    %c0_19 = arith.constant 0 : index
    %22 = vector.load %arg5[%c0_18, %c0_19] : memref<1x16xf32, #tpu.memory_space<vmem>>, vector<1x16xf32>
    %23 = arith.truncf %20 : vector<32x32xf32> to vector<32x32xbf16>
    %cst_20 = arith.constant dense<0.000000e+00> : vector<32x16xf32>
    %24 = tpu.matmul %23, %21, %cst_20 {dimension_numbers = #tpu.dot_dimension_numbers<[1], [0], [0], [1], [0, 0, 1, 1], [], []>} : vector<32x32xbf16>, vector<32x16xbf16>, vector<32x16xf32> -> vector<32x16xf32>
    %25 = vector.broadcast %22 : vector<1x16xf32> to vector<32x16xf32>
    %26 = arith.addf %24, %25 : vector<32x16xf32>
    %cst_21 = arith.constant 0.000000e+00 : f32
    %27 = vector.broadcast %cst_21 : f32 to vector<32x16xf32>
    %28 = arith.maximumf %26, %27 : vector<32x16xf32>
    %29 = arith.truncf %28 : vector<32x16xf32> to vector<32x16xbf16>
    %c0_22 = arith.constant 0 : index
    %c0_23 = arith.constant 0 : index
    %30 = vector.load %arg6[%c0_22, %c0_23] : memref<32x16xbf16, #tpu.memory_space<vmem>>, vector<32x16xbf16>
    tpu.vector_store %arg6[%c0_22, %c0_23], %29 {strides = array<i32>} : memref<32x16xbf16, #tpu.memory_space<vmem>>, vector<32x16xbf16>,
    return
  }
  func.func @transform_0(%arg0: i32) -> (i32, i32, i32) {
    %c0_i32 = arith.constant 0 : i32
    %c0_i32_0 = arith.constant 0 : i32
    %c0_i32_1 = arith.constant 0 : i32
    return %c0_i32, %arg0, %c0_i32_0 : i32, i32, i32
  }
  func.func @transform_1(%arg0: i32) -> (i32, i32) {
    %c0_i32 = arith.constant 0 : i32
    %c0_i32_0 = arith.constant 0 : i32
    %c0_i32_1 = arith.constant 0 : i32
    return %c0_i32, %c0_i32_0 : i32, i32
  }
  func.func @transform_2(%arg0: i32) -> (i32, i32) {
    %c0_i32 = arith.constant 0 : i32
    %c0_i32_0 = arith.constant 0 : i32
    %c0_i32_1 = arith.constant 0 : i32
    return %c0_i32, %c0_i32_0 : i32, i32
  }
  func.func @transform_3(%arg0: i32) -> (i32, i32) {
    %c0_i32 = arith.constant 0 : i32
    %c0_i32_0 = arith.constant 0 : i32
    %c0_i32_1 = arith.constant 0 : i32
    return %c0_i32, %c0_i32_0 : i32, i32
  }
  func.func @transform_4(%arg0: i32) -> (i32, i32) {
    %c0_i32 = arith.constant 0 : i32
    %c0_i32_0 = arith.constant 0 : i32
    %c0_i32_1 = arith.constant 0 : i32
    return %c0_i32, %c0_i32_0 : i32, i32
  }
  func.func @transform_5(%arg0: i32) -> (i32, i32) {
    %c0_i32 = arith.constant 0 : i32
    %c0_i32_0 = arith.constant 0 : i32
    return %arg0, %c0_i32 : i32, i32
  }
}

module attributes {stable_mosaic.version = 11 : i64} {
  func.func @kernel(%arg0: i32, %arg1: memref<4x8x144xbf16, #tpu.memory_space<vmem>>, %arg2: memref<144x128xbf16, #tpu.memory_space<vmem>>, %arg3: memref<1x128xf32, #tpu.memory_space<vmem>>, %arg4: memref<128x32xbf16, #tpu.memory_space<vmem>>, %arg5: memref<1x32xf32, #tpu.memory_space<vmem>>, %arg6: memref<8x32xbf16, #tpu.memory_space<vmem>>) attributes {dimension_semantics = [#tpu.dimension_semantics<parallel>], iteration_bounds = array<i64: 1>, scalar_prefetch = 0 : i64, scratch_operands = 0 : i64, tpu.core_type = #tpu.core_type<tc>, window_params = [{transform_indices = @transform_0, window_bounds = array<i64: 4, 8, 144>}, {pipeline_mode = #tpu.pipeline_mode<synchronous>, transform_indices = @transform_1, window_bounds = array<i64: 144, 128>}, {pipeline_mode = #tpu.pipeline_mode<synchronous>, transform_indices = @transform_2, window_bounds = array<i64: 1, 128>}, {pipeline_mode = #tpu.pipeline_mode<synchronous>, transform_indices = @transform_3, window_bounds = array<i64: 128, 32>}, {pipeline_mode = #tpu.pipeline_mode<synchronous>, transform_indices = @transform_4, window_bounds = array<i64: 1, 32>}, {transform_indices = @transform_5, window_bounds = array<i64: 8, 32>}]} {
    %c0 = arith.constant 0 : index
    %c0_0 = arith.constant 0 : index
    %0 = vector.load %arg2[%c0, %c0_0] : memref<144x128xbf16, #tpu.memory_space<vmem>>, vector<144x128xbf16>
    %c0_1 = arith.constant 0 : index
    %c0_2 = arith.constant 0 : index
    %c0_3 = arith.constant 0 : index
    %1 = vector.load %arg1[%c0_1, %c0_2, %c0_3] : memref<4x8x144xbf16, #tpu.memory_space<vmem>>, vector<1x8x144xbf16>
    %2 = vector.shape_cast %1 : vector<1x8x144xbf16> to vector<8x144xbf16>
    %cst = arith.constant dense<0.000000e+00> : vector<8x128xf32>
    %3 = tpu.matmul %2, %0, %cst {dimension_numbers = #tpu.dot_dimension_numbers<[1], [0], [0], [1], [0, 0, 1, 1], [], []>} : vector<8x144xbf16>, vector<144x128xbf16>, vector<8x128xf32> -> vector<8x128xf32>
    %c1 = arith.constant 1 : index
    %c0_4 = arith.constant 0 : index
    %c0_5 = arith.constant 0 : index
    %4 = vector.load %arg1[%c1, %c0_4, %c0_5] : memref<4x8x144xbf16, #tpu.memory_space<vmem>>, vector<1x8x144xbf16>
    %5 = vector.shape_cast %4 : vector<1x8x144xbf16> to vector<8x144xbf16>
    %cst_6 = arith.constant dense<0.000000e+00> : vector<8x128xf32>
    %6 = tpu.matmul %5, %0, %cst_6 {dimension_numbers = #tpu.dot_dimension_numbers<[1], [0], [0], [1], [0, 0, 1, 1], [], []>} : vector<8x144xbf16>, vector<144x128xbf16>, vector<8x128xf32> -> vector<8x128xf32>
    %7 = arith.maximumf %3, %6 : vector<8x128xf32>
    %c2 = arith.constant 2 : index
    %c0_7 = arith.constant 0 : index
    %c0_8 = arith.constant 0 : index
    %8 = vector.load %arg1[%c2, %c0_7, %c0_8] : memref<4x8x144xbf16, #tpu.memory_space<vmem>>, vector<1x8x144xbf16>
    %9 = vector.shape_cast %8 : vector<1x8x144xbf16> to vector<8x144xbf16>
    %cst_9 = arith.constant dense<0.000000e+00> : vector<8x128xf32>
    %10 = tpu.matmul %9, %0, %cst_9 {dimension_numbers = #tpu.dot_dimension_numbers<[1], [0], [0], [1], [0, 0, 1, 1], [], []>} : vector<8x144xbf16>, vector<144x128xbf16>, vector<8x128xf32> -> vector<8x128xf32>
    %11 = arith.maximumf %7, %10 : vector<8x128xf32>
    %c3 = arith.constant 3 : index
    %c0_10 = arith.constant 0 : index
    %c0_11 = arith.constant 0 : index
    %12 = vector.load %arg1[%c3, %c0_10, %c0_11] : memref<4x8x144xbf16, #tpu.memory_space<vmem>>, vector<1x8x144xbf16>
    %13 = vector.shape_cast %12 : vector<1x8x144xbf16> to vector<8x144xbf16>
    %cst_12 = arith.constant dense<0.000000e+00> : vector<8x128xf32>
    %14 = tpu.matmul %13, %0, %cst_12 {dimension_numbers = #tpu.dot_dimension_numbers<[1], [0], [0], [1], [0, 0, 1, 1], [], []>} : vector<8x144xbf16>, vector<144x128xbf16>, vector<8x128xf32> -> vector<8x128xf32>
    %15 = arith.maximumf %11, %14 : vector<8x128xf32>
    %c0_13 = arith.constant 0 : index
    %c0_14 = arith.constant 0 : index
    %16 = vector.load %arg3[%c0_13, %c0_14] : memref<1x128xf32, #tpu.memory_space<vmem>>, vector<1x128xf32>
    %17 = vector.broadcast %16 : vector<1x128xf32> to vector<8x128xf32>
    %18 = arith.addf %15, %17 : vector<8x128xf32>
    %cst_15 = arith.constant 0.000000e+00 : f32
    %19 = vector.broadcast %cst_15 : f32 to vector<8x128xf32>
    %20 = arith.maximumf %18, %19 : vector<8x128xf32>
    %c0_16 = arith.constant 0 : index
    %c0_17 = arith.constant 0 : index
    %21 = vector.load %arg4[%c0_16, %c0_17] : memref<128x32xbf16, #tpu.memory_space<vmem>>, vector<128x32xbf16>
    %c0_18 = arith.constant 0 : index
    %c0_19 = arith.constant 0 : index
    %22 = vector.load %arg5[%c0_18, %c0_19] : memref<1x32xf32, #tpu.memory_space<vmem>>, vector<1x32xf32>
    %23 = arith.truncf %20 : vector<8x128xf32> to vector<8x128xbf16>
    %cst_20 = arith.constant dense<0.000000e+00> : vector<8x32xf32>
    %24 = tpu.matmul %23, %21, %cst_20 {dimension_numbers = #tpu.dot_dimension_numbers<[1], [0], [0], [1], [0, 0, 1, 1], [], []>} : vector<8x128xbf16>, vector<128x32xbf16>, vector<8x32xf32> -> vector<8x32xf32>
    %25 = vector.broadcast %22 : vector<1x32xf32> to vector<8x32xf32>
    %26 = arith.addf %24, %25 : vector<8x32xf32>
    %cst_21 = arith.constant 0.000000e+00 : f32
    %27 = vector.broadcast %cst_21 : f32 to vector<8x32xf32>
    %28 = arith.maximumf %26, %27 : vector<8x32xf32>
    %29 = arith.truncf %28 : vector<8x32xf32> to vector<8x32xbf16>
    %c0_22 = arith.constant 0 : index
    %c0_23 = arith.constant 0 : index
    %30 = vector.load %arg6[%c0_22, %c0_23] : memref<8x32xbf16, #tpu.memory_space<vmem>>, vector<8x32xbf16>
    tpu.vector_store %arg6[%c0_22, %c0_23], %29 {strides = array<i32>} : memref<8x32xbf16, #tpu.memory_space<vmem>>, vector<8x32xbf16>,
    return
  }
  func.func @transform_0(%arg0: i32) -> (i32, i32, i32) {
    %c0_i32 = arith.constant 0 : i32
    %c0_i32_0 = arith.constant 0 : i32
    %c0_i32_1 = arith.constant 0 : i32
    return %c0_i32, %arg0, %c0_i32_0 : i32, i32, i32
  }
  func.func @transform_1(%arg0: i32) -> (i32, i32) {
    %c0_i32 = arith.constant 0 : i32
    %c0_i32_0 = arith.constant 0 : i32
    %c0_i32_1 = arith.constant 0 : i32
    return %c0_i32, %c0_i32_0 : i32, i32
  }
  func.func @transform_2(%arg0: i32) -> (i32, i32) {
    %c0_i32 = arith.constant 0 : i32
    %c0_i32_0 = arith.constant 0 : i32
    %c0_i32_1 = arith.constant 0 : i32
    return %c0_i32, %c0_i32_0 : i32, i32
  }
  func.func @transform_3(%arg0: i32) -> (i32, i32) {
    %c0_i32 = arith.constant 0 : i32
    %c0_i32_0 = arith.constant 0 : i32
    %c0_i32_1 = arith.constant 0 : i32
    return %c0_i32, %c0_i32_0 : i32, i32
  }
  func.func @transform_4(%arg0: i32) -> (i32, i32) {
    %c0_i32 = arith.constant 0 : i32
    %c0_i32_0 = arith.constant 0 : i32
    %c0_i32_1 = arith.constant 0 : i32
    return %c0_i32, %c0_i32_0 : i32, i32
  }
  func.func @transform_5(%arg0: i32) -> (i32, i32) {
    %c0_i32 = arith.constant 0 : i32
    %c0_i32_0 = arith.constant 0 : i32
    return %arg0, %c0_i32 : i32, i32
  }
}

module attributes {stable_mosaic.version = 11 : i64} {
  func.func @kernel(%arg0: i32, %arg1: memref<4x8x288xbf16, #tpu.memory_space<vmem>>, %arg2: memref<288x256xbf16, #tpu.memory_space<vmem>>, %arg3: memref<1x256xf32, #tpu.memory_space<vmem>>, %arg4: memref<256x256xbf16, #tpu.memory_space<vmem>>, %arg5: memref<1x256xf32, #tpu.memory_space<vmem>>, %arg6: memref<256x2048xbf16, #tpu.memory_space<vmem>>, %arg7: memref<1x2048xf32, #tpu.memory_space<vmem>>, %arg8: memref<8x2048xf32, #tpu.memory_space<vmem>>) attributes {dimension_semantics = [#tpu.dimension_semantics<parallel>], iteration_bounds = array<i64: 1>, scalar_prefetch = 0 : i64, scratch_operands = 0 : i64, tpu.core_type = #tpu.core_type<tc>, window_params = [{transform_indices = @transform_0, window_bounds = array<i64: 4, 8, 288>}, {pipeline_mode = #tpu.pipeline_mode<synchronous>, transform_indices = @transform_1, window_bounds = array<i64: 288, 256>}, {pipeline_mode = #tpu.pipeline_mode<synchronous>, transform_indices = @transform_2, window_bounds = array<i64: 1, 256>}, {pipeline_mode = #tpu.pipeline_mode<synchronous>, transform_indices = @transform_3, window_bounds = array<i64: 256, 256>}, {pipeline_mode = #tpu.pipeline_mode<synchronous>, transform_indices = @transform_4, window_bounds = array<i64: 1, 256>}, {pipeline_mode = #tpu.pipeline_mode<synchronous>, transform_indices = @transform_5, window_bounds = array<i64: 256, 2048>}, {pipeline_mode = #tpu.pipeline_mode<synchronous>, transform_indices = @transform_6, window_bounds = array<i64: 1, 2048>}, {transform_indices = @transform_7, window_bounds = array<i64: 8, 2048>}]} {
    %c0 = arith.constant 0 : index
    %c0_0 = arith.constant 0 : index
    %0 = vector.load %arg2[%c0, %c0_0] : memref<288x256xbf16, #tpu.memory_space<vmem>>, vector<288x256xbf16>
    %c0_1 = arith.constant 0 : index
    %c0_2 = arith.constant 0 : index
    %c0_3 = arith.constant 0 : index
    %1 = vector.load %arg1[%c0_1, %c0_2, %c0_3] : memref<4x8x288xbf16, #tpu.memory_space<vmem>>, vector<1x8x288xbf16>
    %2 = vector.shape_cast %1 : vector<1x8x288xbf16> to vector<8x288xbf16>
    %cst = arith.constant dense<0.000000e+00> : vector<8x256xf32>
    %3 = tpu.matmul %2, %0, %cst {dimension_numbers = #tpu.dot_dimension_numbers<[1], [0], [0], [1], [0, 0, 1, 1], [], []>} : vector<8x288xbf16>, vector<288x256xbf16>, vector<8x256xf32> -> vector<8x256xf32>
    %c1 = arith.constant 1 : index
    %c0_4 = arith.constant 0 : index
    %c0_5 = arith.constant 0 : index
    %4 = vector.load %arg1[%c1, %c0_4, %c0_5] : memref<4x8x288xbf16, #tpu.memory_space<vmem>>, vector<1x8x288xbf16>
    %5 = vector.shape_cast %4 : vector<1x8x288xbf16> to vector<8x288xbf16>
    %cst_6 = arith.constant dense<0.000000e+00> : vector<8x256xf32>
    %6 = tpu.matmul %5, %0, %cst_6 {dimension_numbers = #tpu.dot_dimension_numbers<[1], [0], [0], [1], [0, 0, 1, 1], [], []>} : vector<8x288xbf16>, vector<288x256xbf16>, vector<8x256xf32> -> vector<8x256xf32>
    %7 = arith.maximumf %3, %6 : vector<8x256xf32>
    %c2 = arith.constant 2 : index
    %c0_7 = arith.constant 0 : index
    %c0_8 = arith.constant 0 : index
    %8 = vector.load %arg1[%c2, %c0_7, %c0_8] : memref<4x8x288xbf16, #tpu.memory_space<vmem>>, vector<1x8x288xbf16>
    %9 = vector.shape_cast %8 : vector<1x8x288xbf16> to vector<8x288xbf16>
    %cst_9 = arith.constant dense<0.000000e+00> : vector<8x256xf32>
    %10 = tpu.matmul %9, %0, %cst_9 {dimension_numbers = #tpu.dot_dimension_numbers<[1], [0], [0], [1], [0, 0, 1, 1], [], []>} : vector<8x288xbf16>, vector<288x256xbf16>, vector<8x256xf32> -> vector<8x256xf32>
    %11 = arith.maximumf %7, %10 : vector<8x256xf32>
    %c3 = arith.constant 3 : index
    %c0_10 = arith.constant 0 : index
    %c0_11 = arith.constant 0 : index
    %12 = vector.load %arg1[%c3, %c0_10, %c0_11] : memref<4x8x288xbf16, #tpu.memory_space<vmem>>, vector<1x8x288xbf16>
    %13 = vector.shape_cast %12 : vector<1x8x288xbf16> to vector<8x288xbf16>
    %cst_12 = arith.constant dense<0.000000e+00> : vector<8x256xf32>
    %14 = tpu.matmul %13, %0, %cst_12 {dimension_numbers = #tpu.dot_dimension_numbers<[1], [0], [0], [1], [0, 0, 1, 1], [], []>} : vector<8x288xbf16>, vector<288x256xbf16>, vector<8x256xf32> -> vector<8x256xf32>
    %15 = arith.maximumf %11, %14 : vector<8x256xf32>
    %c0_13 = arith.constant 0 : index
    %c0_14 = arith.constant 0 : index
    %16 = vector.load %arg3[%c0_13, %c0_14] : memref<1x256xf32, #tpu.memory_space<vmem>>, vector<1x256xf32>
    %17 = vector.broadcast %16 : vector<1x256xf32> to vector<8x256xf32>
    %18 = arith.addf %15, %17 : vector<8x256xf32>
    %cst_15 = arith.constant 0.000000e+00 : f32
    %19 = vector.broadcast %cst_15 : f32 to vector<8x256xf32>
    %20 = arith.maximumf %18, %19 : vector<8x256xf32>
    %c0_16 = arith.constant 0 : index
    %c0_17 = arith.constant 0 : index
    %21 = vector.load %arg4[%c0_16, %c0_17] : memref<256x256xbf16, #tpu.memory_space<vmem>>, vector<256x256xbf16>
    %c0_18 = arith.constant 0 : index
    %c0_19 = arith.constant 0 : index
    %22 = vector.load %arg5[%c0_18, %c0_19] : memref<1x256xf32, #tpu.memory_space<vmem>>, vector<1x256xf32>
    %23 = arith.truncf %20 : vector<8x256xf32> to vector<8x256xbf16>
    %cst_20 = arith.constant dense<0.000000e+00> : vector<8x256xf32>
    %24 = tpu.matmul %23, %21, %cst_20 {dimension_numbers = #tpu.dot_dimension_numbers<[1], [0], [0], [1], [0, 0, 1, 1], [], []>} : vector<8x256xbf16>, vector<256x256xbf16>, vector<8x256xf32> -> vector<8x256xf32>
    %25 = vector.broadcast %22 : vector<1x256xf32> to vector<8x256xf32>
    %26 = arith.addf %24, %25 : vector<8x256xf32>
    %cst_21 = arith.constant 0.000000e+00 : f32
    %27 = vector.broadcast %cst_21 : f32 to vector<8x256xf32>
    %28 = arith.maximumf %26, %27 : vector<8x256xf32>
    %c0_22 = arith.constant 0 : index
    %c0_23 = arith.constant 0 : index
    %29 = vector.load %arg6[%c0_22, %c0_23] : memref<256x2048xbf16, #tpu.memory_space<vmem>>, vector<256x2048xbf16>
    %c0_24 = arith.constant 0 : index
    %c0_25 = arith.constant 0 : index
    %30 = vector.load %arg7[%c0_24, %c0_25] : memref<1x2048xf32, #tpu.memory_space<vmem>>, vector<1x2048xf32>
    %31 = arith.truncf %28 : vector<8x256xf32> to vector<8x256xbf16>
    %cst_26 = arith.constant dense<0.000000e+00> : vector<8x2048xf32>
    %32 = tpu.matmul %31, %29, %cst_26 {dimension_numbers = #tpu.dot_dimension_numbers<[1], [0], [0], [1], [0, 0, 1, 1], [], []>} : vector<8x256xbf16>, vector<256x2048xbf16>, vector<8x2048xf32> -> vector<8x2048xf32>
    %33 = vector.broadcast %30 : vector<1x2048xf32> to vector<8x2048xf32>
    %34 = arith.addf %32, %33 : vector<8x2048xf32>
    %cst_27 = arith.constant 0.000000e+00 : f32
    %35 = vector.broadcast %cst_27 : f32 to vector<8x2048xf32>
    %36 = arith.maximumf %34, %35 : vector<8x2048xf32>
    %c0_28 = arith.constant 0 : index
    %c0_29 = arith.constant 0 : index
    %37 = vector.load %arg8[%c0_28, %c0_29] : memref<8x2048xf32, #tpu.memory_space<vmem>>, vector<8x2048xf32>
    tpu.vector_store %arg8[%c0_28, %c0_29], %36 {strides = array<i32>} : memref<8x2048xf32, #tpu.memory_space<vmem>>, vector<8x2048xf32>,
    return
  }
  func.func @transform_0(%arg0: i32) -> (i32, i32, i32) {
    %c0_i32 = arith.constant 0 : i32
    %c0_i32_0 = arith.constant 0 : i32
    %c0_i32_1 = arith.constant 0 : i32
    return %c0_i32, %arg0, %c0_i32_0 : i32, i32, i32
  }
  func.func @transform_1(%arg0: i32) -> (i32, i32) {
    %c0_i32 = arith.constant 0 : i32
    %c0_i32_0 = arith.constant 0 : i32
    %c0_i32_1 = arith.constant 0 : i32
    return %c0_i32, %c0_i32_0 : i32, i32
  }
  func.func @transform_2(%arg0: i32) -> (i32, i32) {
    %c0_i32 = arith.constant 0 : i32
    %c0_i32_0 = arith.constant 0 : i32
    %c0_i32_1 = arith.constant 0 : i32
    return %c0_i32, %c0_i32_0 : i32, i32
  }
  func.func @transform_3(%arg0: i32) -> (i32, i32) {
    %c0_i32 = arith.constant 0 : i32
    %c0_i32_0 = arith.constant 0 : i32
    %c0_i32_1 = arith.constant 0 : i32
    return %c0_i32, %c0_i32_0 : i32, i32
  }
  func.func @transform_4(%arg0: i32) -> (i32, i32) {
    %c0_i32 = arith.constant 0 : i32
    %c0_i32_0 = arith.constant 0 : i32
    %c0_i32_1 = arith.constant 0 : i32
    return %c0_i32, %c0_i32_0 : i32, i32
  }
  func.func @transform_5(%arg0: i32) -> (i32, i32) {
    %c0_i32 = arith.constant 0 : i32
    %c0_i32_0 = arith.constant 0 : i32
    %c0_i32_1 = arith.constant 0 : i32
    return %c0_i32, %c0_i32_0 : i32, i32
  }
  func.func @transform_6(%arg0: i32) -> (i32, i32) {
    %c0_i32 = arith.constant 0 : i32
    %c0_i32_0 = arith.constant 0 : i32
    %c0_i32_1 = arith.constant 0 : i32
    return %c0_i32, %c0_i32_0 : i32, i32
  }
  func.func @transform_7(%arg0: i32) -> (i32, i32) {
    %c0_i32 = arith.constant 0 : i32
    %c0_i32_0 = arith.constant 0 : i32
    return %arg0, %c0_i32 : i32, i32
  }
}

</mosaic_0001>

<bundles_post_ra>
// kernel: forward.5
= control target key start
LH: loop header
LB: loop body
LE: loop exit
PB: predicated region body
PF: predicated region fallthrough
CT: control target
= control target key end

     0   :  { %s4194_s12 = smov 0   ;;  %s5006_s0 = inlined_call_operand.vmem [shape: bf16[1,3056,48], index: 0, kind: input, shape index: {}]   ;;  %s5007_s1 = inlined_call_operand.vmem [shape: bf16[48,8], index: 1, kind: input, shape index: {}]   ;;  %s5008_s2 = inlined_call_operand.vmem [shape: f32[1,8], index: 2, kind: input, shape index: {}]   ;;  %s5009_s3 = inlined_call_operand.vmem [shape: bf16[3056,8], index: 3, kind: output, shape index: {}]  }
   0x1 LB: > { %s3168_s13 = sadd.s32 4294967295, %s4172_s12   ;;  %p3172_p0 = scmp.ge.s32.totalorder %s4172_s12, 1  ;;  %s4172_s12 = sphi %s4194_s12, %s13_s12  }
   0x2   : > { %p138_p1 = scmp.lt.s32.totalorder %s4172_s12, 3 }
   0x4   : > { %p139_p2 = pnand %p3172_p0, %p138_p1 }
   0x5   : > { %v4066_v0 = vld [vmem:[%s5007_s1] sm:$0xff] (!%p139_p2)   ;;  %s162_s16 = smul.u32 (!%p139_p2), 191, %s3168_s13  ;;  %v4067_v1 = vld [vmem:[%s5007_s1 + $0x8] sm:$0xff] (!%p139_p2)   ;;  %v4068_v2 = vld [vmem:[%s5007_s1 + $0x10] sm:$0xff] (!%p139_p2)   ;;  %vm875_vm0 = vcmask (!%p139_p2), 392192   ;;  %vm2920_vm1 = vcmask (!%p139_p2), 60416  }
   0x6   : > { %142 = sbr.rel (%p139_p2) target bundleno = 425 (0x1a9), region = 32  ;;  %3854 = vmatprep.subr.bf16.mxu0 (!%p139_p2), %v4066_v0  ;;  %4052 = vmatprep.subr.bf16.mxu1 (!%p139_p2), %v4066_v0 }
   0x7   : > { %p163_p3 = scmp.lt.s32.totalorder (!%p139_p2), %s162_s16, 381  ;;  %3855 = vmatpush3.bf16.msra.mxu0 (!%p139_p2), %v4066_v0  ;;  %4055 = vmatpush3.bf16.msra.mxu1 (!%p139_p2), %v4066_v0 }
   0x8   : > { %3856 = vmatprep.subr.bf16.mxu0 (!%p139_p2), %v4067_v1  ;;  %4053 = vmatprep.subr.bf16.mxu1 (!%p139_p2), %v4067_v1 }
   0xb   : > { %3857 = vmatpush3.bf16.msra.mxu0 (!%p139_p2), %v4067_v1  ;;  %4056 = vmatpush3.bf16.msra.mxu1 (!%p139_p2), %v4067_v1 }
   0xc   : > { %3858 = vmatprep.subr.bf16.mxu0 (!%p139_p2), %v4068_v2  ;;  %4054 = vmatprep.subr.bf16.mxu1 (!%p139_p2), %v4068_v2 }
   0xd   : > { %s5011_s16 = smov (!%p163_p3, %s162_s16), 381 }
   0xe   : > { %s3173_s21 = sshll.u32 %s5011_s16, 2 }
   0xf   : > { %s4219_s24 = scalar_lea.vmem %s5006_s0, %s3173_s21  ;;  %3859 = vmatpush3.bf16.msra.mxu0 %v4068_v2  ;;  %4057 = vmatpush3.bf16.msra.mxu1 %v4068_v2  ;;  %s4429_s29 = scalar_lea.vmem %s5009_s3, %s3173_s21 }
  0x10   : > { %v4069_v3 = vld [vmem:[%s4219_s24] sm:$0xff]   ;;  %v4071_v5 = vld [vmem:[%s4219_s24 + $0x8] sm:$0xff]   ;;  %v4073_v7 = vld [vmem:[%s4219_s24 + $0x10] sm:$0xff]  }
  0x11   : > { %v4070_v4 = vld [vmem:[%s4219_s24 + $0x180] sm:$0xff]   ;;  %3860 = vmatprep.mubr.msk.bf16.mxu0 %vm875_vm0, %v4069_v3  ;;  %v4072_v6 = vld [vmem:[%s4219_s24 + $0x188] sm:$0xff]   ;;  %v4074_v8 = vld [vmem:[%s4219_s24 + $0x190] sm:$0xff]  }
  0x12   : > { %3956 = vmatprep.mubr.msk.bf16.mxu1 %vm875_vm0, %v4070_v4  ;;  %3861 = vmatmul.mubr.msk.bf16.vlgmr.msra.gmra.mrb[0].mxu0 %vm875_vm0, %v4071_v5  ;;  %v4075_v9 = vld [vmem:[%s4219_s24 + $0x18] sm:$0xff]   ;;  %v4077_v11 = vld [vmem:[%s4219_s24 + $0x20] sm:$0xff]   ;;  %v4079_v13 = vld [vmem:[%s4219_s24 + $0x28] sm:$0xff]  }
  0x13   : > { %3957 = vmatmul.mubr.msk.bf16.vlgmr.msra.gmra.mrb[0].mxu1 %vm875_vm0, %v4072_v6  ;;  %3864 = vmatprep.mubr.msk.bf16.mxu0 %vm875_vm0, %v4073_v7  ;;  %v4076_v10 = vld [vmem:[%s4219_s24 + $0x198] sm:$0xff]   ;;  %v4078_v12 = vld [vmem:[%s4219_s24 + $0x1a0] sm:$0xff]   ;;  %v4080_v14 = vld [vmem:[%s4219_s24 + $0x1a8] sm:$0xff]  }
  0x14   : > { %3960 = vmatprep.mubr.msk.bf16.mxu1 %vm875_vm0, %v4074_v8  ;;  %v4081_v15 = vld [vmem:[%s4219_s24 + $0x30] sm:$0xff]   ;;  %v4083_v17 = vld [vmem:[%s4219_s24 + $0x38] sm:$0xff]   ;;  %v4085_v19 = vld [vmem:[%s4219_s24 + $0x40] sm:$0xff]  }
  0x15   : > { %v4082_v16 = vld [vmem:[%s4219_s24 + $0x1b0] sm:$0xff]   ;;  %v4084_v18 = vld [vmem:[%s4219_s24 + $0x1b8] sm:$0xff]   ;;  %v4086_v20 = vld [vmem:[%s4219_s24 + $0x1c0] sm:$0xff]  }
  0x16   : > { %v4087_v21 = vld [vmem:[%s4219_s24 + $0x48] sm:$0xff]   ;;  %v4089_v23 = vld [vmem:[%s4219_s24 + $0x50] sm:$0xff]   ;;  %v4091_v25 = vld [vmem:[%s4219_s24 + $0x58] sm:$0xff]  }
  0x17   : > { %v4088_v22 = vld [vmem:[%s4219_s24 + $0x1c8] sm:$0xff]   ;;  %v4090_v24 = vld [vmem:[%s4219_s24 + $0x1d0] sm:$0xff]   ;;  %v4092_v26 = vld [vmem:[%s4219_s24 + $0x1d8] sm:$0xff]  }
  0x18   : > { %v4093_v27 = vld [vmem:[%s4219_s24 + $0x60] sm:$0xff]   ;;  %v4095_v29 = vld [vmem:[%s4219_s24 + $0x68] sm:$0xff]   ;;  %v4097_v31 = vld [vmem:[%s4219_s24 + $0x70] sm:$0xff]  }
  0x19   : > { %v4094_v28 = vld [vmem:[%s4219_s24 + $0x1e0] sm:$0xff]   ;;  %v4096_v30 = vld [vmem:[%s4219_s24 + $0x1e8] sm:$0xff]   ;;  %v4098_v32 = vld [vmem:[%s4219_s24 + $0x1f0] sm:$0xff]  }
  0x1a   : > { %3865 = vmatmul.mubr.msk.bf16.gmra.mrb[4].mxu0 %vm875_vm0, %v4075_v9  ;;  %v4099_v33 = vld [vmem:[%s4219_s24 + $0x78] sm:$0xff]   ;;  %v4101_v35 = vld [vmem:[%s4219_s24 + $0x80] sm:$0xff]   ;;  %v4103_v37 = vld [vmem:[%s4219_s24 + $0x88] sm:$0xff]  }
  0x1b   : > { %3961 = vmatmul.mubr.msk.bf16.gmra.mrb[4].mxu1 %vm875_vm0, %v4076_v10  ;;  %3868 = vmatprep.mubr.msk.bf16.mxu0 %vm875_vm0, %v4077_v11  ;;  %v4100_v34 = vld [vmem:[%s4219_s24 + $0x1f8] sm:$0xff]   ;;  %v4102_v36 = vld [vmem:[%s4219_s24 + $0x200] sm:$0xff]   ;;  %v4104_v38 = vld [vmem:[%s4219_s24 + $0x208] sm:$0xff]  }
  0x1c   : > { %3964 = vmatprep.mubr.msk.bf16.mxu1 %vm875_vm0, %v4078_v12  ;;  %v4105_v39 = vld [vmem:[%s4219_s24 + $0x90] sm:$0xff]   ;;  %v4107_v41 = vld [vmem:[%s4219_s24 + $0x98] sm:$0xff]   ;;  %v4109_v43 = vld [vmem:[%s4219_s24 + $0xa0] sm:$0xff]  }
  0x1d   : > { %v4106_v40 = vld [vmem:[%s4219_s24 + $0x210] sm:$0xff]   ;;  %v4108_v42 = vld [vmem:[%s4219_s24 + $0x218] sm:$0xff]   ;;  %v4110_v44 = vld [vmem:[%s4219_s24 + $0x220] sm:$0xff]  }
  0x1e   : > { %v4111_v45 = vld [vmem:[%s4219_s24 + $0xa8] sm:$0xff]   ;;  %v4113_v47 = vld [vmem:[%s4219_s24 + $0xb0] sm:$0xff]   ;;  %v4115_v49 = vld [vmem:[%s4219_s24 + $0xb8] sm:$0xff]  }
  0x1f   : > { %v4112_v46 = vld [vmem:[%s4219_s24 + $0x228] sm:$0xff]   ;;  %v4114_v48 = vld [vmem:[%s4219_s24 + $0x230] sm:$0xff]   ;;  %v4116_v50 = vld [vmem:[%s4219_s24 + $0x238] sm:$0xff]  }
  0x20   : > { %v4117_v51 = vld [vmem:[%s4219_s24 + $0xc0] sm:$0xff]   ;;  %v4119_v53 = vld [vmem:[%s4219_s24 + $0xc8] sm:$0xff]   ;;  %v4121_v55 = vld [vmem:[%s4219_s24 + $0xd0] sm:$0xff]  }
  0x21   : > { %v4118_v52 = vld [vmem:[%s4219_s24 + $0x240] sm:$0xff]   ;;  %v4120_v54 = vld [vmem:[%s4219_s24 + $0x248] sm:$0xff]   ;;  %v4122_v56 = vld [vmem:[%s4219_s24 + $0x250] sm:$0xff]  }
  0x22   : > { %3869 = vmatmul.mubr.msk.bf16.gmra.mrb[8].mxu0 %vm875_vm0, %v4079_v13  ;;  %v4123_v57 = vld [vmem:[%s4219_s24 + $0xd8] sm:$0xff]   ;;  %v4125_v59 = vld [vmem:[%s4219_s24 + $0xe0] sm:$0xff]   ;;  %v4127_v61 = vld [vmem:[%s4219_s24 + $0xe8] sm:$0xff]  }
  0x23   : > { %3965 = vmatmul.mubr.msk.bf16.gmra.mrb[8].mxu1 %vm875_vm0, %v4080_v14  ;;  %3872 = vmatprep.mubr.msk.bf16.mxu0 %vm875_vm0, %v4081_v15  ;;  %v4124_v58 = vld [vmem:[%s4219_s24 + $0x258] sm:$0xff]   ;;  %v4126_v60 = vld [vmem:[%s4219_s24 + $0x260] sm:$0xff]   ;;  %v4128_v62 = vld [vmem:[%s4219_s24 + $0x268] sm:$0xff]  }
  0x24   : > { %3968 = vmatprep.mubr.msk.bf16.mxu1 %vm875_vm0, %v4082_v16  ;;  %v4129_v63 = vld [vmem:[%s4219_s24 + $0xf0] sm:$0xff]   ;;  %v4131_v1 = vld [vmem:[%s4219_s24 + $0xf8] sm:$0xff]   ;;  %v4133_v3 = vld [vmem:[%s4219_s24 + $0x100] sm:$0xff]  }
  0x25   : > { %v4130_v0 = vld [vmem:[%s4219_s24 + $0x270] sm:$0xff]   ;;  %v4132_v2 = vld [vmem:[%s4219_s24 + $0x278] sm:$0xff]   ;;  %v4134_v4 = vld [vmem:[%s4219_s24 + $0x280] sm:$0xff]  }
  0x26   : > { %v4135_v5 = vld [vmem:[%s4219_s24 + $0x108] sm:$0xff]   ;;  %v4137_v7 = vld [vmem:[%s4219_s24 + $0x110] sm:$0xff]   ;;  %v4139_v9 = vld [vmem:[%s4219_s24 + $0x118] sm:$0xff]  }
  0x27   : > { %v4136_v6 = vld [vmem:[%s4219_s24 + $0x288] sm:$0xff]   ;;  %v4138_v8 = vld [vmem:[%s4219_s24 + $0x290] sm:$0xff]   ;;  %v4140_v10 = vld [vmem:[%s4219_s24 + $0x298] sm:$0xff]  }
  0x28   : > { %v4141_v11 = vld [vmem:[%s4219_s24 + $0x120] sm:$0xff]   ;;  %v4143_v13 = vld [vmem:[%s4219_s24 + $0x128] sm:$0xff]   ;;  %v4145_v15 = vld [vmem:[%s4219_s24 + $0x130] sm:$0xff]  }
  0x29   : > { %v4142_v12 = vld [vmem:[%s4219_s24 + $0x2a0] sm:$0xff]   ;;  %v4144_v14 = vld [vmem:[%s4219_s24 + $0x2a8] sm:$0xff]   ;;  %v4146_v16 = vld [vmem:[%s4219_s24 + $0x2b0] sm:$0xff]  }
  0x2a   : > { %3873 = vmatmul.mubr.msk.bf16.gmra.mrb[12].mxu0 %vm875_vm0, %v4083_v17  ;;  %v4147_v17 = vld [vmem:[%s4219_s24 + $0x138] sm:$0xff]  }
  0x2b   : > { %3969 = vmatmul.mubr.msk.bf16.gmra.mrb[12].mxu1 %vm875_vm0, %v4084_v18  ;;  %3876 = vmatprep.mubr.msk.bf16.mxu0 %vm875_vm0, %v4085_v19  ;;  %v4148_v18 = vld [vmem:[%s4219_s24 + $0x2b8] sm:$0xff]   ;;  %v4149_v19 = vld [vmem:[%s4219_s24 + $0x140] sm:$0xff]  }
  0x2c   : > { %3972 = vmatprep.mubr.msk.bf16.mxu1 %vm875_vm0, %v4086_v20  ;;  %v4150_v20 = vld [vmem:[%s4219_s24 + $0x2c0] sm:$0xff]  }
  0x32   : > { %3877 = vmatmul.mubr.msk.bf16.gmra.mrb[16].mxu0 %vm875_vm0, %v4087_v21  ;;  %v4151_v21 = vld [vmem:[%s4219_s24 + $0x148] sm:$0xff]  }
  0x33   : > { %3973 = vmatmul.mubr.msk.bf16.gmra.mrb[16].mxu1 %vm875_vm0, %v4088_v22  ;;  %3880 = vmatprep.mubr.msk.bf16.mxu0 %vm875_vm0, %v4089_v23  ;;  %v4152_v22 = vld [vmem:[%s4219_s24 + $0x2c8] sm:$0xff]   ;;  %v4153_v23 = vld [vmem:[%s4219_s24 + $0x150] sm:$0xff]  }
  0x34   : > { %3976 = vmatprep.mubr.msk.bf16.mxu1 %vm875_vm0, %v4090_v24  ;;  %v4154_v24 = vld [vmem:[%s4219_s24 + $0x2d0] sm:$0xff]  }
  0x3a   : > { %3881 = vmatmul.mubr.msk.bf16.gmra.mrb[20].mxu0 %vm875_vm0, %v4091_v25  ;;  %v4155_v25 = vld [vmem:[%s4219_s24 + $0x158] sm:$0xff]  }
  0x3b   : > { %3977 = vmatmul.mubr.msk.bf16.gmra.mrb[20].mxu1 %vm875_vm0, %v4092_v26  ;;  %3884 = vmatprep.mubr.msk.bf16.mxu0 %vm875_vm0, %v4093_v27  ;;  %v4156_v26 = vld [vmem:[%s4219_s24 + $0x2d8] sm:$0xff]   ;;  %v4157_v27 = vld [vmem:[%s4219_s24 + $0x160] sm:$0xff]  }
  0x3c   : > { %3980 = vmatprep.mubr.msk.bf16.mxu1 %vm875_vm0, %v4094_v28  ;;  %v4158_v28 = vld [vmem:[%s4219_s24 + $0x2e0] sm:$0xff]  }
  0x42   : > { %3885 = vmatmul.mubr.msk.bf16.gmra.mrb[24].mxu0 %vm875_vm0, %v4095_v29  ;;  %v4159_v29 = vld [vmem:[%s4219_s24 + $0x168] sm:$0xff]  }
  0x43   : > { %3981 = vmatmul.mubr.msk.bf16.gmra.mrb[24].mxu1 %vm875_vm0, %v4096_v30  ;;  %3888 = vmatprep.mubr.msk.bf16.mxu0 %vm875_vm0, %v4097_v31  ;;  %v4160_v30 = vld [vmem:[%s4219_s24 + $0x2e8] sm:$0xff]   ;;  %v4161_v31 = vld [vmem:[%s4219_s24 + $0x170] sm:$0xff]  }
  0x44   : > { %3984 = vmatprep.mubr.msk.bf16.mxu1 %vm875_vm0, %v4098_v32  ;;  %v4162_v32 = vld [vmem:[%s4219_s24 + $0x2f0] sm:$0xff]  }
  0x4a   : > { %3889 = vmatmul.mubr.msk.bf16.gmra.mrb[28].mxu0 %vm875_vm0, %v4099_v33  ;;  %v4163_v33 = vld [vmem:[%s4219_s24 + $0x178] sm:$0xff]  }
  0x4b   : > { %3985 = vmatmul.mubr.msk.bf16.gmra.mrb[28].mxu1 %vm875_vm0, %v4100_v34  ;;  %3892 = vmatprep.mubr.msk.bf16.mxu0 %vm875_vm0, %v4101_v35  ;;  %v4164_v34 = vld [vmem:[%s4219_s24 + $0x2f8] ss:$0 sps:$4 sm:$0xff]   ;;  %v4416_v35 = vld [vmem:[%s5008_s2] ss:$0 sm:$0xff] }
  0x4c   : > { %3988 = vmatprep.mubr.msk.bf16.mxu1 %vm875_vm0, %v4102_v36 }
  0x52   : > { %3893 = vmatmul.mubr.msk.bf16.gmra.mrb[32].mxu0 %vm875_vm0, %v4103_v37 }
  0x53   : > { %3989 = vmatmul.mubr.msk.bf16.gmra.mrb[32].mxu1 %vm875_vm0, %v4104_v38  ;;  %3896 = vmatprep.mubr.msk.bf16.mxu0 %vm875_vm0, %v4105_v39 }
  0x54   : > { %3992 = vmatprep.mubr.msk.bf16.mxu1 %vm875_vm0, %v4106_v40 }
  0x5a   : > { %3897 = vmatmul.mubr.msk.bf16.gmra.mrb[36].mxu0 %vm875_vm0, %v4107_v41 }
  0x5b   : > { %3993 = vmatmul.mubr.msk.bf16.gmra.mrb[36].mxu1 %vm875_vm0, %v4108_v42  ;;  %3900 = vmatprep.mubr.msk.bf16.mxu0 %vm875_vm0, %v4109_v43 }
  0x5c   : > { %3996 = vmatprep.mubr.msk.bf16.mxu1 %vm875_vm0, %v4110_v44 }
  0x62   : > { %3901 = vmatmul.mubr.msk.bf16.gmra.mrb[40].mxu0 %vm875_vm0, %v4111_v45 }
  0x63   : > { %3997 = vmatmul.mubr.msk.bf16.gmra.mrb[40].mxu1 %vm875_vm0, %v4112_v46  ;;  %3904 = vmatprep.mubr.msk.bf16.mxu0 %vm875_vm0, %v4113_v47 }
  0x64   : > { %4000 = vmatprep.mubr.msk.bf16.mxu1 %vm875_vm0, %v4114_v48 }
  0x6a   : > { %3905 = vmatmul.mubr.msk.bf16.gmra.mrb[44].mxu0 %vm875_vm0, %v4115_v49 }
  0x6b   : > { %4001 = vmatmul.mubr.msk.bf16.gmra.mrb[44].mxu1 %vm875_vm0, %v4116_v50  ;;  %3908 = vmatprep.mubr.msk.bf16.mxu0 %vm875_vm0, %v4117_v51 }
  0x6c   : > { %4004 = vmatprep.mubr.msk.bf16.mxu1 %vm875_vm0, %v4118_v52 }
  0x72   : > { %3909 = vmatmul.mubr.msk.bf16.gmra.mrb[48].mxu0 %vm875_vm0, %v4119_v53 }
  0x73   : > { %4005 = vmatmul.mubr.msk.bf16.gmra.mrb[48].mxu1 %vm875_vm0, %v4120_v54  ;;  %3912 = vmatprep.mubr.msk.bf16.mxu0 %vm875_vm0, %v4121_v55 }
  0x74   : > { %4008 = vmatprep.mubr.msk.bf16.mxu1 %vm875_vm0, %v4122_v56 }
  0x7a   : > { %3913 = vmatmul.mubr.msk.bf16.gmra.mrb[52].mxu0 %vm875_vm0, %v4123_v57 }
  0x7b   : > { %4009 = vmatmul.mubr.msk.bf16.gmra.mrb[52].mxu1 %vm875_vm0, %v4124_v58  ;;  %3916 = vmatprep.mubr.msk.bf16.mxu0 %vm875_vm0, %v4125_v59 }
  0x7c   : > { %4012 = vmatprep.mubr.msk.bf16.mxu1 %vm875_vm0, %v4126_v60 }
  0x82   : > { %3917 = vmatmul.mubr.msk.bf16.gmra.mrb[56].mxu0 %vm875_vm0, %v4127_v61 }
  0x83   : > { %4013 = vmatmul.mubr.msk.bf16.gmra.mrb[56].mxu1 %vm875_vm0, %v4128_v62  ;;  %3920 = vmatprep.mubr.msk.bf16.mxu0 %vm875_vm0, %v4129_v63 }
  0x84   : > { %4016 = vmatprep.mubr.msk.bf16.mxu1 %vm875_vm0, %v4130_v0 }
  0x8a   : > { %3921 = vmatmul.mubr.msk.bf16.gmra.mrb[60].mxu0 %vm875_vm0, %v4131_v1 }
  0x8b   : > { %4017 = vmatmul.mubr.msk.bf16.gmra.mrb[60].mxu1 %vm875_vm0, %v4132_v2  ;;  %3924 = vmatprep.mubr.msk.bf16.mxu0 %vm875_vm0, %v4133_v3 }
  0x8c   : > { %4020 = vmatprep.mubr.msk.bf16.mxu1 %vm875_vm0, %v4134_v4 }
  0x92   : > { %3925 = vmatmul.mubr.msk.bf16.gmra.mrb[64].mxu0 %vm875_vm0, %v4135_v5 }
  0x93   : > { %4021 = vmatmul.mubr.msk.bf16.gmra.mrb[64].mxu1 %vm875_vm0, %v4136_v6  ;;  %3928 = vmatprep.mubr.msk.bf16.mxu0 %vm875_vm0, %v4137_v7 }
  0x94   : > { %4024 = vmatprep.mubr.msk.bf16.mxu1 %vm875_vm0, %v4138_v8 }
  0x9a   : > { %3929 = vmatmul.mubr.msk.bf16.gmra.mrb[68].mxu0 %vm875_vm0, %v4139_v9 }
  0x9b   : > { %4025 = vmatmul.mubr.msk.bf16.gmra.mrb[68].mxu1 %vm875_vm0, %v4140_v10  ;;  %3932 = vmatprep.mubr.msk.bf16.mxu0 %vm875_vm0, %v4141_v11 }
  0x9c   : > { %4028 = vmatprep.mubr.msk.bf16.mxu1 %vm875_vm0, %v4142_v12 }
  0xa2   : > { %3933 = vmatmul.mubr.msk.bf16.gmra.mrb[72].mxu0 %vm875_vm0, %v4143_v13 }
  0xa3   : > { %4029 = vmatmul.mubr.msk.bf16.gmra.mrb[72].mxu1 %vm875_vm0, %v4144_v14  ;;  %3936 = vmatprep.mubr.msk.bf16.mxu0 %vm875_vm0, %v4145_v15 }
  0xa4   : > { %4032 = vmatprep.mubr.msk.bf16.mxu1 %vm875_vm0, %v4146_v16 }
  0xaa   : > { %3937 = vmatmul.mubr.msk.bf16.gmra.mrb[76].mxu0 %vm875_vm0, %v4147_v17 }
  0xab   : > { %4033 = vmatmul.mubr.msk.bf16.gmra.mrb[76].mxu1 %vm875_vm0, %v4148_v18  ;;  %3940 = vmatprep.mubr.msk.bf16.mxu0 %vm875_vm0, %v4149_v19 }
  0xac   : > { %4036 = vmatprep.mubr.msk.bf16.mxu1 %vm875_vm0, %v4150_v20 }
  0xb2   : > { %3941 = vmatmul.mubr.msk.bf16.gmra.mrb[80].mxu0 %vm875_vm0, %v4151_v21 }
  0xb3   : > { %4037 = vmatmul.mubr.msk.bf16.gmra.mrb[80].mxu1 %vm875_vm0, %v4152_v22  ;;  %3944 = vmatprep.mubr.msk.bf16.mxu0 %vm875_vm0, %v4153_v23 }
  0xb4   : > { %4040 = vmatprep.mubr.msk.bf16.mxu1 %vm875_vm0, %v4154_v24 }
  0xba   : > { %3945 = vmatmul.mubr.msk.bf16.gmra.mrb[84].mxu0 %vm875_vm0, %v4155_v25 }
  0xbb   : > { %4041 = vmatmul.mubr.msk.bf16.gmra.mrb[84].mxu1 %vm875_vm0, %v4156_v26  ;;  %3948 = vmatprep.mubr.msk.bf16.mxu0 %vm875_vm0, %v4157_v27 }
  0xbc   : > { %4044 = vmatprep.mubr.msk.bf16.mxu1 %vm875_vm0, %v4158_v28 }
  0xc2   : > { %3949 = vmatmul.mubr.msk.bf16.gmra.mrb[88].mxu0 %vm875_vm0, %v4159_v29 }
  0xc3   : > { %4045 = vmatmul.mubr.msk.bf16.gmra.mrb[88].mxu1 %vm875_vm0, %v4160_v30  ;;  %3952 = vmatprep.mubr.msk.bf16.mxu0 %vm875_vm0, %v4161_v31 }
  0xc4   : > { %4048 = vmatprep.mubr.msk.bf16.mxu1 %vm875_vm0, %v4162_v32 }
  0xca   : > { %3953 = vmatmul.mubr.msk.bf16.gmra.mrb[92].mxu0 %vm875_vm0, %v4163_v33 }
  0xcb   : > { %4049 = vmatmul.mubr.msk.bf16.gmra.mrb[92].mxu1 %vm875_vm0, %v4164_v34 }
  0xe5   : > { %v3862_v36 = vpop.f32.mrb[0].mxu0 }
  0xe6   : > { %v3958_v37 = vpop.f32.mrb[0].mxu1  ;;  %v1207_v38 = vadd.f32 %v3862_v36, %v4416_v35  ;;  %v1198_v40 = vpop.f32.mrb[1].mxu0 }
  0xe7   : > { %v1591_v39 = vadd.f32 %v3958_v37, %v4416_v35  ;;  %v1582_v41 = vpop.f32.mrb[1].mxu1  ;;  %v1199_v42 = vadd.f32 %v4416_v35, %v1198_v40  ;;  %v3863_v44 = vpop.f32.mrb[2].mxu0 }
  0xe8   : > { %v1583_v43 = vadd.f32 %v4416_v35, %v1582_v41  ;;  %v3959_v45 = vpop.f32.mrb[2].mxu1  ;;  %v1966_v46 = vmax.f32 %v1207_v38, 0.0  ;;  %v1210_v48 = vadd.f32 %v3863_v44, %v4416_v35  ;;  %v1201_v50 = vpop.f32.mrb[3].mxu0 }
  0xe9   : > { %v2062_v47 = vmax.f32 %v1591_v39, 0.0  ;;  %v1594_v49 = vadd.f32 %v3959_v45, %v4416_v35  ;;  %v1585_v51 = vpop.f32.mrb[3].mxu1  ;;  %v1964_v52 = vmax.f32 %v1199_v42, 0.0  ;;  %v1202_v54 = vadd.f32 %v4416_v35, %v1201_v50 }
  0xea   : > { %v2060_v53 = vmax.f32 %v1583_v43, 0.0  ;;  %v1586_v55 = vadd.f32 %v4416_v35, %v1585_v51  ;;  %v3566_v56 = vpack.c.bf16 %v1966_v46, %v1966_v46  ;;  %v1967_v58 = vmax.f32 %v1210_v48, 0.0 }
  0xeb   : > { %v3662_v57 = vpack.c.bf16 %v2062_v47, %v2062_v47  ;;  %v2063_v59 = vmax.f32 %v1594_v49, 0.0  ;;  %v3564_v60 = vpack.c.bf16 %v1964_v52, %v1964_v52  ;;  %v1965_v62 = vmax.f32 %v1202_v54, 0.0 }
  0xec   : > { %v3660_v61 = vpack.c.bf16 %v2060_v53, %v2060_v53  ;;  %v2061_v63 = vmax.f32 %v1586_v55, 0.0  ;;  %2923 = vst.msk [vmem:[%s4429_s29 + $0x8] sm:$0xf] %vm2920_vm1, %v3566_v56  ;;  %v3567_v0 = vpack.c.bf16 %v1967_v58, %v1967_v58 }
  0xed   : > { %3019 = vst.msk [vmem:[%s4429_s29 + $0x188] sm:$0xf] %vm2920_vm1, %v3662_v57  ;;  %v3663_v1 = vpack.c.bf16 %v2063_v59, %v2063_v59  ;;  %2921 = vst.msk [vmem:[%s4429_s29] sm:$0xf] %vm2920_vm1, %v3564_v60  ;;  %v3565_v2 = vpack.c.bf16 %v1965_v62, %v1965_v62  ;;  %v3866_v4 = vpop.f32.mrb[4].mxu0 }
  0xee   : > { %3017 = vst.msk [vmem:[%s4429_s29 + $0x180] sm:$0xf] %vm2920_vm1, %v3660_v61  ;;  %v3661_v3 = vpack.c.bf16 %v2061_v63, %v2061_v63  ;;  %v3962_v5 = vpop.f32.mrb[4].mxu1  ;;  %2924 = vst.msk [vmem:[%s4429_s29 + $0xc] sm:$0xf] %vm2920_vm1, %v3567_v0  ;;  %v1223_v6 = vadd.f32 %v3866_v4, %v4416_v35  ;;  %v1214_v8 = vpop.f32.mrb[5].mxu0 }
  0xef   : > { %3020 = vst.msk [vmem:[%s4429_s29 + $0x18c] sm:$0xf] %vm2920_vm1, %v3663_v1  ;;  %v1607_v7 = vadd.f32 %v3962_v5, %v4416_v35  ;;  %v1598_v9 = vpop.f32.mrb[5].mxu1  ;;  %2922 = vst.msk [vmem:[%s4429_s29 + $0x4] sm:$0xf] %vm2920_vm1, %v3565_v2  ;;  %v1215_v10 = vadd.f32 %v4416_v35, %v1214_v8  ;;  %v3867_v12 = vpop.f32.mrb[6].mxu0 }
  0xf0   : > { %3018 = vst.msk [vmem:[%s4429_s29 + $0x184] sm:$0xf] %vm2920_vm1, %v3661_v3  ;;  %v1599_v11 = vadd.f32 %v4416_v35, %v1598_v9  ;;  %v3963_v13 = vpop.f32.mrb[6].mxu1  ;;  %v1970_v14 = vmax.f32 %v1223_v6, 0.0  ;;  %v1226_v16 = vadd.f32 %v3867_v12, %v4416_v35  ;;  %v1217_v18 = vpop.f32.mrb[7].mxu0 }
  0xf1   : > { %v2066_v15 = vmax.f32 %v1607_v7, 0.0  ;;  %v1610_v17 = vadd.f32 %v3963_v13, %v4416_v35  ;;  %v1601_v19 = vpop.f32.mrb[7].mxu1  ;;  %v1968_v20 = vmax.f32 %v1215_v10, 0.0  ;;  %v1218_v22 = vadd.f32 %v4416_v35, %v1217_v18 }
  0xf2   : > { %v2064_v21 = vmax.f32 %v1599_v11, 0.0  ;;  %v1602_v23 = vadd.f32 %v4416_v35, %v1601_v19  ;;  %v3570_v24 = vpack.c.bf16 %v1970_v14, %v1970_v14  ;;  %v1971_v26 = vmax.f32 %v1226_v16, 0.0 }
  0xf3   : > { %v3666_v25 = vpack.c.bf16 %v2066_v15, %v2066_v15  ;;  %v2067_v27 = vmax.f32 %v1610_v17, 0.0  ;;  %v3568_v28 = vpack.c.bf16 %v1968_v20, %v1968_v20  ;;  %v1969_v30 = vmax.f32 %v1218_v22, 0.0 }
  0xf4   : > { %v3664_v29 = vpack.c.bf16 %v2064_v21, %v2064_v21  ;;  %v2065_v31 = vmax.f32 %v1602_v23, 0.0  ;;  %2927 = vst.msk [vmem:[%s4429_s29 + $0x18] sm:$0xf] %vm2920_vm1, %v3570_v24  ;;  %v3571_v32 = vpack.c.bf16 %v1971_v26, %v1971_v26 }
  0xf5   : > { %3023 = vst.msk [vmem:[%s4429_s29 + $0x198] sm:$0xf] %vm2920_vm1, %v3666_v25  ;;  %v3667_v33 = vpack.c.bf16 %v2067_v27, %v2067_v27  ;;  %2925 = vst.msk [vmem:[%s4429_s29 + $0x10] sm:$0xf] %vm2920_vm1, %v3568_v28  ;;  %v3569_v34 = vpack.c.bf16 %v1969_v30, %v1969_v30  ;;  %v3870_v37 = vpop.f32.mrb[8].mxu0 }
  0xf6   : > { %3021 = vst.msk [vmem:[%s4429_s29 + $0x190] sm:$0xf] %vm2920_vm1, %v3664_v29  ;;  %v3665_v36 = vpack.c.bf16 %v2065_v31, %v2065_v31  ;;  %v3966_v38 = vpop.f32.mrb[8].mxu1  ;;  %2928 = vst.msk [vmem:[%s4429_s29 + $0x1c] sm:$0xf] %vm2920_vm1, %v3571_v32  ;;  %v1239_v39 = vadd.f32 %v3870_v37, %v4416_v35  ;;  %v1230_v41 = vpop.f32.mrb[9].mxu0 }
  0xf7   : > { %3024 = vst.msk [vmem:[%s4429_s29 + $0x19c] sm:$0xf] %vm2920_vm1, %v3667_v33  ;;  %v1623_v40 = vadd.f32 %v3966_v38, %v4416_v35  ;;  %v1614_v42 = vpop.f32.mrb[9].mxu1  ;;  %2926 = vst.msk [vmem:[%s4429_s29 + $0x14] sm:$0xf] %vm2920_vm1, %v3569_v34  ;;  %v1231_v43 = vadd.f32 %v4416_v35, %v1230_v41  ;;  %v3871_v45 = vpop.f32.mrb[10].mxu0 }
  0xf8   : > { %3022 = vst.msk [vmem:[%s4429_s29 + $0x194] sm:$0xf] %vm2920_vm1, %v3665_v36  ;;  %v1615_v44 = vadd.f32 %v4416_v35, %v1614_v42  ;;  %v3967_v46 = vpop.f32.mrb[10].mxu1  ;;  %v1974_v47 = vmax.f32 %v1239_v39, 0.0  ;;  %v1242_v49 = vadd.f32 %v3871_v45, %v4416_v35  ;;  %v1233_v51 = vpop.f32.mrb[11].mxu0 }
  0xf9   : > { %v2070_v48 = vmax.f32 %v1623_v40, 0.0  ;;  %v1626_v50 = vadd.f32 %v3967_v46, %v4416_v35  ;;  %v1617_v52 = vpop.f32.mrb[11].mxu1  ;;  %v1972_v53 = vmax.f32 %v1231_v43, 0.0  ;;  %v1234_v55 = vadd.f32 %v4416_v35, %v1233_v51 }
  0xfa   : > { %v2068_v54 = vmax.f32 %v1615_v44, 0.0  ;;  %v1618_v56 = vadd.f32 %v4416_v35, %v1617_v52  ;;  %v3574_v57 = vpack.c.bf16 %v1974_v47, %v1974_v47  ;;  %v1975_v59 = vmax.f32 %v1242_v49, 0.0 }
  0xfb   : > { %v3670_v58 = vpack.c.bf16 %v2070_v48, %v2070_v48  ;;  %v2071_v60 = vmax.f32 %v1626_v50, 0.0  ;;  %v3572_v61 = vpack.c.bf16 %v1972_v53, %v1972_v53  ;;  %v1973_v63 = vmax.f32 %v1234_v55, 0.0 }
  0xfc   : > { %v3668_v62 = vpack.c.bf16 %v2068_v54, %v2068_v54  ;;  %v2069_v0 = vmax.f32 %v1618_v56, 0.0  ;;  %2931 = vst.msk [vmem:[%s4429_s29 + $0x28] sm:$0xf] %vm2920_vm1, %v3574_v57  ;;  %v3575_v1 = vpack.c.bf16 %v1975_v59, %v1975_v59 }
  0xfd   : > { %3027 = vst.msk [vmem:[%s4429_s29 + $0x1a8] sm:$0xf] %vm2920_vm1, %v3670_v58  ;;  %v3671_v2 = vpack.c.bf16 %v2071_v60, %v2071_v60  ;;  %2929 = vst.msk [vmem:[%s4429_s29 + $0x20] sm:$0xf] %vm2920_vm1, %v3572_v61  ;;  %v3573_v3 = vpack.c.bf16 %v1973_v63, %v1973_v63  ;;  %v3874_v5 = vpop.f32.mrb[12].mxu0 }
  0xfe   : > { %3025 = vst.msk [vmem:[%s4429_s29 + $0x1a0] sm:$0xf] %vm2920_vm1, %v3668_v62  ;;  %v3669_v4 = vpack.c.bf16 %v2069_v0, %v2069_v0  ;;  %v3970_v6 = vpop.f32.mrb[12].mxu1  ;;  %2932 = vst.msk [vmem:[%s4429_s29 + $0x2c] sm:$0xf] %vm2920_vm1, %v3575_v1  ;;  %v1255_v7 = vadd.f32 %v3874_v5, %v4416_v35  ;;  %v1246_v9 = vpop.f32.mrb[13].mxu0 }
  0xff   : > { %3028 = vst.msk [vmem:[%s4429_s29 + $0x1ac] sm:$0xf] %vm2920_vm1, %v3671_v2  ;;  %v1639_v8 = vadd.f32 %v3970_v6, %v4416_v35  ;;  %v1630_v10 = vpop.f32.mrb[13].mxu1  ;;  %2930 = vst.msk [vmem:[%s4429_s29 + $0x24] sm:$0xf] %vm2920_vm1, %v3573_v3  ;;  %v1247_v11 = vadd.f32 %v4416_v35, %v1246_v9  ;;  %v3875_v13 = vpop.f32.mrb[14].mxu0 }
 0x100   : > { %3026 = vst.msk [vmem:[%s4429_s29 + $0x1a4] sm:$0xf] %vm2920_vm1, %v3669_v4  ;;  %v1631_v12 = vadd.f32 %v4416_v35, %v1630_v10  ;;  %v3971_v14 = vpop.f32.mrb[14].mxu1  ;;  %v1978_v15 = vmax.f32 %v1255_v7, 0.0  ;;  %v1258_v17 = vadd.f32 %v3875_v13, %v4416_v35  ;;  %v1249_v19 = vpop.f32.mrb[15].mxu0 }
 0x101   : > { %v2074_v16 = vmax.f32 %v1639_v8, 0.0  ;;  %v1642_v18 = vadd.f32 %v3971_v14, %v4416_v35  ;;  %v1633_v20 = vpop.f32.mrb[15].mxu1  ;;  %v1976_v21 = vmax.f32 %v1247_v11, 0.0  ;;  %v1250_v23 = vadd.f32 %v4416_v35, %v1249_v19 }
 0x102   : > { %v2072_v22 = vmax.f32 %v1631_v12, 0.0  ;;  %v1634_v24 = vadd.f32 %v4416_v35, %v1633_v20  ;;  %v3578_v25 = vpack.c.bf16 %v1978_v15, %v1978_v15  ;;  %v1979_v27 = vmax.f32 %v1258_v17, 0.0 }
 0x103   : > { %v3674_v26 = vpack.c.bf16 %v2074_v16, %v2074_v16  ;;  %v2075_v28 = vmax.f32 %v1642_v18, 0.0  ;;  %v3576_v29 = vpack.c.bf16 %v1976_v21, %v1976_v21  ;;  %v1977_v31 = vmax.f32 %v1250_v23, 0.0 }
 0x104   : > { %v3672_v30 = vpack.c.bf16 %v2072_v22, %v2072_v22  ;;  %v2073_v32 = vmax.f32 %v1634_v24, 0.0  ;;  %2935 = vst.msk [vmem:[%s4429_s29 + $0x38] sm:$0xf] %vm2920_vm1, %v3578_v25  ;;  %v3579_v33 = vpack.c.bf16 %v1979_v27, %v1979_v27 }
 0x105   : > { %3031 = vst.msk [vmem:[%s4429_s29 + $0x1b8] sm:$0xf] %vm2920_vm1, %v3674_v26  ;;  %v3675_v34 = vpack.c.bf16 %v2075_v28, %v2075_v28  ;;  %2933 = vst.msk [vmem:[%s4429_s29 + $0x30] sm:$0xf] %vm2920_vm1, %v3576_v29  ;;  %v3577_v36 = vpack.c.bf16 %v1977_v31, %v1977_v31  ;;  %v3878_v38 = vpop.f32.mrb[16].mxu0 }
 0x106   : > { %3029 = vst.msk [vmem:[%s4429_s29 + $0x1b0] sm:$0xf] %vm2920_vm1, %v3672_v30  ;;  %v3673_v37 = vpack.c.bf16 %v2073_v32, %v2073_v32  ;;  %v3974_v39 = vpop.f32.mrb[16].mxu1  ;;  %2936 = vst.msk [vmem:[%s4429_s29 + $0x3c] sm:$0xf] %vm2920_vm1, %v3579_v33  ;;  %v1271_v40 = vadd.f32 %v3878_v38, %v4416_v35  ;;  %v1262_v42 = vpop.f32.mrb[17].mxu0 }
 0x107   : > { %3032 = vst.msk [vmem:[%s4429_s29 + $0x1bc] sm:$0xf] %vm2920_vm1, %v3675_v34  ;;  %v1655_v41 = vadd.f32 %v3974_v39, %v4416_v35  ;;  %v1646_v43 = vpop.f32.mrb[17].mxu1  ;;  %2934 = vst.msk [vmem:[%s4429_s29 + $0x34] sm:$0xf] %vm2920_vm1, %v3577_v36  ;;  %v1263_v44 = vadd.f32 %v4416_v35, %v1262_v42  ;;  %v3879_v46 = vpop.f32.mrb[18].mxu0 }
 0x108   : > { %3030 = vst.msk [vmem:[%s4429_s29 + $0x1b4] sm:$0xf] %vm2920_vm1, %v3673_v37  ;;  %v1647_v45 = vadd.f32 %v4416_v35, %v1646_v43  ;;  %v3975_v47 = vpop.f32.mrb[18].mxu1  ;;  %v1982_v48 = vmax.f32 %v1271_v40, 0.0  ;;  %v1274_v50 = vadd.f32 %v3879_v46, %v4416_v35  ;;  %v1265_v52 = vpop.f32.mrb[19].mxu0 }
 0x109   : > { %v2078_v49 = vmax.f32 %v1655_v41, 0.0  ;;  %v1658_v51 = vadd.f32 %v3975_v47, %v4416_v35  ;;  %v1649_v53 = vpop.f32.mrb[19].mxu1  ;;  %v1980_v54 = vmax.f32 %v1263_v44, 0.0  ;;  %v1266_v56 = vadd.f32 %v4416_v35, %v1265_v52 }
 0x10a   : > { %v2076_v55 = vmax.f32 %v1647_v45, 0.0  ;;  %v1650_v57 = vadd.f32 %v4416_v35, %v1649_v53  ;;  %v3582_v58 = vpack.c.bf16 %v1982_v48, %v1982_v48  ;;  %v1983_v60 = vmax.f32 %v1274_v50, 0.0 }
 0x10b   : > { %v3678_v59 = vpack.c.bf16 %v2078_v49, %v2078_v49  ;;  %v2079_v61 = vmax.f32 %v1658_v51, 0.0  ;;  %v3580_v62 = vpack.c.bf16 %v1980_v54, %v1980_v54  ;;  %v1981_v0 = vmax.f32 %v1266_v56, 0.0 }
 0x10c   : > { %v3676_v63 = vpack.c.bf16 %v2076_v55, %v2076_v55  ;;  %v2077_v1 = vmax.f32 %v1650_v57, 0.0  ;;  %2939 = vst.msk [vmem:[%s4429_s29 + $0x48] sm:$0xf] %vm2920_vm1, %v3582_v58  ;;  %v3583_v2 = vpack.c.bf16 %v1983_v60, %v1983_v60 }
 0x10d   : > { %3035 = vst.msk [vmem:[%s4429_s29 + $0x1c8] sm:$0xf] %vm2920_vm1, %v3678_v59  ;;  %v3679_v3 = vpack.c.bf16 %v2079_v61, %v2079_v61  ;;  %2937 = vst.msk [vmem:[%s4429_s29 + $0x40] sm:$0xf] %vm2920_vm1, %v3580_v62  ;;  %v3581_v4 = vpack.c.bf16 %v1981_v0, %v1981_v0  ;;  %v3882_v6 = vpop.f32.mrb[20].mxu0 }
 0x10e   : > { %3033 = vst.msk [vmem:[%s4429_s29 + $0x1c0] sm:$0xf] %vm2920_vm1, %v3676_v63  ;;  %v3677_v5 = vpack.c.bf16 %v2077_v1, %v2077_v1  ;;  %v3978_v7 = vpop.f32.mrb[20].mxu1  ;;  %2940 = vst.msk [vmem:[%s4429_s29 + $0x4c] sm:$0xf] %vm2920_vm1, %v3583_v2  ;;  %v1287_v8 = vadd.f32 %v3882_v6, %v4416_v35  ;;  %v1278_v10 = vpop.f32.mrb[21].mxu0 }
 0x10f   : > { %3036 = vst.msk [vmem:[%s4429_s29 + $0x1cc] sm:$0xf] %vm2920_vm1, %v3679_v3  ;;  %v1671_v9 = vadd.f32 %v3978_v7, %v4416_v35  ;;  %v1662_v11 = vpop.f32.mrb[21].mxu1  ;;  %2938 = vst.msk [vmem:[%s4429_s29 + $0x44] sm:$0xf] %vm2920_vm1, %v3581_v4  ;;  %v1279_v12 = vadd.f32 %v4416_v35, %v1278_v10  ;;  %v3883_v14 = vpop.f32.mrb[22].mxu0 }
 0x110   : > { %3034 = vst.msk [vmem:[%s4429_s29 + $0x1c4] sm:$0xf] %vm2920_vm1, %v3677_v5  ;;  %v1663_v13 = vadd.f32 %v4416_v35, %v1662_v11  ;;  %v3979_v15 = vpop.f32.mrb[22].mxu1  ;;  %v1986_v16 = vmax.f32 %v1287_v8, 0.0  ;;  %v1290_v18 = vadd.f32 %v3883_v14, %v4416_v35  ;;  %v1281_v20 = vpop.f32.mrb[23].mxu0 }
 0x111   : > { %v2082_v17 = vmax.f32 %v1671_v9, 0.0  ;;  %v1674_v19 = vadd.f32 %v3979_v15, %v4416_v35  ;;  %v1665_v21 = vpop.f32.mrb[23].mxu1  ;;  %v1984_v22 = vmax.f32 %v1279_v12, 0.0  ;;  %v1282_v24 = vadd.f32 %v4416_v35, %v1281_v20 }
 0x112   : > { %v2080_v23 = vmax.f32 %v1663_v13, 0.0  ;;  %v1666_v25 = vadd.f32 %v4416_v35, %v1665_v21  ;;  %v3586_v26 = vpack.c.bf16 %v1986_v16, %v1986_v16  ;;  %v1987_v28 = vmax.f32 %v1290_v18, 0.0 }
 0x113   : > { %v3682_v27 = vpack.c.bf16 %v2082_v17, %v2082_v17  ;;  %v2083_v29 = vmax.f32 %v1674_v19, 0.0  ;;  %v3584_v30 = vpack.c.bf16 %v1984_v22, %v1984_v22  ;;  %v1985_v32 = vmax.f32 %v1282_v24, 0.0 }
 0x114   : > { %v3680_v31 = vpack.c.bf16 %v2080_v23, %v2080_v23  ;;  %v2081_v33 = vmax.f32 %v1666_v25, 0.0  ;;  %2943 = vst.msk [vmem:[%s4429_s29 + $0x58] sm:$0xf] %vm2920_vm1, %v3586_v26  ;;  %v3587_v34 = vpack.c.bf16 %v1987_v28, %v1987_v28 }
 0x115   : > { %3039 = vst.msk [vmem:[%s4429_s29 + $0x1d8] sm:$0xf] %vm2920_vm1, %v3682_v27  ;;  %v3683_v36 = vpack.c.bf16 %v2083_v29, %v2083_v29  ;;  %2941 = vst.msk [vmem:[%s4429_s29 + $0x50] sm:$0xf] %vm2920_vm1, %v3584_v30  ;;  %v3585_v37 = vpack.c.bf16 %v1985_v32, %v1985_v32  ;;  %v3886_v39 = vpop.f32.mrb[24].mxu0 }
 0x116   : > { %3037 = vst.msk [vmem:[%s4429_s29 + $0x1d0] sm:$0xf] %vm2920_vm1, %v3680_v31  ;;  %v3681_v38 = vpack.c.bf16 %v2081_v33, %v2081_v33  ;;  %v3982_v40 = vpop.f32.mrb[24].mxu1  ;;  %2944 = vst.msk [vmem:[%s4429_s29 + $0x5c] sm:$0xf] %vm2920_vm1, %v3587_v34  ;;  %v1303_v41 = vadd.f32 %v3886_v39, %v4416_v35  ;;  %v1294_v43 = vpop.f32.mrb[25].mxu0 }
 0x117   : > { %3040 = vst.msk [vmem:[%s4429_s29 + $0x1dc] sm:$0xf] %vm2920_vm1, %v3683_v36  ;;  %v1687_v42 = vadd.f32 %v3982_v40, %v4416_v35  ;;  %v1678_v44 = vpop.f32.mrb[25].mxu1  ;;  %2942 = vst.msk [vmem:[%s4429_s29 + $0x54] sm:$0xf] %vm2920_vm1, %v3585_v37  ;;  %v1295_v45 = vadd.f32 %v4416_v35, %v1294_v43  ;;  %v3887_v47 = vpop.f32.mrb[26].mxu0 }
 0x118   : > { %3038 = vst.msk [vmem:[%s4429_s29 + $0x1d4] sm:$0xf] %vm2920_vm1, %v3681_v38  ;;  %v1679_v46 = vadd.f32 %v4416_v35, %v1678_v44  ;;  %v3983_v48 = vpop.f32.mrb[26].mxu1  ;;  %v1990_v49 = vmax.f32 %v1303_v41, 0.0  ;;  %v1306_v51 = vadd.f32 %v3887_v47, %v4416_v35  ;;  %v1297_v53 = vpop.f32.mrb[27].mxu0 }
 0x119   : > { %v2086_v50 = vmax.f32 %v1687_v42, 0.0  ;;  %v1690_v52 = vadd.f32 %v3983_v48, %v4416_v35  ;;  %v1681_v54 = vpop.f32.mrb[27].mxu1  ;;  %v1988_v55 = vmax.f32 %v1295_v45, 0.0  ;;  %v1298_v57 = vadd.f32 %v4416_v35, %v1297_v53 }
 0x11a   : > { %v2084_v56 = vmax.f32 %v1679_v46, 0.0  ;;  %v1682_v58 = vadd.f32 %v4416_v35, %v1681_v54  ;;  %v3590_v59 = vpack.c.bf16 %v1990_v49, %v1990_v49  ;;  %v1991_v61 = vmax.f32 %v1306_v51, 0.0 }
 0x11b   : > { %v3686_v60 = vpack.c.bf16 %v2086_v50, %v2086_v50  ;;  %v2087_v62 = vmax.f32 %v1690_v52, 0.0  ;;  %v3588_v63 = vpack.c.bf16 %v1988_v55, %v1988_v55  ;;  %v1989_v1 = vmax.f32 %v1298_v57, 0.0 }
 0x11c   : > { %v3684_v0 = vpack.c.bf16 %v2084_v56, %v2084_v56  ;;  %v2085_v2 = vmax.f32 %v1682_v58, 0.0  ;;  %2947 = vst.msk [vmem:[%s4429_s29 + $0x68] sm:$0xf] %vm2920_vm1, %v3590_v59  ;;  %v3591_v3 = vpack.c.bf16 %v1991_v61, %v1991_v61 }
 0x11d   : > { %3043 = vst.msk [vmem:[%s4429_s29 + $0x1e8] sm:$0xf] %vm2920_vm1, %v3686_v60  ;;  %v3687_v4 = vpack.c.bf16 %v2087_v62, %v2087_v62  ;;  %2945 = vst.msk [vmem:[%s4429_s29 + $0x60] sm:$0xf] %vm2920_vm1, %v3588_v63  ;;  %v3589_v5 = vpack.c.bf16 %v1989_v1, %v1989_v1  ;;  %v3890_v7 = vpop.f32.mrb[28].mxu0 }
 0x11e   : > { %3041 = vst.msk [vmem:[%s4429_s29 + $0x1e0] sm:$0xf] %vm2920_vm1, %v3684_v0  ;;  %v3685_v6 = vpack.c.bf16 %v2085_v2, %v2085_v2  ;;  %v3986_v8 = vpop.f32.mrb[28].mxu1  ;;  %2948 = vst.msk [vmem:[%s4429_s29 + $0x6c] sm:$0xf] %vm2920_vm1, %v3591_v3  ;;  %v1319_v9 = vadd.f32 %v3890_v7, %v4416_v35  ;;  %v1310_v11 = vpop.f32.mrb[29].mxu0 }
 0x11f   : > { %3044 = vst.msk [vmem:[%s4429_s29 + $0x1ec] sm:$0xf] %vm2920_vm1, %v3687_v4  ;;  %v1703_v10 = vadd.f32 %v3986_v8, %v4416_v35  ;;  %v1694_v12 = vpop.f32.mrb[29].mxu1  ;;  %2946 = vst.msk [vmem:[%s4429_s29 + $0x64] sm:$0xf] %vm2920_vm1, %v3589_v5  ;;  %v1311_v13 = vadd.f32 %v4416_v35, %v1310_v11  ;;  %v3891_v15 = vpop.f32.mrb[30].mxu0 }
 0x120   : > { %3042 = vst.msk [vmem:[%s4429_s29 + $0x1e4] sm:$0xf] %vm2920_vm1, %v3685_v6  ;;  %v1695_v14 = vadd.f32 %v4416_v35, %v1694_v12  ;;  %v3987_v16 = vpop.f32.mrb[30].mxu1  ;;  %v1994_v17 = vmax.f32 %v1319_v9, 0.0  ;;  %v1322_v19 = vadd.f32 %v3891_v15, %v4416_v35  ;;  %v1313_v21 = vpop.f32.mrb[31].mxu0 }
 0x121   : > { %v2090_v18 = vmax.f32 %v1703_v10, 0.0  ;;  %v1706_v20 = vadd.f32 %v3987_v16, %v4416_v35  ;;  %v1697_v22 = vpop.f32.mrb[31].mxu1  ;;  %v1992_v23 = vmax.f32 %v1311_v13, 0.0  ;;  %v1314_v25 = vadd.f32 %v4416_v35, %v1313_v21 }
 0x122   : > { %v2088_v24 = vmax.f32 %v1695_v14, 0.0  ;;  %v1698_v26 = vadd.f32 %v4416_v35, %v1697_v22  ;;  %v3594_v27 = vpack.c.bf16 %v1994_v17, %v1994_v17  ;;  %v1995_v29 = vmax.f32 %v1322_v19, 0.0 }
 0x123   : > { %v3690_v28 = vpack.c.bf16 %v2090_v18, %v2090_v18  ;;  %v2091_v30 = vmax.f32 %v1706_v20, 0.0  ;;  %v3592_v31 = vpack.c.bf16 %v1992_v23, %v1992_v23  ;;  %v1993_v33 = vmax.f32 %v1314_v25, 0.0 }
 0x124   : > { %v3688_v32 = vpack.c.bf16 %v2088_v24, %v2088_v24  ;;  %v2089_v34 = vmax.f32 %v1698_v26, 0.0  ;;  %2951 = vst.msk [vmem:[%s4429_s29 + $0x78] sm:$0xf] %vm2920_vm1, %v3594_v27  ;;  %v3595_v36 = vpack.c.bf16 %v1995_v29, %v1995_v29 }
 0x125   : > { %3047 = vst.msk [vmem:[%s4429_s29 + $0x1f8] sm:$0xf] %vm2920_vm1, %v3690_v28  ;;  %v3691_v37 = vpack.c.bf16 %v2091_v30, %v2091_v30  ;;  %2949 = vst.msk [vmem:[%s4429_s29 + $0x70] sm:$0xf] %vm2920_vm1, %v3592_v31  ;;  %v3593_v38 = vpack.c.bf16 %v1993_v33, %v1993_v33  ;;  %v3894_v40 = vpop.f32.mrb[32].mxu0 }
 0x126   : > { %3045 = vst.msk [vmem:[%s4429_s29 + $0x1f0] sm:$0xf] %vm2920_vm1, %v3688_v32  ;;  %v3689_v39 = vpack.c.bf16 %v2089_v34, %v2089_v34  ;;  %v3990_v41 = vpop.f32.mrb[32].mxu1  ;;  %2952 = vst.msk [vmem:[%s4429_s29 + $0x7c] sm:$0xf] %vm2920_vm1, %v3595_v36  ;;  %v1335_v42 = vadd.f32 %v3894_v40, %v4416_v35  ;;  %v1326_v44 = vpop.f32.mrb[33].mxu0 }
 0x127   : > { %3048 = vst.msk [vmem:[%s4429_s29 + $0x1fc] sm:$0xf] %vm2920_vm1, %v3691_v37  ;;  %v1719_v43 = vadd.f32 %v3990_v41, %v4416_v35  ;;  %v1710_v45 = vpop.f32.mrb[33].mxu1  ;;  %2950 = vst.msk [vmem:[%s4429_s29 + $0x74] sm:$0xf] %vm2920_vm1, %v3593_v38  ;;  %v1327_v46 = vadd.f32 %v4416_v35, %v1326_v44  ;;  %v3895_v48 = vpop.f32.mrb[34].mxu0 }
 0x128   : > { %3046 = vst.msk [vmem:[%s4429_s29 + $0x1f4] sm:$0xf] %vm2920_vm1, %v3689_v39  ;;  %v1711_v47 = vadd.f32 %v4416_v35, %v1710_v45  ;;  %v3991_v49 = vpop.f32.mrb[34].mxu1  ;;  %v1998_v50 = vmax.f32 %v1335_v42, 0.0  ;;  %v1338_v52 = vadd.f32 %v3895_v48, %v4416_v35  ;;  %v1329_v54 = vpop.f32.mrb[35].mxu0 }
 0x129   : > { %v2094_v51 = vmax.f32 %v1719_v43, 0.0  ;;  %v1722_v53 = vadd.f32 %v3991_v49, %v4416_v35  ;;  %v1713_v55 = vpop.f32.mrb[35].mxu1  ;;  %v1996_v56 = vmax.f32 %v1327_v46, 0.0  ;;  %v1330_v58 = vadd.f32 %v4416_v35, %v1329_v54 }
 0x12a   : > { %v2092_v57 = vmax.f32 %v1711_v47, 0.0  ;;  %v1714_v59 = vadd.f32 %v4416_v35, %v1713_v55  ;;  %v3598_v60 = vpack.c.bf16 %v1998_v50, %v1998_v50  ;;  %v1999_v62 = vmax.f32 %v1338_v52, 0.0 }
 0x12b   : > { %v3694_v61 = vpack.c.bf16 %v2094_v51, %v2094_v51  ;;  %v2095_v63 = vmax.f32 %v1722_v53, 0.0  ;;  %v3596_v0 = vpack.c.bf16 %v1996_v56, %v1996_v56  ;;  %v1997_v2 = vmax.f32 %v1330_v58, 0.0 }
 0x12c   : > { %v3692_v1 = vpack.c.bf16 %v2092_v57, %v2092_v57  ;;  %v2093_v3 = vmax.f32 %v1714_v59, 0.0  ;;  %2955 = vst.msk [vmem:[%s4429_s29 + $0x88] sm:$0xf] %vm2920_vm1, %v3598_v60  ;;  %v3599_v4 = vpack.c.bf16 %v1999_v62, %v1999_v62 }
 0x12d   : > { %3051 = vst.msk [vmem:[%s4429_s29 + $0x208] sm:$0xf] %vm2920_vm1, %v3694_v61  ;;  %v3695_v5 = vpack.c.bf16 %v2095_v63, %v2095_v63  ;;  %2953 = vst.msk [vmem:[%s4429_s29 + $0x80] sm:$0xf] %vm2920_vm1, %v3596_v0  ;;  %v3597_v6 = vpack.c.bf16 %v1997_v2, %v1997_v2  ;;  %v3898_v8 = vpop.f32.mrb[36].mxu0 }
 0x12e   : > { %3049 = vst.msk [vmem:[%s4429_s29 + $0x200] sm:$0xf] %vm2920_vm1, %v3692_v1  ;;  %v3693_v7 = vpack.c.bf16 %v2093_v3, %v2093_v3  ;;  %v3994_v9 = vpop.f32.mrb[36].mxu1  ;;  %2956 = vst.msk [vmem:[%s4429_s29 + $0x8c] sm:$0xf] %vm2920_vm1, %v3599_v4  ;;  %v1351_v10 = vadd.f32 %v3898_v8, %v4416_v35  ;;  %v1342_v12 = vpop.f32.mrb[37].mxu0 }
 0x12f   : > { %3052 = vst.msk [vmem:[%s4429_s29 + $0x20c] sm:$0xf] %vm2920_vm1, %v3695_v5  ;;  %v1735_v11 = vadd.f32 %v3994_v9, %v4416_v35  ;;  %v1726_v13 = vpop.f32.mrb[37].mxu1  ;;  %2954 = vst.msk [vmem:[%s4429_s29 + $0x84] sm:$0xf] %vm2920_vm1, %v3597_v6  ;;  %v1343_v14 = vadd.f32 %v4416_v35, %v1342_v12  ;;  %v3899_v16 = vpop.f32.mrb[38].mxu0 }
 0x130   : > { %3050 = vst.msk [vmem:[%s4429_s29 + $0x204] sm:$0xf] %vm2920_vm1, %v3693_v7  ;;  %v1727_v15 = vadd.f32 %v4416_v35, %v1726_v13  ;;  %v3995_v17 = vpop.f32.mrb[38].mxu1  ;;  %v2002_v18 = vmax.f32 %v1351_v10, 0.0  ;;  %v1354_v20 = vadd.f32 %v3899_v16, %v4416_v35  ;;  %v1345_v22 = vpop.f32.mrb[39].mxu0 }
 0x131   : > { %v2098_v19 = vmax.f32 %v1735_v11, 0.0  ;;  %v1738_v21 = vadd.f32 %v3995_v17, %v4416_v35  ;;  %v1729_v23 = vpop.f32.mrb[39].mxu1  ;;  %v2000_v24 = vmax.f32 %v1343_v14, 0.0  ;;  %v1346_v26 = vadd.f32 %v4416_v35, %v1345_v22 }
 0x132   : > { %v2096_v25 = vmax.f32 %v1727_v15, 0.0  ;;  %v1730_v27 = vadd.f32 %v4416_v35, %v1729_v23  ;;  %v3602_v28 = vpack.c.bf16 %v2002_v18, %v2002_v18  ;;  %v2003_v30 = vmax.f32 %v1354_v20, 0.0 }
 0x133   : > { %v3698_v29 = vpack.c.bf16 %v2098_v19, %v2098_v19  ;;  %v2099_v31 = vmax.f32 %v1738_v21, 0.0  ;;  %v3600_v32 = vpack.c.bf16 %v2000_v24, %v2000_v24  ;;  %v2001_v34 = vmax.f32 %v1346_v26, 0.0 }
 0x134   : > { %v3696_v33 = vpack.c.bf16 %v2096_v25, %v2096_v25  ;;  %v2097_v36 = vmax.f32 %v1730_v27, 0.0  ;;  %2959 = vst.msk [vmem:[%s4429_s29 + $0x98] sm:$0xf] %vm2920_vm1, %v3602_v28  ;;  %v3603_v37 = vpack.c.bf16 %v2003_v30, %v2003_v30 }
 0x135   : > { %3055 = vst.msk [vmem:[%s4429_s29 + $0x218] sm:$0xf] %vm2920_vm1, %v3698_v29  ;;  %v3699_v38 = vpack.c.bf16 %v2099_v31, %v2099_v31  ;;  %2957 = vst.msk [vmem:[%s4429_s29 + $0x90] sm:$0xf] %vm2920_vm1, %v3600_v32  ;;  %v3601_v39 = vpack.c.bf16 %v2001_v34, %v2001_v34  ;;  %v3902_v41 = vpop.f32.mrb[40].mxu0 }
 0x136   : > { %3053 = vst.msk [vmem:[%s4429_s29 + $0x210] sm:$0xf] %vm2920_vm1, %v3696_v33  ;;  %v3697_v40 = vpack.c.bf16 %v2097_v36, %v2097_v36  ;;  %v3998_v42 = vpop.f32.mrb[40].mxu1  ;;  %2960 = vst.msk [vmem:[%s4429_s29 + $0x9c] sm:$0xf] %vm2920_vm1, %v3603_v37  ;;  %v1367_v43 = vadd.f32 %v3902_v41, %v4416_v35  ;;  %v1358_v45 = vpop.f32.mrb[41].mxu0 }
 0x137   : > { %3056 = vst.msk [vmem:[%s4429_s29 + $0x21c] sm:$0xf] %vm2920_vm1, %v3699_v38  ;;  %v1751_v44 = vadd.f32 %v3998_v42, %v4416_v35  ;;  %v1742_v46 = vpop.f32.mrb[41].mxu1  ;;  %2958 = vst.msk [vmem:[%s4429_s29 + $0x94] sm:$0xf] %vm2920_vm1, %v3601_v39  ;;  %v1359_v47 = vadd.f32 %v4416_v35, %v1358_v45  ;;  %v3903_v49 = vpop.f32.mrb[42].mxu0 }
 0x138   : > { %3054 = vst.msk [vmem:[%s4429_s29 + $0x214] sm:$0xf] %vm2920_vm1, %v3697_v40  ;;  %v1743_v48 = vadd.f32 %v4416_v35, %v1742_v46  ;;  %v3999_v50 = vpop.f32.mrb[42].mxu1  ;;  %v2006_v51 = vmax.f32 %v1367_v43, 0.0  ;;  %v1370_v53 = vadd.f32 %v3903_v49, %v4416_v35  ;;  %v1361_v55 = vpop.f32.mrb[43].mxu0 }
 0x139   : > { %v2102_v52 = vmax.f32 %v1751_v44, 0.0  ;;  %v1754_v54 = vadd.f32 %v3999_v50, %v4416_v35  ;;  %v1745_v56 = vpop.f32.mrb[43].mxu1  ;;  %v2004_v57 = vmax.f32 %v1359_v47, 0.0  ;;  %v1362_v59 = vadd.f32 %v4416_v35, %v1361_v55 }
 0x13a   : > { %v2100_v58 = vmax.f32 %v1743_v48, 0.0  ;;  %v1746_v60 = vadd.f32 %v4416_v35, %v1745_v56  ;;  %v3606_v61 = vpack.c.bf16 %v2006_v51, %v2006_v51  ;;  %v2007_v63 = vmax.f32 %v1370_v53, 0.0 }
 0x13b   : > { %v3702_v62 = vpack.c.bf16 %v2102_v52, %v2102_v52  ;;  %v2103_v0 = vmax.f32 %v1754_v54, 0.0  ;;  %v3604_v1 = vpack.c.bf16 %v2004_v57, %v2004_v57  ;;  %v2005_v3 = vmax.f32 %v1362_v59, 0.0 }
 0x13c   : > { %v3700_v2 = vpack.c.bf16 %v2100_v58, %v2100_v58  ;;  %v2101_v4 = vmax.f32 %v1746_v60, 0.0  ;;  %2963 = vst.msk [vmem:[%s4429_s29 + $0xa8] sm:$0xf] %vm2920_vm1, %v3606_v61  ;;  %v3607_v5 = vpack.c.bf16 %v2007_v63, %v2007_v63 }
 0x13d   : > { %3059 = vst.msk [vmem:[%s4429_s29 + $0x228] sm:$0xf] %vm2920_vm1, %v3702_v62  ;;  %v3703_v6 = vpack.c.bf16 %v2103_v0, %v2103_v0  ;;  %2961 = vst.msk [vmem:[%s4429_s29 + $0xa0] sm:$0xf] %vm2920_vm1, %v3604_v1  ;;  %v3605_v7 = vpack.c.bf16 %v2005_v3, %v2005_v3  ;;  %v3906_v9 = vpop.f32.mrb[44].mxu0 }
 0x13e   : > { %3057 = vst.msk [vmem:[%s4429_s29 + $0x220] sm:$0xf] %vm2920_vm1, %v3700_v2  ;;  %v3701_v8 = vpack.c.bf16 %v2101_v4, %v2101_v4  ;;  %v4002_v10 = vpop.f32.mrb[44].mxu1  ;;  %2964 = vst.msk [vmem:[%s4429_s29 + $0xac] sm:$0xf] %vm2920_vm1, %v3607_v5  ;;  %v1383_v11 = vadd.f32 %v3906_v9, %v4416_v35  ;;  %v1374_v13 = vpop.f32.mrb[45].mxu0 }
 0x13f   : > { %3060 = vst.msk [vmem:[%s4429_s29 + $0x22c] sm:$0xf] %vm2920_vm1, %v3703_v6  ;;  %v1767_v12 = vadd.f32 %v4002_v10, %v4416_v35  ;;  %v1758_v14 = vpop.f32.mrb[45].mxu1  ;;  %2962 = vst.msk [vmem:[%s4429_s29 + $0xa4] sm:$0xf] %vm2920_vm1, %v3605_v7  ;;  %v1375_v15 = vadd.f32 %v4416_v35, %v1374_v13  ;;  %v3907_v17 = vpop.f32.mrb[46].mxu0 }
 0x140   : > { %3058 = vst.msk [vmem:[%s4429_s29 + $0x224] sm:$0xf] %vm2920_vm1, %v3701_v8  ;;  %v1759_v16 = vadd.f32 %v4416_v35, %v1758_v14  ;;  %v4003_v18 = vpop.f32.mrb[46].mxu1  ;;  %v2010_v19 = vmax.f32 %v1383_v11, 0.0  ;;  %v1386_v21 = vadd.f32 %v3907_v17, %v4416_v35  ;;  %v1377_v23 = vpop.f32.mrb[47].mxu0 }
 0x141   : > { %v2106_v20 = vmax.f32 %v1767_v12, 0.0  ;;  %v1770_v22 = vadd.f32 %v4003_v18, %v4416_v35  ;;  %v1761_v24 = vpop.f32.mrb[47].mxu1  ;;  %v2008_v25 = vmax.f32 %v1375_v15, 0.0  ;;  %v1378_v27 = vadd.f32 %v4416_v35, %v1377_v23  ;;  %v4736_v11 = vld [vmem:[%s5008_s2] ss:$0 sm:$0xff] }
 0x142   : > { %v2104_v26 = vmax.f32 %v1759_v16, 0.0  ;;  %v1762_v28 = vadd.f32 %v4416_v35, %v1761_v24  ;;  %v3610_v29 = vpack.c.bf16 %v2010_v19, %v2010_v19  ;;  %v2011_v31 = vmax.f32 %v1386_v21, 0.0 }
 0x143   : > { %v3706_v30 = vpack.c.bf16 %v2106_v20, %v2106_v20  ;;  %v2107_v32 = vmax.f32 %v1770_v22, 0.0  ;;  %v3608_v33 = vpack.c.bf16 %v2008_v25, %v2008_v25  ;;  %v2009_v36 = vmax.f32 %v1378_v27, 0.0 }
 0x144   : > { %v3704_v34 = vpack.c.bf16 %v2104_v26, %v2104_v26  ;;  %v2105_v37 = vmax.f32 %v1762_v28, 0.0  ;;  %2967 = vst.msk [vmem:[%s4429_s29 + $0xb8] sm:$0xf] %vm2920_vm1, %v3610_v29  ;;  %v3611_v38 = vpack.c.bf16 %v2011_v31, %v2011_v31 }
 0x145   : > { %3063 = vst.msk [vmem:[%s4429_s29 + $0x238] sm:$0xf] %vm2920_vm1, %v3706_v30  ;;  %v3707_v39 = vpack.c.bf16 %v2107_v32, %v2107_v32  ;;  %2965 = vst.msk [vmem:[%s4429_s29 + $0xb0] sm:$0xf] %vm2920_vm1, %v3608_v33  ;;  %v3609_v40 = vpack.c.bf16 %v2009_v36, %v2009_v36  ;;  %v3910_v42 = vpop.f32.mrb[48].mxu0 }
 0x146   : > { %3061 = vst.msk [vmem:[%s4429_s29 + $0x230] sm:$0xf] %vm2920_vm1, %v3704_v34  ;;  %v3705_v41 = vpack.c.bf16 %v2105_v37, %v2105_v37  ;;  %v4006_v43 = vpop.f32.mrb[48].mxu1  ;;  %2968 = vst.msk [vmem:[%s4429_s29 + $0xbc] sm:$0xf] %vm2920_vm1, %v3611_v38  ;;  %v1399_v44 = vadd.f32 %v3910_v42, %v4416_v35  ;;  %v1390_v46 = vpop.f32.mrb[49].mxu0 }
 0x147   : > { %3064 = vst.msk [vmem:[%s4429_s29 + $0x23c] sm:$0xf] %vm2920_vm1, %v3707_v39  ;;  %v1783_v45 = vadd.f32 %v4006_v43, %v4416_v35  ;;  %v1774_v47 = vpop.f32.mrb[49].mxu1  ;;  %2966 = vst.msk [vmem:[%s4429_s29 + $0xb4] sm:$0xf] %vm2920_vm1, %v3609_v40  ;;  %v1391_v48 = vadd.f32 %v4416_v35, %v1390_v46  ;;  %v3911_v50 = vpop.f32.mrb[50].mxu0 }
 0x148   : > { %3062 = vst.msk [vmem:[%s4429_s29 + $0x234] sm:$0xf] %vm2920_vm1, %v3705_v41  ;;  %v1775_v49 = vadd.f32 %v4416_v35, %v1774_v47  ;;  %v4007_v51 = vpop.f32.mrb[50].mxu1  ;;  %v2014_v52 = vmax.f32 %v1399_v44, 0.0  ;;  %v1402_v54 = vadd.f32 %v3911_v50, %v4416_v35  ;;  %v1393_v56 = vpop.f32.mrb[51].mxu0 }
 0x149   : > { %v2110_v53 = vmax.f32 %v1783_v45, 0.0  ;;  %v1786_v55 = vadd.f32 %v4007_v51, %v4416_v35  ;;  %v1777_v57 = vpop.f32.mrb[51].mxu1  ;;  %v2012_v58 = vmax.f32 %v1391_v48, 0.0  ;;  %v1394_v60 = vadd.f32 %v4416_v35, %v1393_v56 }
 0x14a   : > { %v2108_v59 = vmax.f32 %v1775_v49, 0.0  ;;  %v1778_v61 = vadd.f32 %v4416_v35, %v1777_v57  ;;  %v3614_v62 = vpack.c.bf16 %v2014_v52, %v2014_v52  ;;  %v2015_v0 = vmax.f32 %v1402_v54, 0.0 }
 0x14b   : > { %v3710_v63 = vpack.c.bf16 %v2110_v53, %v2110_v53  ;;  %v2111_v1 = vmax.f32 %v1786_v55, 0.0  ;;  %v3612_v2 = vpack.c.bf16 %v2012_v58, %v2012_v58  ;;  %v2013_v4 = vmax.f32 %v1394_v60, 0.0 }
 0x14c   : > { %v3708_v3 = vpack.c.bf16 %v2108_v59, %v2108_v59  ;;  %v2109_v5 = vmax.f32 %v1778_v61, 0.0  ;;  %2971 = vst.msk [vmem:[%s4429_s29 + $0xc8] sm:$0xf] %vm2920_vm1, %v3614_v62  ;;  %v3615_v6 = vpack.c.bf16 %v2015_v0, %v2015_v0 }
 0x14d   : > { %3067 = vst.msk [vmem:[%s4429_s29 + $0x248] sm:$0xf] %vm2920_vm1, %v3710_v63  ;;  %v3711_v7 = vpack.c.bf16 %v2111_v1, %v2111_v1  ;;  %2969 = vst.msk [vmem:[%s4429_s29 + $0xc0] sm:$0xf] %vm2920_vm1, %v3612_v2  ;;  %v3613_v35 = vpack.c.bf16 %v2013_v4, %v2013_v4  ;;  %v3914_v9 = vpop.f32.mrb[52].mxu0 }
 0x14e   : > { %3065 = vst.msk [vmem:[%s4429_s29 + $0x240] sm:$0xf] %vm2920_vm1, %v3708_v3  ;;  %v3709_v8 = vpack.c.bf16 %v2109_v5, %v2109_v5  ;;  %v4010_v10 = vpop.f32.mrb[52].mxu1  ;;  %2972 = vst.msk [vmem:[%s4429_s29 + $0xcc] sm:$0xf] %vm2920_vm1, %v3615_v6  ;;  %v1415_v12 = vadd.f32 %v4736_v11, %v3914_v9  ;;  %v1406_v14 = vpop.f32.mrb[53].mxu0 }
 0x14f   : > { %3068 = vst.msk [vmem:[%s4429_s29 + $0x24c] sm:$0xf] %vm2920_vm1, %v3711_v7  ;;  %v1799_v13 = vadd.f32 %v4736_v11, %v4010_v10  ;;  %v1790_v15 = vpop.f32.mrb[53].mxu1  ;;  %2970 = vst.msk [vmem:[%s4429_s29 + $0xc4] sm:$0xf] %vm2920_vm1, %v3613_v35  ;;  %v1407_v16 = vadd.f32 %v4736_v11, %v1406_v14  ;;  %v3915_v18 = vpop.f32.mrb[54].mxu0 }
 0x150   : > { %3066 = vst.msk [vmem:[%s4429_s29 + $0x244] sm:$0xf] %vm2920_vm1, %v3709_v8  ;;  %v1791_v17 = vadd.f32 %v4736_v11, %v1790_v15  ;;  %v4011_v19 = vpop.f32.mrb[54].mxu1  ;;  %v2018_v20 = vmax.f32 %v1415_v12, 0.0  ;;  %v1418_v22 = vadd.f32 %v4736_v11, %v3915_v18  ;;  %v1409_v24 = vpop.f32.mrb[55].mxu0 }
 0x151   : > { %v2114_v21 = vmax.f32 %v1799_v13, 0.0  ;;  %v1802_v23 = vadd.f32 %v4736_v11, %v4011_v19  ;;  %v1793_v25 = vpop.f32.mrb[55].mxu1  ;;  %v2016_v26 = vmax.f32 %v1407_v16, 0.0  ;;  %v1410_v28 = vadd.f32 %v4736_v11, %v1409_v24 }
 0x152   : > { %v2112_v27 = vmax.f32 %v1791_v17, 0.0  ;;  %v1794_v29 = vadd.f32 %v4736_v11, %v1793_v25  ;;  %v3618_v30 = vpack.c.bf16 %v2018_v20, %v2018_v20  ;;  %v2019_v32 = vmax.f32 %v1418_v22, 0.0 }
 0x153   : > { %v3714_v31 = vpack.c.bf16 %v2114_v21, %v2114_v21  ;;  %v2115_v33 = vmax.f32 %v1802_v23, 0.0  ;;  %v3616_v34 = vpack.c.bf16 %v2016_v26, %v2016_v26  ;;  %v2017_v37 = vmax.f32 %v1410_v28, 0.0 }
 0x154   : > { %v3712_v36 = vpack.c.bf16 %v2112_v27, %v2112_v27  ;;  %v2113_v38 = vmax.f32 %v1794_v29, 0.0  ;;  %2975 = vst.msk [vmem:[%s4429_s29 + $0xd8] sm:$0xf] %vm2920_vm1, %v3618_v30  ;;  %v3619_v39 = vpack.c.bf16 %v2019_v32, %v2019_v32 }
 0x155   : > { %3071 = vst.msk [vmem:[%s4429_s29 + $0x258] sm:$0xf] %vm2920_vm1, %v3714_v31  ;;  %v3715_v40 = vpack.c.bf16 %v2115_v33, %v2115_v33  ;;  %2973 = vst.msk [vmem:[%s4429_s29 + $0xd0] sm:$0xf] %vm2920_vm1, %v3616_v34  ;;  %v3617_v41 = vpack.c.bf16 %v2017_v37, %v2017_v37  ;;  %v3918_v43 = vpop.f32.mrb[56].mxu0 }
 0x156   : > { %3069 = vst.msk [vmem:[%s4429_s29 + $0x250] sm:$0xf] %vm2920_vm1, %v3712_v36  ;;  %v3713_v42 = vpack.c.bf16 %v2113_v38, %v2113_v38  ;;  %v4014_v44 = vpop.f32.mrb[56].mxu1  ;;  %2976 = vst.msk [vmem:[%s4429_s29 + $0xdc] sm:$0xf] %vm2920_vm1, %v3619_v39  ;;  %v1431_v45 = vadd.f32 %v4736_v11, %v3918_v43  ;;  %v1422_v47 = vpop.f32.mrb[57].mxu0 }
 0x157   : > { %3072 = vst.msk [vmem:[%s4429_s29 + $0x25c] sm:$0xf] %vm2920_vm1, %v3715_v40  ;;  %v1815_v46 = vadd.f32 %v4736_v11, %v4014_v44  ;;  %v1806_v48 = vpop.f32.mrb[57].mxu1  ;;  %2974 = vst.msk [vmem:[%s4429_s29 + $0xd4] sm:$0xf] %vm2920_vm1, %v3617_v41  ;;  %v1423_v49 = vadd.f32 %v4736_v11, %v1422_v47  ;;  %v3919_v51 = vpop.f32.mrb[58].mxu0 }
 0x158   : > { %3070 = vst.msk [vmem:[%s4429_s29 + $0x254] sm:$0xf] %vm2920_vm1, %v3713_v42  ;;  %v1807_v50 = vadd.f32 %v4736_v11, %v1806_v48  ;;  %v4015_v52 = vpop.f32.mrb[58].mxu1  ;;  %v2022_v53 = vmax.f32 %v1431_v45, 0.0  ;;  %v1434_v55 = vadd.f32 %v4736_v11, %v3919_v51  ;;  %v1425_v57 = vpop.f32.mrb[59].mxu0 }
 0x159   : > { %v2118_v54 = vmax.f32 %v1815_v46, 0.0  ;;  %v1818_v56 = vadd.f32 %v4736_v11, %v4015_v52  ;;  %v1809_v58 = vpop.f32.mrb[59].mxu1  ;;  %v2020_v59 = vmax.f32 %v1423_v49, 0.0  ;;  %v1426_v61 = vadd.f32 %v4736_v11, %v1425_v57 }
 0x15a   : > { %v2116_v60 = vmax.f32 %v1807_v50, 0.0  ;;  %v1810_v62 = vadd.f32 %v4736_v11, %v1809_v58  ;;  %v3622_v63 = vpack.c.bf16 %v2022_v53, %v2022_v53  ;;  %v2023_v1 = vmax.f32 %v1434_v55, 0.0 }
 0x15b   : > { %v3718_v0 = vpack.c.bf16 %v2118_v54, %v2118_v54  ;;  %v2119_v2 = vmax.f32 %v1818_v56, 0.0  ;;  %v3620_v3 = vpack.c.bf16 %v2020_v59, %v2020_v59  ;;  %v2021_v5 = vmax.f32 %v1426_v61, 0.0 }
 0x15c   : > { %v3716_v4 = vpack.c.bf16 %v2116_v60, %v2116_v60  ;;  %v2117_v6 = vmax.f32 %v1810_v62, 0.0  ;;  %2979 = vst.msk [vmem:[%s4429_s29 + $0xe8] sm:$0xf] %vm2920_vm1, %v3622_v63  ;;  %v3623_v7 = vpack.c.bf16 %v2023_v1, %v2023_v1 }
 0x15d   : > { %3075 = vst.msk [vmem:[%s4429_s29 + $0x268] sm:$0xf] %vm2920_vm1, %v3718_v0  ;;  %v3719_v35 = vpack.c.bf16 %v2119_v2, %v2119_v2  ;;  %2977 = vst.msk [vmem:[%s4429_s29 + $0xe0] sm:$0xf] %vm2920_vm1, %v3620_v3  ;;  %v3621_v8 = vpack.c.bf16 %v2021_v5, %v2021_v5  ;;  %v3922_v10 = vpop.f32.mrb[60].mxu0 }
 0x15e   : > { %3073 = vst.msk [vmem:[%s4429_s29 + $0x260] sm:$0xf] %vm2920_vm1, %v3716_v4  ;;  %v3717_v9 = vpack.c.bf16 %v2117_v6, %v2117_v6  ;;  %v4018_v12 = vpop.f32.mrb[60].mxu1  ;;  %2980 = vst.msk [vmem:[%s4429_s29 + $0xec] sm:$0xf] %vm2920_vm1, %v3623_v7  ;;  %v1447_v13 = vadd.f32 %v4736_v11, %v3922_v10  ;;  %v1438_v15 = vpop.f32.mrb[61].mxu0 }
 0x15f   : > { %3076 = vst.msk [vmem:[%s4429_s29 + $0x26c] sm:$0xf] %vm2920_vm1, %v3719_v35  ;;  %v1831_v14 = vadd.f32 %v4736_v11, %v4018_v12  ;;  %v1822_v16 = vpop.f32.mrb[61].mxu1  ;;  %2978 = vst.msk [vmem:[%s4429_s29 + $0xe4] sm:$0xf] %vm2920_vm1, %v3621_v8  ;;  %v1439_v17 = vadd.f32 %v4736_v11, %v1438_v15  ;;  %v3923_v19 = vpop.f32.mrb[62].mxu0 }
 0x160   : > { %3074 = vst.msk [vmem:[%s4429_s29 + $0x264] sm:$0xf] %vm2920_vm1, %v3717_v9  ;;  %v1823_v18 = vadd.f32 %v4736_v11, %v1822_v16  ;;  %v4019_v20 = vpop.f32.mrb[62].mxu1  ;;  %v2026_v21 = vmax.f32 %v1447_v13, 0.0  ;;  %v1450_v23 = vadd.f32 %v4736_v11, %v3923_v19  ;;  %v1441_v25 = vpop.f32.mrb[63].mxu0 }
 0x161   : > { %v2122_v22 = vmax.f32 %v1831_v14, 0.0  ;;  %v1834_v24 = vadd.f32 %v4736_v11, %v4019_v20  ;;  %v1825_v26 = vpop.f32.mrb[63].mxu1  ;;  %v2024_v27 = vmax.f32 %v1439_v17, 0.0  ;;  %v1442_v29 = vadd.f32 %v4736_v11, %v1441_v25 }
 0x162   : > { %v2120_v28 = vmax.f32 %v1823_v18, 0.0  ;;  %v1826_v30 = vadd.f32 %v4736_v11, %v1825_v26  ;;  %v3626_v31 = vpack.c.bf16 %v2026_v21, %v2026_v21  ;;  %v2027_v33 = vmax.f32 %v1450_v23, 0.0 }
 0x163   : > { %v3722_v32 = vpack.c.bf16 %v2122_v22, %v2122_v22  ;;  %v2123_v34 = vmax.f32 %v1834_v24, 0.0  ;;  %v3624_v36 = vpack.c.bf16 %v2024_v27, %v2024_v27  ;;  %v2025_v38 = vmax.f32 %v1442_v29, 0.0 }
 0x164   : > { %v3720_v37 = vpack.c.bf16 %v2120_v28, %v2120_v28  ;;  %v2121_v39 = vmax.f32 %v1826_v30, 0.0  ;;  %2983 = vst.msk [vmem:[%s4429_s29 + $0xf8] sm:$0xf] %vm2920_vm1, %v3626_v31  ;;  %v3627_v40 = vpack.c.bf16 %v2027_v33, %v2027_v33 }
 0x165   : > { %3079 = vst.msk [vmem:[%s4429_s29 + $0x278] sm:$0xf] %vm2920_vm1, %v3722_v32  ;;  %v3723_v41 = vpack.c.bf16 %v2123_v34, %v2123_v34  ;;  %2981 = vst.msk [vmem:[%s4429_s29 + $0xf0] sm:$0xf] %vm2920_vm1, %v3624_v36  ;;  %v3625_v42 = vpack.c.bf16 %v2025_v38, %v2025_v38  ;;  %v3926_v44 = vpop.f32.mrb[64].mxu0 }
 0x166   : > { %3077 = vst.msk [vmem:[%s4429_s29 + $0x270] sm:$0xf] %vm2920_vm1, %v3720_v37  ;;  %v3721_v43 = vpack.c.bf16 %v2121_v39, %v2121_v39  ;;  %v4022_v45 = vpop.f32.mrb[64].mxu1  ;;  %2984 = vst.msk [vmem:[%s4429_s29 + $0xfc] sm:$0xf] %vm2920_vm1, %v3627_v40  ;;  %v1463_v46 = vadd.f32 %v4736_v11, %v3926_v44  ;;  %v1454_v48 = vpop.f32.mrb[65].mxu0 }
 0x167   : > { %3080 = vst.msk [vmem:[%s4429_s29 + $0x27c] sm:$0xf] %vm2920_vm1, %v3723_v41  ;;  %v1847_v47 = vadd.f32 %v4736_v11, %v4022_v45  ;;  %v1838_v49 = vpop.f32.mrb[65].mxu1  ;;  %2982 = vst.msk [vmem:[%s4429_s29 + $0xf4] sm:$0xf] %vm2920_vm1, %v3625_v42  ;;  %v1455_v50 = vadd.f32 %v4736_v11, %v1454_v48  ;;  %v3927_v52 = vpop.f32.mrb[66].mxu0 }
 0x168   : > { %3078 = vst.msk [vmem:[%s4429_s29 + $0x274] sm:$0xf] %vm2920_vm1, %v3721_v43  ;;  %v1839_v51 = vadd.f32 %v4736_v11, %v1838_v49  ;;  %v4023_v53 = vpop.f32.mrb[66].mxu1  ;;  %v2030_v54 = vmax.f32 %v1463_v46, 0.0  ;;  %v1466_v56 = vadd.f32 %v4736_v11, %v3927_v52  ;;  %v1457_v58 = vpop.f32.mrb[67].mxu0 }
 0x169   : > { %v2126_v55 = vmax.f32 %v1847_v47, 0.0  ;;  %v1850_v57 = vadd.f32 %v4736_v11, %v4023_v53  ;;  %v1841_v59 = vpop.f32.mrb[67].mxu1  ;;  %v2028_v60 = vmax.f32 %v1455_v50, 0.0  ;;  %v1458_v62 = vadd.f32 %v4736_v11, %v1457_v58 }
 0x16a   : > { %v2124_v61 = vmax.f32 %v1839_v51, 0.0  ;;  %v1842_v63 = vadd.f32 %v4736_v11, %v1841_v59  ;;  %v3630_v0 = vpack.c.bf16 %v2030_v54, %v2030_v54  ;;  %v2031_v2 = vmax.f32 %v1466_v56, 0.0 }
 0x16b   : > { %v3726_v1 = vpack.c.bf16 %v2126_v55, %v2126_v55  ;;  %v2127_v3 = vmax.f32 %v1850_v57, 0.0  ;;  %v3628_v4 = vpack.c.bf16 %v2028_v60, %v2028_v60  ;;  %v2029_v6 = vmax.f32 %v1458_v62, 0.0 }
 0x16c   : > { %v3724_v5 = vpack.c.bf16 %v2124_v61, %v2124_v61  ;;  %v2125_v7 = vmax.f32 %v1842_v63, 0.0  ;;  %2987 = vst.msk [vmem:[%s4429_s29 + $0x108] sm:$0xf] %vm2920_vm1, %v3630_v0  ;;  %v3631_v35 = vpack.c.bf16 %v2031_v2, %v2031_v2 }
 0x16d   : > { %3083 = vst.msk [vmem:[%s4429_s29 + $0x288] sm:$0xf] %vm2920_vm1, %v3726_v1  ;;  %v3727_v8 = vpack.c.bf16 %v2127_v3, %v2127_v3  ;;  %2985 = vst.msk [vmem:[%s4429_s29 + $0x100] sm:$0xf] %vm2920_vm1, %v3628_v4  ;;  %v3629_v9 = vpack.c.bf16 %v2029_v6, %v2029_v6  ;;  %v3930_v12 = vpop.f32.mrb[68].mxu0 }
 0x16e   : > { %3081 = vst.msk [vmem:[%s4429_s29 + $0x280] sm:$0xf] %vm2920_vm1, %v3724_v5  ;;  %v3725_v10 = vpack.c.bf16 %v2125_v7, %v2125_v7  ;;  %v4026_v13 = vpop.f32.mrb[68].mxu1  ;;  %2988 = vst.msk [vmem:[%s4429_s29 + $0x10c] sm:$0xf] %vm2920_vm1, %v3631_v35  ;;  %v1479_v14 = vadd.f32 %v4736_v11, %v3930_v12  ;;  %v1470_v16 = vpop.f32.mrb[69].mxu0 }
 0x16f   : > { %3084 = vst.msk [vmem:[%s4429_s29 + $0x28c] sm:$0xf] %vm2920_vm1, %v3727_v8  ;;  %v1863_v15 = vadd.f32 %v4736_v11, %v4026_v13  ;;  %v1854_v17 = vpop.f32.mrb[69].mxu1  ;;  %2986 = vst.msk [vmem:[%s4429_s29 + $0x104] sm:$0xf] %vm2920_vm1, %v3629_v9  ;;  %v1471_v18 = vadd.f32 %v4736_v11, %v1470_v16  ;;  %v3931_v20 = vpop.f32.mrb[70].mxu0 }
 0x170   : > { %3082 = vst.msk [vmem:[%s4429_s29 + $0x284] sm:$0xf] %vm2920_vm1, %v3725_v10  ;;  %v1855_v19 = vadd.f32 %v4736_v11, %v1854_v17  ;;  %v4027_v21 = vpop.f32.mrb[70].mxu1  ;;  %v2034_v22 = vmax.f32 %v1479_v14, 0.0  ;;  %v1482_v24 = vadd.f32 %v4736_v11, %v3931_v20  ;;  %v1473_v26 = vpop.f32.mrb[71].mxu0 }
 0x171   : > { %v2130_v23 = vmax.f32 %v1863_v15, 0.0  ;;  %v1866_v25 = vadd.f32 %v4736_v11, %v4027_v21  ;;  %v1857_v27 = vpop.f32.mrb[71].mxu1  ;;  %v2032_v28 = vmax.f32 %v1471_v18, 0.0  ;;  %v1474_v30 = vadd.f32 %v4736_v11, %v1473_v26 }
 0x172   : > { %v2128_v29 = vmax.f32 %v1855_v19, 0.0  ;;  %v1858_v31 = vadd.f32 %v4736_v11, %v1857_v27  ;;  %v3634_v32 = vpack.c.bf16 %v2034_v22, %v2034_v22  ;;  %v2035_v34 = vmax.f32 %v1482_v24, 0.0 }
 0x173   : > { %v3730_v33 = vpack.c.bf16 %v2130_v23, %v2130_v23  ;;  %v2131_v36 = vmax.f32 %v1866_v25, 0.0  ;;  %v3632_v37 = vpack.c.bf16 %v2032_v28, %v2032_v28  ;;  %v2033_v39 = vmax.f32 %v1474_v30, 0.0 }
 0x174   : > { %v3728_v38 = vpack.c.bf16 %v2128_v29, %v2128_v29  ;;  %v2129_v40 = vmax.f32 %v1858_v31, 0.0  ;;  %2991 = vst.msk [vmem:[%s4429_s29 + $0x118] sm:$0xf] %vm2920_vm1, %v3634_v32  ;;  %v3635_v41 = vpack.c.bf16 %v2035_v34, %v2035_v34 }
 0x175   : > { %3087 = vst.msk [vmem:[%s4429_s29 + $0x298] sm:$0xf] %vm2920_vm1, %v3730_v33  ;;  %v3731_v42 = vpack.c.bf16 %v2131_v36, %v2131_v36  ;;  %2989 = vst.msk [vmem:[%s4429_s29 + $0x110] sm:$0xf] %vm2920_vm1, %v3632_v37  ;;  %v3633_v43 = vpack.c.bf16 %v2033_v39, %v2033_v39  ;;  %v3934_v45 = vpop.f32.mrb[72].mxu0 }
 0x176   : > { %3085 = vst.msk [vmem:[%s4429_s29 + $0x290] sm:$0xf] %vm2920_vm1, %v3728_v38  ;;  %v3729_v44 = vpack.c.bf16 %v2129_v40, %v2129_v40  ;;  %v4030_v46 = vpop.f32.mrb[72].mxu1  ;;  %2992 = vst.msk [vmem:[%s4429_s29 + $0x11c] sm:$0xf] %vm2920_vm1, %v3635_v41  ;;  %v1495_v47 = vadd.f32 %v4736_v11, %v3934_v45  ;;  %v1486_v49 = vpop.f32.mrb[73].mxu0 }
 0x177   : > { %3088 = vst.msk [vmem:[%s4429_s29 + $0x29c] sm:$0xf] %vm2920_vm1, %v3731_v42  ;;  %v1879_v48 = vadd.f32 %v4736_v11, %v4030_v46  ;;  %v1870_v50 = vpop.f32.mrb[73].mxu1  ;;  %2990 = vst.msk [vmem:[%s4429_s29 + $0x114] sm:$0xf] %vm2920_vm1, %v3633_v43  ;;  %v1487_v51 = vadd.f32 %v4736_v11, %v1486_v49  ;;  %v3935_v53 = vpop.f32.mrb[74].mxu0 }
 0x178   : > { %3086 = vst.msk [vmem:[%s4429_s29 + $0x294] sm:$0xf] %vm2920_vm1, %v3729_v44  ;;  %v1871_v52 = vadd.f32 %v4736_v11, %v1870_v50  ;;  %v4031_v54 = vpop.f32.mrb[74].mxu1  ;;  %v2038_v55 = vmax.f32 %v1495_v47, 0.0  ;;  %v1498_v57 = vadd.f32 %v4736_v11, %v3935_v53  ;;  %v1489_v59 = vpop.f32.mrb[75].mxu0 }
 0x179   : > { %v2134_v56 = vmax.f32 %v1879_v48, 0.0  ;;  %v1882_v58 = vadd.f32 %v4736_v11, %v4031_v54  ;;  %v1873_v60 = vpop.f32.mrb[75].mxu1  ;;  %v2036_v61 = vmax.f32 %v1487_v51, 0.0  ;;  %v1490_v63 = vadd.f32 %v4736_v11, %v1489_v59 }
 0x17a   : > { %v2132_v62 = vmax.f32 %v1871_v52, 0.0  ;;  %v1874_v0 = vadd.f32 %v4736_v11, %v1873_v60  ;;  %v3638_v1 = vpack.c.bf16 %v2038_v55, %v2038_v55  ;;  %v2039_v3 = vmax.f32 %v1498_v57, 0.0 }
 0x17b   : > { %v3734_v2 = vpack.c.bf16 %v2134_v56, %v2134_v56  ;;  %v2135_v4 = vmax.f32 %v1882_v58, 0.0  ;;  %v3636_v5 = vpack.c.bf16 %v2036_v61, %v2036_v61  ;;  %v2037_v7 = vmax.f32 %v1490_v63, 0.0 }
 0x17c   : > { %v3732_v6 = vpack.c.bf16 %v2132_v62, %v2132_v62  ;;  %v2133_v35 = vmax.f32 %v1874_v0, 0.0  ;;  %2995 = vst.msk [vmem:[%s4429_s29 + $0x128] sm:$0xf] %vm2920_vm1, %v3638_v1  ;;  %v3639_v8 = vpack.c.bf16 %v2039_v3, %v2039_v3 }
 0x17d   : > { %3091 = vst.msk [vmem:[%s4429_s29 + $0x2a8] sm:$0xf] %vm2920_vm1, %v3734_v2  ;;  %v3735_v9 = vpack.c.bf16 %v2135_v4, %v2135_v4  ;;  %2993 = vst.msk [vmem:[%s4429_s29 + $0x120] sm:$0xf] %vm2920_vm1, %v3636_v5  ;;  %v3637_v10 = vpack.c.bf16 %v2037_v7, %v2037_v7  ;;  %v3938_v13 = vpop.f32.mrb[76].mxu0 }
 0x17e   : > { %3089 = vst.msk [vmem:[%s4429_s29 + $0x2a0] sm:$0xf] %vm2920_vm1, %v3732_v6  ;;  %v3733_v12 = vpack.c.bf16 %v2133_v35, %v2133_v35  ;;  %v4034_v14 = vpop.f32.mrb[76].mxu1  ;;  %2996 = vst.msk [vmem:[%s4429_s29 + $0x12c] sm:$0xf] %vm2920_vm1, %v3639_v8  ;;  %v1511_v15 = vadd.f32 %v4736_v11, %v3938_v13  ;;  %v1502_v17 = vpop.f32.mrb[77].mxu0 }
 0x17f   : > { %3092 = vst.msk [vmem:[%s4429_s29 + $0x2ac] sm:$0xf] %vm2920_vm1, %v3735_v9  ;;  %v1895_v16 = vadd.f32 %v4736_v11, %v4034_v14  ;;  %v1886_v18 = vpop.f32.mrb[77].mxu1  ;;  %2994 = vst.msk [vmem:[%s4429_s29 + $0x124] sm:$0xf] %vm2920_vm1, %v3637_v10  ;;  %v1503_v19 = vadd.f32 %v4736_v11, %v1502_v17  ;;  %v3939_v21 = vpop.f32.mrb[78].mxu0 }
 0x180   : > { %3090 = vst.msk [vmem:[%s4429_s29 + $0x2a4] sm:$0xf] %vm2920_vm1, %v3733_v12  ;;  %v1887_v20 = vadd.f32 %v4736_v11, %v1886_v18  ;;  %v4035_v22 = vpop.f32.mrb[78].mxu1  ;;  %v2042_v23 = vmax.f32 %v1511_v15, 0.0  ;;  %v1514_v25 = vadd.f32 %v4736_v11, %v3939_v21  ;;  %v1505_v27 = vpop.f32.mrb[79].mxu0 }
 0x181   : > { %v2138_v24 = vmax.f32 %v1895_v16, 0.0  ;;  %v1898_v26 = vadd.f32 %v4736_v11, %v4035_v22  ;;  %v1889_v28 = vpop.f32.mrb[79].mxu1  ;;  %v2040_v29 = vmax.f32 %v1503_v19, 0.0  ;;  %v1506_v31 = vadd.f32 %v4736_v11, %v1505_v27 }
 0x182   : > { %v2136_v30 = vmax.f32 %v1887_v20, 0.0  ;;  %v1890_v32 = vadd.f32 %v4736_v11, %v1889_v28  ;;  %v3642_v33 = vpack.c.bf16 %v2042_v23, %v2042_v23  ;;  %v2043_v36 = vmax.f32 %v1514_v25, 0.0 }
 0x183   : > { %v3738_v34 = vpack.c.bf16 %v2138_v24, %v2138_v24  ;;  %v2139_v37 = vmax.f32 %v1898_v26, 0.0  ;;  %v3640_v38 = vpack.c.bf16 %v2040_v29, %v2040_v29  ;;  %v2041_v40 = vmax.f32 %v1506_v31, 0.0 }
 0x184   : > { %v3736_v39 = vpack.c.bf16 %v2136_v30, %v2136_v30  ;;  %v2137_v41 = vmax.f32 %v1890_v32, 0.0  ;;  %2999 = vst.msk [vmem:[%s4429_s29 + $0x138] sm:$0xf] %vm2920_vm1, %v3642_v33  ;;  %v3643_v42 = vpack.c.bf16 %v2043_v36, %v2043_v36 }
 0x185   : > { %3095 = vst.msk [vmem:[%s4429_s29 + $0x2b8] sm:$0xf] %vm2920_vm1, %v3738_v34  ;;  %v3739_v43 = vpack.c.bf16 %v2139_v37, %v2139_v37  ;;  %2997 = vst.msk [vmem:[%s4429_s29 + $0x130] sm:$0xf] %vm2920_vm1, %v3640_v38  ;;  %v3641_v44 = vpack.c.bf16 %v2041_v40, %v2041_v40  ;;  %v3942_v46 = vpop.f32.mrb[80].mxu0 }
 0x186   : > { %3093 = vst.msk [vmem:[%s4429_s29 + $0x2b0] sm:$0xf] %vm2920_vm1, %v3736_v39  ;;  %v3737_v45 = vpack.c.bf16 %v2137_v41, %v2137_v41  ;;  %v4038_v47 = vpop.f32.mrb[80].mxu1  ;;  %3000 = vst.msk [vmem:[%s4429_s29 + $0x13c] sm:$0xf] %vm2920_vm1, %v3643_v42  ;;  %v1527_v48 = vadd.f32 %v4736_v11, %v3942_v46  ;;  %v1518_v50 = vpop.f32.mrb[81].mxu0 }
 0x187   : > { %3096 = vst.msk [vmem:[%s4429_s29 + $0x2bc] sm:$0xf] %vm2920_vm1, %v3739_v43  ;;  %v1911_v49 = vadd.f32 %v4736_v11, %v4038_v47  ;;  %v1902_v51 = vpop.f32.mrb[81].mxu1  ;;  %2998 = vst.msk [vmem:[%s4429_s29 + $0x134] sm:$0xf] %vm2920_vm1, %v3641_v44  ;;  %v1519_v52 = vadd.f32 %v4736_v11, %v1518_v50  ;;  %v3943_v54 = vpop.f32.mrb[82].mxu0 }
 0x188   : > { %3094 = vst.msk [vmem:[%s4429_s29 + $0x2b4] sm:$0xf] %vm2920_vm1, %v3737_v45  ;;  %v1903_v53 = vadd.f32 %v4736_v11, %v1902_v51  ;;  %v4039_v55 = vpop.f32.mrb[82].mxu1  ;;  %v2046_v56 = vmax.f32 %v1527_v48, 0.0  ;;  %v1530_v58 = vadd.f32 %v4736_v11, %v3943_v54  ;;  %v1521_v60 = vpop.f32.mrb[83].mxu0 }
 0x189   : > { %v2142_v57 = vmax.f32 %v1911_v49, 0.0  ;;  %v1914_v59 = vadd.f32 %v4736_v11, %v4039_v55  ;;  %v1905_v61 = vpop.f32.mrb[83].mxu1  ;;  %v2044_v62 = vmax.f32 %v1519_v52, 0.0  ;;  %v1522_v0 = vadd.f32 %v4736_v11, %v1521_v60 }
 0x18a   : > { %v2140_v63 = vmax.f32 %v1903_v53, 0.0  ;;  %v1906_v1 = vadd.f32 %v4736_v11, %v1905_v61  ;;  %v3646_v2 = vpack.c.bf16 %v2046_v56, %v2046_v56  ;;  %v2047_v4 = vmax.f32 %v1530_v58, 0.0 }
 0x18b   : > { %v3742_v3 = vpack.c.bf16 %v2142_v57, %v2142_v57  ;;  %v2143_v5 = vmax.f32 %v1914_v59, 0.0  ;;  %v3644_v6 = vpack.c.bf16 %v2044_v62, %v2044_v62  ;;  %v2045_v35 = vmax.f32 %v1522_v0, 0.0 }
 0x18c   : > { %v3740_v7 = vpack.c.bf16 %v2140_v63, %v2140_v63  ;;  %v2141_v8 = vmax.f32 %v1906_v1, 0.0  ;;  %3003 = vst.msk [vmem:[%s4429_s29 + $0x148] sm:$0xf] %vm2920_vm1, %v3646_v2  ;;  %v3647_v9 = vpack.c.bf16 %v2047_v4, %v2047_v4 }
 0x18d   : > { %3099 = vst.msk [vmem:[%s4429_s29 + $0x2c8] sm:$0xf] %vm2920_vm1, %v3742_v3  ;;  %v3743_v10 = vpack.c.bf16 %v2143_v5, %v2143_v5  ;;  %3001 = vst.msk [vmem:[%s4429_s29 + $0x140] sm:$0xf] %vm2920_vm1, %v3644_v6  ;;  %v3645_v12 = vpack.c.bf16 %v2045_v35, %v2045_v35  ;;  %v3946_v14 = vpop.f32.mrb[84].mxu0 }
 0x18e   : > { %3097 = vst.msk [vmem:[%s4429_s29 + $0x2c0] sm:$0xf] %vm2920_vm1, %v3740_v7  ;;  %v3741_v13 = vpack.c.bf16 %v2141_v8, %v2141_v8  ;;  %v4042_v15 = vpop.f32.mrb[84].mxu1  ;;  %3004 = vst.msk [vmem:[%s4429_s29 + $0x14c] sm:$0xf] %vm2920_vm1, %v3647_v9  ;;  %v1543_v16 = vadd.f32 %v4736_v11, %v3946_v14  ;;  %v1534_v18 = vpop.f32.mrb[85].mxu0 }
 0x18f   : > { %3100 = vst.msk [vmem:[%s4429_s29 + $0x2cc] sm:$0xf] %vm2920_vm1, %v3743_v10  ;;  %v1927_v17 = vadd.f32 %v4736_v11, %v4042_v15  ;;  %v1918_v19 = vpop.f32.mrb[85].mxu1  ;;  %3002 = vst.msk [vmem:[%s4429_s29 + $0x144] sm:$0xf] %vm2920_vm1, %v3645_v12  ;;  %v1535_v20 = vadd.f32 %v4736_v11, %v1534_v18  ;;  %v3947_v22 = vpop.f32.mrb[86].mxu0 }
 0x190   : > { %3098 = vst.msk [vmem:[%s4429_s29 + $0x2c4] sm:$0xf] %vm2920_vm1, %v3741_v13  ;;  %v1919_v21 = vadd.f32 %v4736_v11, %v1918_v19  ;;  %v4043_v23 = vpop.f32.mrb[86].mxu1  ;;  %v2050_v24 = vmax.f32 %v1543_v16, 0.0  ;;  %v1546_v26 = vadd.f32 %v4736_v11, %v3947_v22  ;;  %v1537_v28 = vpop.f32.mrb[87].mxu0 }
 0x191   : > { %v2146_v25 = vmax.f32 %v1927_v17, 0.0  ;;  %v1930_v27 = vadd.f32 %v4736_v11, %v4043_v23  ;;  %v1921_v29 = vpop.f32.mrb[87].mxu1  ;;  %v2048_v30 = vmax.f32 %v1535_v20, 0.0  ;;  %v1538_v32 = vadd.f32 %v4736_v11, %v1537_v28 }
 0x192   : > { %v2144_v31 = vmax.f32 %v1919_v21, 0.0  ;;  %v1922_v33 = vadd.f32 %v4736_v11, %v1921_v29  ;;  %v3650_v34 = vpack.c.bf16 %v2050_v24, %v2050_v24  ;;  %v2051_v37 = vmax.f32 %v1546_v26, 0.0 }
 0x193   : > { %v3746_v36 = vpack.c.bf16 %v2146_v25, %v2146_v25  ;;  %v2147_v38 = vmax.f32 %v1930_v27, 0.0  ;;  %v3648_v39 = vpack.c.bf16 %v2048_v30, %v2048_v30  ;;  %v2049_v41 = vmax.f32 %v1538_v32, 0.0 }
 0x194   : > { %v3744_v40 = vpack.c.bf16 %v2144_v31, %v2144_v31  ;;  %v2145_v42 = vmax.f32 %v1922_v33, 0.0  ;;  %3007 = vst.msk [vmem:[%s4429_s29 + $0x158] sm:$0xf] %vm2920_vm1, %v3650_v34  ;;  %v3651_v43 = vpack.c.bf16 %v2051_v37, %v2051_v37 }
 0x195   : > { %3103 = vst.msk [vmem:[%s4429_s29 + $0x2d8] sm:$0xf] %vm2920_vm1, %v3746_v36  ;;  %v3747_v44 = vpack.c.bf16 %v2147_v38, %v2147_v38  ;;  %3005 = vst.msk [vmem:[%s4429_s29 + $0x150] sm:$0xf] %vm2920_vm1, %v3648_v39  ;;  %v3649_v45 = vpack.c.bf16 %v2049_v41, %v2049_v41  ;;  %v3950_v47 = vpop.f32.mrb[88].mxu0 }
 0x196   : > { %3101 = vst.msk [vmem:[%s4429_s29 + $0x2d0] sm:$0xf] %vm2920_vm1, %v3744_v40  ;;  %v3745_v46 = vpack.c.bf16 %v2145_v42, %v2145_v42  ;;  %v4046_v48 = vpop.f32.mrb[88].mxu1  ;;  %3008 = vst.msk [vmem:[%s4429_s29 + $0x15c] sm:$0xf] %vm2920_vm1, %v3651_v43  ;;  %v1559_v49 = vadd.f32 %v4736_v11, %v3950_v47  ;;  %v1550_v51 = vpop.f32.mrb[89].mxu0 }
 0x197   : > { %3104 = vst.msk [vmem:[%s4429_s29 + $0x2dc] sm:$0xf] %vm2920_vm1, %v3747_v44  ;;  %v1943_v50 = vadd.f32 %v4736_v11, %v4046_v48  ;;  %v1934_v52 = vpop.f32.mrb[89].mxu1  ;;  %3006 = vst.msk [vmem:[%s4429_s29 + $0x154] sm:$0xf] %vm2920_vm1, %v3649_v45  ;;  %v1551_v53 = vadd.f32 %v4736_v11, %v1550_v51  ;;  %v3951_v55 = vpop.f32.mrb[90].mxu0 }
 0x198   : > { %3102 = vst.msk [vmem:[%s4429_s29 + $0x2d4] sm:$0xf] %vm2920_vm1, %v3745_v46  ;;  %v1935_v54 = vadd.f32 %v4736_v11, %v1934_v52  ;;  %v4047_v56 = vpop.f32.mrb[90].mxu1  ;;  %v2054_v57 = vmax.f32 %v1559_v49, 0.0  ;;  %v1562_v59 = vadd.f32 %v4736_v11, %v3951_v55  ;;  %v1553_v61 = vpop.f32.mrb[91].mxu0 }
 0x199   : > { %v2150_v58 = vmax.f32 %v1943_v50, 0.0  ;;  %v1946_v60 = vadd.f32 %v4736_v11, %v4047_v56  ;;  %v1937_v62 = vpop.f32.mrb[91].mxu1  ;;  %v2052_v63 = vmax.f32 %v1551_v53, 0.0  ;;  %v1554_v1 = vadd.f32 %v4736_v11, %v1553_v61 }
 0x19a   : > { %v2148_v0 = vmax.f32 %v1935_v54, 0.0  ;;  %v1938_v2 = vadd.f32 %v4736_v11, %v1937_v62  ;;  %v3654_v3 = vpack.c.bf16 %v2054_v57, %v2054_v57  ;;  %v2055_v5 = vmax.f32 %v1562_v59, 0.0 }
 0x19b   : > { %v3750_v4 = vpack.c.bf16 %v2150_v58, %v2150_v58  ;;  %v2151_v6 = vmax.f32 %v1946_v60, 0.0  ;;  %v3652_v7 = vpack.c.bf16 %v2052_v63, %v2052_v63  ;;  %v2053_v8 = vmax.f32 %v1554_v1, 0.0 }
 0x19c   : > { %v3748_v35 = vpack.c.bf16 %v2148_v0, %v2148_v0  ;;  %v2149_v9 = vmax.f32 %v1938_v2, 0.0  ;;  %3011 = vst.msk [vmem:[%s4429_s29 + $0x168] sm:$0xf] %vm2920_vm1, %v3654_v3  ;;  %v3655_v10 = vpack.c.bf16 %v2055_v5, %v2055_v5 }
 0x19d   : > { %3107 = vst.msk [vmem:[%s4429_s29 + $0x2e8] sm:$0xf] %vm2920_vm1, %v3750_v4  ;;  %v3751_v12 = vpack.c.bf16 %v2151_v6, %v2151_v6  ;;  %3009 = vst.msk [vmem:[%s4429_s29 + $0x160] sm:$0xf] %vm2920_vm1, %v3652_v7  ;;  %v3653_v13 = vpack.c.bf16 %v2053_v8, %v2053_v8  ;;  %v3954_v15 = vpop.f32.mrb[92].mxu0 }
 0x19e   : > { %3105 = vst.msk [vmem:[%s4429_s29 + $0x2e0] sm:$0xf] %vm2920_vm1, %v3748_v35  ;;  %v3749_v14 = vpack.c.bf16 %v2149_v9, %v2149_v9  ;;  %v4050_v16 = vpop.f32.mrb[92].mxu1  ;;  %3012 = vst.msk [vmem:[%s4429_s29 + $0x16c] sm:$0xf] %vm2920_vm1, %v3655_v10  ;;  %v1575_v17 = vadd.f32 %v4736_v11, %v3954_v15  ;;  %v1566_v19 = vpop.f32.mrb[93].mxu0 }
 0x19f   : > { %3108 = vst.msk [vmem:[%s4429_s29 + $0x2ec] sm:$0xf] %vm2920_vm1, %v3751_v12  ;;  %v1959_v18 = vadd.f32 %v4736_v11, %v4050_v16  ;;  %v1950_v20 = vpop.f32.mrb[93].mxu1  ;;  %3010 = vst.msk [vmem:[%s4429_s29 + $0x164] sm:$0xf] %vm2920_vm1, %v3653_v13  ;;  %v1567_v21 = vadd.f32 %v4736_v11, %v1566_v19  ;;  %v3955_v23 = vpop.f32.mrb[94].mxu0 }
 0x1a0   : > { %3106 = vst.msk [vmem:[%s4429_s29 + $0x2e4] sm:$0xf] %vm2920_vm1, %v3749_v14  ;;  %v1951_v22 = vadd.f32 %v4736_v11, %v1950_v20  ;;  %v4051_v24 = vpop.f32.mrb[94].mxu1  ;;  %v2058_v25 = vmax.f32 %v1575_v17, 0.0  ;;  %v1578_v27 = vadd.f32 %v4736_v11, %v3955_v23  ;;  %v1569_v28 = vpop.f32.mrb[95].mxu0 }
 0x1a1   : > { %v2154_v26 = vmax.f32 %v1959_v18, 0.0  ;;  %v1953_v29 = vpop.f32.mrb[95].mxu1  ;;  %v2056_v30 = vmax.f32 %v1567_v21, 0.0  ;;  %v1570_v32 = vadd.f32 %v4736_v11, %v1569_v28 }
 0x1a2   : > { %v2152_v31 = vmax.f32 %v1951_v22, 0.0  ;;  %v1954_v33 = vadd.f32 %v4736_v11, %v1953_v29  ;;  %v3658_v34 = vpack.c.bf16 %v2058_v25, %v2058_v25  ;;  %v2059_v37 = vmax.f32 %v1578_v27, 0.0 }
 0x1a3   : > { %v3754_v36 = vpack.c.bf16 %v2154_v26, %v2154_v26  ;;  %v3656_v38 = vpack.c.bf16 %v2056_v30, %v2056_v30  ;;  %v2057_v40 = vmax.f32 %v1570_v32, 0.0 }
 0x1a4   : > { %v3752_v39 = vpack.c.bf16 %v2152_v31, %v2152_v31  ;;  %v2153_v41 = vmax.f32 %v1954_v33, 0.0  ;;  %3015 = vst.msk [vmem:[%s4429_s29 + $0x178] sm:$0xf] %vm2920_vm1, %v3658_v34  ;;  %v3659_v42 = vpack.c.bf16 %v2059_v37, %v2059_v37 }
 0x1a5   : > { %3111 = vst.msk [vmem:[%s4429_s29 + $0x2f8] sm:$0xf] %vm2920_vm1, %v3754_v36  ;;  %3013 = vst.msk [vmem:[%s4429_s29 + $0x170] sm:$0xf] %vm2920_vm1, %v3656_v38  ;;  %v3657_v43 = vpack.c.bf16 %v2057_v40, %v2057_v40 }
 0x1a6   : > { %3109 = vst.msk [vmem:[%s4429_s29 + $0x2f0] sm:$0xf] %vm2920_vm1, %v3752_v39  ;;  %v3753_v11 = vpack.c.bf16 %v2153_v41, %v2153_v41  ;;  %3016 = vst.msk [vmem:[%s4429_s29 + $0x17c] sm:$0xf] %vm2920_vm1, %v3659_v42 }
 0x1a7   : > { %3014 = vst.msk [vmem:[%s4429_s29 + $0x174] sm:$0xf] %vm2920_vm1, %v3657_v43 }
 0x1a8   : > { %3110 = vst.msk [vmem:[%s4429_s29 + $0x2f4] sm:$0xf] %vm2920_vm1, %v3753_v11 }
 0x1a9 PF: > { %s13_s12 = sadd.s32 1, %s4172_s12  }
 0x1aa   : > { %p10_p4 = scmp.ge.s32.totalorder %s13_s12, 4  }
 0x1ac   :  { %12 = sbr.rel (!%p10_p4) target bundleno = 1 (0x1), region = 62 }

// kernel: forward.6
= control target key start
LH: loop header
LB: loop body
LE: loop exit
PB: predicated region body
PF: predicated region fallthrough
CT: control target
= control target key end

     0   :  { %v7362_v0 = vmov 0.0   ;;  %vm5315_vm0 = vmmov 0   ;;  %vm3559_vm1 = vcmask 125952   ;;  %s7356_s1 = inlined_call_operand.vmem [shape: bf16[128,16], index: 1, kind: input, shape index: {}]   ;;  %s7357_s0 = inlined_call_operand.vmem [shape: bf16[4,648,128], index: 0, kind: input, shape index: {}]   ;;  %s7358_s2 = inlined_call_operand.vmem [shape: f32[1,16], index: 2, kind: input, shape index: {}]   ;;  %s7359_s3 = inlined_call_operand.vmem [shape: bf16[648,16], index: 3, kind: output, shape index: {}]  }
   0x1   :  { %4419 = vmatprep.subr.bf16.mxu0 %v7362_v0  ;;  %4599 = vmatprep.subr.bf16.mxu1 %v7362_v0  ;;  %v5141_v1 = vld [vmem:[%s7356_s1] sm:$0xff]   ;;  %v5142_v2 = vld [vmem:[%s7356_s1 + $0x8] sm:$0xff]   ;;  %v5143_v3 = vld [vmem:[%s7356_s1 + $0x10] sm:$0xff]  }
   0x2   :  { %4435 = vmatprep.mubr.msk.bf16.mxu0 %vm5315_vm0, %v7362_v0  ;;  %4615 = vmatprep.mubr.msk.bf16.mxu1 %vm5315_vm0, %v7362_v0  ;;  %v5144_v4 = vld [vmem:[%s7356_s1 + $0x18] sm:$0xff]   ;;  %v5145_v5 = vld [vmem:[%s7356_s1 + $0x20] sm:$0xff]   ;;  %v5146_v6 = vld [vmem:[%s7356_s1 + $0x28] sm:$0xff]  }
   0x3   :  { %4420 = vmatpush3.bf16.msra.mxu0 %v5141_v1  ;;  %4600 = vmatpush3.bf16.msra.mxu1 %v5141_v1  ;;  %v5147_v7 = vld [vmem:[%s7356_s1 + $0x30] sm:$0xff]   ;;  %v5148_v8 = vld [vmem:[%s7356_s1 + $0x38] sm:$0xff]   ;;  %v5149_v9 = vld [vmem:[%s7357_s0] sm:$0xff]  }
   0x4   :  { %4421 = vmatprep.subr.bf16.mxu0 %v7362_v0  ;;  %4601 = vmatprep.subr.bf16.mxu1 %v7362_v0  ;;  %v5150_v10 = vld [vmem:[%s7357_s0 + $0x144] sm:$0xff]   ;;  %v5152_v12 = vld [vmem:[%s7357_s0 + $0x14c] sm:$0xff]   ;;  %v5154_v14 = vld [vmem:[%s7357_s0 + $0x154] sm:$0xff]  }
   0x5   :  { %v5151_v11 = vld [vmem:[%s7357_s0 + $0x8] sm:$0xff]   ;;  %v5153_v13 = vld [vmem:[%s7357_s0 + $0x10] sm:$0xff]   ;;  %v5155_v15 = vld [vmem:[%s7357_s0 + $0x18] sm:$0xff]  }
   0x6   :  { %v5156_v16 = vld [vmem:[%s7357_s0 + $0x15c] sm:$0xff]   ;;  %v5158_v18 = vld [vmem:[%s7357_s0 + $0x164] sm:$0xff]   ;;  %v5160_v20 = vld [vmem:[%s7357_s0 + $0x16c] sm:$0xff]  }
   0x7   :  { %4422 = vmatpush3.bf16.msra.mxu0 %v5142_v2  ;;  %4602 = vmatpush3.bf16.msra.mxu1 %v5142_v2  ;;  %v5157_v17 = vld [vmem:[%s7357_s0 + $0x20] sm:$0xff]   ;;  %v5159_v19 = vld [vmem:[%s7357_s0 + $0x28] sm:$0xff]   ;;  %v5161_v21 = vld [vmem:[%s7357_s0 + $0x30] sm:$0xff]  }
   0x8   :  { %4423 = vmatprep.subr.bf16.mxu0 %v7362_v0  ;;  %4603 = vmatprep.subr.bf16.mxu1 %v7362_v0  ;;  %v5162_v22 = vld [vmem:[%s7357_s0 + $0x174] sm:$0xff]   ;;  %v5164_v24 = vld [vmem:[%s7357_s0 + $0x17c] sm:$0xff]   ;;  %v5166_v26 = vld [vmem:[%s7357_s0 + $0x184] sm:$0xff]  }
   0x9   :  { %v5163_v23 = vld [vmem:[%s7357_s0 + $0x38] sm:$0xff]   ;;  %v5165_v25 = vld [vmem:[%s7357_s0 + $0x40] sm:$0xff]   ;;  %v5167_v27 = vld [vmem:[%s7357_s0 + $0x48] sm:$0xff]  }
   0xa   :  { %v5168_v28 = vld [vmem:[%s7357_s0 + $0x18c] sm:$0xff]   ;;  %v5170_v30 = vld [vmem:[%s7357_s0 + $0x194] sm:$0xff]   ;;  %v5172_v32 = vld [vmem:[%s7357_s0 + $0x19c] sm:$0xff]  }
   0xb   :  { %4424 = vmatpush3.bf16.msra.mxu0 %v5143_v3  ;;  %4604 = vmatpush3.bf16.msra.mxu1 %v5143_v3  ;;  %v5169_v29 = vld [vmem:[%s7357_s0 + $0x50] sm:$0xff]   ;;  %v5171_v31 = vld [vmem:[%s7357_s0 + $0x58] sm:$0xff]   ;;  %v5173_v33 = vld [vmem:[%s7357_s0 + $0x60] sm:$0xff]  }
   0xc   :  { %4425 = vmatprep.subr.bf16.mxu0 %v7362_v0  ;;  %4605 = vmatprep.subr.bf16.mxu1 %v7362_v0  ;;  %v5174_v34 = vld [vmem:[%s7357_s0 + $0x1a4] sm:$0xff]   ;;  %v5176_v36 = vld [vmem:[%s7357_s0 + $0x1ac] sm:$0xff]   ;;  %v5178_v38 = vld [vmem:[%s7357_s0 + $0x1b4] sm:$0xff]  }
   0xd   :  { %v5175_v35 = vld [vmem:[%s7357_s0 + $0x68] sm:$0xff]   ;;  %v5177_v37 = vld [vmem:[%s7357_s0 + $0x70] sm:$0xff]   ;;  %v5179_v39 = vld [vmem:[%s7357_s0 + $0x78] sm:$0xff]  }
   0xe   :  { %v5180_v40 = vld [vmem:[%s7357_s0 + $0x1bc] sm:$0xff]   ;;  %v5182_v42 = vld [vmem:[%s7357_s0 + $0x1c4] sm:$0xff]   ;;  %v5184_v44 = vld [vmem:[%s7357_s0 + $0x1cc] sm:$0xff]  }
   0xf   :  { %4426 = vmatpush3.bf16.msra.mxu0 %v5144_v4  ;;  %4606 = vmatpush3.bf16.msra.mxu1 %v5144_v4  ;;  %v5181_v41 = vld [vmem:[%s7357_s0 + $0x80] sm:$0xff]   ;;  %v5183_v43 = vld [vmem:[%s7357_s0 + $0x88] sm:$0xff]   ;;  %v5185_v45 = vld [vmem:[%s7357_s0 + $0x90] sm:$0xff]  }
  0x10   :  { %4427 = vmatprep.subr.bf16.mxu0 %v7362_v0  ;;  %4607 = vmatprep.subr.bf16.mxu1 %v7362_v0  ;;  %v5186_v46 = vld [vmem:[%s7357_s0 + $0x1d4] sm:$0xff]   ;;  %v5188_v48 = vld [vmem:[%s7357_s0 + $0x1dc] sm:$0xff]   ;;  %v5190_v50 = vld [vmem:[%s7357_s0 + $0x1e4] sm:$0xff]  }
  0x11   :  { %v5187_v47 = vld [vmem:[%s7357_s0 + $0x98] sm:$0xff]   ;;  %v5189_v49 = vld [vmem:[%s7357_s0 + $0xa0] sm:$0xff]   ;;  %v5191_v51 = vld [vmem:[%s7357_s0 + $0xa8] sm:$0xff]  }
  0x12   :  { %v5192_v52 = vld [vmem:[%s7357_s0 + $0x1ec] sm:$0xff]   ;;  %v5194_v54 = vld [vmem:[%s7357_s0 + $0x1f4] sm:$0xff]   ;;  %v5196_v56 = vld [vmem:[%s7357_s0 + $0x1fc] sm:$0xff]  }
  0x13   :  { %4428 = vmatpush3.bf16.msra.mxu0 %v5145_v5  ;;  %4608 = vmatpush3.bf16.msra.mxu1 %v5145_v5  ;;  %v5193_v53 = vld [vmem:[%s7357_s0 + $0xb0] sm:$0xff]   ;;  %v5195_v55 = vld [vmem:[%s7357_s0 + $0xb8] sm:$0xff]   ;;  %v5197_v57 = vld [vmem:[%s7357_s0 + $0xc0] sm:$0xff]  }
  0x14   :  { %4429 = vmatprep.subr.bf16.mxu0 %v7362_v0  ;;  %4609 = vmatprep.subr.bf16.mxu1 %v7362_v0  ;;  %v5198_v58 = vld [vmem:[%s7357_s0 + $0x204] sm:$0xff]   ;;  %v5200_v60 = vld [vmem:[%s7357_s0 + $0x20c] sm:$0xff]   ;;  %v5202_v62 = vld [vmem:[%s7357_s0 + $0x214] sm:$0xff]  }
  0x15   :  { %v5199_v59 = vld [vmem:[%s7357_s0 + $0xc8] sm:$0xff]   ;;  %v5201_v61 = vld [vmem:[%s7357_s0 + $0xd0] sm:$0xff]  }
  0x17   :  { %4430 = vmatpush3.bf16.msra.mxu0 %v5146_v6  ;;  %4610 = vmatpush3.bf16.msra.mxu1 %v5146_v6 }
  0x18   :  { %4431 = vmatprep.subr.bf16.mxu0 %v7362_v0  ;;  %4611 = vmatprep.subr.bf16.mxu1 %v7362_v0 }
  0x1b   :  { %4432 = vmatpush3.bf16.msra.mxu0 %v5147_v7  ;;  %4612 = vmatpush3.bf16.msra.mxu1 %v5147_v7 }
  0x1c   :  { %4433 = vmatprep.subr.bf16.mxu0 %v7362_v0  ;;  %4613 = vmatprep.subr.bf16.mxu1 %v7362_v0 }
  0x1f   :  { %4434 = vmatpush3.bf16.msra.mxu0 %v5148_v8  ;;  %4614 = vmatpush3.bf16.msra.mxu1 %v5148_v8 }
  0x20   :  { %4779 = vmatprep.subr.bf16.mxu0 %v7362_v0  ;;  %4959 = vmatprep.subr.bf16.mxu1 %v7362_v0 }
  0x22   :  { %4436 = vmatmul.mubr.bf16.vlgmr.msra.gmra.mrb[0].mxu0 %v5149_v9  ;;  %4616 = vmatmul.mubr.bf16.vlgmr.msra.gmra.mrb[0].mxu1 %v5150_v10 }
  0x23   :  { %4780 = vmatpush3.bf16.msra.mxu0 %v5141_v1  ;;  %4960 = vmatpush3.bf16.msra.mxu1 %v5141_v1 }
  0x24   :  { %4439 = vmatprep.mubr.msk.bf16.mxu0 %vm5315_vm0, %v7362_v0  ;;  %4619 = vmatprep.mubr.msk.bf16.mxu1 %vm5315_vm0, %v7362_v0 }
  0x25   :  { %4781 = vmatprep.subr.bf16.mxu0 %v7362_v0  ;;  %4961 = vmatprep.subr.bf16.mxu1 %v7362_v0 }
  0x27   :  { %4782 = vmatpush3.bf16.msra.mxu0 %v5142_v2  ;;  %4962 = vmatpush3.bf16.msra.mxu1 %v5142_v2 }
  0x28   :  { %4783 = vmatprep.subr.bf16.mxu0 %v7362_v0  ;;  %4963 = vmatprep.subr.bf16.mxu1 %v7362_v0 }
  0x2a   :  { %4440 = vmatmul.mubr.bf16.gmra.mrb[4].mxu0 %v5151_v11  ;;  %4620 = vmatmul.mubr.bf16.gmra.mrb[4].mxu1 %v5152_v12 }
  0x2b   :  { %4443 = vmatprep.mubr.msk.bf16.mxu0 %vm5315_vm0, %v7362_v0  ;;  %4623 = vmatprep.mubr.msk.bf16.mxu1 %vm5315_vm0, %v7362_v0 }
  0x2c   :  { %4784 = vmatpush3.bf16.msra.mxu0 %v5143_v3  ;;  %4964 = vmatpush3.bf16.msra.mxu1 %v5143_v3 }
  0x2d   :  { %4785 = vmatprep.subr.bf16.mxu0 %v7362_v0  ;;  %4965 = vmatprep.subr.bf16.mxu1 %v7362_v0 }
  0x30   :  { %4786 = vmatpush3.bf16.msra.mxu0 %v5144_v4  ;;  %4966 = vmatpush3.bf16.msra.mxu1 %v5144_v4  ;;  %v5203_v4 = vld [vmem:[%s7357_s0 + $0xd8] sm:$0xff]  }
  0x31   :  { %4787 = vmatprep.subr.bf16.mxu0 %v7362_v0  ;;  %4967 = vmatprep.subr.bf16.mxu1 %v7362_v0 }
  0x32   :  { %4444 = vmatmul.mubr.bf16.gmra.mrb[8].mxu0 %v5153_v13  ;;  %4624 = vmatmul.mubr.bf16.gmra.mrb[8].mxu1 %v5154_v14 }
  0x33   :  { %4447 = vmatprep.mubr.msk.bf16.mxu0 %vm5315_vm0, %v7362_v0  ;;  %4627 = vmatprep.mubr.msk.bf16.mxu1 %vm5315_vm0, %v7362_v0 }
  0x34   :  { %4788 = vmatpush3.bf16.msra.mxu0 %v5145_v5  ;;  %4968 = vmatpush3.bf16.msra.mxu1 %v5145_v5  ;;  %v5204_v5 = vld [vmem:[%s7357_s0 + $0x21c] sm:$0xff]  }
  0x35   :  { %4789 = vmatprep.subr.bf16.mxu0 %v7362_v0  ;;  %4969 = vmatprep.subr.bf16.mxu1 %v7362_v0 }
  0x38   :  { %4790 = vmatpush3.bf16.msra.mxu0 %v5146_v6  ;;  %4970 = vmatpush3.bf16.msra.mxu1 %v5146_v6 }
  0x39   :  { %4791 = vmatprep.subr.bf16.mxu0 %v7362_v0  ;;  %4971 = vmatprep.subr.bf16.mxu1 %v7362_v0 }
  0x3a   :  { %4448 = vmatmul.mubr.bf16.gmra.mrb[12].mxu0 %v5155_v15  ;;  %4628 = vmatmul.mubr.bf16.gmra.mrb[12].mxu1 %v5156_v16  ;;  %v5205_v16 = vld [vmem:[%s7357_s0 + $0xe0] sm:$0xff]  }
  0x3b   :  { %4451 = vmatprep.mubr.msk.bf16.mxu0 %vm5315_vm0, %v7362_v0  ;;  %4631 = vmatprep.mubr.msk.bf16.mxu1 %vm5315_vm0, %v7362_v0 }
  0x3c   :  { %4792 = vmatpush3.bf16.msra.mxu0 %v5147_v7  ;;  %4972 = vmatpush3.bf16.msra.mxu1 %v5147_v7 }
  0x3d   :  { %4793 = vmatprep.subr.bf16.mxu0 %v7362_v0  ;;  %4973 = vmatprep.subr.bf16.mxu1 %v7362_v0 }
  0x40   :  { %4794 = vmatpush3.bf16.msra.mxu0 %v5148_v8  ;;  %4974 = vmatpush3.bf16.msra.mxu1 %v5148_v8 }
  0x42   :  { %4452 = vmatmul.mubr.bf16.gmra.mrb[16].mxu0 %v5157_v17  ;;  %4632 = vmatmul.mubr.bf16.gmra.mrb[16].mxu1 %v5158_v18  ;;  %v5206_v17 = vld [vmem:[%s7357_s0 + $0x224] sm:$0xff]  }
  0x43   :  { %4455 = vmatprep.mubr.msk.bf16.mxu0 %vm5315_vm0, %v7362_v0  ;;  %4635 = vmatprep.mubr.msk.bf16.mxu1 %vm5315_vm0, %v7362_v0 }
  0x4a   :  { %4456 = vmatmul.mubr.bf16.gmra.mrb[20].mxu0 %v5159_v19  ;;  %4636 = vmatmul.mubr.bf16.gmra.mrb[20].mxu1 %v5160_v20 }
  0x4b   :  { %4459 = vmatprep.mubr.msk.bf16.mxu0 %vm5315_vm0, %v7362_v0  ;;  %4639 = vmatprep.mubr.msk.bf16.mxu1 %vm5315_vm0, %v7362_v0 }
  0x52   :  { %4460 = vmatmul.mubr.bf16.gmra.mrb[24].mxu0 %v5161_v21  ;;  %4640 = vmatmul.mubr.bf16.gmra.mrb[24].mxu1 %v5162_v22 }
  0x53   :  { %4463 = vmatprep.mubr.msk.bf16.mxu0 %vm5315_vm0, %v7362_v0  ;;  %4643 = vmatprep.mubr.msk.bf16.mxu1 %vm5315_vm0, %v7362_v0 }
  0x5a   :  { %4464 = vmatmul.mubr.bf16.gmra.mrb[28].mxu0 %v5163_v23  ;;  %4644 = vmatmul.mubr.bf16.gmra.mrb[28].mxu1 %v5164_v24 }
  0x5b   :  { %4467 = vmatprep.mubr.msk.bf16.mxu0 %vm5315_vm0, %v7362_v0  ;;  %4647 = vmatprep.mubr.msk.bf16.mxu1 %vm5315_vm0, %v7362_v0 }
  0x62   :  { %4468 = vmatmul.mubr.bf16.gmra.mrb[32].mxu0 %v5165_v25  ;;  %4648 = vmatmul.mubr.bf16.gmra.mrb[32].mxu1 %v5166_v26 }
  0x63   :  { %4471 = vmatprep.mubr.msk.bf16.mxu0 %vm5315_vm0, %v7362_v0  ;;  %4651 = vmatprep.mubr.msk.bf16.mxu1 %vm5315_vm0, %v7362_v0 }
  0x6a   :  { %4472 = vmatmul.mubr.bf16.gmra.mrb[36].mxu0 %v5167_v27  ;;  %4652 = vmatmul.mubr.bf16.gmra.mrb[36].mxu1 %v5168_v28  ;;  %v5207_v28 = vld [vmem:[%s7357_s0 + $0xe8] sm:$0xff]  }
  0x6b   :  { %4475 = vmatprep.mubr.msk.bf16.mxu0 %vm5315_vm0, %v7362_v0  ;;  %4655 = vmatprep.mubr.msk.bf16.mxu1 %vm5315_vm0, %v7362_v0 }
  0x72   :  { %4476 = vmatmul.mubr.bf16.gmra.mrb[40].mxu0 %v5169_v29  ;;  %4656 = vmatmul.mubr.bf16.gmra.mrb[40].mxu1 %v5170_v30  ;;  %v5208_v29 = vld [vmem:[%s7357_s0 + $0x22c] sm:$0xff]  }
  0x73   :  { %4479 = vmatprep.mubr.msk.bf16.mxu0 %vm5315_vm0, %v7362_v0  ;;  %4659 = vmatprep.mubr.msk.bf16.mxu1 %vm5315_vm0, %v7362_v0 }
  0x7a   :  { %4480 = vmatmul.mubr.bf16.gmra.mrb[44].mxu0 %v5171_v31  ;;  %4660 = vmatmul.mubr.bf16.gmra.mrb[44].mxu1 %v5172_v32 }
  0x7b   :  { %4483 = vmatprep.mubr.msk.bf16.mxu0 %vm5315_vm0, %v7362_v0  ;;  %4663 = vmatprep.mubr.msk.bf16.mxu1 %vm5315_vm0, %v7362_v0 }
  0x82   :  { %4484 = vmatmul.mubr.bf16.gmra.mrb[48].mxu0 %v5173_v33  ;;  %4664 = vmatmul.mubr.bf16.gmra.mrb[48].mxu1 %v5174_v34 }
  0x83   :  { %4487 = vmatprep.mubr.msk.bf16.mxu0 %vm5315_vm0, %v7362_v0  ;;  %4667 = vmatprep.mubr.msk.bf16.mxu1 %vm5315_vm0, %v7362_v0 }
  0x8a   :  { %4488 = vmatmul.mubr.bf16.gmra.mrb[52].mxu0 %v5175_v35  ;;  %4668 = vmatmul.mubr.bf16.gmra.mrb[52].mxu1 %v5176_v36 }
  0x8b   :  { %4491 = vmatprep.mubr.msk.bf16.mxu0 %vm5315_vm0, %v7362_v0  ;;  %4671 = vmatprep.mubr.msk.bf16.mxu1 %vm5315_vm0, %v7362_v0 }
  0x92   :  { %4492 = vmatmul.mubr.bf16.gmra.mrb[56].mxu0 %v5177_v37  ;;  %4672 = vmatmul.mubr.bf16.gmra.mrb[56].mxu1 %v5178_v38 }
  0x93   :  { %4495 = vmatprep.mubr.msk.bf16.mxu0 %vm5315_vm0, %v7362_v0  ;;  %4675 = vmatprep.mubr.msk.bf16.mxu1 %vm5315_vm0, %v7362_v0 }
  0x9a   :  { %4496 = vmatmul.mubr.bf16.gmra.mrb[60].mxu0 %v5179_v39  ;;  %4676 = vmatmul.mubr.bf16.gmra.mrb[60].mxu1 %v5180_v40  ;;  %v5209_v40 = vld [vmem:[%s7357_s0 + $0xf0] sm:$0xff]  }
  0x9b   :  { %4499 = vmatprep.mubr.msk.bf16.mxu0 %vm5315_vm0, %v7362_v0  ;;  %4679 = vmatprep.mubr.msk.bf16.mxu1 %vm5315_vm0, %v7362_v0 }
  0xa2   :  { %4500 = vmatmul.mubr.bf16.gmra.mrb[64].mxu0 %v5181_v41  ;;  %4680 = vmatmul.mubr.bf16.gmra.mrb[64].mxu1 %v5182_v42  ;;  %v5210_v41 = vld [vmem:[%s7357_s0 + $0x234] sm:$0xff]  }
  0xa3   :  { %4503 = vmatprep.mubr.msk.bf16.mxu0 %vm5315_vm0, %v7362_v0  ;;  %4683 = vmatprep.mubr.msk.bf16.mxu1 %vm5315_vm0, %v7362_v0 }
  0xaa   :  { %4504 = vmatmul.mubr.bf16.gmra.mrb[68].mxu0 %v5183_v43  ;;  %4684 = vmatmul.mubr.bf16.gmra.mrb[68].mxu1 %v5184_v44 }
  0xab   :  { %4507 = vmatprep.mubr.msk.bf16.mxu0 %vm5315_vm0, %v7362_v0  ;;  %4687 = vmatprep.mubr.msk.bf16.mxu1 %vm5315_vm0, %v7362_v0 }
  0xb2   :  { %4508 = vmatmul.mubr.bf16.gmra.mrb[72].mxu0 %v5185_v45  ;;  %4688 = vmatmul.mubr.bf16.gmra.mrb[72].mxu1 %v5186_v46 }
  0xb3   :  { %4511 = vmatprep.mubr.msk.bf16.mxu0 %vm5315_vm0, %v7362_v0  ;;  %4691 = vmatprep.mubr.msk.bf16.mxu1 %vm5315_vm0, %v7362_v0 }
  0xba   :  { %4512 = vmatmul.mubr.bf16.gmra.mrb[76].mxu0 %v5187_v47  ;;  %4692 = vmatmul.mubr.bf16.gmra.mrb[76].mxu1 %v5188_v48 }
  0xbb   :  { %4515 = vmatprep.mubr.msk.bf16.mxu0 %vm5315_vm0, %v7362_v0  ;;  %4695 = vmatprep.mubr.msk.bf16.mxu1 %vm5315_vm0, %v7362_v0 }
  0xc2   :  { %4516 = vmatmul.mubr.bf16.gmra.mrb[80].mxu0 %v5189_v49  ;;  %4696 = vmatmul.mubr.bf16.gmra.mrb[80].mxu1 %v5190_v50 }
  0xc3   :  { %4519 = vmatprep.mubr.msk.bf16.mxu0 %vm5315_vm0, %v7362_v0  ;;  %4699 = vmatprep.mubr.msk.bf16.mxu1 %vm5315_vm0, %v7362_v0 }
  0xca   :  { %4520 = vmatmul.mubr.bf16.gmra.mrb[84].mxu0 %v5191_v51  ;;  %4700 = vmatmul.mubr.bf16.gmra.mrb[84].mxu1 %v5192_v52  ;;  %v5211_v52 = vld [vmem:[%s7357_s0 + $0xf8] sm:$0xff]  }
  0xcb   :  { %4523 = vmatprep.mubr.msk.bf16.mxu0 %vm5315_vm0, %v7362_v0  ;;  %4703 = vmatprep.mubr.msk.bf16.mxu1 %vm5315_vm0, %v7362_v0 }
  0xd2   :  { %4524 = vmatmul.mubr.bf16.gmra.mrb[88].mxu0 %v5193_v53  ;;  %4704 = vmatmul.mubr.bf16.gmra.mrb[88].mxu1 %v5194_v54  ;;  %v5212_v53 = vld [vmem:[%s7357_s0 + $0x23c] sm:$0xff]  }
  0xd3   :  { %4527 = vmatprep.mubr.msk.bf16.mxu0 %vm5315_vm0, %v7362_v0  ;;  %4707 = vmatprep.mubr.msk.bf16.mxu1 %vm5315_vm0, %v7362_v0 }
  0xda   :  { %4528 = vmatmul.mubr.bf16.gmra.mrb[92].mxu0 %v5195_v55  ;;  %4708 = vmatmul.mubr.bf16.gmra.mrb[92].mxu1 %v5196_v56 }
  0xdb   :  { %4531 = vmatprep.mubr.msk.bf16.mxu0 %vm5315_vm0, %v7362_v0  ;;  %4711 = vmatprep.mubr.msk.bf16.mxu1 %vm5315_vm0, %v7362_v0 }
  0xe2   :  { %4532 = vmatmul.mubr.bf16.gmra.mrb[96].mxu0 %v5197_v57  ;;  %4712 = vmatmul.mubr.bf16.gmra.mrb[96].mxu1 %v5198_v58 }
  0xe3   :  { %4535 = vmatprep.mubr.msk.bf16.mxu0 %vm5315_vm0, %v7362_v0  ;;  %4715 = vmatprep.mubr.msk.bf16.mxu1 %vm5315_vm0, %v7362_v0 }
  0xea   :  { %4536 = vmatmul.mubr.bf16.gmra.mrb[100].mxu0 %v5199_v59  ;;  %4716 = vmatmul.mubr.bf16.gmra.mrb[100].mxu1 %v5200_v60 }
  0xeb   :  { %4539 = vmatprep.mubr.msk.bf16.mxu0 %vm5315_vm0, %v7362_v0  ;;  %4719 = vmatprep.mubr.msk.bf16.mxu1 %vm5315_vm0, %v7362_v0 }
  0xf2   :  { %4540 = vmatmul.mubr.bf16.gmra.mrb[104].mxu0 %v5201_v61  ;;  %4720 = vmatmul.mubr.bf16.gmra.mrb[104].mxu1 %v5202_v62 }
  0xf3   :  { %4543 = vmatprep.mubr.msk.bf16.mxu0 %vm5315_vm0, %v7362_v0  ;;  %4723 = vmatprep.mubr.msk.bf16.mxu1 %vm5315_vm0, %v7362_v0 }
  0xf5   :  { %v5666_v63 = vpop.f32.mrb[0].mxu0  ;;  %v5668_v1 = vpop.f32.mrb[0].mxu1 }
  0xf6   :  { %v4437_v2 = vpop.f32.mrb[1].mxu0  ;;  %v4617_v3 = vpop.f32.mrb[1].mxu1 }
  0xf7   :  { %v5678_v7 = vpop.f32.mrb[2].mxu0  ;;  %v5680_v8 = vpop.f32.mrb[2].mxu1  ;;  %v5213_v3 = vld [vmem:[%s7357_s0 + $0x100] sm:$0xff]  }
  0xf8   :  { %v4438_v9 = vpop.f32.mrb[3].mxu0  ;;  %v4618_v10 = vpop.f32.mrb[3].mxu1 }
  0xfa   :  { %4544 = vmatmul.mubr.bf16.gmra.mrb[108].mxu0 %v5203_v4  ;;  %4724 = vmatmul.mubr.bf16.gmra.mrb[108].mxu1 %v5204_v5  ;;  %v5214_v4 = vld [vmem:[%s7357_s0 + $0x244] sm:$0xff]  }
  0xfb   :  { %4547 = vmatprep.mubr.msk.bf16.mxu0 %vm5315_vm0, %v7362_v0  ;;  %4727 = vmatprep.mubr.msk.bf16.mxu1 %vm5315_vm0, %v7362_v0 }
  0xfd   :  { %v5688_v12 = vpop.f32.mrb[4].mxu0  ;;  %v5690_v13 = vpop.f32.mrb[4].mxu1 }
  0xfe   :  { %v4441_v14 = vpop.f32.mrb[5].mxu0  ;;  %v4621_v15 = vpop.f32.mrb[5].mxu1 }
  0xff   :  { %v5700_v19 = vpop.f32.mrb[6].mxu0  ;;  %v5702_v20 = vpop.f32.mrb[6].mxu1 }
 0x100   :  { %v4442_v21 = vpop.f32.mrb[7].mxu0  ;;  %v4622_v22 = vpop.f32.mrb[7].mxu1 }
 0x102   :  { %4548 = vmatmul.mubr.bf16.gmra.mrb[112].mxu0 %v5205_v16  ;;  %4728 = vmatmul.mubr.bf16.gmra.mrb[112].mxu1 %v5206_v17 }
 0x103   :  { %4551 = vmatprep.mubr.msk.bf16.mxu0 %vm5315_vm0, %v7362_v0  ;;  %4731 = vmatprep.mubr.msk.bf16.mxu1 %vm5315_vm0, %v7362_v0 }
 0x105   :  { %v5710_v24 = vpop.f32.mrb[8].mxu0  ;;  %v5712_v25 = vpop.f32.mrb[8].mxu1 }
 0x106   :  { %v4445_v26 = vpop.f32.mrb[9].mxu0  ;;  %v4625_v27 = vpop.f32.mrb[9].mxu1 }
 0x107   :  { %v5722_v31 = vpop.f32.mrb[10].mxu0  ;;  %v5724_v32 = vpop.f32.mrb[10].mxu1  ;;  %v5215_v27 = vld [vmem:[%s7357_s0 + $0x108] sm:$0xff]  }
 0x108   :  { %v4446_v33 = vpop.f32.mrb[11].mxu0  ;;  %v4626_v34 = vpop.f32.mrb[11].mxu1 }
 0x10a   :  { %4552 = vmatmul.mubr.bf16.gmra.mrb[116].mxu0 %v5207_v28  ;;  %4732 = vmatmul.mubr.bf16.gmra.mrb[116].mxu1 %v5208_v29  ;;  %v5216_v28 = vld [vmem:[%s7357_s0 + $0x24c] sm:$0xff]  }
 0x10b   :  { %4555 = vmatprep.mubr.msk.bf16.mxu0 %vm5315_vm0, %v7362_v0  ;;  %4735 = vmatprep.mubr.msk.bf16.mxu1 %vm5315_vm0, %v7362_v0 }
 0x10d   :  { %v5732_v36 = vpop.f32.mrb[12].mxu0  ;;  %v5734_v37 = vpop.f32.mrb[12].mxu1 }
 0x10e   :  { %v4449_v38 = vpop.f32.mrb[13].mxu0  ;;  %v4629_v39 = vpop.f32.mrb[13].mxu1 }
 0x10f   :  { %v5744_v43 = vpop.f32.mrb[14].mxu0  ;;  %v5746_v44 = vpop.f32.mrb[14].mxu1 }
 0x110   :  { %v4450_v45 = vpop.f32.mrb[15].mxu0  ;;  %v4630_v46 = vpop.f32.mrb[15].mxu1 }
 0x112   :  { %4556 = vmatmul.mubr.bf16.gmra.mrb[120].mxu0 %v5209_v40  ;;  %4736 = vmatmul.mubr.bf16.gmra.mrb[120].mxu1 %v5210_v41 }
 0x113   :  { %4559 = vmatprep.mubr.msk.bf16.mxu0 %vm5315_vm0, %v7362_v0  ;;  %4739 = vmatprep.mubr.msk.bf16.mxu1 %vm5315_vm0, %v7362_v0 }
 0x115   :  { %v5754_v48 = vpop.f32.mrb[16].mxu0  ;;  %v5756_v49 = vpop.f32.mrb[16].mxu1 }
 0x116   :  { %v4453_v50 = vpop.f32.mrb[17].mxu0  ;;  %v4633_v51 = vpop.f32.mrb[17].mxu1 }
 0x117   :  { %v5766_v55 = vpop.f32.mrb[18].mxu0  ;;  %v5768_v56 = vpop.f32.mrb[18].mxu1  ;;  %v5217_v51 = vld [vmem:[%s7357_s0 + $0x110] sm:$0xff]  }
 0x118   :  { %v4454_v57 = vpop.f32.mrb[19].mxu0  ;;  %v4634_v58 = vpop.f32.mrb[19].mxu1 }
 0x11a   :  { %4560 = vmatmul.mubr.bf16.gmra.mrb[124].mxu0 %v5211_v52  ;;  %4740 = vmatmul.mubr.bf16.gmra.mrb[124].mxu1 %v5212_v53  ;;  %v5218_v52 = vld [vmem:[%s7357_s0 + $0x254] sm:$0xff]  }
 0x11b   :  { %4563 = vmatprep.mubr.msk.bf16.mxu0 %vm5315_vm0, %v7362_v0  ;;  %4743 = vmatprep.mubr.msk.bf16.mxu1 %vm5315_vm0, %v7362_v0 }
 0x11d   :  { %v5776_v60 = vpop.f32.mrb[20].mxu0  ;;  %v5778_v61 = vpop.f32.mrb[20].mxu1 }
 0x11e   :  { %v4457_v62 = vpop.f32.mrb[21].mxu0  ;;  %v4637_v2 = vpop.f32.mrb[21].mxu1 }
 0x11f   :  { %v5788_v9 = vpop.f32.mrb[22].mxu0  ;;  %v5790_v10 = vpop.f32.mrb[22].mxu1 }
 0x120   :  { %v4458_v14 = vpop.f32.mrb[23].mxu0  ;;  %v4638_v15 = vpop.f32.mrb[23].mxu1 }
 0x122   :  { %4564 = vmatmul.mubr.bf16.gmra.mrb[128].mxu0 %v5213_v3  ;;  %4744 = vmatmul.mubr.bf16.gmra.mrb[128].mxu1 %v5214_v4 }
 0x123   :  { %4567 = vmatprep.mubr.msk.bf16.mxu0 %vm5315_vm0, %v7362_v0  ;;  %4747 = vmatprep.mubr.msk.bf16.mxu1 %vm5315_vm0, %v7362_v0 }
 0x125   :  { %v5798_v17 = vpop.f32.mrb[24].mxu0  ;;  %v5800_v21 = vpop.f32.mrb[24].mxu1 }
 0x126   :  { %v4461_v22 = vpop.f32.mrb[25].mxu0  ;;  %v4641_v26 = vpop.f32.mrb[25].mxu1 }
 0x127   :  { %v5810_v33 = vpop.f32.mrb[26].mxu0  ;;  %v5812_v34 = vpop.f32.mrb[26].mxu1  ;;  %v5219_v26 = vld [vmem:[%s7357_s0 + $0x118] sm:$0xff]  }
 0x128   :  { %v4462_v38 = vpop.f32.mrb[27].mxu0  ;;  %v4642_v39 = vpop.f32.mrb[27].mxu1 }
 0x12a   :  { %4568 = vmatmul.mubr.bf16.gmra.mrb[132].mxu0 %v5215_v27  ;;  %4748 = vmatmul.mubr.bf16.gmra.mrb[132].mxu1 %v5216_v28  ;;  %v5220_v27 = vld [vmem:[%s7357_s0 + $0x25c] sm:$0xff]  }
 0x12b   :  { %4571 = vmatprep.mubr.msk.bf16.mxu0 %vm5315_vm0, %v7362_v0  ;;  %4751 = vmatprep.mubr.msk.bf16.mxu1 %vm5315_vm0, %v7362_v0 }
 0x12d   :  { %v5820_v41 = vpop.f32.mrb[28].mxu0  ;;  %v5822_v45 = vpop.f32.mrb[28].mxu1 }
 0x12e   :  { %v4465_v46 = vpop.f32.mrb[29].mxu0  ;;  %v4645_v50 = vpop.f32.mrb[29].mxu1 }
 0x12f   :  { %v5832_v57 = vpop.f32.mrb[30].mxu0  ;;  %v5834_v58 = vpop.f32.mrb[30].mxu1 }
 0x130   :  { %v4466_v62 = vpop.f32.mrb[31].mxu0  ;;  %v4646_v2 = vpop.f32.mrb[31].mxu1 }
 0x132   :  { %4572 = vmatmul.mubr.bf16.gmra.mrb[136].mxu0 %v5217_v51  ;;  %4752 = vmatmul.mubr.bf16.gmra.mrb[136].mxu1 %v5218_v52 }
 0x133   :  { %4575 = vmatprep.mubr.msk.bf16.mxu0 %vm5315_vm0, %v7362_v0  ;;  %4755 = vmatprep.mubr.msk.bf16.mxu1 %vm5315_vm0, %v7362_v0 }
 0x135   :  { %v5842_v4 = vpop.f32.mrb[32].mxu0  ;;  %v5844_v14 = vpop.f32.mrb[32].mxu1 }
 0x136   :  { %v4469_v15 = vpop.f32.mrb[33].mxu0  ;;  %v4649_v22 = vpop.f32.mrb[33].mxu1 }
 0x137   :  { %v5854_v38 = vpop.f32.mrb[34].mxu0  ;;  %v5856_v39 = vpop.f32.mrb[34].mxu1  ;;  %v5221_v22 = vld [vmem:[%s7357_s0 + $0x120] sm:$0xff]  }
 0x138   :  { %v4470_v46 = vpop.f32.mrb[35].mxu0  ;;  %v4650_v50 = vpop.f32.mrb[35].mxu1 }
 0x13a   :  { %4576 = vmatmul.mubr.bf16.gmra.mrb[140].mxu0 %v5219_v26  ;;  %4756 = vmatmul.mubr.bf16.gmra.mrb[140].mxu1 %v5220_v27  ;;  %v5222_v26 = vld [vmem:[%s7357_s0 + $0x264] sm:$0xff]  }
 0x13b   :  { %4579 = vmatprep.mubr.msk.bf16.mxu0 %vm5315_vm0, %v7362_v0  ;;  %4759 = vmatprep.mubr.msk.bf16.mxu1 %vm5315_vm0, %v7362_v0 }
 0x13d   :  { %v5864_v52 = vpop.f32.mrb[36].mxu0  ;;  %v5866_v62 = vpop.f32.mrb[36].mxu1 }
 0x13e   :  { %v4473_v2 = vpop.f32.mrb[37].mxu0  ;;  %v4653_v15 = vpop.f32.mrb[37].mxu1 }
 0x13f   :  { %v5876_v46 = vpop.f32.mrb[38].mxu0  ;;  %v5878_v50 = vpop.f32.mrb[38].mxu1 }
 0x140   :  { %v4474_v51 = vpop.f32.mrb[39].mxu0  ;;  %v4654_v28 = vpop.f32.mrb[39].mxu1 }
 0x141   :  { %v5223_v28 = vld [vmem:[%s7357_s0 + $0x128] sm:$0xff]  }
 0x142   :  { %4580 = vmatmul.mubr.bf16.gmra.mrb[144].mxu0 %v5221_v22  ;;  %4760 = vmatmul.mubr.bf16.gmra.mrb[144].mxu1 %v5222_v26  ;;  %v5224_v51 = vld [vmem:[%s7357_s0 + $0x26c] sm:$0xff]  }
 0x143   :  { %4583 = vmatprep.mubr.msk.bf16.mxu0 %vm5315_vm0, %v7362_v0  ;;  %4763 = vmatprep.mubr.msk.bf16.mxu1 %vm5315_vm0, %v7362_v0 }
 0x145   :  { %v5886_v15 = vpop.f32.mrb[40].mxu0  ;;  %v5888_v27 = vpop.f32.mrb[40].mxu1 }
 0x146   :  { %v4477_v3 = vpop.f32.mrb[41].mxu0  ;;  %v4657_v53 = vpop.f32.mrb[41].mxu1 }
 0x147   :  { %v5898_v26 = vpop.f32.mrb[42].mxu0  ;;  %v5900_v2 = vpop.f32.mrb[42].mxu1 }
 0x148   :  { %v4478_v40 = vpop.f32.mrb[43].mxu0  ;;  %v4658_v29 = vpop.f32.mrb[43].mxu1 }
 0x149   :  { %v5225_v29 = vld [vmem:[%s7357_s0 + $0x130] sm:$0xff]  }
 0x14a   :  { %4584 = vmatmul.mubr.bf16.gmra.mrb[148].mxu0 %v5223_v28  ;;  %4764 = vmatmul.mubr.bf16.gmra.mrb[148].mxu1 %v5224_v51  ;;  %v5226_v40 = vld [vmem:[%s7357_s0 + $0x274] sm:$0xff]  }
 0x14b   :  { %4587 = vmatprep.mubr.msk.bf16.mxu0 %vm5315_vm0, %v7362_v0  ;;  %4767 = vmatprep.mubr.msk.bf16.mxu1 %vm5315_vm0, %v7362_v0 }
 0x14d   :  { %v5908_v3 = vpop.f32.mrb[44].mxu0  ;;  %v5910_v22 = vpop.f32.mrb[44].mxu1 }
 0x14e   :  { %v4481_v16 = vpop.f32.mrb[45].mxu0  ;;  %v4661_v5 = vpop.f32.mrb[45].mxu1 }
 0x14f   :  { %v5920_v51 = vpop.f32.mrb[46].mxu0  ;;  %v5922_v53 = vpop.f32.mrb[46].mxu1 }
 0x150   :  { %v4482_v59 = vpop.f32.mrb[47].mxu0  ;;  %v4662_v54 = vpop.f32.mrb[47].mxu1 }
 0x151   :  { %v5227_v54 = vld [vmem:[%s7357_s0 + $0x138] sm:$0xff]  }
 0x152   :  { %4588 = vmatmul.mubr.bf16.gmra.mrb[152].mxu0 %v5225_v29  ;;  %4768 = vmatmul.mubr.bf16.gmra.mrb[152].mxu1 %v5226_v40  ;;  %v5228_v59 = vld [vmem:[%s7357_s0 + $0x27c] sm:$0xff]  }
 0x153   :  { %4591 = vmatprep.mubr.msk.bf16.mxu0 %vm5315_vm0, %v7362_v0  ;;  %4771 = vmatprep.mubr.msk.bf16.mxu1 %vm5315_vm0, %v7362_v0 }
 0x155   :  { %v5930_v16 = vpop.f32.mrb[48].mxu0  ;;  %v5932_v28 = vpop.f32.mrb[48].mxu1 }
 0x156   :  { %v4485_v47 = vpop.f32.mrb[49].mxu0  ;;  %v4665_v42 = vpop.f32.mrb[49].mxu1 }
 0x157   :  { %v5942_v40 = vpop.f32.mrb[50].mxu0  ;;  %v5944_v5 = vpop.f32.mrb[50].mxu1 }
 0x158   :  { %7474 = vst [vmem:[#allocation2_spill] sm:$0xff] %v5942_v40  ;;  %7475 = vst [vmem:[#allocation3_spill] sm:$0xff] %v5944_v5  ;;  %v4486_v35 = vpop.f32.mrb[51].mxu0  ;;  %v4666_v30 = vpop.f32.mrb[51].mxu1 }
 0x159   :  { %v5229_v30 = vld [vmem:[%s7357_s0 + $0x140] ss:$0 sps:$4 sm:$0xff]   ;;  %v5230_v35 = vld [vmem:[%s7357_s0 + $0x284] ss:$0 sps:$4 sm:$0xff]  }
 0x15a   :  { %4592 = vmatmul.mubr.bf16.gmra.mrb[156].mxu0 %v5227_v54  ;;  %4772 = vmatmul.mubr.bf16.gmra.mrb[156].mxu1 %v5228_v59 }
 0x15b   :  { %4595 = vmatprep.mubr.msk.bf16.mxu0 %vm5315_vm0, %v7362_v0  ;;  %4775 = vmatprep.mubr.msk.bf16.mxu1 %vm5315_vm0, %v7362_v0 }
 0x15d   :  { %v5952_v47 = vpop.f32.mrb[52].mxu0  ;;  %v5954_v29 = vpop.f32.mrb[52].mxu1 }
 0x15e   :  { %7476 = vst [vmem:[#allocation4_spill] sm:$0xff] %v5952_v47  ;;  %7477 = vst [vmem:[#allocation5_spill] sm:$0xff] %v5954_v29  ;;  %v4489_v23 = vpop.f32.mrb[53].mxu0  ;;  %v4669_v18 = vpop.f32.mrb[53].mxu1 }
 0x15f   :  { %v5964_v59 = vpop.f32.mrb[54].mxu0  ;;  %v5966_v42 = vpop.f32.mrb[54].mxu1 }
 0x160   :  { %7478 = vst [vmem:[#allocation6_spill] sm:$0xff] %v5964_v59  ;;  %7479 = vst [vmem:[#allocation7_spill] sm:$0xff] %v5966_v42  ;;  %v4490_v11 = vpop.f32.mrb[55].mxu0  ;;  %v4670_v6 = vpop.f32.mrb[55].mxu1 }
 0x161   :  { %v5231_v6 = vld [vmem:[%s7357_s0 + $0x288] sm:$0xff]  }
 0x162   :  { %4596 = vmatmul.mubr.bf16.gmra.mrb[160].mxu0 %v5229_v30  ;;  %4776 = vmatmul.mubr.bf16.gmra.mrb[160].mxu1 %v5230_v35  ;;  %v5232_v11 = vld [vmem:[%s7357_s0 + $0x3cc] sm:$0xff]  }
 0x163   :  { %4795 = vmatprep.mubr.msk.bf16.mxu0 %vm5315_vm0, %v7362_v0  ;;  %4975 = vmatprep.mubr.msk.bf16.mxu1 %vm5315_vm0, %v7362_v0 }
 0x165   :  { %v5974_v23 = vpop.f32.mrb[56].mxu0  ;;  %v5976_v54 = vpop.f32.mrb[56].mxu1 }
 0x166   :  { %7480 = vst [vmem:[#allocation8_spill] sm:$0xff] %v5974_v23  ;;  %7481 = vst [vmem:[#allocation9_spill] sm:$0xff] %v5976_v54  ;;  %v4493_v29 = vpop.f32.mrb[57].mxu0  ;;  %v4673_v47 = vpop.f32.mrb[57].mxu1 }
 0x167   :  { %v5986_v35 = vpop.f32.mrb[58].mxu0  ;;  %v5988_v18 = vpop.f32.mrb[58].mxu1  ;;  %v7484_v47 = vmov 0.0  }
 0x168   :  { %7482 = vst [vmem:[#allocation10_spill] sm:$0xff] %v5986_v35  ;;  %7483 = vst [vmem:[#allocation11_spill] sm:$0xff] %v5988_v18  ;;  %v4494_v0 = vpop.f32.mrb[59].mxu0  ;;  %v4674_v42 = vpop.f32.mrb[59].mxu1 }
 0x169   :  { %v5233_v0 = vld [vmem:[%s7357_s0 + $0x290] sm:$0xff]  }
 0x16a   :  { %4796 = vmatmul.mubr.bf16.vlgmr.msra.gmra.mrb[164].mxu0 %v5231_v6  ;;  %4976 = vmatmul.mubr.bf16.vlgmr.msra.gmra.mrb[164].mxu1 %v5232_v11  ;;  %v5234_v42 = vld [vmem:[%s7357_s0 + $0x3d4] sm:$0xff]  }
 0x16b   :  { %4799 = vmatprep.mubr.msk.bf16.mxu0 %vm5315_vm0, %v7484_v47  ;;  %4979 = vmatprep.mubr.msk.bf16.mxu1 %vm5315_vm0, %v7484_v47 }
 0x16d   :  { %v5996_v59 = vpop.f32.mrb[60].mxu0  ;;  %v5998_v30 = vpop.f32.mrb[60].mxu1 }
 0x16e   :  { %7485 = vst [vmem:[#allocation12_spill] sm:$0xff] %v5996_v59  ;;  %7486 = vst [vmem:[#allocation13_spill] sm:$0xff] %v5998_v30  ;;  %v4497_v54 = vpop.f32.mrb[61].mxu0  ;;  %v4677_v23 = vpop.f32.mrb[61].mxu1 }
 0x16f   :  { %v6008_v11 = vpop.f32.mrb[62].mxu0  ;;  %v6010_v29 = vpop.f32.mrb[62].mxu1 }
 0x170   :  { %7487 = vst [vmem:[#allocation14_spill] sm:$0xff] %v6008_v11  ;;  %7488 = vst [vmem:[#allocation15_spill] sm:$0xff] %v6010_v29  ;;  %v4498_v18 = vpop.f32.mrb[63].mxu0  ;;  %v4678_v35 = vpop.f32.mrb[63].mxu1 }
 0x171   :  { %v5235_v18 = vld [vmem:[%s7357_s0 + $0x298] sm:$0xff]  }
 0x172   :  { %4800 = vmatmul.mubr.bf16.gmra.mrb[168].mxu0 %v5233_v0  ;;  %4980 = vmatmul.mubr.bf16.gmra.mrb[168].mxu1 %v5234_v42  ;;  %v5236_v35 = vld [vmem:[%s7357_s0 + $0x3dc] sm:$0xff]  }
 0x173   :  { %4803 = vmatprep.mubr.msk.bf16.mxu0 %vm5315_vm0, %v7484_v47  ;;  %4983 = vmatprep.mubr.msk.bf16.mxu1 %vm5315_vm0, %v7484_v47 }
 0x175   :  { %v6018_v23 = vpop.f32.mrb[64].mxu0  ;;  %v6020_v6 = vpop.f32.mrb[64].mxu1 }
 0x176   :  { %7489 = vst [vmem:[#allocation16_spill] sm:$0xff] %v6018_v23  ;;  %7490 = vst [vmem:[#allocation17_spill] sm:$0xff] %v6020_v6  ;;  %v4501_v30 = vpop.f32.mrb[65].mxu0  ;;  %v4681_v59 = vpop.f32.mrb[65].mxu1 }
 0x177   :  { %v6030_v42 = vpop.f32.mrb[66].mxu0  ;;  %v6032_v54 = vpop.f32.mrb[66].mxu1 }
 0x178   :  { %7491 = vst [vmem:[#allocation18_spill] sm:$0xff] %v6030_v42  ;;  %7492 = vst [vmem:[#allocation19_spill] sm:$0xff] %v6032_v54  ;;  %v4502_v29 = vpop.f32.mrb[67].mxu0  ;;  %v4682_v11 = vpop.f32.mrb[67].mxu1 }
 0x179   :  { %v5237_v29 = vld [vmem:[%s7357_s0 + $0x2a0] sm:$0xff]  }
 0x17a   :  { %4804 = vmatmul.mubr.bf16.gmra.mrb[172].mxu0 %v5235_v18  ;;  %4984 = vmatmul.mubr.bf16.gmra.mrb[172].mxu1 %v5236_v35  ;;  %v5238_v11 = vld [vmem:[%s7357_s0 + $0x3e4] sm:$0xff]  }
 0x17b   :  { %4807 = vmatprep.mubr.msk.bf16.mxu0 %vm5315_vm0, %v7484_v47  ;;  %4987 = vmatprep.mubr.msk.bf16.mxu1 %vm5315_vm0, %v7484_v47 }
 0x17d   :  { %v6040_v30 = vpop.f32.mrb[68].mxu0  ;;  %v6042_v0 = vpop.f32.mrb[68].mxu1 }
 0x17e   :  { %7493 = vst [vmem:[#allocation20_spill] sm:$0xff] %v6040_v30  ;;  %7494 = vst [vmem:[#allocation21_spill] sm:$0xff] %v6042_v0  ;;  %v4505_v6 = vpop.f32.mrb[69].mxu0  ;;  %v4685_v23 = vpop.f32.mrb[69].mxu1  ;;  %v7587_v0 = vmax.f32 %v5666_v63, %v5668_v1  ;;  %v7588_v63 = vmax.f32 %v5678_v7, %v5680_v8 }
 0x17f   :  { %v6052_v35 = vpop.f32.mrb[70].mxu0  ;;  %v6054_v59 = vpop.f32.mrb[70].mxu1 }
 0x180   :  { %7495 = vst [vmem:[#allocation22_spill] sm:$0xff] %v6052_v35  ;;  %7496 = vst [vmem:[#allocation23_spill] sm:$0xff] %v6054_v59  ;;  %v4506_v54 = vpop.f32.mrb[71].mxu0  ;;  %v4686_v42 = vpop.f32.mrb[71].mxu1 }
 0x182   :  { %4808 = vmatmul.mubr.bf16.gmra.mrb[176].mxu0 %v5237_v29  ;;  %4988 = vmatmul.mubr.bf16.gmra.mrb[176].mxu1 %v5238_v11  ;;  %v5239_v29 = vld [vmem:[%s7357_s0 + $0x2a8] sm:$0xff]  }
 0x183   :  { %4811 = vmatprep.mubr.msk.bf16.mxu0 %vm5315_vm0, %v7484_v47  ;;  %4991 = vmatprep.mubr.msk.bf16.mxu1 %vm5315_vm0, %v7484_v47  ;;  %v5240_v11 = vld [vmem:[%s7357_s0 + $0x3ec] sm:$0xff]  }
 0x185   :  { %v6062_v23 = vpop.f32.mrb[72].mxu0  ;;  %v6064_v18 = vpop.f32.mrb[72].mxu1 }
 0x186   :  { %7497 = vst [vmem:[#allocation24_spill] sm:$0xff] %v6062_v23  ;;  %7498 = vst [vmem:[#allocation25_spill] sm:$0xff] %v6064_v18  ;;  %v4509_v54 = vpop.f32.mrb[73].mxu0  ;;  %v4689_v42 = vpop.f32.mrb[73].mxu1 }
 0x187   :  { %v6074_v6 = vpop.f32.mrb[74].mxu0  ;;  %v6076_v59 = vpop.f32.mrb[74].mxu1 }
 0x188   :  { %7499 = vst [vmem:[#allocation26_spill] sm:$0xff] %v6074_v6  ;;  %7500 = vst [vmem:[#allocation27_spill] sm:$0xff] %v6076_v59  ;;  %v4510_v30 = vpop.f32.mrb[75].mxu0  ;;  %v4690_v5 = vpop.f32.mrb[75].mxu1 }
 0x189   :  { %v5241_v5 = vld [vmem:[%s7357_s0 + $0x2b0] sm:$0xff]  }
 0x18a   :  { %4812 = vmatmul.mubr.bf16.gmra.mrb[180].mxu0 %v5239_v29  ;;  %4992 = vmatmul.mubr.bf16.gmra.mrb[180].mxu1 %v5240_v11  ;;  %v5242_v30 = vld [vmem:[%s7357_s0 + $0x3f4] sm:$0xff]  }
 0x18b   :  { %4815 = vmatprep.mubr.msk.bf16.mxu0 %vm5315_vm0, %v7484_v47  ;;  %4995 = vmatprep.mubr.msk.bf16.mxu1 %vm5315_vm0, %v7484_v47 }
 0x18d   :  { %v6084_v54 = vpop.f32.mrb[76].mxu0  ;;  %v6086_v42 = vpop.f32.mrb[76].mxu1 }
 0x18e   :  { %7501 = vst [vmem:[#allocation28_spill] sm:$0xff] %v6084_v54  ;;  %7502 = vst [vmem:[#allocation29_spill] sm:$0xff] %v6086_v42  ;;  %v4513_v18 = vpop.f32.mrb[77].mxu0  ;;  %v4693_v23 = vpop.f32.mrb[77].mxu1 }
 0x18f   :  { %v6096_v29 = vpop.f32.mrb[78].mxu0  ;;  %v6098_v11 = vpop.f32.mrb[78].mxu1 }
 0x190   :  { %7503 = vst [vmem:[#allocation30_spill] sm:$0xff] %v6096_v29  ;;  %7504 = vst [vmem:[#allocation31_spill] sm:$0xff] %v6098_v11  ;;  %v4514_v59 = vpop.f32.mrb[79].mxu0  ;;  %v4694_v6 = vpop.f32.mrb[79].mxu1 }
 0x191   :  { %v5243_v59 = vld [vmem:[%s7357_s0 + $0x2b8] sm:$0xff]  }
 0x192   :  { %4816 = vmatmul.mubr.bf16.gmra.mrb[184].mxu0 %v5241_v5  ;;  %4996 = vmatmul.mubr.bf16.gmra.mrb[184].mxu1 %v5242_v30  ;;  %v5244_v6 = vld [vmem:[%s7357_s0 + $0x3fc] sm:$0xff]  }
 0x193   :  { %4819 = vmatprep.mubr.msk.bf16.mxu0 %vm5315_vm0, %v7484_v47  ;;  %4999 = vmatprep.mubr.msk.bf16.mxu1 %vm5315_vm0, %v7484_v47 }
 0x195   :  { %v6106_v18 = vpop.f32.mrb[80].mxu0  ;;  %v6108_v23 = vpop.f32.mrb[80].mxu1 }
 0x196   :  { %7505 = vst [vmem:[#allocation32_spill] sm:$0xff] %v6106_v18  ;;  %7506 = vst [vmem:[#allocation33_spill] sm:$0xff] %v6108_v23  ;;  %v4517_v42 = vpop.f32.mrb[81].mxu0  ;;  %v4697_v54 = vpop.f32.mrb[81].mxu1 }
 0x197   :  { %v6118_v5 = vpop.f32.mrb[82].mxu0  ;;  %v6120_v30 = vpop.f32.mrb[82].mxu1 }
 0x198   :  { %7507 = vst [vmem:[#allocation34_spill] sm:$0xff] %v6118_v5  ;;  %7508 = vst [vmem:[#allocation35_spill] sm:$0xff] %v6120_v30  ;;  %v4518_v11 = vpop.f32.mrb[83].mxu0  ;;  %v4698_v29 = vpop.f32.mrb[83].mxu1 }
 0x199   :  { %v5245_v29 = vld [vmem:[%s7357_s0 + $0x2c0] sm:$0xff]  }
 0x19a   :  { %4820 = vmatmul.mubr.bf16.gmra.mrb[188].mxu0 %v5243_v59  ;;  %5000 = vmatmul.mubr.bf16.gmra.mrb[188].mxu1 %v5244_v6  ;;  %v5246_v11 = vld [vmem:[%s7357_s0 + $0x404] sm:$0xff]  }
 0x19b   :  { %4823 = vmatprep.mubr.msk.bf16.mxu0 %vm5315_vm0, %v7484_v47  ;;  %5003 = vmatprep.mubr.msk.bf16.mxu1 %vm5315_vm0, %v7484_v47 }
 0x19d   :  { %v6128_v54 = vpop.f32.mrb[84].mxu0  ;;  %v6130_v42 = vpop.f32.mrb[84].mxu1 }
 0x19e   :  { %7509 = vst [vmem:[#allocation36_spill] sm:$0xff] %v6128_v54  ;;  %7510 = vst [vmem:[#allocation37_spill] sm:$0xff] %v6130_v42  ;;  %v4521_v23 = vpop.f32.mrb[85].mxu0  ;;  %v4701_v18 = vpop.f32.mrb[85].mxu1 }
 0x19f   :  { %v6140_v59 = vpop.f32.mrb[86].mxu0  ;;  %v6142_v6 = vpop.f32.mrb[86].mxu1 }
 0x1a0   :  { %7511 = vst [vmem:[#allocation38_spill] sm:$0xff] %v6140_v59  ;;  %7512 = vst [vmem:[#allocation39_spill] sm:$0xff] %v6142_v6  ;;  %v4522_v30 = vpop.f32.mrb[87].mxu0  ;;  %v4702_v5 = vpop.f32.mrb[87].mxu1 }
 0x1a1   :  { %v5247_v5 = vld [vmem:[%s7357_s0 + $0x2c8] sm:$0xff]  }
 0x1a2   :  { %4824 = vmatmul.mubr.bf16.gmra.mrb[192].mxu0 %v5245_v29  ;;  %5004 = vmatmul.mubr.bf16.gmra.mrb[192].mxu1 %v5246_v11  ;;  %v5248_v30 = vld [vmem:[%s7357_s0 + $0x40c] sm:$0xff]  }
 0x1a3   :  { %4827 = vmatprep.mubr.msk.bf16.mxu0 %vm5315_vm0, %v7484_v47  ;;  %5007 = vmatprep.mubr.msk.bf16.mxu1 %vm5315_vm0, %v7484_v47 }
 0x1a5   :  { %v6150_v18 = vpop.f32.mrb[88].mxu0  ;;  %v6152_v23 = vpop.f32.mrb[88].mxu1 }
 0x1a6   :  { %7513 = vst [vmem:[#allocation40_spill] sm:$0xff] %v6150_v18  ;;  %7514 = vst [vmem:[#allocation41_spill] sm:$0xff] %v6152_v23  ;;  %v4525_v42 = vpop.f32.mrb[89].mxu0  ;;  %v4705_v54 = vpop.f32.mrb[89].mxu1 }
 0x1a7   :  { %v6162_v29 = vpop.f32.mrb[90].mxu0  ;;  %v6164_v11 = vpop.f32.mrb[90].mxu1 }
 0x1a8   :  { %7515 = vst [vmem:[#allocation42_spill] sm:$0xff] %v6162_v29  ;;  %7516 = vst [vmem:[#allocation43_spill] sm:$0xff] %v6164_v11  ;;  %v4526_v6 = vpop.f32.mrb[91].mxu0  ;;  %v4706_v59 = vpop.f32.mrb[91].mxu1 }
 0x1a9   :  { %v5249_v59 = vld [vmem:[%s7357_s0 + $0x2d0] sm:$0xff]  }
 0x1aa   :  { %4828 = vmatmul.mubr.bf16.gmra.mrb[196].mxu0 %v5247_v5  ;;  %5008 = vmatmul.mubr.bf16.gmra.mrb[196].mxu1 %v5248_v30  ;;  %v5250_v6 = vld [vmem:[%s7357_s0 + $0x414] sm:$0xff]  }
 0x1ab   :  { %4831 = vmatprep.mubr.msk.bf16.mxu0 %vm5315_vm0, %v7484_v47  ;;  %5011 = vmatprep.mubr.msk.bf16.mxu1 %vm5315_vm0, %v7484_v47 }
 0x1ad   :  { %v6172_v54 = vpop.f32.mrb[92].mxu0  ;;  %v6174_v42 = vpop.f32.mrb[92].mxu1 }
 0x1ae   :  { %7517 = vst [vmem:[#allocation44_spill] sm:$0xff] %v6172_v54  ;;  %7518 = vst [vmem:[#allocation45_spill] sm:$0xff] %v6174_v42  ;;  %v4529_v23 = vpop.f32.mrb[93].mxu0  ;;  %v4709_v18 = vpop.f32.mrb[93].mxu1 }
 0x1af   :  { %v6184_v5 = vpop.f32.mrb[94].mxu0  ;;  %v6186_v30 = vpop.f32.mrb[94].mxu1 }
 0x1b0   :  { %7519 = vst [vmem:[#allocation46_spill] sm:$0xff] %v6184_v5  ;;  %7520 = vst [vmem:[#allocation47_spill] sm:$0xff] %v6186_v30  ;;  %v4530_v11 = vpop.f32.mrb[95].mxu0  ;;  %v4710_v29 = vpop.f32.mrb[95].mxu1 }
 0x1b1   :  { %v5251_v29 = vld [vmem:[%s7357_s0 + $0x2d8] sm:$0xff]  }
 0x1b2   :  { %4832 = vmatmul.mubr.bf16.gmra.mrb[200].mxu0 %v5249_v59  ;;  %5012 = vmatmul.mubr.bf16.gmra.mrb[200].mxu1 %v5250_v6  ;;  %v5252_v11 = vld [vmem:[%s7357_s0 + $0x41c] sm:$0xff]  }
 0x1b3   :  { %4835 = vmatprep.mubr.msk.bf16.mxu0 %vm5315_vm0, %v7484_v47  ;;  %5015 = vmatprep.mubr.msk.bf16.mxu1 %vm5315_vm0, %v7484_v47 }
 0x1b5   :  { %v6194_v18 = vpop.f32.mrb[96].mxu0  ;;  %v6196_v23 = vpop.f32.mrb[96].mxu1 }
 0x1b6   :  { %7521 = vst [vmem:[#allocation48_spill] sm:$0xff] %v6194_v18  ;;  %7522 = vst [vmem:[#allocation49_spill] sm:$0xff] %v6196_v23  ;;  %v4533_v42 = vpop.f32.mrb[97].mxu0  ;;  %v4713_v54 = vpop.f32.mrb[97].mxu1 }
 0x1b7   :  { %v6206_v59 = vpop.f32.mrb[98].mxu0  ;;  %v6208_v6 = vpop.f32.mrb[98].mxu1 }
 0x1b8   :  { %7523 = vst [vmem:[#allocation50_spill] sm:$0xff] %v6206_v59  ;;  %7524 = vst [vmem:[#allocation51_spill] sm:$0xff] %v6208_v6  ;;  %v4534_v30 = vpop.f32.mrb[99].mxu0  ;;  %v4714_v5 = vpop.f32.mrb[99].mxu1 }
 0x1b9   :  { %v5253_v5 = vld [vmem:[%s7357_s0 + $0x2e0] sm:$0xff]  }
 0x1ba   :  { %4836 = vmatmul.mubr.bf16.gmra.mrb[204].mxu0 %v5251_v29  ;;  %5016 = vmatmul.mubr.bf16.gmra.mrb[204].mxu1 %v5252_v11  ;;  %v5254_v30 = vld [vmem:[%s7357_s0 + $0x424] sm:$0xff]  }
 0x1bb   :  { %4839 = vmatprep.mubr.msk.bf16.mxu0 %vm5315_vm0, %v7484_v47  ;;  %5019 = vmatprep.mubr.msk.bf16.mxu1 %vm5315_vm0, %v7484_v47 }
 0x1bd   :  { %v6216_v54 = vpop.f32.mrb[100].mxu0  ;;  %v6218_v42 = vpop.f32.mrb[100].mxu1 }
 0x1be   :  { %7525 = vst [vmem:[#allocation52_spill] sm:$0xff] %v6216_v54  ;;  %7526 = vst [vmem:[#allocation53_spill] sm:$0xff] %v6218_v42  ;;  %v4537_v23 = vpop.f32.mrb[101].mxu0  ;;  %v4717_v18 = vpop.f32.mrb[101].mxu1 }
 0x1bf   :  { %v6228_v29 = vpop.f32.mrb[102].mxu0  ;;  %v6230_v11 = vpop.f32.mrb[102].mxu1 }
 0x1c0   :  { %7527 = vst [vmem:[#allocation54_spill] sm:$0xff] %v6228_v29  ;;  %7528 = vst [vmem:[#allocation55_spill] sm:$0xff] %v6230_v11  ;;  %v4538_v6 = vpop.f32.mrb[103].mxu0  ;;  %v4718_v59 = vpop.f32.mrb[103].mxu1 }
 0x1c1   :  { %v5255_v59 = vld [vmem:[%s7357_s0 + $0x2e8] sm:$0xff]  }
 0x1c2   :  { %4840 = vmatmul.mubr.bf16.gmra.mrb[208].mxu0 %v5253_v5  ;;  %5020 = vmatmul.mubr.bf16.gmra.mrb[208].mxu1 %v5254_v30  ;;  %v5256_v6 = vld [vmem:[%s7357_s0 + $0x42c] sm:$0xff]  }
 0x1c3   :  { %4843 = vmatprep.mubr.msk.bf16.mxu0 %vm5315_vm0, %v7484_v47  ;;  %5023 = vmatprep.mubr.msk.bf16.mxu1 %vm5315_vm0, %v7484_v47 }
 0x1c5   :  { %v6238_v18 = vpop.f32.mrb[104].mxu0  ;;  %v6240_v23 = vpop.f32.mrb[104].mxu1 }
 0x1c6   :  { %7529 = vst [vmem:[#allocation56_spill] sm:$0xff] %v6238_v18  ;;  %7530 = vst [vmem:[#allocation57_spill] sm:$0xff] %v6240_v23  ;;  %v4541_v42 = vpop.f32.mrb[105].mxu0  ;;  %v4721_v54 = vpop.f32.mrb[105].mxu1 }
 0x1c7   :  { %v6250_v5 = vpop.f32.mrb[106].mxu0  ;;  %v6252_v30 = vpop.f32.mrb[106].mxu1 }
 0x1c8   :  { %7531 = vst [vmem:[#allocation58_spill] sm:$0xff] %v6250_v5  ;;  %7532 = vst [vmem:[#allocation59_spill] sm:$0xff] %v6252_v30  ;;  %v4542_v11 = vpop.f32.mrb[107].mxu0  ;;  %v4722_v29 = vpop.f32.mrb[107].mxu1 }
 0x1c9   :  { %v5257_v29 = vld [vmem:[%s7357_s0 + $0x2f0] sm:$0xff]  }
 0x1ca   :  { %4844 = vmatmul.mubr.bf16.gmra.mrb[212].mxu0 %v5255_v59  ;;  %5024 = vmatmul.mubr.bf16.gmra.mrb[212].mxu1 %v5256_v6  ;;  %v5258_v11 = vld [vmem:[%s7357_s0 + $0x434] sm:$0xff]  }
 0x1cb   :  { %4847 = vmatprep.mubr.msk.bf16.mxu0 %vm5315_vm0, %v7484_v47  ;;  %5027 = vmatprep.mubr.msk.bf16.mxu1 %vm5315_vm0, %v7484_v47 }
 0x1cd   :  { %v6260_v54 = vpop.f32.mrb[108].mxu0  ;;  %v6262_v42 = vpop.f32.mrb[108].mxu1 }
 0x1ce   :  { %7533 = vst [vmem:[#allocation60_spill] sm:$0xff] %v6260_v54  ;;  %7534 = vst [vmem:[#allocation61_spill] sm:$0xff] %v6262_v42  ;;  %v4545_v23 = vpop.f32.mrb[109].mxu0  ;;  %v4725_v18 = vpop.f32.mrb[109].mxu1 }
 0x1cf   :  { %v6272_v59 = vpop.f32.mrb[110].mxu0  ;;  %v6274_v6 = vpop.f32.mrb[110].mxu1 }
 0x1d0   :  { %7535 = vst [vmem:[#allocation62_spill] sm:$0xff] %v6272_v59  ;;  %7536 = vst [vmem:[#allocation63_spill] sm:$0xff] %v6274_v6  ;;  %v4546_v30 = vpop.f32.mrb[111].mxu0  ;;  %v4726_v5 = vpop.f32.mrb[111].mxu1 }
 0x1d1   :  { %v5259_v5 = vld [vmem:[%s7357_s0 + $0x2f8] sm:$0xff]  }
 0x1d2   :  { %4848 = vmatmul.mubr.bf16.gmra.mrb[216].mxu0 %v5257_v29  ;;  %5028 = vmatmul.mubr.bf16.gmra.mrb[216].mxu1 %v5258_v11  ;;  %v5260_v30 = vld [vmem:[%s7357_s0 + $0x43c] sm:$0xff]  }
 0x1d3   :  { %4851 = vmatprep.mubr.msk.bf16.mxu0 %vm5315_vm0, %v7484_v47  ;;  %5031 = vmatprep.mubr.msk.bf16.mxu1 %vm5315_vm0, %v7484_v47 }
 0x1d5   :  { %v6282_v18 = vpop.f32.mrb[112].mxu0  ;;  %v6284_v23 = vpop.f32.mrb[112].mxu1 }
 0x1d6   :  { %7537 = vst [vmem:[#allocation64_spill] sm:$0xff] %v6282_v18  ;;  %7538 = vst [vmem:[#allocation65_spill] sm:$0xff] %v6284_v23  ;;  %v4549_v42 = vpop.f32.mrb[113].mxu0  ;;  %v4729_v54 = vpop.f32.mrb[113].mxu1 }
 0x1d7   :  { %v6294_v29 = vpop.f32.mrb[114].mxu0  ;;  %v6296_v11 = vpop.f32.mrb[114].mxu1 }
 0x1d8   :  { %7539 = vst [vmem:[#allocation66_spill] sm:$0xff] %v6294_v29  ;;  %7540 = vst [vmem:[#allocation67_spill] sm:$0xff] %v6296_v11  ;;  %v4550_v6 = vpop.f32.mrb[115].mxu0  ;;  %v4730_v59 = vpop.f32.mrb[115].mxu1 }
 0x1d9   :  { %v5261_v59 = vld [vmem:[%s7357_s0 + $0x300] sm:$0xff]  }
 0x1da   :  { %4852 = vmatmul.mubr.bf16.gmra.mrb[220].mxu0 %v5259_v5  ;;  %5032 = vmatmul.mubr.bf16.gmra.mrb[220].mxu1 %v5260_v30  ;;  %v5262_v6 = vld [vmem:[%s7357_s0 + $0x444] sm:$0xff]  }
 0x1db   :  { %4855 = vmatprep.mubr.msk.bf16.mxu0 %vm5315_vm0, %v7484_v47  ;;  %5035 = vmatprep.mubr.msk.bf16.mxu1 %vm5315_vm0, %v7484_v47 }
 0x1dd   :  { %v6304_v54 = vpop.f32.mrb[116].mxu0  ;;  %v6306_v42 = vpop.f32.mrb[116].mxu1 }
 0x1de   :  { %7541 = vst [vmem:[#allocation68_spill] sm:$0xff] %v6304_v54  ;;  %7542 = vst [vmem:[#allocation69_spill] sm:$0xff] %v6306_v42  ;;  %v4553_v23 = vpop.f32.mrb[117].mxu0  ;;  %v4733_v18 = vpop.f32.mrb[117].mxu1 }
 0x1df   :  { %v6316_v5 = vpop.f32.mrb[118].mxu0  ;;  %v6318_v30 = vpop.f32.mrb[118].mxu1 }
 0x1e0   :  { %7543 = vst [vmem:[#allocation70_spill] sm:$0xff] %v6316_v5  ;;  %7544 = vst [vmem:[#allocation71_spill] sm:$0xff] %v6318_v30  ;;  %v4554_v11 = vpop.f32.mrb[119].mxu0  ;;  %v4734_v29 = vpop.f32.mrb[119].mxu1 }
 0x1e1   :  { %v5263_v29 = vld [vmem:[%s7357_s0 + $0x308] sm:$0xff]  }
 0x1e2   :  { %4856 = vmatmul.mubr.bf16.gmra.mrb[224].mxu0 %v5261_v59  ;;  %5036 = vmatmul.mubr.bf16.gmra.mrb[224].mxu1 %v5262_v6  ;;  %v5264_v11 = vld [vmem:[%s7357_s0 + $0x44c] sm:$0xff]  }
 0x1e3   :  { %4859 = vmatprep.mubr.msk.bf16.mxu0 %vm5315_vm0, %v7484_v47  ;;  %5039 = vmatprep.mubr.msk.bf16.mxu1 %vm5315_vm0, %v7484_v47 }
 0x1e5   :  { %v6326_v18 = vpop.f32.mrb[120].mxu0  ;;  %v6328_v23 = vpop.f32.mrb[120].mxu1 }
 0x1e6   :  { %7545 = vst [vmem:[#allocation72_spill] sm:$0xff] %v6326_v18  ;;  %7546 = vst [vmem:[#allocation73_spill] sm:$0xff] %v6328_v23  ;;  %v4557_v42 = vpop.f32.mrb[121].mxu0  ;;  %v4737_v54 = vpop.f32.mrb[121].mxu1 }
 0x1e7   :  { %v6338_v59 = vpop.f32.mrb[122].mxu0  ;;  %v6340_v6 = vpop.f32.mrb[122].mxu1 }
 0x1e8   :  { %7547 = vst [vmem:[#allocation74_spill] sm:$0xff] %v6338_v59  ;;  %7548 = vst [vmem:[#allocation75_spill] sm:$0xff] %v6340_v6  ;;  %v4558_v30 = vpop.f32.mrb[123].mxu0  ;;  %v4738_v5 = vpop.f32.mrb[123].mxu1 }
 0x1e9   :  { %v5265_v5 = vld [vmem:[%s7357_s0 + $0x310] sm:$0xff]  }
 0x1ea   :  { %4860 = vmatmul.mubr.bf16.gmra.mrb[228].mxu0 %v5263_v29  ;;  %5040 = vmatmul.mubr.bf16.gmra.mrb[228].mxu1 %v5264_v11  ;;  %v5266_v30 = vld [vmem:[%s7357_s0 + $0x454] sm:$0xff]  }
 0x1eb   :  { %4863 = vmatprep.mubr.msk.bf16.mxu0 %vm5315_vm0, %v7484_v47  ;;  %5043 = vmatprep.mubr.msk.bf16.mxu1 %vm5315_vm0, %v7484_v47 }
 0x1ed   :  { %v6348_v54 = vpop.f32.mrb[124].mxu0  ;;  %v6350_v42 = vpop.f32.mrb[124].mxu1 }
 0x1ee   :  { %7549 = vst [vmem:[#allocation76_spill] sm:$0xff] %v6348_v54  ;;  %7550 = vst [vmem:[#allocation77_spill] sm:$0xff] %v6350_v42  ;;  %v4561_v23 = vpop.f32.mrb[125].mxu0  ;;  %v4741_v18 = vpop.f32.mrb[125].mxu1 }
 0x1ef   :  { %v6360_v29 = vpop.f32.mrb[126].mxu0  ;;  %v6362_v11 = vpop.f32.mrb[126].mxu1 }
 0x1f0   :  { %7551 = vst [vmem:[#allocation78_spill] sm:$0xff] %v6360_v29  ;;  %7552 = vst [vmem:[#allocation79_spill] sm:$0xff] %v6362_v11  ;;  %v4562_v6 = vpop.f32.mrb[127].mxu0  ;;  %v4742_v59 = vpop.f32.mrb[127].mxu1 }
 0x1f1   :  { %v5267_v59 = vld [vmem:[%s7357_s0 + $0x318] sm:$0xff]  }
 0x1f2   :  { %4864 = vmatmul.mubr.bf16.gmra.mrb[232].mxu0 %v5265_v5  ;;  %5044 = vmatmul.mubr.bf16.gmra.mrb[232].mxu1 %v5266_v30  ;;  %v5268_v6 = vld [vmem:[%s7357_s0 + $0x45c] sm:$0xff]  }
 0x1f3   :  { %4867 = vmatprep.mubr.msk.bf16.mxu0 %vm5315_vm0, %v7484_v47  ;;  %5047 = vmatprep.mubr.msk.bf16.mxu1 %vm5315_vm0, %v7484_v47 }
 0x1f5   :  { %v6370_v18 = vpop.f32.mrb[128].mxu0  ;;  %v6372_v23 = vpop.f32.mrb[128].mxu1 }
 0x1f6   :  { %7553 = vst [vmem:[#allocation80_spill] sm:$0xff] %v6370_v18  ;;  %7554 = vst [vmem:[#allocation81_spill] sm:$0xff] %v6372_v23  ;;  %v4565_v42 = vpop.f32.mrb[129].mxu0  ;;  %v4745_v54 = vpop.f32.mrb[129].mxu1 }
 0x1f7   :  { %v6382_v5 = vpop.f32.mrb[130].mxu0  ;;  %v6384_v30 = vpop.f32.mrb[130].mxu1 }
 0x1f8   :  { %7555 = vst [vmem:[#allocation82_spill] sm:$0xff] %v6382_v5  ;;  %7556 = vst [vmem:[#allocation83_spill] sm:$0xff] %v6384_v30  ;;  %v4566_v11 = vpop.f32.mrb[131].mxu0  ;;  %v4746_v29 = vpop.f32.mrb[131].mxu1 }
 0x1f9   :  { %v5269_v29 = vld [vmem:[%s7357_s0 + $0x320] sm:$0xff]  }
 0x1fa   :  { %4868 = vmatmul.mubr.bf16.gmra.mrb[236].mxu0 %v5267_v59  ;;  %5048 = vmatmul.mubr.bf16.gmra.mrb[236].mxu1 %v5268_v6  ;;  %v5270_v11 = vld [vmem:[%s7357_s0 + $0x464] sm:$0xff]  }
 0x1fb   :  { %4871 = vmatprep.mubr.msk.bf16.mxu0 %vm5315_vm0, %v7484_v47  ;;  %5051 = vmatprep.mubr.msk.bf16.mxu1 %vm5315_vm0, %v7484_v47 }
 0x1fd   :  { %v6392_v54 = vpop.f32.mrb[132].mxu0  ;;  %v6394_v42 = vpop.f32.mrb[132].mxu1 }
 0x1fe   :  { %7557 = vst [vmem:[#allocation84_spill] sm:$0xff] %v6392_v54  ;;  %7558 = vst [vmem:[#allocation85_spill] sm:$0xff] %v6394_v42  ;;  %v4569_v23 = vpop.f32.mrb[133].mxu0  ;;  %v4749_v18 = vpop.f32.mrb[133].mxu1 }
 0x1ff   :  { %v6404_v59 = vpop.f32.mrb[134].mxu0  ;;  %v6406_v6 = vpop.f32.mrb[134].mxu1 }
 0x200   :  { %7559 = vst [vmem:[#allocation86_spill] sm:$0xff] %v6404_v59  ;;  %7560 = vst [vmem:[#allocation87_spill] sm:$0xff] %v6406_v6  ;;  %v4570_v30 = vpop.f32.mrb[135].mxu0  ;;  %v4750_v5 = vpop.f32.mrb[135].mxu1 }
 0x201   :  { %v5271_v5 = vld [vmem:[%s7357_s0 + $0x328] sm:$0xff]  }
 0x202   :  { %4872 = vmatmul.mubr.bf16.gmra.mrb[240].mxu0 %v5269_v29  ;;  %5052 = vmatmul.mubr.bf16.gmra.mrb[240].mxu1 %v5270_v11  ;;  %v5272_v30 = vld [vmem:[%s7357_s0 + $0x46c] sm:$0xff]  }
 0x203   :  { %4875 = vmatprep.mubr.msk.bf16.mxu0 %vm5315_vm0, %v7484_v47  ;;  %5055 = vmatprep.mubr.msk.bf16.mxu1 %vm5315_vm0, %v7484_v47 }
 0x205   :  { %v6414_v18 = vpop.f32.mrb[136].mxu0  ;;  %v6416_v23 = vpop.f32.mrb[136].mxu1 }
 0x206   :  { %7561 = vst [vmem:[#allocation88_spill] sm:$0xff] %v6414_v18  ;;  %7562 = vst [vmem:[#allocation89_spill] sm:$0xff] %v6416_v23  ;;  %v4573_v42 = vpop.f32.mrb[137].mxu0  ;;  %v4753_v54 = vpop.f32.mrb[137].mxu1 }
 0x207   :  { %v6426_v29 = vpop.f32.mrb[138].mxu0  ;;  %v6428_v11 = vpop.f32.mrb[138].mxu1 }
 0x208   :  { %7563 = vst [vmem:[#allocation90_spill] sm:$0xff] %v6426_v29  ;;  %7564 = vst [vmem:[#allocation91_spill] sm:$0xff] %v6428_v11  ;;  %v4574_v6 = vpop.f32.mrb[139].mxu0  ;;  %v4754_v59 = vpop.f32.mrb[139].mxu1 }
 0x209   :  { %v5273_v59 = vld [vmem:[%s7357_s0 + $0x330] sm:$0xff]  }
 0x20a   :  { %4876 = vmatmul.mubr.bf16.gmra.mrb[244].mxu0 %v5271_v5  ;;  %5056 = vmatmul.mubr.bf16.gmra.mrb[244].mxu1 %v5272_v30  ;;  %v5274_v6 = vld [vmem:[%s7357_s0 + $0x474] sm:$0xff]  }
 0x20b   :  { %4879 = vmatprep.mubr.msk.bf16.mxu0 %vm5315_vm0, %v7484_v47  ;;  %5059 = vmatprep.mubr.msk.bf16.mxu1 %vm5315_vm0, %v7484_v47 }
 0x20d   :  { %v6436_v54 = vpop.f32.mrb[140].mxu0  ;;  %v6438_v42 = vpop.f32.mrb[140].mxu1 }
 0x20e   :  { %7565 = vst [vmem:[#allocation92_spill] sm:$0xff] %v6436_v54  ;;  %7566 = vst [vmem:[#allocation93_spill] sm:$0xff] %v6438_v42  ;;  %v4577_v23 = vpop.f32.mrb[141].mxu0  ;;  %v4757_v18 = vpop.f32.mrb[141].mxu1 }
 0x20f   :  { %v6448_v5 = vpop.f32.mrb[142].mxu0  ;;  %v6450_v30 = vpop.f32.mrb[142].mxu1 }
 0x210   :  { %7567 = vst [vmem:[#allocation94_spill] sm:$0xff] %v6448_v5  ;;  %7568 = vst [vmem:[#allocation95_spill] sm:$0xff] %v6450_v30  ;;  %v4578_v11 = vpop.f32.mrb[143].mxu0  ;;  %v4758_v29 = vpop.f32.mrb[143].mxu1 }
 0x211   :  { %v5275_v29 = vld [vmem:[%s7357_s0 + $0x338] sm:$0xff]  }
 0x212   :  { %4880 = vmatmul.mubr.bf16.gmra.mrb[248].mxu0 %v5273_v59  ;;  %5060 = vmatmul.mubr.bf16.gmra.mrb[248].mxu1 %v5274_v6  ;;  %v5276_v11 = vld [vmem:[%s7357_s0 + $0x47c] sm:$0xff]  }
 0x213   :  { %4883 = vmatprep.mubr.msk.bf16.mxu0 %vm5315_vm0, %v7484_v47  ;;  %5063 = vmatprep.mubr.msk.bf16.mxu1 %vm5315_vm0, %v7484_v47 }
 0x215   :  { %v6458_v18 = vpop.f32.mrb[144].mxu0  ;;  %v6460_v23 = vpop.f32.mrb[144].mxu1 }
 0x216   :  { %7569 = vst [vmem:[#allocation96_spill] sm:$0xff] %v6458_v18  ;;  %7570 = vst [vmem:[#allocation97_spill] sm:$0xff] %v6460_v23  ;;  %v4581_v42 = vpop.f32.mrb[145].mxu0  ;;  %v4761_v54 = vpop.f32.mrb[145].mxu1 }
 0x217   :  { %v6470_v59 = vpop.f32.mrb[146].mxu0  ;;  %v6472_v6 = vpop.f32.mrb[146].mxu1 }
 0x218   :  { %7571 = vst [vmem:[#allocation98_spill] sm:$0xff] %v6470_v59  ;;  %7572 = vst [vmem:[#allocation99_spill] sm:$0xff] %v6472_v6  ;;  %v4582_v30 = vpop.f32.mrb[147].mxu0  ;;  %v4762_v5 = vpop.f32.mrb[147].mxu1 }
 0x219   :  { %v5277_v5 = vld [vmem:[%s7357_s0 + $0x340] sm:$0xff]  }
 0x21a   :  { %4884 = vmatmul.mubr.bf16.gmra.mrb[252].mxu0 %v5275_v29  ;;  %5064 = vmatmul.mubr.bf16.gmra.mrb[252].mxu1 %v5276_v11  ;;  %v5278_v30 = vld [vmem:[%s7357_s0 + $0x484] sm:$0xff]  }
 0x21b   :  { %4887 = vmatprep.mubr.msk.bf16.mxu0 %vm5315_vm0, %v7484_v47  ;;  %5067 = vmatprep.mubr.msk.bf16.mxu1 %vm5315_vm0, %v7484_v47 }
 0x21d   :  { %v6480_v54 = vpop.f32.mrb[148].mxu0  ;;  %v6482_v42 = vpop.f32.mrb[148].mxu1 }
 0x21e   :  { %7573 = vst [vmem:[#allocation100_spill] sm:$0xff] %v6480_v54  ;;  %7574 = vst [vmem:[#allocation101_spill] sm:$0xff] %v6482_v42  ;;  %v4585_v23 = vpop.f32.mrb[149].mxu0  ;;  %v4765_v18 = vpop.f32.mrb[149].mxu1 }
 0x21f   :  { %v6492_v29 = vpop.f32.mrb[150].mxu0  ;;  %v6494_v11 = vpop.f32.mrb[150].mxu1 }
 0x220   :  { %7575 = vst [vmem:[#allocation102_spill] sm:$0xff] %v6492_v29  ;;  %7576 = vst [vmem:[#allocation103_spill] sm:$0xff] %v6494_v11  ;;  %v4586_v6 = vpop.f32.mrb[151].mxu0  ;;  %v4766_v59 = vpop.f32.mrb[151].mxu1 }
 0x221   :  { %v5279_v59 = vld [vmem:[%s7357_s0 + $0x348] sm:$0xff]  }
 0x222   :  { %4888 = vmatmul.mubr.bf16.gmra.mrb[0].mxu0 %v5277_v5  ;;  %5068 = vmatmul.mubr.bf16.gmra.mrb[0].mxu1 %v5278_v30  ;;  %v5280_v6 = vld [vmem:[%s7357_s0 + $0x48c] sm:$0xff]  }
 0x223   :  { %4891 = vmatprep.mubr.msk.bf16.mxu0 %vm5315_vm0, %v7484_v47  ;;  %5071 = vmatprep.mubr.msk.bf16.mxu1 %vm5315_vm0, %v7484_v47 }
 0x225   :  { %v6502_v18 = vpop.f32.mrb[152].mxu0  ;;  %v6504_v23 = vpop.f32.mrb[152].mxu1 }
 0x226   :  { %7577 = vst [vmem:[#allocation104_spill] sm:$0xff] %v6502_v18  ;;  %7578 = vst [vmem:[#allocation105_spill] sm:$0xff] %v6504_v23  ;;  %v4589_v42 = vpop.f32.mrb[153].mxu0  ;;  %v4769_v54 = vpop.f32.mrb[153].mxu1 }
 0x227   :  { %v6514_v5 = vpop.f32.mrb[154].mxu0  ;;  %v6516_v30 = vpop.f32.mrb[154].mxu1 }
 0x228   :  { %7579 = vst [vmem:[#allocation106_spill] sm:$0xff] %v6514_v5  ;;  %7580 = vst [vmem:[#allocation107_spill] sm:$0xff] %v6516_v30  ;;  %v4590_v11 = vpop.f32.mrb[155].mxu0  ;;  %v4770_v29 = vpop.f32.mrb[155].mxu1 }
 0x229   :  { %v5281_v29 = vld [vmem:[%s7357_s0 + $0x350] sm:$0xff]  }
 0x22a   :  { %4892 = vmatmul.mubr.bf16.gmra.mrb[4].mxu0 %v5279_v59  ;;  %5072 = vmatmul.mubr.bf16.gmra.mrb[4].mxu1 %v5280_v6  ;;  %v5282_v11 = vld [vmem:[%s7357_s0 + $0x494] sm:$0xff]  }
 0x22b   :  { %4895 = vmatprep.mubr.msk.bf16.mxu0 %vm5315_vm0, %v7484_v47  ;;  %5075 = vmatprep.mubr.msk.bf16.mxu1 %vm5315_vm0, %v7484_v47 }
 0x22d   :  { %v6524_v54 = vpop.f32.mrb[156].mxu0  ;;  %v6526_v42 = vpop.f32.mrb[156].mxu1 }
 0x22e   :  { %7581 = vst [vmem:[#allocation108_spill] sm:$0xff] %v6524_v54  ;;  %7582 = vst [vmem:[#allocation109_spill] sm:$0xff] %v6526_v42  ;;  %v4593_v23 = vpop.f32.mrb[157].mxu0  ;;  %v4773_v18 = vpop.f32.mrb[157].mxu1 }
 0x22f   :  { %v6536_v59 = vpop.f32.mrb[158].mxu0  ;;  %v6538_v6 = vpop.f32.mrb[158].mxu1 }
 0x230   :  { %7583 = vst [vmem:[#allocation110_spill] sm:$0xff] %v6536_v59  ;;  %7584 = vst [vmem:[#allocation111_spill] sm:$0xff] %v6538_v6  ;;  %v4594_v30 = vpop.f32.mrb[159].mxu0  ;;  %v4774_v5 = vpop.f32.mrb[159].mxu1 }
 0x231   :  { %v5283_v5 = vld [vmem:[%s7357_s0 + $0x358] sm:$0xff]  }
 0x232   :  { %4896 = vmatmul.mubr.bf16.gmra.mrb[8].mxu0 %v5281_v29  ;;  %5076 = vmatmul.mubr.bf16.gmra.mrb[8].mxu1 %v5282_v11  ;;  %v5284_v30 = vld [vmem:[%s7357_s0 + $0x49c] sm:$0xff]  }
 0x233   :  { %4899 = vmatprep.mubr.msk.bf16.mxu0 %vm5315_vm0, %v7484_v47  ;;  %5079 = vmatprep.mubr.msk.bf16.mxu1 %vm5315_vm0, %v7484_v47 }
 0x235   :  { %v6546_v18 = vpop.f32.mrb[160].mxu0  ;;  %v6548_v23 = vpop.f32.mrb[160].mxu1 }
 0x236   :  { %7585 = vst [vmem:[#allocation112_spill] sm:$0xff] %v6546_v18  ;;  %7586 = vst [vmem:[#allocation113_spill] sm:$0xff] %v6548_v23  ;;  %v4597_v42 = vpop.f32.mrb[161].mxu0  ;;  %v4777_v54 = vpop.f32.mrb[161].mxu1 }
 0x237   :  { %v761_v29 = vpop.f32.mrb[162].mxu0  ;;  %v1447_v11 = vpop.f32.mrb[162].mxu1 }
 0x238   :  { %v4598_v35 = vpop.f32.mrb[163].mxu0  ;;  %v4778_v6 = vpop.f32.mrb[163].mxu1 }
 0x239   :  { %v5285_v35 = vld [vmem:[%s7357_s0 + $0x360] sm:$0xff]  }
 0x23a   :  { %4900 = vmatmul.mubr.bf16.gmra.mrb[12].mxu0 %v5283_v5  ;;  %5080 = vmatmul.mubr.bf16.gmra.mrb[12].mxu1 %v5284_v30  ;;  %v5286_v6 = vld [vmem:[%s7357_s0 + $0x4a4] sm:$0xff]   ;;  %v6574_v5 = vld [vmem:[%s7358_s2] ss:$0 sm:$0xff] }
 0x23b   :  { %4903 = vmatprep.mubr.msk.bf16.mxu0 %vm5315_vm0, %v7484_v47  ;;  %5083 = vmatprep.mubr.msk.bf16.mxu1 %vm5315_vm0, %v7484_v47 }
 0x23d   :  { %v1891_v54 = vpop.f32.mrb[164].mxu0  ;;  %v2658_v42 = vpop.f32.mrb[164].mxu1 }
 0x23e   :  { %v2217_v23 = vmax.f32 %v7587_v0, %v1891_v54  ;;  %v4797_v18 = vpop.f32.mrb[165].mxu0  ;;  %v4977_v59 = vpop.f32.mrb[165].mxu1 }
 0x23f   :  { %v1894_v30 = vpop.f32.mrb[166].mxu0  ;;  %v2661_v29 = vpop.f32.mrb[166].mxu1 }
 0x240   :  { %v2984_v11 = vmax.f32 %v2217_v23, %v2658_v42  ;;  %v2218_v1 = vmax.f32 %v7588_v63, %v1894_v30  ;;  %v4798_v0 = vpop.f32.mrb[167].mxu0  ;;  %v4978_v59 = vpop.f32.mrb[167].mxu1  ;;  %v5287_v63 = vld [vmem:[%s7357_s0 + $0x368] sm:$0xff]  }
 0x242   :  { %v3072_v18 = vadd.f32 %v6574_v5, %v2984_v11  ;;  %v2985_v54 = vmax.f32 %v2218_v1, %v2661_v29  ;;  %4904 = vmatmul.mubr.bf16.gmra.mrb[16].mxu0 %v5285_v35  ;;  %5084 = vmatmul.mubr.bf16.gmra.mrb[16].mxu1 %v5286_v6  ;;  %v7589_v11 = vmax.f32 %v5688_v12, %v5690_v13  ;;  %v5288_v1 = vld [vmem:[%s7357_s0 + $0x4ac] sm:$0xff]  }
 0x243   :  { %4907 = vmatprep.mubr.msk.bf16.mxu0 %vm5315_vm0, %v7484_v47  ;;  %5087 = vmatprep.mubr.msk.bf16.mxu1 %vm5315_vm0, %v7484_v47  ;;  %v7590_v13 = vmax.f32 %v5700_v19, %v5702_v20 }
 0x244   :  { %v3153_v40 = vmax.f32 %v3072_v18, 0.0  ;;  %v3073_v23 = vadd.f32 %v6574_v5, %v2985_v54 }
 0x245   :  { %v1899_v42 = vpop.f32.mrb[168].mxu0  ;;  %v2666_v7 = vpop.f32.mrb[168].mxu1 }
 0x246   :  { %v4142_v8 = vpack.c.bf16 %v3153_v40, %v3153_v40  ;;  %v3154_v30 = vmax.f32 %v3073_v23, 0.0  ;;  %v2219_v29 = vmax.f32 %v7589_v11, %v1899_v42  ;;  %v4801_v35 = vpop.f32.mrb[169].mxu0  ;;  %v4981_v6 = vpop.f32.mrb[169].mxu1 }
 0x247   :  { %v1902_v0 = vpop.f32.mrb[170].mxu0  ;;  %v2669_v59 = vpop.f32.mrb[170].mxu1  ;;  %v7591_v35 = vmax.f32 %v5710_v24, %v5712_v25  ;;  %v7592_v25 = vmax.f32 %v5722_v31, %v5724_v32 }
 0x248   :  { %3560 = vst.msk [vmem:[%s7359_s3] sm:$0xf] %vm3559_vm1, %v4142_v8  ;;  %v4143_v40 = vpack.c.bf16 %v3154_v30, %v3154_v30  ;;  %v2986_v12 = vmax.f32 %v2219_v29, %v2666_v7  ;;  %v2220_v18 = vmax.f32 %v7590_v13, %v1902_v0  ;;  %v4802_v54 = vpop.f32.mrb[171].mxu0  ;;  %v4982_v23 = vpop.f32.mrb[171].mxu1 }
 0x24a   :  { %3561 = vst.msk [vmem:[%s7359_s3 + $0x4] sm:$0xf] %vm3559_vm1, %v4143_v40  ;;  %v3074_v42 = vadd.f32 %v6574_v5, %v2986_v12  ;;  %v2987_v11 = vmax.f32 %v2220_v18, %v2669_v59  ;;  %4908 = vmatmul.mubr.bf16.gmra.mrb[20].mxu0 %v5287_v63  ;;  %5088 = vmatmul.mubr.bf16.gmra.mrb[20].mxu1 %v5288_v1  ;;  %v5289_v1 = vld [vmem:[%s7357_s0 + $0x370] sm:$0xff]  }
 0x24b   :  { %4911 = vmatprep.mubr.msk.bf16.mxu0 %vm5315_vm0, %v7484_v47  ;;  %5091 = vmatprep.mubr.msk.bf16.mxu1 %vm5315_vm0, %v7484_v47  ;;  %v5290_v59 = vld [vmem:[%s7357_s0 + $0x4b4] sm:$0xff]  }
 0x24c   :  { %v3155_v19 = vmax.f32 %v3074_v42, 0.0  ;;  %v3075_v20 = vadd.f32 %v6574_v5, %v2987_v11 }
 0x24d   :  { %v1907_v7 = vpop.f32.mrb[172].mxu0  ;;  %v2674_v8 = vpop.f32.mrb[172].mxu1 }
 0x24e   :  { %v4144_v30 = vpack.c.bf16 %v3155_v19, %v3155_v19  ;;  %v3156_v29 = vmax.f32 %v3075_v20, 0.0  ;;  %v2221_v6 = vmax.f32 %v7591_v35, %v1907_v7  ;;  %v4805_v0 = vpop.f32.mrb[173].mxu0  ;;  %v4985_v63 = vpop.f32.mrb[173].mxu1 }
 0x24f   :  { %v1910_v40 = vpop.f32.mrb[174].mxu0  ;;  %v2677_v12 = vpop.f32.mrb[174].mxu1  ;;  %v5291_v0 = vld [vmem:[%s7357_s0 + $0x378] sm:$0xff]  }
 0x250   :  { %3562 = vst.msk [vmem:[%s7359_s3 + $0x8] sm:$0xf] %vm3559_vm1, %v4144_v30  ;;  %v4145_v13 = vpack.c.bf16 %v3156_v29, %v3156_v29  ;;  %v2988_v24 = vmax.f32 %v2221_v6, %v2674_v8  ;;  %v2222_v18 = vmax.f32 %v7592_v25, %v1910_v40  ;;  %v4806_v54 = vpop.f32.mrb[175].mxu0  ;;  %v4986_v23 = vpop.f32.mrb[175].mxu1  ;;  %v7593_v30 = vmax.f32 %v5732_v36, %v5734_v37  ;;  %v5292_v63 = vld [vmem:[%s7357_s0 + $0x4bc] sm:$0xff]  }
 0x251   :  { %v7594_v37 = vmax.f32 %v5744_v43, %v5746_v44 }
 0x252   :  { %3563 = vst.msk [vmem:[%s7359_s3 + $0xc] sm:$0xf] %vm3559_vm1, %v4145_v13  ;;  %v3076_v42 = vadd.f32 %v6574_v5, %v2988_v24  ;;  %v2989_v11 = vmax.f32 %v2222_v18, %v2677_v12  ;;  %4912 = vmatmul.mubr.bf16.gmra.mrb[24].mxu0 %v5289_v1  ;;  %5092 = vmatmul.mubr.bf16.gmra.mrb[24].mxu1 %v5290_v59 }
 0x253   :  { %4915 = vmatprep.mubr.msk.bf16.mxu0 %vm5315_vm0, %v7484_v47  ;;  %5095 = vmatprep.mubr.msk.bf16.mxu1 %vm5315_vm0, %v7484_v47 }
 0x254   :  { %v3157_v31 = vmax.f32 %v3076_v42, 0.0  ;;  %v3077_v32 = vadd.f32 %v6574_v5, %v2989_v11 }
 0x255   :  { %v1915_v19 = vpop.f32.mrb[176].mxu0  ;;  %v2682_v20 = vpop.f32.mrb[176].mxu1 }
 0x256   :  { %v4146_v7 = vpack.c.bf16 %v3157_v31, %v3157_v31  ;;  %v3158_v8 = vmax.f32 %v3077_v32, 0.0  ;;  %v2223_v29 = vmax.f32 %v7593_v30, %v1915_v19  ;;  %v4809_v35 = vpop.f32.mrb[177].mxu0  ;;  %v4989_v6 = vpop.f32.mrb[177].mxu1  ;;  %v7595_v31 = vmax.f32 %v5754_v48, %v5756_v49 }
 0x257   :  { %v1918_v1 = vpop.f32.mrb[178].mxu0  ;;  %v2685_v59 = vpop.f32.mrb[178].mxu1  ;;  %v7596_v49 = vmax.f32 %v5766_v55, %v5768_v56 }
 0x258   :  { %3564 = vst.msk [vmem:[%s7359_s3 + $0x10] sm:$0xf] %vm3559_vm1, %v4146_v7  ;;  %v4147_v40 = vpack.c.bf16 %v3158_v8, %v3158_v8  ;;  %v2990_v36 = vmax.f32 %v2223_v29, %v2682_v20  ;;  %v2224_v12 = vmax.f32 %v7594_v37, %v1918_v1  ;;  %v4810_v13 = vpop.f32.mrb[179].mxu0  ;;  %v4990_v24 = vpop.f32.mrb[179].mxu1  ;;  %v5293_v7 = vld [vmem:[%s7357_s0 + $0x380] sm:$0xff]  }
 0x259   :  { %v5294_v8 = vld [vmem:[%s7357_s0 + $0x4c4] sm:$0xff]   ;;  %v7597_v13 = vmax.f32 %v5776_v60, %v5778_v61  ;;  %v7598_v61 = vmax.f32 %v5788_v9, %v5790_v10 }
 0x25a   :  { %3565 = vst.msk [vmem:[%s7359_s3 + $0x14] sm:$0xf] %vm3559_vm1, %v4147_v40  ;;  %v3078_v25 = vadd.f32 %v6574_v5, %v2990_v36  ;;  %v2991_v18 = vmax.f32 %v2224_v12, %v2685_v59  ;;  %4916 = vmatmul.mubr.bf16.gmra.mrb[28].mxu0 %v5291_v0  ;;  %5096 = vmatmul.mubr.bf16.gmra.mrb[28].mxu1 %v5292_v63 }
 0x25b   :  { %4919 = vmatprep.mubr.msk.bf16.mxu0 %vm5315_vm0, %v7484_v47  ;;  %5099 = vmatprep.mubr.msk.bf16.mxu1 %vm5315_vm0, %v7484_v47 }
 0x25c   :  { %v3159_v43 = vmax.f32 %v3078_v25, 0.0  ;;  %v3079_v44 = vadd.f32 %v6574_v5, %v2991_v18 }
 0x25d   :  { %v1923_v54 = vpop.f32.mrb[180].mxu0  ;;  %v2690_v23 = vpop.f32.mrb[180].mxu1 }
 0x25e   :  { %v4148_v42 = vpack.c.bf16 %v3159_v43, %v3159_v43  ;;  %v3160_v11 = vmax.f32 %v3079_v44, 0.0  ;;  %v2225_v32 = vmax.f32 %v7595_v31, %v1923_v54  ;;  %v4813_v19 = vpop.f32.mrb[181].mxu0  ;;  %v4993_v20 = vpop.f32.mrb[181].mxu1  ;;  %v5295_v43 = vld [vmem:[%s7357_s0 + $0x388] sm:$0xff]  }
 0x25f   :  { %v1926_v30 = vpop.f32.mrb[182].mxu0  ;;  %v2693_v29 = vpop.f32.mrb[182].mxu1  ;;  %v5296_v44 = vld [vmem:[%s7357_s0 + $0x4cc] sm:$0xff]  }
 0x260   :  { %3566 = vst.msk [vmem:[%s7359_s3 + $0x18] sm:$0xf] %vm3559_vm1, %v4148_v42  ;;  %v4149_v35 = vpack.c.bf16 %v3160_v11, %v3160_v11  ;;  %v2992_v48 = vmax.f32 %v2225_v32, %v2690_v23  ;;  %v2226_v6 = vmax.f32 %v7596_v49, %v1926_v30  ;;  %v4814_v0 = vpop.f32.mrb[183].mxu0  ;;  %v4994_v63 = vpop.f32.mrb[183].mxu1 }
 0x261   :  { %v5297_v0 = vld [vmem:[%s7357_s0 + $0x390] sm:$0xff]  }
 0x262   :  { %3567 = vst.msk [vmem:[%s7359_s3 + $0x1c] sm:$0xf] %vm3559_vm1, %v4149_v35  ;;  %v3080_v1 = vadd.f32 %v6574_v5, %v2992_v48  ;;  %v2993_v59 = vmax.f32 %v2226_v6, %v2693_v29  ;;  %4920 = vmatmul.mubr.bf16.gmra.mrb[32].mxu0 %v5293_v7  ;;  %5100 = vmatmul.mubr.bf16.gmra.mrb[32].mxu1 %v5294_v8  ;;  %v5298_v63 = vld [vmem:[%s7357_s0 + $0x4d4] sm:$0xff]  }
 0x263   :  { %4923 = vmatprep.mubr.msk.bf16.mxu0 %vm5315_vm0, %v7484_v47  ;;  %5103 = vmatprep.mubr.msk.bf16.mxu1 %vm5315_vm0, %v7484_v47  ;;  %v7599_v35 = vmax.f32 %v5798_v17, %v5800_v21  ;;  %v7600_v21 = vmax.f32 %v5810_v33, %v5812_v34 }
 0x264   :  { %v3161_v55 = vmax.f32 %v3080_v1, 0.0  ;;  %v3081_v56 = vadd.f32 %v6574_v5, %v2993_v59 }
 0x265   :  { %v1931_v40 = vpop.f32.mrb[184].mxu0  ;;  %v2698_v36 = vpop.f32.mrb[184].mxu1 }
 0x266   :  { %v4150_v37 = vpack.c.bf16 %v3161_v55, %v3161_v55  ;;  %v3162_v12 = vmax.f32 %v3081_v56, 0.0  ;;  %v2227_v24 = vmax.f32 %v7597_v13, %v1931_v40  ;;  %v4817_v25 = vpop.f32.mrb[185].mxu0  ;;  %v4997_v18 = vpop.f32.mrb[185].mxu1 }
 0x267   :  { %v1934_v54 = vpop.f32.mrb[186].mxu0  ;;  %v2701_v23 = vpop.f32.mrb[186].mxu1 }
 0x268   :  { %3568 = vst.msk [vmem:[%s7359_s3 + $0x20] sm:$0xf] %vm3559_vm1, %v4150_v37  ;;  %v4151_v42 = vpack.c.bf16 %v3162_v12, %v3162_v12  ;;  %v2994_v60 = vmax.f32 %v2227_v24, %v2698_v36  ;;  %v2228_v11 = vmax.f32 %v7598_v61, %v1934_v54  ;;  %v4818_v31 = vpop.f32.mrb[187].mxu0  ;;  %v4998_v32 = vpop.f32.mrb[187].mxu1 }
 0x26a   :  { %3569 = vst.msk [vmem:[%s7359_s3 + $0x24] sm:$0xf] %vm3559_vm1, %v4151_v42  ;;  %v3082_v19 = vadd.f32 %v6574_v5, %v2994_v60  ;;  %v2995_v20 = vmax.f32 %v2228_v11, %v2701_v23  ;;  %4924 = vmatmul.mubr.bf16.gmra.mrb[36].mxu0 %v5295_v43  ;;  %5104 = vmatmul.mubr.bf16.gmra.mrb[36].mxu1 %v5296_v44  ;;  %v5299_v42 = vld [vmem:[%s7357_s0 + $0x398] sm:$0xff]  }
 0x26b   :  { %4927 = vmatprep.mubr.msk.bf16.mxu0 %vm5315_vm0, %v7484_v47  ;;  %5107 = vmatprep.mubr.msk.bf16.mxu1 %vm5315_vm0, %v7484_v47  ;;  %v7601_v43 = vmax.f32 %v5820_v41, %v5822_v45  ;;  %v5300_v60 = vld [vmem:[%s7357_s0 + $0x4dc] sm:$0xff]   ;;  %v7602_v45 = vmax.f32 %v5832_v57, %v5834_v58 }
 0x26c   :  { %v3163_v9 = vmax.f32 %v3082_v19, 0.0  ;;  %v3083_v10 = vadd.f32 %v6574_v5, %v2995_v20 }
 0x26d   :  { %v1939_v7 = vpop.f32.mrb[188].mxu0  ;;  %v2706_v8 = vpop.f32.mrb[188].mxu1 }
 0x26e   :  { %v4152_v30 = vpack.c.bf16 %v3163_v9, %v3163_v9  ;;  %v3164_v29 = vmax.f32 %v3083_v10, 0.0  ;;  %v2229_v48 = vmax.f32 %v7599_v35, %v1939_v7  ;;  %v4821_v49 = vpop.f32.mrb[189].mxu0  ;;  %v5001_v6 = vpop.f32.mrb[189].mxu1  ;;  %v7603_v35 = vmax.f32 %v5842_v4, %v5844_v14 }
 0x26f   :  { %v1942_v1 = vpop.f32.mrb[190].mxu0  ;;  %v2709_v59 = vpop.f32.mrb[190].mxu1  ;;  %v7604_v14 = vmax.f32 %v5854_v38, %v5856_v39 }
 0x270   :  { %3570 = vst.msk [vmem:[%s7359_s3 + $0x28] sm:$0xf] %vm3559_vm1, %v4152_v30  ;;  %v4153_v55 = vpack.c.bf16 %v3164_v29, %v3164_v29  ;;  %v2996_v17 = vmax.f32 %v2229_v48, %v2706_v8  ;;  %v2230_v56 = vmax.f32 %v7600_v21, %v1942_v1  ;;  %v4822_v40 = vpop.f32.mrb[191].mxu0  ;;  %v5002_v36 = vpop.f32.mrb[191].mxu1 }
 0x272   :  { %3571 = vst.msk [vmem:[%s7359_s3 + $0x2c] sm:$0xf] %vm3559_vm1, %v4153_v55  ;;  %v3084_v37 = vadd.f32 %v6574_v5, %v2996_v17  ;;  %v2997_v12 = vmax.f32 %v2230_v56, %v2709_v59  ;;  %4928 = vmatmul.mubr.bf16.gmra.mrb[40].mxu0 %v5297_v0  ;;  %5108 = vmatmul.mubr.bf16.gmra.mrb[40].mxu1 %v5298_v63  ;;  %v5301_v0 = vld [vmem:[%s7357_s0 + $0x3a0] sm:$0xff]  }
 0x273   :  { %4931 = vmatprep.mubr.msk.bf16.mxu0 %vm5315_vm0, %v7484_v47  ;;  %5111 = vmatprep.mubr.msk.bf16.mxu1 %vm5315_vm0, %v7484_v47  ;;  %v5302_v63 = vld [vmem:[%s7357_s0 + $0x4e4] sm:$0xff]  }
 0x274   :  { %v3165_v33 = vmax.f32 %v3084_v37, 0.0  ;;  %v3085_v34 = vadd.f32 %v6574_v5, %v2997_v12 }
 0x275   :  { %v1947_v13 = vpop.f32.mrb[192].mxu0  ;;  %v2714_v24 = vpop.f32.mrb[192].mxu1 }
 0x276   :  { %v4154_v25 = vpack.c.bf16 %v3165_v33, %v3165_v33  ;;  %v3166_v18 = vmax.f32 %v3085_v34, 0.0  ;;  %v2231_v44 = vmax.f32 %v7601_v43, %v1947_v13  ;;  %v4825_v54 = vpop.f32.mrb[193].mxu0  ;;  %v5005_v23 = vpop.f32.mrb[193].mxu1  ;;  %v7605_v13 = vmax.f32 %v5864_v52, %v5866_v62  ;;  %v5303_v43 = vld [vmem:[%s7357_s0 + $0x3a8] sm:$0xff]  }
 0x277   :  { %v1950_v61 = vpop.f32.mrb[194].mxu0  ;;  %v2717_v11 = vpop.f32.mrb[194].mxu1  ;;  %v7606_v62 = vmax.f32 %v5876_v46, %v5878_v50 }
 0x278   :  { %3572 = vst.msk [vmem:[%s7359_s3 + $0x30] sm:$0xf] %vm3559_vm1, %v4154_v25  ;;  %v4155_v31 = vpack.c.bf16 %v3166_v18, %v3166_v18  ;;  %v2998_v41 = vmax.f32 %v2231_v44, %v2714_v24  ;;  %v2232_v32 = vmax.f32 %v7602_v45, %v1950_v61  ;;  %v4826_v19 = vpop.f32.mrb[195].mxu0  ;;  %v5006_v20 = vpop.f32.mrb[195].mxu1  ;;  %v5304_v44 = vld [vmem:[%s7357_s0 + $0x4ec] sm:$0xff]  }
 0x27a   :  { %3573 = vst.msk [vmem:[%s7359_s3 + $0x34] sm:$0xf] %vm3559_vm1, %v4155_v31  ;;  %v3086_v9 = vadd.f32 %v6574_v5, %v2998_v41  ;;  %v2999_v10 = vmax.f32 %v2232_v32, %v2717_v11  ;;  %4932 = vmatmul.mubr.bf16.gmra.mrb[44].mxu0 %v5299_v42  ;;  %5112 = vmatmul.mubr.bf16.gmra.mrb[44].mxu1 %v5300_v60 }
 0x27b   :  { %4935 = vmatprep.mubr.msk.bf16.mxu0 %vm5315_vm0, %v7484_v47  ;;  %5115 = vmatprep.mubr.msk.bf16.mxu1 %vm5315_vm0, %v7484_v47 }
 0x27c   :  { %v3167_v57 = vmax.f32 %v3086_v9, 0.0  ;;  %v3087_v58 = vadd.f32 %v6574_v5, %v2999_v10  ;;  %v7607_v9 = vmax.f32 %v5886_v15, %v5888_v27  ;;  %v7608_v15 = vmax.f32 %v5898_v26, %v5900_v2 }
 0x27d   :  { %v1955_v7 = vpop.f32.mrb[196].mxu0  ;;  %v2722_v8 = vpop.f32.mrb[196].mxu1 }
 0x27e   :  { %v4156_v30 = vpack.c.bf16 %v3167_v57, %v3167_v57  ;;  %v3168_v29 = vmax.f32 %v3087_v58, 0.0  ;;  %v2233_v48 = vmax.f32 %v7603_v35, %v1955_v7  ;;  %v4829_v49 = vpop.f32.mrb[197].mxu0  ;;  %v5009_v6 = vpop.f32.mrb[197].mxu1  ;;  %v5305_v7 = vld [vmem:[%s7357_s0 + $0x3b0] sm:$0xff]  }
 0x27f   :  { %v1958_v1 = vpop.f32.mrb[198].mxu0  ;;  %v2725_v59 = vpop.f32.mrb[198].mxu1 }
 0x280   :  { %3574 = vst.msk [vmem:[%s7359_s3 + $0x38] sm:$0xf] %vm3559_vm1, %v4156_v30  ;;  %v4157_v55 = vpack.c.bf16 %v3168_v29, %v3168_v29  ;;  %v3000_v4 = vmax.f32 %v2233_v48, %v2722_v8  ;;  %v2234_v17 = vmax.f32 %v7604_v14, %v1958_v1  ;;  %v4830_v21 = vpop.f32.mrb[199].mxu0  ;;  %v5010_v56 = vpop.f32.mrb[199].mxu1  ;;  %v5306_v8 = vld [vmem:[%s7357_s0 + $0x4f4] sm:$0xff]   ;;  %v7609_v14 = vmax.f32 %v5908_v3, %v5910_v22 }
 0x281   :  { %v7610_v3 = vmax.f32 %v5920_v51, %v5922_v53 }
 0x282   :  { %3575 = vst.msk [vmem:[%s7359_s3 + $0x3c] sm:$0xf] %vm3559_vm1, %v4157_v55  ;;  %v3088_v40 = vadd.f32 %v6574_v5, %v3000_v4  ;;  %v3001_v36 = vmax.f32 %v2234_v17, %v2725_v59  ;;  %4936 = vmatmul.mubr.bf16.gmra.mrb[48].mxu0 %v5301_v0  ;;  %5116 = vmatmul.mubr.bf16.gmra.mrb[48].mxu1 %v5302_v63 }
 0x283   :  { %4939 = vmatprep.mubr.msk.bf16.mxu0 %vm5315_vm0, %v7484_v47  ;;  %5119 = vmatprep.mubr.msk.bf16.mxu1 %vm5315_vm0, %v7484_v47 }
 0x284   :  { %v3169_v38 = vmax.f32 %v3088_v40, 0.0  ;;  %v3089_v39 = vadd.f32 %v6574_v5, %v3001_v36  ;;  %v5307_v40 = vld [vmem:[%s7357_s0 + $0x3b8] sm:$0xff]  }
 0x285   :  { %v1963_v37 = vpop.f32.mrb[200].mxu0  ;;  %v2730_v12 = vpop.f32.mrb[200].mxu1  ;;  %v5308_v36 = vld [vmem:[%s7357_s0 + $0x4fc] sm:$0xff]  }
 0x286   :  { %v4158_v33 = vpack.c.bf16 %v3169_v38, %v3169_v38  ;;  %v3170_v34 = vmax.f32 %v3089_v39, 0.0  ;;  %v2235_v24 = vmax.f32 %v7605_v13, %v1963_v37  ;;  %v4833_v25 = vpop.f32.mrb[201].mxu0  ;;  %v5013_v18 = vpop.f32.mrb[201].mxu1 }
 0x287   :  { %v1966_v54 = vpop.f32.mrb[202].mxu0  ;;  %v2733_v23 = vpop.f32.mrb[202].mxu1 }
 0x288   :  { %3576 = vst.msk [vmem:[%s7359_s3 + $0x40] sm:$0xf] %vm3559_vm1, %v4158_v33  ;;  %v4159_v42 = vpack.c.bf16 %v3170_v34, %v3170_v34  ;;  %v3002_v52 = vmax.f32 %v2235_v24, %v2730_v12  ;;  %v2236_v60 = vmax.f32 %v7606_v62, %v1966_v54  ;;  %v4834_v61 = vpop.f32.mrb[203].mxu0  ;;  %v5014_v11 = vpop.f32.mrb[203].mxu1  ;;  %v7611_v54 = vmax.f32 %v5930_v16, %v5932_v28  ;;  %v5309_v62 = vld [vmem:[%s7357_s0 + $0x3c0] sm:$0xff]  }
 0x289   :  { %v7612_v16 = vld [vmem:[#allocation2_spill] sm:$0xff] }
 0x28a   :  { %3577 = vst.msk [vmem:[%s7359_s3 + $0x44] sm:$0xf] %vm3559_vm1, %v4159_v42  ;;  %v3090_v31 = vadd.f32 %v6574_v5, %v3002_v52  ;;  %v3003_v41 = vmax.f32 %v2236_v60, %v2733_v23  ;;  %4940 = vmatmul.mubr.bf16.gmra.mrb[52].mxu0 %v5303_v43  ;;  %5120 = vmatmul.mubr.bf16.gmra.mrb[52].mxu1 %v5304_v44  ;;  %v5310_v60 = vld [vmem:[%s7357_s0 + $0x504] sm:$0xff]  }
 0x28b   :  { %4943 = vmatprep.mubr.msk.bf16.mxu0 %vm5315_vm0, %v7484_v47  ;;  %5123 = vmatprep.mubr.msk.bf16.mxu1 %vm5315_vm0, %v7484_v47 }
 0x28c   :  { %v3171_v46 = vmax.f32 %v3090_v31, 0.0  ;;  %v3091_v50 = vadd.f32 %v6574_v5, %v3003_v41  ;;  %v7613_v41 = vld [vmem:[#allocation3_spill] sm:$0xff] }
 0x28d   :  { %v1971_v45 = vpop.f32.mrb[204].mxu0  ;;  %v2738_v32 = vpop.f32.mrb[204].mxu1 }
 0x28e   :  { %v4160_v19 = vpack.c.bf16 %v3171_v46, %v3171_v46  ;;  %v3172_v20 = vmax.f32 %v3091_v50, 0.0  ;;  %v2237_v10 = vmax.f32 %v7607_v9, %v1971_v45  ;;  %v4837_v57 = vpop.f32.mrb[205].mxu0  ;;  %v5017_v58 = vpop.f32.mrb[205].mxu1  ;;  %v7614_v46 = vmax.f32 %v7612_v16, %v7613_v41  ;;  %v7627_v41 = vld [vmem:[#allocation12_spill] sm:$0xff] }
 0x28f   :  { %v1974_v30 = vpop.f32.mrb[206].mxu0  ;;  %v2741_v29 = vpop.f32.mrb[206].mxu1 }
 0x290   :  { %3578 = vst.msk [vmem:[%s7359_s3 + $0x48] sm:$0xf] %vm3559_vm1, %v4160_v19  ;;  %v4161_v35 = vpack.c.bf16 %v3172_v20, %v3172_v20  ;;  %v3004_v27 = vmax.f32 %v2237_v10, %v2738_v32  ;;  %v2238_v48 = vmax.f32 %v7608_v15, %v1974_v30  ;;  %v4838_v49 = vpop.f32.mrb[207].mxu0  ;;  %v5018_v6 = vpop.f32.mrb[207].mxu1 }
 0x292   :  { %3579 = vst.msk [vmem:[%s7359_s3 + $0x4c] sm:$0xf] %vm3559_vm1, %v4161_v35  ;;  %v3092_v0 = vadd.f32 %v6574_v5, %v3004_v27  ;;  %v3005_v63 = vmax.f32 %v2238_v48, %v2741_v29  ;;  %4944 = vmatmul.mubr.bf16.gmra.mrb[56].mxu0 %v5305_v7  ;;  %5124 = vmatmul.mubr.bf16.gmra.mrb[56].mxu1 %v5306_v8  ;;  %v5311_v7 = vld [vmem:[%s7357_s0 + $0x3c8] ss:$0 sps:$4 sm:$0xff]   ;;  %v7615_v29 = vld [vmem:[#allocation4_spill] sm:$0xff]  ;;  %v7616_v35 = vld [vmem:[#allocation5_spill] sm:$0xff] }
 0x293   :  { %4947 = vmatprep.mubr.msk.bf16.mxu0 %vm5315_vm0, %v7484_v47  ;;  %5127 = vmatprep.mubr.msk.bf16.mxu1 %vm5315_vm0, %v7484_v47  ;;  %v7617_v27 = vmax.f32 %v7615_v29, %v7616_v35 }
 0x294   :  { %v3173_v2 = vmax.f32 %v3092_v0, 0.0  ;;  %v3093_v26 = vadd.f32 %v6574_v5, %v3005_v63 }
 0x295   :  { %v1979_v1 = vpop.f32.mrb[208].mxu0  ;;  %v2746_v59 = vpop.f32.mrb[208].mxu1 }
 0x296   :  { %v4162_v55 = vpack.c.bf16 %v3173_v2, %v3173_v2  ;;  %v3174_v4 = vmax.f32 %v3093_v26, 0.0  ;;  %v2239_v17 = vmax.f32 %v7609_v14, %v1979_v1  ;;  %v4841_v21 = vpop.f32.mrb[209].mxu0  ;;  %v5021_v56 = vpop.f32.mrb[209].mxu1  ;;  %v7618_v26 = vld [vmem:[#allocation6_spill] sm:$0xff]  ;;  %v7619_v1 = vld [vmem:[#allocation7_spill] sm:$0xff] }
 0x297   :  { %v1982_v38 = vpop.f32.mrb[210].mxu0  ;;  %v2749_v39 = vpop.f32.mrb[210].mxu1 }
 0x298   :  { %3580 = vst.msk [vmem:[%s7359_s3 + $0x50] sm:$0xf] %vm3559_vm1, %v4162_v55  ;;  %v4163_v37 = vpack.c.bf16 %v3174_v4, %v3174_v4  ;;  %v3006_v22 = vmax.f32 %v2239_v17, %v2746_v59  ;;  %v2240_v12 = vmax.f32 %v7610_v3, %v1982_v38  ;;  %v4842_v33 = vpop.f32.mrb[211].mxu0  ;;  %v5022_v34 = vpop.f32.mrb[211].mxu1  ;;  %v7620_v59 = vmax.f32 %v7618_v26, %v7619_v1  ;;  %v7622_v3 = vld [vmem:[#allocation9_spill] sm:$0xff] }
 0x299   :  { %v7634_v26 = vld [vmem:[#allocation17_spill] sm:$0xff] }
 0x29a   :  { %3581 = vst.msk [vmem:[%s7359_s3 + $0x54] sm:$0xf] %vm3559_vm1, %v4163_v37  ;;  %v3094_v13 = vadd.f32 %v6574_v5, %v3006_v22  ;;  %v3007_v24 = vmax.f32 %v2240_v12, %v2749_v39  ;;  %4948 = vmatmul.mubr.bf16.gmra.mrb[60].mxu0 %v5307_v40  ;;  %5128 = vmatmul.mubr.bf16.gmra.mrb[60].mxu1 %v5308_v36  ;;  %v7621_v22 = vld [vmem:[#allocation8_spill] sm:$0xff] }
 0x29b   :  { %4951 = vmatprep.mubr.msk.bf16.mxu0 %vm5315_vm0, %v7484_v47  ;;  %5131 = vmatprep.mubr.msk.bf16.mxu1 %vm5315_vm0, %v7484_v47  ;;  %v7623_v12 = vmax.f32 %v7621_v22, %v7622_v3 }
 0x29c   :  { %v3175_v53 = vmax.f32 %v3094_v13, 0.0  ;;  %v3095_v51 = vadd.f32 %v6574_v5, %v3007_v24 }
 0x29d   :  { %v1987_v25 = vpop.f32.mrb[212].mxu0  ;;  %v2754_v18 = vpop.f32.mrb[212].mxu1 }
 0x29e   :  { %v4164_v43 = vpack.c.bf16 %v3175_v53, %v3175_v53  ;;  %v3176_v44 = vmax.f32 %v3095_v51, 0.0  ;;  %v2241_v23 = vmax.f32 %v7611_v54, %v1987_v25  ;;  %v4845_v42 = vpop.f32.mrb[213].mxu0  ;;  %v5025_v52 = vpop.f32.mrb[213].mxu1 }
 0x29f   :  { %v1990_v61 = vpop.f32.mrb[214].mxu0  ;;  %v2757_v11 = vpop.f32.mrb[214].mxu1 }
 0x2a0   :  { %3582 = vst.msk [vmem:[%s7359_s3 + $0x58] sm:$0xf] %vm3559_vm1, %v4164_v43  ;;  %v4165_v31 = vpack.c.bf16 %v3176_v44, %v3176_v44  ;;  %v3008_v28 = vmax.f32 %v2241_v23, %v2754_v18  ;;  %v2242_v50 = vmax.f32 %v7614_v46, %v1990_v61  ;;  %v4846_v45 = vpop.f32.mrb[215].mxu0  ;;  %v5026_v32 = vpop.f32.mrb[215].mxu1  ;;  %v7624_v18 = vld [vmem:[#allocation10_spill] sm:$0xff]  ;;  %v7625_v43 = vld [vmem:[#allocation11_spill] sm:$0xff] }
 0x2a1   :  { %v7626_v44 = vmax.f32 %v7624_v18, %v7625_v43  ;;  %v7628_v46 = vld [vmem:[#allocation13_spill] sm:$0xff] }
 0x2a2   :  { %3583 = vst.msk [vmem:[%s7359_s3 + $0x5c] sm:$0xf] %vm3559_vm1, %v4165_v31  ;;  %v3096_v19 = vadd.f32 %v6574_v5, %v3008_v28  ;;  %v3009_v20 = vmax.f32 %v2242_v50, %v2757_v11  ;;  %4952 = vmatmul.mubr.bf16.gmra.mrb[64].mxu0 %v5309_v62  ;;  %5132 = vmatmul.mubr.bf16.gmra.mrb[64].mxu1 %v5310_v60  ;;  %v7640_v18 = vld [vmem:[#allocation21_spill] sm:$0xff] }
 0x2a3   :  { %4955 = vmatprep.mubr.msk.bf16.mxu0 %vm5315_vm0, %v7484_v47  ;;  %5135 = vmatprep.mubr.msk.bf16.mxu1 %vm5315_vm0, %v7484_v47  ;;  %v5312_v47 = vld [vmem:[%s7357_s0 + $0x50c] ss:$0 sps:$4 sm:$0xff]   ;;  %v7629_v50 = vmax.f32 %v7627_v41, %v7628_v46 }
 0x2a4   :  { %v3177_v9 = vmax.f32 %v3096_v19, 0.0  ;;  %v3097_v10 = vadd.f32 %v6574_v5, %v3009_v20 }
 0x2a5   :  { %v1995_v57 = vpop.f32.mrb[216].mxu0  ;;  %v2762_v58 = vpop.f32.mrb[216].mxu1 }
 0x2a6   :  { %v4166_v8 = vpack.c.bf16 %v3177_v9, %v3177_v9  ;;  %v3178_v30 = vmax.f32 %v3097_v10, 0.0  ;;  %v2243_v15 = vmax.f32 %v7617_v27, %v1995_v57  ;;  %v4849_v48 = vpop.f32.mrb[217].mxu0  ;;  %v5029_v49 = vpop.f32.mrb[217].mxu1 }
 0x2a7   :  { %v1998_v6 = vpop.f32.mrb[218].mxu0  ;;  %v2765_v0 = vpop.f32.mrb[218].mxu1 }
 0x2a8   :  { %3584 = vst.msk [vmem:[%s7359_s3 + $0x60] sm:$0xf] %vm3559_vm1, %v4166_v8  ;;  %v4167_v63 = vpack.c.bf16 %v3178_v30, %v3178_v30  ;;  %v3010_v2 = vmax.f32 %v2243_v15, %v2762_v58  ;;  %v2244_v55 = vmax.f32 %v7620_v59, %v1998_v6  ;;  %v4850_v4 = vpop.f32.mrb[219].mxu0  ;;  %v5030_v14 = vpop.f32.mrb[219].mxu1  ;;  %v7630_v58 = vld [vmem:[#allocation14_spill] sm:$0xff] }
 0x2aa   :  { %3585 = vst.msk [vmem:[%s7359_s3 + $0x64] sm:$0xf] %vm3559_vm1, %v4167_v63  ;;  %v3098_v17 = vadd.f32 %v6574_v5, %v3010_v2  ;;  %v3011_v21 = vmax.f32 %v2244_v55, %v2765_v0  ;;  %4956 = vmatmul.mubr.bf16.gmra.mrb[68].mxu0 %v5311_v7  ;;  %5136 = vmatmul.mubr.bf16.gmra.mrb[68].mxu1 %v5312_v47  ;;  %v7631_v7 = vld [vmem:[#allocation15_spill] sm:$0xff]  ;;  %v7633_v2 = vld [vmem:[#allocation16_spill] sm:$0xff] }
 0x2ab   :  { %v7632_v8 = vmax.f32 %v7630_v58, %v7631_v7  ;;  %v7635_v1 = vmax.f32 %v7633_v2, %v7634_v26  ;;  %v7646_v58 = vld [vmem:[#allocation25_spill] sm:$0xff] }
 0x2ac   :  { %v3179_v56 = vmax.f32 %v3098_v17, 0.0  ;;  %v3099_v40 = vadd.f32 %v6574_v5, %v3011_v21 }
 0x2ad   :  { %v2003_v36 = vpop.f32.mrb[220].mxu0  ;;  %v2770_v38 = vpop.f32.mrb[220].mxu1 }
 0x2ae   :  { %v4168_v39 = vpack.c.bf16 %v3179_v56, %v3179_v56  ;;  %v3180_v37 = vmax.f32 %v3099_v40, 0.0  ;;  %v2245_v33 = vmax.f32 %v7623_v12, %v2003_v36  ;;  %v4853_v34 = vpop.f32.mrb[221].mxu0  ;;  %v5033_v13 = vpop.f32.mrb[221].mxu1  ;;  %v7636_v40 = vld [vmem:[#allocation18_spill] sm:$0xff]  ;;  %v7637_v36 = vld [vmem:[#allocation19_spill] sm:$0xff] }
 0x2af   :  { %v2006_v24 = vpop.f32.mrb[222].mxu0  ;;  %v2773_v53 = vpop.f32.mrb[222].mxu1 }
 0x2b0   :  { %3586 = vst.msk [vmem:[%s7359_s3 + $0x68] sm:$0xf] %vm3559_vm1, %v4168_v39  ;;  %v4169_v51 = vpack.c.bf16 %v3180_v37, %v3180_v37  ;;  %v3012_v25 = vmax.f32 %v2245_v33, %v2770_v38  ;;  %v2246_v54 = vmax.f32 %v7626_v44, %v2006_v24  ;;  %v4854_v23 = vpop.f32.mrb[223].mxu0  ;;  %v5034_v42 = vpop.f32.mrb[223].mxu1  ;;  %v7638_v38 = vmax.f32 %v7636_v40, %v7637_v36  ;;  %v7652_v40 = vld [vmem:[#allocation29_spill] sm:$0xff] }
 0x2b2   :  { %3587 = vst.msk [vmem:[%s7359_s3 + $0x6c] sm:$0xf] %vm3559_vm1, %v4169_v51  ;;  %v3100_v52 = vadd.f32 %v6574_v5, %v3012_v25  ;;  %v3013_v62 = vmax.f32 %v2246_v54, %v2773_v53  ;;  %v7639_v25 = vld [vmem:[#allocation20_spill] sm:$0xff] }
 0x2b3   :  { %v7641_v43 = vmax.f32 %v7639_v25, %v7640_v18 }
 0x2b4   :  { %v3181_v60 = vmax.f32 %v3100_v52, 0.0  ;;  %v3101_v61 = vadd.f32 %v6574_v5, %v3013_v62 }
 0x2b5   :  { %v2011_v11 = vpop.f32.mrb[224].mxu0  ;;  %v2778_v31 = vpop.f32.mrb[224].mxu1 }
 0x2b6   :  { %v4170_v28 = vpack.c.bf16 %v3181_v60, %v3181_v60  ;;  %v3182_v16 = vmax.f32 %v3101_v61, 0.0  ;;  %v2247_v45 = vmax.f32 %v7629_v50, %v2011_v11  ;;  %v4857_v32 = vpop.f32.mrb[225].mxu0  ;;  %v5037_v19 = vpop.f32.mrb[225].mxu1  ;;  %v7642_v61 = vld [vmem:[#allocation22_spill] sm:$0xff]  ;;  %v7643_v11 = vld [vmem:[#allocation23_spill] sm:$0xff] }
 0x2b7   :  { %v2014_v20 = vpop.f32.mrb[226].mxu0  ;;  %v2781_v9 = vpop.f32.mrb[226].mxu1 }
 0x2b8   :  { %3588 = vst.msk [vmem:[%s7359_s3 + $0x70] sm:$0xf] %vm3559_vm1, %v4170_v28  ;;  %v4171_v10 = vpack.c.bf16 %v3182_v16, %v3182_v16  ;;  %v3014_v57 = vmax.f32 %v2247_v45, %v2778_v31  ;;  %v2248_v30 = vmax.f32 %v7632_v8, %v2014_v20  ;;  %v4858_v29 = vpop.f32.mrb[227].mxu0  ;;  %v5038_v35 = vpop.f32.mrb[227].mxu1  ;;  %v7644_v31 = vmax.f32 %v7642_v61, %v7643_v11  ;;  %v7658_v61 = vld [vmem:[#allocation33_spill] sm:$0xff] }
 0x2ba   :  { %3589 = vst.msk [vmem:[%s7359_s3 + $0x74] sm:$0xf] %vm3559_vm1, %v4171_v10  ;;  %v3102_v27 = vadd.f32 %v6574_v5, %v3014_v57  ;;  %v3015_v15 = vmax.f32 %v2248_v30, %v2781_v9  ;;  %v7645_v57 = vld [vmem:[#allocation24_spill] sm:$0xff] }
 0x2bb   :  { %v7647_v7 = vmax.f32 %v7645_v57, %v7646_v58 }
 0x2bc   :  { %v3183_v48 = vmax.f32 %v3102_v27, 0.0  ;;  %v3103_v49 = vadd.f32 %v6574_v5, %v3015_v15 }
 0x2bd   :  { %v2019_v47 = vpop.f32.mrb[228].mxu0  ;;  %v2786_v6 = vpop.f32.mrb[228].mxu1 }
 0x2be   :  { %v4172_v0 = vpack.c.bf16 %v3183_v48, %v3183_v48  ;;  %v3184_v63 = vmax.f32 %v3103_v49, 0.0  ;;  %v2249_v59 = vmax.f32 %v7635_v1, %v2019_v47  ;;  %v4861_v55 = vpop.f32.mrb[229].mxu0  ;;  %v5041_v4 = vpop.f32.mrb[229].mxu1  ;;  %v7648_v49 = vld [vmem:[#allocation26_spill] sm:$0xff]  ;;  %v7649_v47 = vld [vmem:[#allocation27_spill] sm:$0xff] }
 0x2bf   :  { %v2022_v14 = vpop.f32.mrb[230].mxu0  ;;  %v2789_v17 = vpop.f32.mrb[230].mxu1 }
 0x2c0   :  { %3590 = vst.msk [vmem:[%s7359_s3 + $0x78] sm:$0xf] %vm3559_vm1, %v4172_v0  ;;  %v4173_v21 = vpack.c.bf16 %v3184_v63, %v3184_v63  ;;  %v3016_v56 = vmax.f32 %v2249_v59, %v2786_v6  ;;  %v2250_v39 = vmax.f32 %v7638_v38, %v2022_v14  ;;  %v4862_v37 = vpop.f32.mrb[231].mxu0  ;;  %v5042_v22 = vpop.f32.mrb[231].mxu1  ;;  %v7650_v6 = vmax.f32 %v7648_v49, %v7649_v47  ;;  %v7664_v49 = vld [vmem:[#allocation37_spill] sm:$0xff] }
 0x2c2   :  { %3591 = vst.msk [vmem:[%s7359_s3 + $0x7c] sm:$0xf] %vm3559_vm1, %v4173_v21  ;;  %v3104_v3 = vadd.f32 %v6574_v5, %v3016_v56  ;;  %v3017_v12 = vmax.f32 %v2250_v39, %v2789_v17  ;;  %v7651_v56 = vld [vmem:[#allocation28_spill] sm:$0xff] }
 0x2c3   :  { %v7653_v36 = vmax.f32 %v7651_v56, %v7652_v40 }
 0x2c4   :  { %v3185_v33 = vmax.f32 %v3104_v3, 0.0  ;;  %v3105_v34 = vadd.f32 %v6574_v5, %v3017_v12 }
 0x2c5   :  { %v2027_v13 = vpop.f32.mrb[232].mxu0  ;;  %v2794_v24 = vpop.f32.mrb[232].mxu1 }
 0x2c6   :  { %v4174_v53 = vpack.c.bf16 %v3185_v33, %v3185_v33  ;;  %v3186_v51 = vmax.f32 %v3105_v34, 0.0  ;;  %v2251_v44 = vmax.f32 %v7641_v43, %v2027_v13  ;;  %v4865_v54 = vpop.f32.mrb[233].mxu0  ;;  %v5045_v23 = vpop.f32.mrb[233].mxu1  ;;  %v7654_v34 = vld [vmem:[#allocation30_spill] sm:$0xff]  ;;  %v7655_v13 = vld [vmem:[#allocation31_spill] sm:$0xff] }
 0x2c7   :  { %v2030_v42 = vpop.f32.mrb[234].mxu0  ;;  %v2797_v52 = vpop.f32.mrb[234].mxu1 }
 0x2c8   :  { %3592 = vst.msk [vmem:[%s7359_s3 + $0x80] sm:$0xf] %vm3559_vm1, %v4174_v53  ;;  %v4175_v62 = vpack.c.bf16 %v3186_v51, %v3186_v51  ;;  %v3018_v60 = vmax.f32 %v2251_v44, %v2794_v24  ;;  %v2252_v28 = vmax.f32 %v7644_v31, %v2030_v42  ;;  %v4866_v16 = vpop.f32.mrb[235].mxu0  ;;  %v5046_v41 = vpop.f32.mrb[235].mxu1  ;;  %v7656_v24 = vmax.f32 %v7654_v34, %v7655_v13  ;;  %v7669_v34 = vld [vmem:[#allocation40_spill] sm:$0xff]  ;;  %v7670_v13 = vld [vmem:[#allocation41_spill] sm:$0xff] }
 0x2ca   :  { %3593 = vst.msk [vmem:[%s7359_s3 + $0x84] sm:$0xf] %vm3559_vm1, %v4175_v62  ;;  %v3106_v46 = vadd.f32 %v6574_v5, %v3018_v60  ;;  %v3019_v50 = vmax.f32 %v2252_v28, %v2797_v52  ;;  %v7657_v60 = vld [vmem:[#allocation32_spill] sm:$0xff] }
 0x2cb   :  { %v7659_v11 = vmax.f32 %v7657_v60, %v7658_v61 }
 0x2cc   :  { %v3187_v45 = vmax.f32 %v3106_v46, 0.0  ;;  %v3107_v32 = vadd.f32 %v6574_v5, %v3019_v50 }
 0x2cd   :  { %v2035_v19 = vpop.f32.mrb[236].mxu0  ;;  %v2802_v20 = vpop.f32.mrb[236].mxu1 }
 0x2ce   :  { %v4176_v9 = vpack.c.bf16 %v3187_v45, %v3187_v45  ;;  %v3188_v10 = vmax.f32 %v3107_v32, 0.0  ;;  %v2253_v8 = vmax.f32 %v7647_v7, %v2035_v19  ;;  %v4869_v30 = vpop.f32.mrb[237].mxu0  ;;  %v5049_v29 = vpop.f32.mrb[237].mxu1  ;;  %v7660_v32 = vld [vmem:[#allocation34_spill] sm:$0xff]  ;;  %v7661_v19 = vld [vmem:[#allocation35_spill] sm:$0xff] }
 0x2cf   :  { %v2038_v35 = vpop.f32.mrb[238].mxu0  ;;  %v2805_v27 = vpop.f32.mrb[238].mxu1 }
 0x2d0   :  { %3594 = vst.msk [vmem:[%s7359_s3 + $0x88] sm:$0xf] %vm3559_vm1, %v4176_v9  ;;  %v4177_v15 = vpack.c.bf16 %v3188_v10, %v3188_v10  ;;  %v3020_v48 = vmax.f32 %v2253_v8, %v2802_v20  ;;  %v2254_v0 = vmax.f32 %v7650_v6, %v2038_v35  ;;  %v4870_v63 = vpop.f32.mrb[239].mxu0  ;;  %v5050_v2 = vpop.f32.mrb[239].mxu1  ;;  %v7662_v20 = vmax.f32 %v7660_v32, %v7661_v19  ;;  %v7676_v32 = vld [vmem:[#allocation45_spill] sm:$0xff] }
 0x2d2   :  { %3595 = vst.msk [vmem:[%s7359_s3 + $0x8c] sm:$0xf] %vm3559_vm1, %v4177_v15  ;;  %v3108_v26 = vadd.f32 %v6574_v5, %v3020_v48  ;;  %v3021_v1 = vmax.f32 %v2254_v0, %v2805_v27  ;;  %v7663_v48 = vld [vmem:[#allocation36_spill] sm:$0xff] }
 0x2d3   :  { %v7665_v47 = vmax.f32 %v7663_v48, %v7664_v49 }
 0x2d4   :  { %v3189_v59 = vmax.f32 %v3108_v26, 0.0  ;;  %v3109_v55 = vadd.f32 %v6574_v5, %v3021_v1 }
 0x2d5   :  { %v2043_v4 = vpop.f32.mrb[240].mxu0  ;;  %v2810_v14 = vpop.f32.mrb[240].mxu1 }
 0x2d6   :  { %v4178_v17 = vpack.c.bf16 %v3189_v59, %v3189_v59  ;;  %v3190_v21 = vmax.f32 %v3109_v55, 0.0  ;;  %v2255_v38 = vmax.f32 %v7653_v36, %v2043_v4  ;;  %v4873_v39 = vpop.f32.mrb[241].mxu0  ;;  %v5053_v37 = vpop.f32.mrb[241].mxu1  ;;  %v7666_v55 = vld [vmem:[#allocation38_spill] sm:$0xff]  ;;  %v7667_v4 = vld [vmem:[#allocation39_spill] sm:$0xff] }
 0x2d7   :  { %v2046_v22 = vpop.f32.mrb[242].mxu0  ;;  %v2813_v3 = vpop.f32.mrb[242].mxu1  ;;  %v7049_v39 = vld [vmem:[%s7358_s2] ss:$0 sm:$0xff] }
 0x2d8   :  { %3596 = vst.msk [vmem:[%s7359_s3 + $0x90] sm:$0xf] %vm3559_vm1, %v4178_v17  ;;  %v4179_v12 = vpack.c.bf16 %v3190_v21, %v3190_v21  ;;  %v3022_v33 = vmax.f32 %v2255_v38, %v2810_v14  ;;  %v2256_v53 = vmax.f32 %v7656_v24, %v2046_v22  ;;  %v4874_v51 = vpop.f32.mrb[243].mxu0  ;;  %v5054_v25 = vpop.f32.mrb[243].mxu1  ;;  %v7668_v14 = vmax.f32 %v7666_v55, %v7667_v4  ;;  %v7682_v55 = vld [vmem:[#allocation49_spill] sm:$0xff] }
 0x2d9   :  { %v7671_v24 = vmax.f32 %v7669_v34, %v7670_v13 }
 0x2da   :  { %3597 = vst.msk [vmem:[%s7359_s3 + $0x94] sm:$0xf] %vm3559_vm1, %v4179_v12  ;;  %v3110_v18 = vadd.f32 %v6574_v5, %v3022_v33  ;;  %v3023_v43 = vmax.f32 %v2256_v53, %v2813_v3 }
 0x2dc   :  { %v3191_v44 = vmax.f32 %v3110_v18, 0.0  ;;  %v3111_v54 = vadd.f32 %v6574_v5, %v3023_v43 }
 0x2dd   :  { %v2051_v23 = vpop.f32.mrb[244].mxu0  ;;  %v2818_v42 = vpop.f32.mrb[244].mxu1 }
 0x2de   :  { %v4180_v52 = vpack.c.bf16 %v3191_v44, %v3191_v44  ;;  %v3192_v62 = vmax.f32 %v3111_v54, 0.0  ;;  %v2257_v31 = vmax.f32 %v7659_v11, %v2051_v23  ;;  %v4877_v28 = vpop.f32.mrb[245].mxu0  ;;  %v5057_v16 = vpop.f32.mrb[245].mxu1  ;;  %v7672_v54 = vld [vmem:[#allocation42_spill] sm:$0xff]  ;;  %v7673_v23 = vld [vmem:[#allocation43_spill] sm:$0xff] }
 0x2df   :  { %v2054_v41 = vpop.f32.mrb[246].mxu0  ;;  %v2821_v46 = vpop.f32.mrb[246].mxu1 }
 0x2e0   :  { %3598 = vst.msk [vmem:[%s7359_s3 + $0x98] sm:$0xf] %vm3559_vm1, %v4180_v52  ;;  %v4181_v50 = vpack.c.bf16 %v3192_v62, %v3192_v62  ;;  %v3024_v45 = vmax.f32 %v2257_v31, %v2818_v42  ;;  %v2258_v9 = vmax.f32 %v7662_v20, %v2054_v41  ;;  %v4878_v10 = vpop.f32.mrb[247].mxu0  ;;  %v5058_v57 = vpop.f32.mrb[247].mxu1  ;;  %v7674_v42 = vmax.f32 %v7672_v54, %v7673_v23  ;;  %v7688_v54 = vld [vmem:[#allocation53_spill] sm:$0xff] }
 0x2e2   :  { %3599 = vst.msk [vmem:[%s7359_s3 + $0x9c] sm:$0xf] %vm3559_vm1, %v4181_v50  ;;  %v3112_v58 = vadd.f32 %v6574_v5, %v3024_v45  ;;  %v3025_v7 = vmax.f32 %v2258_v9, %v2821_v46  ;;  %v7675_v45 = vld [vmem:[#allocation44_spill] sm:$0xff] }
 0x2e3   :  { %v7677_v19 = vmax.f32 %v7675_v45, %v7676_v32 }
 0x2e4   :  { %v3193_v8 = vmax.f32 %v3112_v58, 0.0  ;;  %v3113_v30 = vadd.f32 %v6574_v5, %v3025_v7 }
 0x2e5   :  { %v2059_v29 = vpop.f32.mrb[248].mxu0  ;;  %v2826_v35 = vpop.f32.mrb[248].mxu1 }
 0x2e6   :  { %v4182_v27 = vpack.c.bf16 %v3193_v8, %v3193_v8  ;;  %v3194_v15 = vmax.f32 %v3113_v30, 0.0  ;;  %v2259_v6 = vmax.f32 %v7665_v47, %v2059_v29  ;;  %v4881_v0 = vpop.f32.mrb[249].mxu0  ;;  %v5061_v63 = vpop.f32.mrb[249].mxu1  ;;  %v7678_v30 = vld [vmem:[#allocation46_spill] sm:$0xff]  ;;  %v7679_v29 = vld [vmem:[#allocation47_spill] sm:$0xff] }
 0x2e7   :  { %v2062_v2 = vpop.f32.mrb[250].mxu0  ;;  %v2829_v26 = vpop.f32.mrb[250].mxu1 }
 0x2e8   :  { %3600 = vst.msk [vmem:[%s7359_s3 + $0xa0] sm:$0xf] %vm3559_vm1, %v4182_v27  ;;  %v4183_v1 = vpack.c.bf16 %v3194_v15, %v3194_v15  ;;  %v3026_v59 = vmax.f32 %v2259_v6, %v2826_v35  ;;  %v2260_v17 = vmax.f32 %v7668_v14, %v2062_v2  ;;  %v4882_v21 = vpop.f32.mrb[251].mxu0  ;;  %v5062_v56 = vpop.f32.mrb[251].mxu1  ;;  %v7680_v35 = vmax.f32 %v7678_v30, %v7679_v29  ;;  %v7694_v30 = vld [vmem:[#allocation57_spill] sm:$0xff] }
 0x2ea   :  { %3601 = vst.msk [vmem:[%s7359_s3 + $0xa4] sm:$0xf] %vm3559_vm1, %v4183_v1  ;;  %v3114_v40 = vadd.f32 %v6574_v5, %v3026_v59  ;;  %v3027_v36 = vmax.f32 %v2260_v17, %v2829_v26  ;;  %v7681_v59 = vld [vmem:[#allocation48_spill] sm:$0xff] }
 0x2eb   :  { %v7683_v4 = vmax.f32 %v7681_v59, %v7682_v55 }
 0x2ec   :  { %v3195_v38 = vmax.f32 %v3114_v40, 0.0  ;;  %v3115_v37 = vadd.f32 %v7049_v39, %v3027_v36 }
 0x2ed   :  { %v2067_v22 = vpop.f32.mrb[252].mxu0  ;;  %v2834_v3 = vpop.f32.mrb[252].mxu1 }
 0x2ee   :  { %v4184_v12 = vpack.c.bf16 %v3195_v38, %v3195_v38  ;;  %v3196_v33 = vmax.f32 %v3115_v37, 0.0  ;;  %v2261_v53 = vmax.f32 %v7671_v24, %v2067_v22  ;;  %v4885_v51 = vpop.f32.mrb[253].mxu0  ;;  %v5065_v25 = vpop.f32.mrb[253].mxu1  ;;  %v7684_v37 = vld [vmem:[#allocation50_spill] sm:$0xff]  ;;  %v7685_v22 = vld [vmem:[#allocation51_spill] sm:$0xff] }
 0x2ef   :  { %v2070_v5 = vpop.f32.mrb[254].mxu0  ;;  %v2837_v18 = vpop.f32.mrb[254].mxu1 }
 0x2f0   :  { %3602 = vst.msk [vmem:[%s7359_s3 + $0xa8] sm:$0xf] %vm3559_vm1, %v4184_v12  ;;  %v4185_v43 = vpack.c.bf16 %v3196_v33, %v3196_v33  ;;  %v3028_v44 = vmax.f32 %v2261_v53, %v2834_v3  ;;  %v2262_v52 = vmax.f32 %v7674_v42, %v2070_v5  ;;  %v4886_v62 = vpop.f32.mrb[255].mxu0  ;;  %v5066_v60 = vpop.f32.mrb[255].mxu1  ;;  %v7686_v3 = vmax.f32 %v7684_v37, %v7685_v22  ;;  %v7700_v37 = vld [vmem:[#allocation61_spill] sm:$0xff] }
 0x2f2   :  { %3603 = vst.msk [vmem:[%s7359_s3 + $0xac] sm:$0xf] %vm3559_vm1, %v4185_v43  ;;  %v3116_v61 = vadd.f32 %v7049_v39, %v3028_v44  ;;  %v3029_v11 = vmax.f32 %v2262_v52, %v2837_v18  ;;  %v7687_v44 = vld [vmem:[#allocation52_spill] sm:$0xff] }
 0x2f3   :  { %v7689_v23 = vmax.f32 %v7687_v44, %v7688_v54 }
 0x2f4   :  { %v3197_v31 = vmax.f32 %v3116_v61, 0.0  ;;  %v3117_v28 = vadd.f32 %v7049_v39, %v3029_v11 }
 0x2f5   :  { %v2075_v16 = vpop.f32.mrb[0].mxu0  ;;  %v2842_v41 = vpop.f32.mrb[0].mxu1 }
 0x2f6   :  { %v4186_v46 = vpack.c.bf16 %v3197_v31, %v3197_v31  ;;  %v3198_v50 = vmax.f32 %v3117_v28, 0.0  ;;  %v2263_v20 = vmax.f32 %v7677_v19, %v2075_v16  ;;  %v4889_v9 = vpop.f32.mrb[1].mxu0  ;;  %v5069_v10 = vpop.f32.mrb[1].mxu1  ;;  %v7690_v28 = vld [vmem:[#allocation54_spill] sm:$0xff]  ;;  %v7691_v16 = vld [vmem:[#allocation55_spill] sm:$0xff] }
 0x2f7   :  { %v2078_v57 = vpop.f32.mrb[2].mxu0  ;;  %v2845_v58 = vpop.f32.mrb[2].mxu1 }
 0x2f8   :  { %3604 = vst.msk [vmem:[%s7359_s3 + $0xb0] sm:$0xf] %vm3559_vm1, %v4186_v46  ;;  %v4187_v7 = vpack.c.bf16 %v3198_v50, %v3198_v50  ;;  %v3030_v8 = vmax.f32 %v2263_v20, %v2842_v41  ;;  %v2264_v27 = vmax.f32 %v7680_v35, %v2078_v57  ;;  %v4890_v15 = vpop.f32.mrb[3].mxu0  ;;  %v5070_v48 = vpop.f32.mrb[3].mxu1  ;;  %v7692_v41 = vmax.f32 %v7690_v28, %v7691_v16  ;;  %v7706_v28 = vld [vmem:[#allocation65_spill] sm:$0xff] }
 0x2fa   :  { %3605 = vst.msk [vmem:[%s7359_s3 + $0xb4] sm:$0xf] %vm3559_vm1, %v4187_v7  ;;  %v3118_v49 = vadd.f32 %v7049_v39, %v3030_v8  ;;  %v3031_v47 = vmax.f32 %v2264_v27, %v2845_v58  ;;  %v7693_v8 = vld [vmem:[#allocation56_spill] sm:$0xff] }
 0x2fb   :  { %v7695_v29 = vmax.f32 %v7693_v8, %v7694_v30 }
 0x2fc   :  { %v3199_v6 = vmax.f32 %v3118_v49, 0.0  ;;  %v3119_v0 = vadd.f32 %v7049_v39, %v3031_v47 }
 0x2fd   :  { %v2083_v63 = vpop.f32.mrb[4].mxu0  ;;  %v2850_v2 = vpop.f32.mrb[4].mxu1 }
 0x2fe   :  { %v4188_v26 = vpack.c.bf16 %v3199_v6, %v3199_v6  ;;  %v3200_v1 = vmax.f32 %v3119_v0, 0.0  ;;  %v2265_v14 = vmax.f32 %v7683_v4, %v2083_v63  ;;  %v4893_v17 = vpop.f32.mrb[5].mxu0  ;;  %v5073_v21 = vpop.f32.mrb[5].mxu1  ;;  %v7696_v0 = vld [vmem:[#allocation58_spill] sm:$0xff]  ;;  %v7697_v63 = vld [vmem:[#allocation59_spill] sm:$0xff] }
 0x2ff   :  { %v2086_v56 = vpop.f32.mrb[6].mxu0  ;;  %v2853_v40 = vpop.f32.mrb[6].mxu1 }
 0x300   :  { %3606 = vst.msk [vmem:[%s7359_s3 + $0xb8] sm:$0xf] %vm3559_vm1, %v4188_v26  ;;  %v4189_v36 = vpack.c.bf16 %v3200_v1, %v3200_v1  ;;  %v3032_v38 = vmax.f32 %v2265_v14, %v2850_v2  ;;  %v2266_v12 = vmax.f32 %v7686_v3, %v2086_v56  ;;  %v4894_v33 = vpop.f32.mrb[7].mxu0  ;;  %v5074_v34 = vpop.f32.mrb[7].mxu1  ;;  %v7698_v2 = vmax.f32 %v7696_v0, %v7697_v63  ;;  %v7712_v0 = vld [vmem:[#allocation69_spill] sm:$0xff] }
 0x302   :  { %3607 = vst.msk [vmem:[%s7359_s3 + $0xbc] sm:$0xf] %vm3559_vm1, %v4189_v36  ;;  %v3120_v13 = vadd.f32 %v7049_v39, %v3032_v38  ;;  %v3033_v24 = vmax.f32 %v2266_v12, %v2853_v40  ;;  %v7699_v38 = vld [vmem:[#allocation60_spill] sm:$0xff] }
 0x303   :  { %v7701_v22 = vmax.f32 %v7699_v38, %v7700_v37 }
 0x304   :  { %v3201_v53 = vmax.f32 %v3120_v13, 0.0  ;;  %v3121_v51 = vadd.f32 %v7049_v39, %v3033_v24 }
 0x305   :  { %v2091_v25 = vpop.f32.mrb[8].mxu0  ;;  %v2858_v5 = vpop.f32.mrb[8].mxu1 }
 0x306   :  { %v4190_v18 = vpack.c.bf16 %v3201_v53, %v3201_v53  ;;  %v3202_v43 = vmax.f32 %v3121_v51, 0.0  ;;  %v2267_v42 = vmax.f32 %v7689_v23, %v2091_v25  ;;  %v4897_v52 = vpop.f32.mrb[9].mxu0  ;;  %v5077_v62 = vpop.f32.mrb[9].mxu1  ;;  %v7702_v51 = vld [vmem:[#allocation62_spill] sm:$0xff]  ;;  %v7703_v25 = vld [vmem:[#allocation63_spill] sm:$0xff] }
 0x307   :  { %v2094_v60 = vpop.f32.mrb[10].mxu0  ;;  %v2861_v61 = vpop.f32.mrb[10].mxu1 }
 0x308   :  { %3608 = vst.msk [vmem:[%s7359_s3 + $0xc0] sm:$0xf] %vm3559_vm1, %v4190_v18  ;;  %v4191_v11 = vpack.c.bf16 %v3202_v43, %v3202_v43  ;;  %v3034_v31 = vmax.f32 %v2267_v42, %v2858_v5  ;;  %v2268_v46 = vmax.f32 %v7692_v41, %v2094_v60  ;;  %v4898_v50 = vpop.f32.mrb[11].mxu0  ;;  %v5078_v45 = vpop.f32.mrb[11].mxu1  ;;  %v7704_v5 = vmax.f32 %v7702_v51, %v7703_v25  ;;  %v7718_v51 = vld [vmem:[#allocation73_spill] sm:$0xff] }
 0x30a   :  { %3609 = vst.msk [vmem:[%s7359_s3 + $0xc4] sm:$0xf] %vm3559_vm1, %v4191_v11  ;;  %v3122_v32 = vadd.f32 %v7049_v39, %v3034_v31  ;;  %v3035_v19 = vmax.f32 %v2268_v46, %v2861_v61  ;;  %v7705_v31 = vld [vmem:[#allocation64_spill] sm:$0xff] }
 0x30b   :  { %v7707_v16 = vmax.f32 %v7705_v31, %v7706_v28 }
 0x30c   :  { %v3203_v20 = vmax.f32 %v3122_v32, 0.0  ;;  %v3123_v9 = vadd.f32 %v7049_v39, %v3035_v19 }
 0x30d   :  { %v2099_v10 = vpop.f32.mrb[12].mxu0  ;;  %v2866_v57 = vpop.f32.mrb[12].mxu1 }
 0x30e   :  { %v4192_v58 = vpack.c.bf16 %v3203_v20, %v3203_v20  ;;  %v3204_v7 = vmax.f32 %v3123_v9, 0.0  ;;  %v2269_v35 = vmax.f32 %v7695_v29, %v2099_v10  ;;  %v4901_v27 = vpop.f32.mrb[13].mxu0  ;;  %v5081_v15 = vpop.f32.mrb[13].mxu1  ;;  %v7708_v9 = vld [vmem:[#allocation66_spill] sm:$0xff]  ;;  %v7709_v10 = vld [vmem:[#allocation67_spill] sm:$0xff] }
 0x30f   :  { %v2102_v48 = vpop.f32.mrb[14].mxu0  ;;  %v2869_v49 = vpop.f32.mrb[14].mxu1 }
 0x310   :  { %3610 = vst.msk [vmem:[%s7359_s3 + $0xc8] sm:$0xf] %vm3559_vm1, %v4192_v58  ;;  %v4193_v47 = vpack.c.bf16 %v3204_v7, %v3204_v7  ;;  %v3036_v6 = vmax.f32 %v2269_v35, %v2866_v57  ;;  %v2270_v26 = vmax.f32 %v7698_v2, %v2102_v48  ;;  %v4902_v1 = vpop.f32.mrb[15].mxu0  ;;  %v5082_v59 = vpop.f32.mrb[15].mxu1  ;;  %v7710_v57 = vmax.f32 %v7708_v9, %v7709_v10  ;;  %v7724_v9 = vld [vmem:[#allocation77_spill] sm:$0xff] }
 0x312   :  { %3611 = vst.msk [vmem:[%s7359_s3 + $0xcc] sm:$0xf] %vm3559_vm1, %v4193_v47  ;;  %v3124_v55 = vadd.f32 %v7049_v39, %v3036_v6  ;;  %v3037_v4 = vmax.f32 %v2270_v26, %v2869_v49  ;;  %v7711_v6 = vld [vmem:[#allocation68_spill] sm:$0xff] }
 0x313   :  { %v7713_v63 = vmax.f32 %v7711_v6, %v7712_v0 }
 0x314   :  { %v3205_v14 = vmax.f32 %v3124_v55, 0.0  ;;  %v3125_v17 = vadd.f32 %v7049_v39, %v3037_v4 }
 0x315   :  { %v2107_v21 = vpop.f32.mrb[16].mxu0  ;;  %v2874_v56 = vpop.f32.mrb[16].mxu1 }
 0x316   :  { %v4194_v40 = vpack.c.bf16 %v3205_v14, %v3205_v14  ;;  %v3206_v36 = vmax.f32 %v3125_v17, 0.0  ;;  %v2271_v3 = vmax.f32 %v7701_v22, %v2107_v21  ;;  %v4905_v12 = vpop.f32.mrb[17].mxu0  ;;  %v5085_v33 = vpop.f32.mrb[17].mxu1  ;;  %v7714_v17 = vld [vmem:[#allocation70_spill] sm:$0xff]  ;;  %v7715_v21 = vld [vmem:[#allocation71_spill] sm:$0xff] }
 0x317   :  { %v2110_v34 = vpop.f32.mrb[18].mxu0  ;;  %v2877_v13 = vpop.f32.mrb[18].mxu1 }
 0x318   :  { %3612 = vst.msk [vmem:[%s7359_s3 + $0xd0] sm:$0xf] %vm3559_vm1, %v4194_v40  ;;  %v4195_v24 = vpack.c.bf16 %v3206_v36, %v3206_v36  ;;  %v3038_v53 = vmax.f32 %v2271_v3, %v2874_v56  ;;  %v2272_v18 = vmax.f32 %v7704_v5, %v2110_v34  ;;  %v4906_v43 = vpop.f32.mrb[19].mxu0  ;;  %v5086_v44 = vpop.f32.mrb[19].mxu1  ;;  %v7716_v56 = vmax.f32 %v7714_v17, %v7715_v21  ;;  %v7730_v17 = vld [vmem:[#allocation81_spill] sm:$0xff] }
 0x31a   :  { %3613 = vst.msk [vmem:[%s7359_s3 + $0xd4] sm:$0xf] %vm3559_vm1, %v4195_v24  ;;  %v3126_v54 = vadd.f32 %v7049_v39, %v3038_v53  ;;  %v3039_v23 = vmax.f32 %v2272_v18, %v2877_v13  ;;  %v7717_v53 = vld [vmem:[#allocation72_spill] sm:$0xff] }
 0x31b   :  { %v7719_v25 = vmax.f32 %v7717_v53, %v7718_v51 }
 0x31c   :  { %v3207_v42 = vmax.f32 %v3126_v54, 0.0  ;;  %v3127_v52 = vadd.f32 %v7049_v39, %v3039_v23 }
 0x31d   :  { %v2115_v62 = vpop.f32.mrb[20].mxu0  ;;  %v2882_v60 = vpop.f32.mrb[20].mxu1 }
 0x31e   :  { %v4196_v61 = vpack.c.bf16 %v3207_v42, %v3207_v42  ;;  %v3208_v11 = vmax.f32 %v3127_v52, 0.0  ;;  %v2273_v41 = vmax.f32 %v7707_v16, %v2115_v62  ;;  %v4909_v46 = vpop.f32.mrb[21].mxu0  ;;  %v5089_v50 = vpop.f32.mrb[21].mxu1  ;;  %v7720_v52 = vld [vmem:[#allocation74_spill] sm:$0xff]  ;;  %v7721_v62 = vld [vmem:[#allocation75_spill] sm:$0xff] }
 0x31f   :  { %v2118_v45 = vpop.f32.mrb[22].mxu0  ;;  %v2885_v32 = vpop.f32.mrb[22].mxu1 }
 0x320   :  { %3614 = vst.msk [vmem:[%s7359_s3 + $0xd8] sm:$0xf] %vm3559_vm1, %v4196_v61  ;;  %v4197_v19 = vpack.c.bf16 %v3208_v11, %v3208_v11  ;;  %v3040_v20 = vmax.f32 %v2273_v41, %v2882_v60  ;;  %v2274_v58 = vmax.f32 %v7710_v57, %v2118_v45  ;;  %v4910_v7 = vpop.f32.mrb[23].mxu0  ;;  %v5090_v8 = vpop.f32.mrb[23].mxu1  ;;  %v7722_v60 = vmax.f32 %v7720_v52, %v7721_v62  ;;  %v7736_v52 = vld [vmem:[#allocation85_spill] sm:$0xff] }
 0x322   :  { %3615 = vst.msk [vmem:[%s7359_s3 + $0xdc] sm:$0xf] %vm3559_vm1, %v4197_v19  ;;  %v3128_v30 = vadd.f32 %v7049_v39, %v3040_v20  ;;  %v3041_v29 = vmax.f32 %v2274_v58, %v2885_v32  ;;  %v7723_v20 = vld [vmem:[#allocation76_spill] sm:$0xff] }
 0x323   :  { %v7725_v10 = vmax.f32 %v7723_v20, %v7724_v9 }
 0x324   :  { %v3209_v35 = vmax.f32 %v3128_v30, 0.0  ;;  %v3129_v27 = vadd.f32 %v7049_v39, %v3041_v29 }
 0x325   :  { %v2123_v15 = vpop.f32.mrb[24].mxu0  ;;  %v2890_v48 = vpop.f32.mrb[24].mxu1 }
 0x326   :  { %v4198_v49 = vpack.c.bf16 %v3209_v35, %v3209_v35  ;;  %v3210_v47 = vmax.f32 %v3129_v27, 0.0  ;;  %v2275_v2 = vmax.f32 %v7713_v63, %v2123_v15  ;;  %v4913_v26 = vpop.f32.mrb[25].mxu0  ;;  %v5093_v1 = vpop.f32.mrb[25].mxu1  ;;  %v7726_v27 = vld [vmem:[#allocation78_spill] sm:$0xff]  ;;  %v7727_v15 = vld [vmem:[#allocation79_spill] sm:$0xff] }
 0x327   :  { %v2126_v59 = vpop.f32.mrb[26].mxu0  ;;  %v2893_v55 = vpop.f32.mrb[26].mxu1 }
 0x328   :  { %3616 = vst.msk [vmem:[%s7359_s3 + $0xe0] sm:$0xf] %vm3559_vm1, %v4198_v49  ;;  %v4199_v4 = vpack.c.bf16 %v3210_v47, %v3210_v47  ;;  %v3042_v14 = vmax.f32 %v2275_v2, %v2890_v48  ;;  %v2276_v40 = vmax.f32 %v7716_v56, %v2126_v59  ;;  %v4914_v36 = vpop.f32.mrb[27].mxu0  ;;  %v5094_v38 = vpop.f32.mrb[27].mxu1  ;;  %v7728_v48 = vmax.f32 %v7726_v27, %v7727_v15  ;;  %v7742_v27 = vld [vmem:[#allocation89_spill] sm:$0xff] }
 0x32a   :  { %3617 = vst.msk [vmem:[%s7359_s3 + $0xe4] sm:$0xf] %vm3559_vm1, %v4199_v4  ;;  %v3130_v37 = vadd.f32 %v7049_v39, %v3042_v14  ;;  %v3043_v22 = vmax.f32 %v2276_v40, %v2893_v55  ;;  %v7729_v14 = vld [vmem:[#allocation80_spill] sm:$0xff] }
 0x32b   :  { %v7731_v21 = vmax.f32 %v7729_v14, %v7730_v17 }
 0x32c   :  { %v3211_v3 = vmax.f32 %v3130_v37, 0.0  ;;  %v3131_v12 = vadd.f32 %v7049_v39, %v3043_v22 }
 0x32d   :  { %v2131_v33 = vpop.f32.mrb[28].mxu0  ;;  %v2898_v34 = vpop.f32.mrb[28].mxu1 }
 0x32e   :  { %v4200_v13 = vpack.c.bf16 %v3211_v3, %v3211_v3  ;;  %v3212_v24 = vmax.f32 %v3131_v12, 0.0  ;;  %v2277_v5 = vmax.f32 %v7719_v25, %v2131_v33  ;;  %v4917_v18 = vpop.f32.mrb[29].mxu0  ;;  %v5097_v43 = vpop.f32.mrb[29].mxu1  ;;  %v7732_v12 = vld [vmem:[#allocation82_spill] sm:$0xff]  ;;  %v7733_v33 = vld [vmem:[#allocation83_spill] sm:$0xff] }
 0x32f   :  { %v2134_v44 = vpop.f32.mrb[30].mxu0  ;;  %v2901_v54 = vpop.f32.mrb[30].mxu1 }
 0x330   :  { %3618 = vst.msk [vmem:[%s7359_s3 + $0xe8] sm:$0xf] %vm3559_vm1, %v4200_v13  ;;  %v4201_v23 = vpack.c.bf16 %v3212_v24, %v3212_v24  ;;  %v3044_v42 = vmax.f32 %v2277_v5, %v2898_v34  ;;  %v2278_v61 = vmax.f32 %v7722_v60, %v2134_v44  ;;  %v4918_v11 = vpop.f32.mrb[31].mxu0  ;;  %v5098_v31 = vpop.f32.mrb[31].mxu1  ;;  %v7734_v34 = vmax.f32 %v7732_v12, %v7733_v33  ;;  %v7748_v12 = vld [vmem:[#allocation93_spill] sm:$0xff] }
 0x332   :  { %3619 = vst.msk [vmem:[%s7359_s3 + $0xec] sm:$0xf] %vm3559_vm1, %v4201_v23  ;;  %v3132_v28 = vadd.f32 %v7049_v39, %v3044_v42  ;;  %v3045_v16 = vmax.f32 %v2278_v61, %v2901_v54  ;;  %v7735_v42 = vld [vmem:[#allocation84_spill] sm:$0xff] }
 0x333   :  { %v7737_v62 = vmax.f32 %v7735_v42, %v7736_v52 }
 0x334   :  { %v3213_v41 = vmax.f32 %v3132_v28, 0.0  ;;  %v3133_v46 = vadd.f32 %v7049_v39, %v3045_v16 }
 0x335   :  { %v2139_v50 = vpop.f32.mrb[32].mxu0  ;;  %v2906_v45 = vpop.f32.mrb[32].mxu1 }
 0x336   :  { %v4202_v32 = vpack.c.bf16 %v3213_v41, %v3213_v41  ;;  %v3214_v19 = vmax.f32 %v3133_v46, 0.0  ;;  %v2279_v57 = vmax.f32 %v7725_v10, %v2139_v50  ;;  %v4921_v58 = vpop.f32.mrb[33].mxu0  ;;  %v5101_v7 = vpop.f32.mrb[33].mxu1  ;;  %v7738_v46 = vld [vmem:[#allocation86_spill] sm:$0xff]  ;;  %v7739_v50 = vld [vmem:[#allocation87_spill] sm:$0xff] }
 0x337   :  { %v2142_v8 = vpop.f32.mrb[34].mxu0  ;;  %v2909_v30 = vpop.f32.mrb[34].mxu1 }
 0x338   :  { %3620 = vst.msk [vmem:[%s7359_s3 + $0xf0] sm:$0xf] %vm3559_vm1, %v4202_v32  ;;  %v4203_v29 = vpack.c.bf16 %v3214_v19, %v3214_v19  ;;  %v3046_v35 = vmax.f32 %v2279_v57, %v2906_v45  ;;  %v2280_v49 = vmax.f32 %v7728_v48, %v2142_v8  ;;  %v4922_v47 = vpop.f32.mrb[35].mxu0  ;;  %v5102_v6 = vpop.f32.mrb[35].mxu1  ;;  %v7740_v45 = vmax.f32 %v7738_v46, %v7739_v50  ;;  %v7754_v46 = vld [vmem:[#allocation97_spill] sm:$0xff] }
 0x33a   :  { %3621 = vst.msk [vmem:[%s7359_s3 + $0xf4] sm:$0xf] %vm3559_vm1, %v4203_v29  ;;  %v3134_v0 = vadd.f32 %v7049_v39, %v3046_v35  ;;  %v3047_v63 = vmax.f32 %v2280_v49, %v2909_v30  ;;  %v7741_v35 = vld [vmem:[#allocation88_spill] sm:$0xff] }
 0x33b   :  { %v7743_v15 = vmax.f32 %v7741_v35, %v7742_v27 }
 0x33c   :  { %v3215_v2 = vmax.f32 %v3134_v0, 0.0  ;;  %v3135_v26 = vadd.f32 %v7049_v39, %v3047_v63 }
 0x33d   :  { %v2147_v1 = vpop.f32.mrb[36].mxu0  ;;  %v2914_v59 = vpop.f32.mrb[36].mxu1 }
 0x33e   :  { %v4204_v55 = vpack.c.bf16 %v3215_v2, %v3215_v2  ;;  %v3216_v4 = vmax.f32 %v3135_v26, 0.0  ;;  %v2281_v56 = vmax.f32 %v7731_v21, %v2147_v1  ;;  %v4925_v40 = vpop.f32.mrb[37].mxu0  ;;  %v5105_v36 = vpop.f32.mrb[37].mxu1  ;;  %v7744_v26 = vld [vmem:[#allocation90_spill] sm:$0xff]  ;;  %v7745_v1 = vld [vmem:[#allocation91_spill] sm:$0xff] }
 0x33f   :  { %v2150_v38 = vpop.f32.mrb[38].mxu0  ;;  %v2917_v37 = vpop.f32.mrb[38].mxu1 }
 0x340   :  { %3622 = vst.msk [vmem:[%s7359_s3 + $0xf8] sm:$0xf] %vm3559_vm1, %v4204_v55  ;;  %v4205_v22 = vpack.c.bf16 %v3216_v4, %v3216_v4  ;;  %v3048_v3 = vmax.f32 %v2281_v56, %v2914_v59  ;;  %v2282_v13 = vmax.f32 %v7734_v34, %v2150_v38  ;;  %v4926_v24 = vpop.f32.mrb[39].mxu0  ;;  %v5106_v53 = vpop.f32.mrb[39].mxu1  ;;  %v7746_v59 = vmax.f32 %v7744_v26, %v7745_v1  ;;  %v7760_v26 = vld [vmem:[#allocation101_spill] sm:$0xff] }
 0x342   :  { %3623 = vst.msk [vmem:[%s7359_s3 + $0xfc] sm:$0xf] %vm3559_vm1, %v4205_v22  ;;  %v3136_v51 = vadd.f32 %v7049_v39, %v3048_v3  ;;  %v3049_v25 = vmax.f32 %v2282_v13, %v2917_v37  ;;  %v7747_v3 = vld [vmem:[#allocation92_spill] sm:$0xff] }
 0x343   :  { %v7749_v33 = vmax.f32 %v7747_v3, %v7748_v12 }
 0x344   :  { %v3217_v5 = vmax.f32 %v3136_v51, 0.0  ;;  %v3137_v18 = vadd.f32 %v7049_v39, %v3049_v25 }
 0x345   :  { %v2155_v43 = vpop.f32.mrb[40].mxu0  ;;  %v2922_v44 = vpop.f32.mrb[40].mxu1 }
 0x346   :  { %v4206_v54 = vpack.c.bf16 %v3217_v5, %v3217_v5  ;;  %v3218_v23 = vmax.f32 %v3137_v18, 0.0  ;;  %v2283_v60 = vmax.f32 %v7737_v62, %v2155_v43  ;;  %v4929_v61 = vpop.f32.mrb[41].mxu0  ;;  %v5109_v11 = vpop.f32.mrb[41].mxu1  ;;  %v7750_v18 = vld [vmem:[#allocation94_spill] sm:$0xff]  ;;  %v7751_v43 = vld [vmem:[#allocation95_spill] sm:$0xff] }
 0x347   :  { %v2158_v31 = vpop.f32.mrb[42].mxu0  ;;  %v2925_v28 = vpop.f32.mrb[42].mxu1 }
 0x348   :  { %3624 = vst.msk [vmem:[%s7359_s3 + $0x100] sm:$0xf] %vm3559_vm1, %v4206_v54  ;;  %v4207_v16 = vpack.c.bf16 %v3218_v23, %v3218_v23  ;;  %v3050_v41 = vmax.f32 %v2283_v60, %v2922_v44  ;;  %v2284_v32 = vmax.f32 %v7740_v45, %v2158_v31  ;;  %v4930_v19 = vpop.f32.mrb[43].mxu0  ;;  %v5110_v20 = vpop.f32.mrb[43].mxu1  ;;  %v7752_v44 = vmax.f32 %v7750_v18, %v7751_v43  ;;  %v7766_v18 = vld [vmem:[#allocation105_spill] sm:$0xff] }
 0x34a   :  { %3625 = vst.msk [vmem:[%s7359_s3 + $0x104] sm:$0xf] %vm3559_vm1, %v4207_v16  ;;  %v3138_v9 = vadd.f32 %v7049_v39, %v3050_v41  ;;  %v3051_v10 = vmax.f32 %v2284_v32, %v2925_v28  ;;  %v7753_v41 = vld [vmem:[#allocation96_spill] sm:$0xff] }
 0x34b   :  { %v7755_v50 = vmax.f32 %v7753_v41, %v7754_v46 }
 0x34c   :  { %v3219_v57 = vmax.f32 %v3138_v9, 0.0  ;;  %v3139_v58 = vadd.f32 %v7049_v39, %v3051_v10 }
 0x34d   :  { %v2163_v7 = vpop.f32.mrb[44].mxu0  ;;  %v2930_v8 = vpop.f32.mrb[44].mxu1 }
 0x34e   :  { %v4208_v30 = vpack.c.bf16 %v3219_v57, %v3219_v57  ;;  %v3220_v29 = vmax.f32 %v3139_v58, 0.0  ;;  %v2285_v48 = vmax.f32 %v7743_v15, %v2163_v7  ;;  %v4933_v49 = vpop.f32.mrb[45].mxu0  ;;  %v5113_v47 = vpop.f32.mrb[45].mxu1  ;;  %v7756_v58 = vld [vmem:[#allocation98_spill] sm:$0xff]  ;;  %v7757_v7 = vld [vmem:[#allocation99_spill] sm:$0xff] }
 0x34f   :  { %v2166_v6 = vpop.f32.mrb[46].mxu0  ;;  %v2933_v0 = vpop.f32.mrb[46].mxu1 }
 0x350   :  { %3626 = vst.msk [vmem:[%s7359_s3 + $0x108] sm:$0xf] %vm3559_vm1, %v4208_v30  ;;  %v4209_v63 = vpack.c.bf16 %v3220_v29, %v3220_v29  ;;  %v3052_v2 = vmax.f32 %v2285_v48, %v2930_v8  ;;  %v2286_v55 = vmax.f32 %v7746_v59, %v2166_v6  ;;  %v4934_v4 = vpop.f32.mrb[47].mxu0  ;;  %v5114_v14 = vpop.f32.mrb[47].mxu1  ;;  %v7758_v8 = vmax.f32 %v7756_v58, %v7757_v7  ;;  %v7772_v58 = vld [vmem:[#allocation109_spill] sm:$0xff] }
 0x352   :  { %3627 = vst.msk [vmem:[%s7359_s3 + $0x10c] sm:$0xf] %vm3559_vm1, %v4209_v63  ;;  %v3140_v17 = vadd.f32 %v7049_v39, %v3052_v2  ;;  %v3053_v21 = vmax.f32 %v2286_v55, %v2933_v0  ;;  %v7759_v2 = vld [vmem:[#allocation100_spill] sm:$0xff] }
 0x353   :  { %v7761_v1 = vmax.f32 %v7759_v2, %v7760_v26 }
 0x354   :  { %v3221_v56 = vmax.f32 %v3140_v17, 0.0  ;;  %v3141_v40 = vadd.f32 %v7049_v39, %v3053_v21 }
 0x355   :  { %v2171_v36 = vpop.f32.mrb[48].mxu0  ;;  %v2938_v38 = vpop.f32.mrb[48].mxu1 }
 0x356   :  { %v4210_v37 = vpack.c.bf16 %v3221_v56, %v3221_v56  ;;  %v3222_v22 = vmax.f32 %v3141_v40, 0.0  ;;  %v2287_v34 = vmax.f32 %v7749_v33, %v2171_v36  ;;  %v4937_v13 = vpop.f32.mrb[49].mxu0  ;;  %v5117_v24 = vpop.f32.mrb[49].mxu1  ;;  %v7762_v40 = vld [vmem:[#allocation102_spill] sm:$0xff]  ;;  %v7763_v36 = vld [vmem:[#allocation103_spill] sm:$0xff] }
 0x357   :  { %v2174_v53 = vpop.f32.mrb[50].mxu0  ;;  %v2941_v51 = vpop.f32.mrb[50].mxu1 }
 0x358   :  { %3628 = vst.msk [vmem:[%s7359_s3 + $0x110] sm:$0xf] %vm3559_vm1, %v4210_v37  ;;  %v4211_v25 = vpack.c.bf16 %v3222_v22, %v3222_v22  ;;  %v3054_v5 = vmax.f32 %v2287_v34, %v2938_v38  ;;  %v2288_v54 = vmax.f32 %v7752_v44, %v2174_v53  ;;  %v4938_v23 = vpop.f32.mrb[51].mxu0  ;;  %v5118_v42 = vpop.f32.mrb[51].mxu1  ;;  %v7764_v38 = vmax.f32 %v7762_v40, %v7763_v36  ;;  %v7778_v40 = vld [vmem:[#allocation113_spill] sm:$0xff] }
 0x35a   :  { %3629 = vst.msk [vmem:[%s7359_s3 + $0x114] sm:$0xf] %vm3559_vm1, %v4211_v25  ;;  %v3142_v52 = vadd.f32 %v7049_v39, %v3054_v5  ;;  %v3055_v62 = vmax.f32 %v2288_v54, %v2941_v51  ;;  %v7765_v5 = vld [vmem:[#allocation104_spill] sm:$0xff] }
 0x35b   :  { %v7767_v43 = vmax.f32 %v7765_v5, %v7766_v18 }
 0x35c   :  { %v3223_v60 = vmax.f32 %v3142_v52, 0.0  ;;  %v3143_v61 = vadd.f32 %v7049_v39, %v3055_v62 }
 0x35d   :  { %v2179_v11 = vpop.f32.mrb[52].mxu0  ;;  %v2946_v31 = vpop.f32.mrb[52].mxu1 }
 0x35e   :  { %v4212_v28 = vpack.c.bf16 %v3223_v60, %v3223_v60  ;;  %v3224_v16 = vmax.f32 %v3143_v61, 0.0  ;;  %v2289_v45 = vmax.f32 %v7755_v50, %v2179_v11  ;;  %v4941_v32 = vpop.f32.mrb[53].mxu0  ;;  %v5121_v19 = vpop.f32.mrb[53].mxu1  ;;  %v7768_v61 = vld [vmem:[#allocation106_spill] sm:$0xff]  ;;  %v7769_v11 = vld [vmem:[#allocation107_spill] sm:$0xff] }
 0x35f   :  { %v2182_v20 = vpop.f32.mrb[54].mxu0  ;;  %v2949_v9 = vpop.f32.mrb[54].mxu1 }
 0x360   :  { %3630 = vst.msk [vmem:[%s7359_s3 + $0x118] sm:$0xf] %vm3559_vm1, %v4212_v28  ;;  %v4213_v10 = vpack.c.bf16 %v3224_v16, %v3224_v16  ;;  %v3056_v57 = vmax.f32 %v2289_v45, %v2946_v31  ;;  %v2290_v30 = vmax.f32 %v7758_v8, %v2182_v20  ;;  %v4942_v29 = vpop.f32.mrb[55].mxu0  ;;  %v5122_v35 = vpop.f32.mrb[55].mxu1  ;;  %v7770_v31 = vmax.f32 %v7768_v61, %v7769_v11 }
 0x362   :  { %3631 = vst.msk [vmem:[%s7359_s3 + $0x11c] sm:$0xf] %vm3559_vm1, %v4213_v10  ;;  %v3144_v27 = vadd.f32 %v7049_v39, %v3056_v57  ;;  %v3057_v15 = vmax.f32 %v2290_v30, %v2949_v9  ;;  %v7771_v57 = vld [vmem:[#allocation108_spill] sm:$0xff] }
 0x363   :  { %v7773_v7 = vmax.f32 %v7771_v57, %v7772_v58 }
 0x364   :  { %v3225_v48 = vmax.f32 %v3144_v27, 0.0  ;;  %v3145_v49 = vadd.f32 %v7049_v39, %v3057_v15 }
 0x365   :  { %v2187_v47 = vpop.f32.mrb[56].mxu0  ;;  %v2954_v6 = vpop.f32.mrb[56].mxu1 }
 0x366   :  { %v4214_v0 = vpack.c.bf16 %v3225_v48, %v3225_v48  ;;  %v3226_v63 = vmax.f32 %v3145_v49, 0.0  ;;  %v2291_v59 = vmax.f32 %v7761_v1, %v2187_v47  ;;  %v4945_v55 = vpop.f32.mrb[57].mxu0  ;;  %v5125_v4 = vpop.f32.mrb[57].mxu1  ;;  %v7774_v49 = vld [vmem:[#allocation110_spill] sm:$0xff]  ;;  %v7775_v47 = vld [vmem:[#allocation111_spill] sm:$0xff] }
 0x367   :  { %v2190_v14 = vpop.f32.mrb[58].mxu0  ;;  %v2957_v17 = vpop.f32.mrb[58].mxu1 }
 0x368   :  { %3632 = vst.msk [vmem:[%s7359_s3 + $0x120] sm:$0xf] %vm3559_vm1, %v4214_v0  ;;  %v4215_v21 = vpack.c.bf16 %v3226_v63, %v3226_v63  ;;  %v3058_v56 = vmax.f32 %v2291_v59, %v2954_v6  ;;  %v2292_v37 = vmax.f32 %v7764_v38, %v2190_v14  ;;  %v4946_v22 = vpop.f32.mrb[59].mxu0  ;;  %v5126_v3 = vpop.f32.mrb[59].mxu1  ;;  %v7776_v6 = vmax.f32 %v7774_v49, %v7775_v47 }
 0x36a   :  { %3633 = vst.msk [vmem:[%s7359_s3 + $0x124] sm:$0xf] %vm3559_vm1, %v4215_v21  ;;  %v3146_v12 = vadd.f32 %v7049_v39, %v3058_v56  ;;  %v3059_v33 = vmax.f32 %v2292_v37, %v2957_v17  ;;  %v7777_v56 = vld [vmem:[#allocation112_spill] sm:$0xff] }
 0x36b   :  { %v7779_v36 = vmax.f32 %v7777_v56, %v7778_v40 }
 0x36c   :  { %v3227_v34 = vmax.f32 %v3146_v12, 0.0  ;;  %v3147_v13 = vadd.f32 %v7049_v39, %v3059_v33 }
 0x36d   :  { %v2195_v24 = vpop.f32.mrb[60].mxu0  ;;  %v2962_v53 = vpop.f32.mrb[60].mxu1 }
 0x36e   :  { %v4216_v51 = vpack.c.bf16 %v3227_v34, %v3227_v34  ;;  %v3228_v25 = vmax.f32 %v3147_v13, 0.0  ;;  %v2293_v44 = vmax.f32 %v7767_v43, %v2195_v24  ;;  %v4949_v54 = vpop.f32.mrb[61].mxu0  ;;  %v5129_v23 = vpop.f32.mrb[61].mxu1 }
 0x36f   :  { %v2198_v42 = vpop.f32.mrb[62].mxu0  ;;  %v2965_v52 = vpop.f32.mrb[62].mxu1 }
 0x370   :  { %3634 = vst.msk [vmem:[%s7359_s3 + $0x128] sm:$0xf] %vm3559_vm1, %v4216_v51  ;;  %v4217_v62 = vpack.c.bf16 %v3228_v25, %v3228_v25  ;;  %v3060_v60 = vmax.f32 %v2293_v44, %v2962_v53  ;;  %v2294_v28 = vmax.f32 %v7770_v31, %v2198_v42  ;;  %v4950_v16 = vpop.f32.mrb[63].mxu0  ;;  %v5130_v41 = vpop.f32.mrb[63].mxu1 }
 0x372   :  { %3635 = vst.msk [vmem:[%s7359_s3 + $0x12c] sm:$0xf] %vm3559_vm1, %v4217_v62  ;;  %v3148_v46 = vadd.f32 %v7049_v39, %v3060_v60  ;;  %v3061_v50 = vmax.f32 %v2294_v28, %v2965_v52 }
 0x374   :  { %v3229_v45 = vmax.f32 %v3148_v46, 0.0  ;;  %v3149_v32 = vadd.f32 %v7049_v39, %v3061_v50 }
 0x375   :  { %v2203_v19 = vpop.f32.mrb[64].mxu0  ;;  %v2970_v20 = vpop.f32.mrb[64].mxu1 }
 0x376   :  { %v4218_v9 = vpack.c.bf16 %v3229_v45, %v3229_v45  ;;  %v3230_v10 = vmax.f32 %v3149_v32, 0.0  ;;  %v2295_v8 = vmax.f32 %v7773_v7, %v2203_v19  ;;  %v4953_v30 = vpop.f32.mrb[65].mxu0  ;;  %v5133_v29 = vpop.f32.mrb[65].mxu1 }
 0x377   :  { %v2206_v35 = vpop.f32.mrb[66].mxu0  ;;  %v2973_v27 = vpop.f32.mrb[66].mxu1 }
 0x378   :  { %3636 = vst.msk [vmem:[%s7359_s3 + $0x130] sm:$0xf] %vm3559_vm1, %v4218_v9  ;;  %v4219_v15 = vpack.c.bf16 %v3230_v10, %v3230_v10  ;;  %v3062_v48 = vmax.f32 %v2295_v8, %v2970_v20  ;;  %v2296_v0 = vmax.f32 %v7776_v6, %v2206_v35  ;;  %v4954_v63 = vpop.f32.mrb[67].mxu0  ;;  %v5134_v2 = vpop.f32.mrb[67].mxu1 }
 0x37a   :  { %3637 = vst.msk [vmem:[%s7359_s3 + $0x134] sm:$0xf] %vm3559_vm1, %v4219_v15  ;;  %v3150_v26 = vadd.f32 %v7049_v39, %v3062_v48  ;;  %v3063_v1 = vmax.f32 %v2296_v0, %v2973_v27 }
 0x37c   :  { %v3231_v59 = vmax.f32 %v3150_v26, 0.0  ;;  %v3151_v55 = vadd.f32 %v7049_v39, %v3063_v1 }
 0x37d   :  { %v2211_v4 = vpop.f32.mrb[68].mxu0  ;;  %v2978_v14 = vpop.f32.mrb[68].mxu1 }
 0x37e   :  { %v4220_v17 = vpack.c.bf16 %v3231_v59, %v3231_v59  ;;  %v3232_v21 = vmax.f32 %v3151_v55, 0.0  ;;  %v2297_v38 = vmax.f32 %v7779_v36, %v2211_v4  ;;  %v4957_v37 = vpop.f32.mrb[69].mxu0  ;;  %v5137_v22 = vpop.f32.mrb[69].mxu1 }
 0x37f   :  { %v2214_v3 = vpop.f32.mrb[70].mxu0  ;;  %v2981_v12 = vpop.f32.mrb[70].mxu1 }
 0x380   :  { %3638 = vst.msk [vmem:[%s7359_s3 + $0x138] sm:$0xf] %vm3559_vm1, %v4220_v17  ;;  %v4221_v33 = vpack.c.bf16 %v3232_v21, %v3232_v21  ;;  %v3064_v34 = vmax.f32 %v2297_v38, %v2978_v14  ;;  %v4958_v13 = vpop.f32.mrb[71].mxu0  ;;  %v5138_v24 = vpop.f32.mrb[71].mxu1 }
 0x382   :  { %3639 = vst.msk [vmem:[%s7359_s3 + $0x13c] sm:$0xf] %vm3559_vm1, %v4221_v33  ;;  %v3152_v53 = vadd.f32 %v7049_v39, %v3064_v34 }
 0x384   :  { %v3233_v51 = vmax.f32 %v3152_v53, 0.0 }
 0x386   :  { %v4222_v25 = vpack.c.bf16 %v3233_v51, %v3233_v51 }
 0x388   :  { %3640 = vst.msk [vmem:[%s7359_s3 + $0x140] sm:$0xf] %vm3559_vm1, %v4222_v25 }

// kernel: forward.7
= control target key start
LH: loop header
LB: loop body
LE: loop exit
PB: predicated region body
PF: predicated region fallthrough
CT: control target
= control target key end

     0   :  { %v649_v0 = vmov 0   ;;  %vm115_vm0 = vcmask 130048   ;;  %vm457_vm1 = vcmask 261120   ;;  %vm533_vm2 = vcmask 125952   ;;  %s835_s1 = inlined_call_operand.vmem [shape: bf16[144,32], index: 1, kind: input, shape index: {}]   ;;  %s836_s0 = inlined_call_operand.vmem [shape: bf16[4,32,144], index: 0, kind: input, shape index: {}]   ;;  %s837_s3 = inlined_call_operand.vmem [shape: bf16[32,16], index: 3, kind: input, shape index: {}]   ;;  %s838_s2 = inlined_call_operand.vmem [shape: f32[1,32], index: 2, kind: input, shape index: {}]   ;;  %s839_s4 = inlined_call_operand.vmem [shape: f32[1,16], index: 4, kind: input, shape index: {}]   ;;  %s840_s5 = inlined_call_operand.vmem [shape: bf16[32,16], index: 5, kind: output, shape index: {}]  }
   0x1   :  { %122 = vmatprep.subr.bf16.mxu0 %v649_v0  ;;  %200 = vmatprep.subr.bf16.mxu1 %v649_v0  ;;  %v614_v1 = vld [vmem:[%s835_s1] sm:$0xff]   ;;  %v615_v2 = vld [vmem:[%s835_s1 + $0x8] sm:$0xff]   ;;  %v693_v3 = vld [vmem:[%s835_s1 + $0x10] sm:$0xff]  }
   0x2   :  { %123 = vmatpush1.bf16.msra.mxu0 %v614_v1  ;;  %201 = vmatpush1.bf16.msra.mxu1 %v614_v1  ;;  %v700_v4 = vld [vmem:[%s835_s1 + $0x18] sm:$0xff]   ;;  %v625_v5 = vld [vmem:[%s836_s0 + $0x4] ss:$8 sps:$4 sm:$0xff]   ;;  %v620_v9 = vld [vmem:[%s835_s1 + $0x30] sm:$0xff]  }
   0x3   :  { %124 = vmatprep.subr.bf16.mxu0 %v649_v0  ;;  %202 = vmatprep.subr.bf16.mxu1 %v649_v0  ;;  %v628_v6 = vld [vmem:[%s836_s0 + $0x24] ss:$8 sps:$4 sm:$0xff]   ;;  %v621_v10 = vld [vmem:[%s835_s1 + $0x38] sm:$0xff]   ;;  %v623_v12 = vld [vmem:[%s836_s0] ss:$8 sps:$4 sm:$0xff]  }
   0x4   :  { %555 = vmatprep.mubr.msk.bf16.mxu0 %vm115_vm0, %v625_v5  ;;  %565 = vmatprep.mubr.msk.bf16.mxu1 %vm115_vm0, %v628_v6  ;;  %v618_v7 = vld [vmem:[%s835_s1 + $0x20] sm:$0xff]   ;;  %v619_v8 = vld [vmem:[%s835_s1 + $0x28] sm:$0xff]   ;;  %v629_v14 = vld [vmem:[%s836_s0 + $0x14] ss:$8 sps:$4 sm:$0xff]  }
   0x5   :  { %v622_v11 = vld [vmem:[%s835_s1 + $0x40] sm:$0xff]   ;;  %v632_v15 = vld [vmem:[%s836_s0 + $0x34] ss:$8 sps:$4 sm:$0xff]   ;;  %v631_v16 = vld [vmem:[%s836_s0 + $0x10] ss:$8 sps:$4 sm:$0xff]  }
   0x6   :  { %125 = vmatpush1.bf16.msra.mxu0 %v615_v2  ;;  %203 = vmatpush1.bf16.msra.mxu1 %v615_v2  ;;  %v626_v13 = vld [vmem:[%s836_s0 + $0x20] ss:$8 sps:$4 sm:$0xff]   ;;  %v634_v17 = vld [vmem:[%s836_s0 + $0x30] ss:$8 sps:$4 sm:$0xff]   ;;  %v637_v18 = vld [vmem:[%s836_s0 + $0x44] ss:$8 sps:$4 sm:$0xff]  }
   0x7   :  { %126 = vmatprep.subr.bf16.mxu0 %v649_v0  ;;  %204 = vmatprep.subr.bf16.mxu1 %v649_v0  ;;  %v640_v19 = vld [vmem:[%s836_s0 + $0x64] ss:$8 sps:$4 sm:$0xff]   ;;  %v635_v20 = vld [vmem:[%s836_s0 + $0x40] ss:$8 sps:$4 sm:$0xff]   ;;  %v641_v22 = vld [vmem:[%s836_s0 + $0x54] ss:$8 sps:$4 sm:$0xff]  }
   0x8   :  { %v638_v21 = vld [vmem:[%s836_s0 + $0x60] ss:$8 sps:$4 sm:$0xff]   ;;  %v643_v23 = vld [vmem:[%s836_s0 + $0x74] ss:$8 sps:$4 sm:$0xff]   ;;  %v645_v24 = vld [vmem:[%s836_s0 + $0x50] ss:$8 sps:$4 sm:$0xff]  }
   0x9   :  { %v646_v25 = vld [vmem:[%s836_s0 + $0x70] ss:$8 sps:$4 sm:$0xff]   ;;  %v647_v26 = vld [vmem:[%s837_s3] sm:$0xff]   ;;  %v648_v27 = vld [vmem:[%s837_s3 + $0x8] sm:$0xff]  }
   0xa   :  { %127 = vmatpush1.bf16.msra.mxu0 %v693_v3  ;;  %205 = vmatpush1.bf16.msra.mxu1 %v693_v3  ;;  %v587_v53 = vld [vmem:[%s838_s2] ss:$0 sm:$0xff] }
   0xb   :  { %128 = vmatprep.subr.bf16.mxu0 %v649_v0  ;;  %206 = vmatprep.subr.bf16.mxu1 %v649_v0 }
   0xe   :  { %129 = vmatpush1.bf16.msra.mxu0 %v700_v4  ;;  %207 = vmatpush1.bf16.msra.mxu1 %v700_v4 }
   0xf   :  { %130 = vmatprep.subr.bf16.mxu0 %v649_v0  ;;  %208 = vmatprep.subr.bf16.mxu1 %v649_v0 }
  0x12   :  { %131 = vmatpush1.bf16.msra.mxu0 %v618_v7  ;;  %209 = vmatpush1.bf16.msra.mxu1 %v618_v7 }
  0x13   :  { %132 = vmatprep.subr.bf16.mxu0 %v649_v0  ;;  %210 = vmatprep.subr.bf16.mxu1 %v649_v0 }
  0x16   :  { %133 = vmatpush1.bf16.msra.mxu0 %v619_v8  ;;  %211 = vmatpush1.bf16.msra.mxu1 %v619_v8 }
  0x17   :  { %134 = vmatprep.subr.bf16.mxu0 %v649_v0  ;;  %212 = vmatprep.subr.bf16.mxu1 %v649_v0 }
  0x1a   :  { %135 = vmatpush1.bf16.msra.mxu0 %v620_v9  ;;  %213 = vmatpush1.bf16.msra.mxu1 %v620_v9 }
  0x1b   :  { %136 = vmatprep.subr.bf16.mxu0 %v649_v0  ;;  %214 = vmatprep.subr.bf16.mxu1 %v649_v0 }
  0x1e   :  { %137 = vmatpush1.bf16.msra.mxu0 %v621_v10  ;;  %215 = vmatpush1.bf16.msra.mxu1 %v621_v10 }
  0x1f   :  { %138 = vmatprep.subr.bf16.mxu0 %v649_v0  ;;  %216 = vmatprep.subr.bf16.mxu1 %v649_v0 }
  0x22   :  { %139 = vmatpush1.bf16.msra.mxu0 %v622_v11  ;;  %217 = vmatpush1.bf16.msra.mxu1 %v622_v11 }
  0x23   :  { %282 = vmatprep.subr.bf16.mxu0 %v649_v0  ;;  %364 = vmatprep.subr.bf16.mxu1 %v649_v0 }
  0x25   :  { %155 = vmatmul.mubr.bf16.vlgmr.msra.gmra.mrb[0].mxu0 %v623_v12  ;;  %233 = vmatmul.mubr.bf16.vlgmr.msra.gmra.mrb[0].mxu1 %v626_v13 }
  0x26   :  { %283 = vmatpush1.bf16.msra.mxu0 %v614_v1  ;;  %365 = vmatpush1.bf16.msra.mxu1 %v614_v1 }
  0x27   :  { %284 = vmatprep.subr.bf16.mxu0 %v649_v0  ;;  %366 = vmatprep.subr.bf16.mxu1 %v649_v0 }
  0x28   :  { %556 = vmatprep.mubr.msk.bf16.mxu0 %vm115_vm0, %v629_v14  ;;  %566 = vmatprep.mubr.msk.bf16.mxu1 %vm115_vm0, %v632_v15 }
  0x2a   :  { %285 = vmatpush1.bf16.msra.mxu0 %v615_v2  ;;  %367 = vmatpush1.bf16.msra.mxu1 %v615_v2 }
  0x2b   :  { %286 = vmatprep.subr.bf16.mxu0 %v649_v0  ;;  %368 = vmatprep.subr.bf16.mxu1 %v649_v0 }
  0x2d   :  { %163 = vmatmul.mubr.bf16.gmra.mrb[4].mxu0 %v631_v16  ;;  %241 = vmatmul.mubr.bf16.gmra.mrb[4].mxu1 %v634_v17 }
  0x2e   :  { %287 = vmatpush1.bf16.msra.mxu0 %v693_v3  ;;  %369 = vmatpush1.bf16.msra.mxu1 %v693_v3 }
  0x2f   :  { %288 = vmatprep.subr.bf16.mxu0 %v649_v0  ;;  %370 = vmatprep.subr.bf16.mxu1 %v649_v0 }
  0x30   :  { %575 = vmatprep.mubr.msk.bf16.mxu0 %vm115_vm0, %v637_v18  ;;  %585 = vmatprep.mubr.msk.bf16.mxu1 %vm115_vm0, %v640_v19  ;;  %v588_v19 = vld [vmem:[%s839_s4] ss:$0 sm:$0xff] }
  0x32   :  { %289 = vmatpush1.bf16.msra.mxu0 %v700_v4  ;;  %371 = vmatpush1.bf16.msra.mxu1 %v700_v4 }
  0x33   :  { %290 = vmatprep.subr.bf16.mxu0 %v649_v0  ;;  %372 = vmatprep.subr.bf16.mxu1 %v649_v0 }
  0x36   :  { %291 = vmatpush1.bf16.msra.mxu0 %v618_v7  ;;  %373 = vmatpush1.bf16.msra.mxu1 %v618_v7 }
  0x37   :  { %292 = vmatprep.subr.bf16.mxu0 %v649_v0  ;;  %374 = vmatprep.subr.bf16.mxu1 %v649_v0 }
  0x3a   :  { %293 = vmatpush1.bf16.msra.mxu0 %v619_v8  ;;  %375 = vmatpush1.bf16.msra.mxu1 %v619_v8 }
  0x3b   :  { %294 = vmatprep.subr.bf16.mxu0 %v649_v0  ;;  %376 = vmatprep.subr.bf16.mxu1 %v649_v0 }
  0x3e   :  { %295 = vmatpush1.bf16.msra.mxu0 %v620_v9  ;;  %377 = vmatpush1.bf16.msra.mxu1 %v620_v9 }
  0x3f   :  { %296 = vmatprep.subr.bf16.mxu0 %v649_v0  ;;  %378 = vmatprep.subr.bf16.mxu1 %v649_v0 }
  0x42   :  { %297 = vmatpush1.bf16.msra.mxu0 %v621_v10  ;;  %379 = vmatpush1.bf16.msra.mxu1 %v621_v10 }
  0x43   :  { %298 = vmatprep.subr.bf16.mxu0 %v649_v0  ;;  %380 = vmatprep.subr.bf16.mxu1 %v649_v0 }
  0x46   :  { %299 = vmatpush1.bf16.msra.mxu0 %v622_v11  ;;  %381 = vmatpush1.bf16.msra.mxu1 %v622_v11 }
  0x47   :  { %605 = vmatprep.subr.bf16.mxu0 %v647_v26 }
  0x49   :  { %315 = vmatmul.mubr.bf16.vlgmr.msra.gmra.mrb[8].mxu0 %v635_v20  ;;  %397 = vmatmul.mubr.bf16.vlgmr.msra.gmra.mrb[8].mxu1 %v638_v21 }
  0x4a   :  { %576 = vmatprep.mubr.msk.bf16.mxu0 %vm115_vm0, %v641_v22  ;;  %586 = vmatprep.mubr.msk.bf16.mxu1 %vm115_vm0, %v643_v23 }
  0x4b   :  { %606 = vmatpush3.bf16.msra.mxu0 %v647_v26 }
  0x4c   :  { %607 = vmatprep.subr.bf16.mxu0 %v648_v27 }
  0x4f   :  { %608 = vmatpush3.bf16.msra.mxu0 %v648_v27 }
  0x51   :  { %323 = vmatmul.mubr.bf16.gmra.mrb[12].mxu0 %v645_v24  ;;  %405 = vmatmul.mubr.bf16.gmra.mrb[12].mxu1 %v646_v25 }
  0xf8   :  { %v156_v28 = vpop.f32.mrb[0].mxu0  ;;  %v234_v29 = vpop.f32.mrb[0].mxu1 }
  0xf9   :  { %v249_v30 = vmax.f32 %v156_v28, %v234_v29  ;;  %v158_v31 = vpop.f32.mrb[1].mxu0  ;;  %v236_v32 = vpop.f32.mrb[1].mxu1 }
  0xfa   :  { %v159_v33 = vpop.f32.mrb[2].mxu0  ;;  %v237_v34 = vpop.f32.mrb[2].mxu1 }
  0xfb   :  { %v250_v35 = vmax.f32 %v159_v33, %v237_v34  ;;  %v161_v36 = vpop.f32.mrb[3].mxu0  ;;  %v239_v37 = vpop.f32.mrb[3].mxu1 }
 0x100   :  { %v164_v38 = vpop.f32.mrb[4].mxu0  ;;  %v242_v39 = vpop.f32.mrb[4].mxu1 }
 0x101   :  { %v166_v40 = vpop.f32.mrb[5].mxu0  ;;  %v251_v41 = vmax.f32 %v164_v38, %v242_v39  ;;  %v244_v42 = vpop.f32.mrb[5].mxu1 }
 0x102   :  { %v167_v43 = vpop.f32.mrb[6].mxu0  ;;  %v245_v44 = vpop.f32.mrb[6].mxu1 }
 0x103   :  { %v169_v45 = vpop.f32.mrb[7].mxu0  ;;  %v252_v46 = vmax.f32 %v167_v43, %v245_v44  ;;  %v247_v47 = vpop.f32.mrb[7].mxu1 }
 0x11c   :  { %v316_v48 = vpop.f32.mrb[8].mxu0  ;;  %v398_v49 = vpop.f32.mrb[8].mxu1 }
 0x11d   :  { %v331_v50 = vmax.f32 %v249_v30, %v316_v48  ;;  %v318_v51 = vpop.f32.mrb[9].mxu0  ;;  %v400_v52 = vpop.f32.mrb[9].mxu1 }
 0x11e   :  { %v319_v54 = vpop.f32.mrb[10].mxu0  ;;  %v401_v55 = vpop.f32.mrb[10].mxu1 }
 0x11f   :  { %v413_v56 = vmax.f32 %v331_v50, %v398_v49  ;;  %v332_v57 = vmax.f32 %v250_v35, %v319_v54  ;;  %v321_v58 = vpop.f32.mrb[11].mxu0  ;;  %v403_v59 = vpop.f32.mrb[11].mxu1 }
 0x121   :  { %v424_v60 = vadd.f32 %v587_v53, %v413_v56  ;;  %v414_v61 = vmax.f32 %v332_v57, %v401_v55 }
 0x123   :  { %v425_v62 = vadd.f32 %v587_v53, %v414_v61  ;;  %v428_v1 = vmax.f32 %v424_v60, 0.0 }
 0x124   :  { %v324_v63 = vpop.f32.mrb[12].mxu0  ;;  %v406_v0 = vpop.f32.mrb[12].mxu1 }
 0x125   :  { %v429_v2 = vmax.f32 %v425_v62, 0.0  ;;  %v333_v3 = vmax.f32 %v251_v41, %v324_v63  ;;  %v326_v4 = vpop.f32.mrb[13].mxu0  ;;  %v408_v5 = vpop.f32.mrb[13].mxu1 }
 0x126   :  { %v327_v6 = vpop.f32.mrb[14].mxu0  ;;  %v409_v7 = vpop.f32.mrb[14].mxu1 }
 0x127   :  { %v437_v8 = vpack.c.bf16 %v429_v2, %v428_v1  ;;  %v415_v9 = vmax.f32 %v333_v3, %v406_v0  ;;  %v334_v10 = vmax.f32 %v252_v46, %v327_v6  ;;  %v329_v11 = vpop.f32.mrb[15].mxu0  ;;  %v411_v12 = vpop.f32.mrb[15].mxu1 }
 0x129   :  { %v426_v13 = vadd.f32 %v587_v53, %v415_v9  ;;  %v416_v14 = vmax.f32 %v334_v10, %v409_v7  ;;  %609 = vmatprep.mubr.msk.bf16.mxu0 %vm457_vm1, %v437_v8 }
 0x12b   :  { %v427_v15 = vadd.f32 %v587_v53, %v416_v14  ;;  %v430_v16 = vmax.f32 %v426_v13, 0.0 }
 0x12d   :  { %v431_v17 = vmax.f32 %v427_v15, 0.0 }
 0x12f   :  { %v438_v18 = vpack.c.bf16 %v431_v17, %v430_v16 }
 0x131   :  { %610 = vmatmul.mubr.msk.bf16.vlgmr.msra.gmra.mrb[16].mxu0 %vm457_vm1, %v438_v18 }
 0x204   :  { %v611_v20 = vpop.f32.mrb[16].mxu0 }
 0x205   :  { %v507_v21 = vadd.f32 %v611_v20, %v588_v19  ;;  %v498_v22 = vpop.f32.mrb[17].mxu0 }
 0x206   :  { %v499_v23 = vadd.f32 %v588_v19, %v498_v22  ;;  %v612_v24 = vpop.f32.mrb[18].mxu0 }
 0x207   :  { %v515_v25 = vmax.f32 %v507_v21, 0.0  ;;  %v510_v26 = vadd.f32 %v612_v24, %v588_v19  ;;  %v501_v27 = vpop.f32.mrb[19].mxu0 }
 0x208   :  { %v513_v28 = vmax.f32 %v499_v23, 0.0  ;;  %v502_v29 = vadd.f32 %v588_v19, %v501_v27 }
 0x209   :  { %v599_v30 = vpack.c.bf16 %v515_v25, %v515_v25  ;;  %v516_v31 = vmax.f32 %v510_v26, 0.0 }
 0x20a   :  { %v597_v32 = vpack.c.bf16 %v513_v28, %v513_v28  ;;  %v514_v33 = vmax.f32 %v502_v29, 0.0 }
 0x20b   :  { %536 = vst.msk [vmem:[%s840_s5 + $0x8] sm:$0xf] %vm533_vm2, %v599_v30  ;;  %v600_v34 = vpack.c.bf16 %v516_v31, %v516_v31 }
 0x20c   :  { %534 = vst.msk [vmem:[%s840_s5] sm:$0xf] %vm533_vm2, %v597_v32  ;;  %v598_v35 = vpack.c.bf16 %v514_v33, %v514_v33 }
 0x20d   :  { %537 = vst.msk [vmem:[%s840_s5 + $0xc] sm:$0xf] %vm533_vm2, %v600_v34 }
 0x20e   :  { %535 = vst.msk [vmem:[%s840_s5 + $0x4] sm:$0xf] %vm533_vm2, %v598_v35 }

// kernel: forward.8
= control target key start
LH: loop header
LB: loop body
LE: loop exit
PB: predicated region body
PF: predicated region fallthrough
CT: control target
= control target key end

     0   :  { %v520_v0 = vmov 0   ;;  %vm100_vm0 = vcmask 130048   ;;  %v521_v22 = vmov 0.0   ;;  %vm522_vm1 = vmmov 0   ;;  %s677_s1 = inlined_call_operand.vmem [shape: bf16[144,128], index: 1, kind: input, shape index: {}]   ;;  %s678_s0 = inlined_call_operand.vmem [shape: bf16[4,8,144], index: 0, kind: input, shape index: {}]   ;;  %s679_s3 = inlined_call_operand.vmem [shape: bf16[128,32], index: 3, kind: input, shape index: {}]   ;;  %s680_s2 = inlined_call_operand.vmem [shape: f32[1,128], index: 2, kind: input, shape index: {}]   ;;  %s681_s4 = inlined_call_operand.vmem [shape: f32[1,32], index: 4, kind: input, shape index: {}]   ;;  %s682_s5 = inlined_call_operand.vmem [shape: bf16[8,32], index: 5, kind: output, shape index: {}]  }
   0x1   :  { %104 = vmatprep.subr.bf16.mxu0 %v520_v0  ;;  %155 = vmatprep.subr.bf16.mxu1 %v520_v0  ;;  %v495_v1 = vld [vmem:[%s677_s1] sm:$0xff]   ;;  %v561_v2 = vld [vmem:[%s677_s1 + $0x8] sm:$0xff]   ;;  %v570_v3 = vld [vmem:[%s677_s1 + $0x10] sm:$0xff]   ;;  %vm423_vm2 = vcmask 257024  }
   0x2   :  { %105 = vmatpush1.bf16.msra.mxu0 %v495_v1  ;;  %156 = vmatpush1.bf16.msra.mxu1 %v495_v1  ;;  %v39_v4 = vld [vmem:[%s678_s0] sm:$0xff]  ;;  %v441_v5 = vld [vmem:[%s678_s0 + $0x8] sm:$0xff]  ;;  %v498_v6 = vld [vmem:[%s677_s1 + $0x18] sm:$0xff]  }
   0x3   :  { %106 = vmatprep.subr.bf16.mxu0 %v520_v0  ;;  %157 = vmatprep.subr.bf16.mxu1 %v520_v0  ;;  %v430_v7 = vcombine.high %v39_v4, %v39_v4  ;;  %v443_v8 = vcombine.high %v441_v5, %v441_v5  ;;  %v499_v9 = vld [vmem:[%s677_s1 + $0x20] sm:$0xff]   ;;  %v500_v10 = vld [vmem:[%s677_s1 + $0x28] sm:$0xff]   ;;  %v501_v11 = vld [vmem:[%s677_s1 + $0x30] sm:$0xff]   ;;  %v429_v14 = vcombine.low %v39_v4, %v39_v4 }
   0x4   :  { %v502_v12 = vld [vmem:[%s677_s1 + $0x38] sm:$0xff]   ;;  %v503_v13 = vld [vmem:[%s677_s1 + $0x40] sm:$0xff]   ;;  %v442_v15 = vcombine.low %v441_v5, %v441_v5  ;;  %v445_v16 = vld [vmem:[%s678_s0 + $0x10] sm:$0xff] }
   0x5   :  { %440 = vmatprep.mubr.msk.bf16.mxu0 %vm100_vm0, %v430_v7  ;;  %444 = vmatprep.mubr.msk.bf16.mxu1 %vm100_vm0, %v443_v8  ;;  %v449_v17 = vld [vmem:[%s678_s0 + $0x18] sm:$0xff]  ;;  %v447_v18 = vcombine.high %v445_v16, %v445_v16  ;;  %v446_v20 = vcombine.low %v445_v16, %v445_v16  ;;  %v512_v23 = vld [vmem:[%s679_s3] sm:$0xff]   ;;  %v513_v24 = vld [vmem:[%s679_s3 + $0x8] sm:$0xff]  }
   0x6   :  { %107 = vmatpush1.bf16.msra.mxu0 %v561_v2  ;;  %158 = vmatpush1.bf16.msra.mxu1 %v561_v2  ;;  %v451_v19 = vcombine.high %v449_v17, %v449_v17  ;;  %v450_v21 = vcombine.low %v449_v17, %v449_v17  ;;  %v514_v25 = vld [vmem:[%s679_s3 + $0x10] sm:$0xff]   ;;  %v515_v26 = vld [vmem:[%s679_s3 + $0x18] sm:$0xff]   ;;  %v516_v27 = vld [vmem:[%s679_s3 + $0x20] sm:$0xff]  }
   0x7   :  { %108 = vmatprep.subr.bf16.mxu0 %v520_v0  ;;  %159 = vmatprep.subr.bf16.mxu1 %v520_v0  ;;  %v517_v28 = vld [vmem:[%s679_s3 + $0x28] sm:$0xff]   ;;  %v518_v29 = vld [vmem:[%s679_s3 + $0x30] sm:$0xff]   ;;  %v519_v30 = vld [vmem:[%s679_s3 + $0x38] sm:$0xff]  }
   0x8   :  { %v453_v45 = vld [vmem:[%s680_s2] ss:$0 sm:$0xff] }
   0x9   :  { %v454_v54 = vld [vmem:[%s681_s4] ss:$0 sm:$0xff] }
   0xa   :  { %109 = vmatpush1.bf16.msra.mxu0 %v570_v3  ;;  %160 = vmatpush1.bf16.msra.mxu1 %v570_v3 }
   0xb   :  { %110 = vmatprep.subr.bf16.mxu0 %v520_v0  ;;  %161 = vmatprep.subr.bf16.mxu1 %v520_v0 }
   0xe   :  { %111 = vmatpush1.bf16.msra.mxu0 %v498_v6  ;;  %162 = vmatpush1.bf16.msra.mxu1 %v498_v6 }
   0xf   :  { %112 = vmatprep.subr.bf16.mxu0 %v520_v0  ;;  %163 = vmatprep.subr.bf16.mxu1 %v520_v0 }
  0x12   :  { %113 = vmatpush1.bf16.msra.mxu0 %v499_v9  ;;  %164 = vmatpush1.bf16.msra.mxu1 %v499_v9 }
  0x13   :  { %114 = vmatprep.subr.bf16.mxu0 %v520_v0  ;;  %165 = vmatprep.subr.bf16.mxu1 %v520_v0 }
  0x16   :  { %115 = vmatpush1.bf16.msra.mxu0 %v500_v10  ;;  %166 = vmatpush1.bf16.msra.mxu1 %v500_v10 }
  0x17   :  { %116 = vmatprep.subr.bf16.mxu0 %v520_v0  ;;  %167 = vmatprep.subr.bf16.mxu1 %v520_v0 }
  0x1a   :  { %117 = vmatpush1.bf16.msra.mxu0 %v501_v11  ;;  %168 = vmatpush1.bf16.msra.mxu1 %v501_v11 }
  0x1b   :  { %118 = vmatprep.subr.bf16.mxu0 %v520_v0  ;;  %169 = vmatprep.subr.bf16.mxu1 %v520_v0 }
  0x1e   :  { %119 = vmatpush1.bf16.msra.mxu0 %v502_v12  ;;  %170 = vmatpush1.bf16.msra.mxu1 %v502_v12 }
  0x1f   :  { %120 = vmatprep.subr.bf16.mxu0 %v520_v0  ;;  %171 = vmatprep.subr.bf16.mxu1 %v520_v0 }
  0x22   :  { %121 = vmatpush1.bf16.msra.mxu0 %v503_v13  ;;  %172 = vmatpush1.bf16.msra.mxu1 %v503_v13 }
  0x23   :  { %207 = vmatprep.subr.bf16.mxu0 %v520_v0  ;;  %259 = vmatprep.subr.bf16.mxu1 %v520_v0 }
  0x25   :  { %137 = vmatmul.mubr.bf16.vlgmr.msra.gmra.mrb[0].mxu0 %v429_v14  ;;  %188 = vmatmul.mubr.bf16.vlgmr.msra.gmra.mrb[0].mxu1 %v442_v15 }
  0x26   :  { %208 = vmatpush1.bf16.msra.mxu0 %v495_v1  ;;  %260 = vmatpush1.bf16.msra.mxu1 %v495_v1 }
  0x27   :  { %209 = vmatprep.subr.bf16.mxu0 %v520_v0  ;;  %261 = vmatprep.subr.bf16.mxu1 %v520_v0 }
  0x28   :  { %448 = vmatprep.mubr.msk.bf16.mxu0 %vm100_vm0, %v447_v18  ;;  %452 = vmatprep.mubr.msk.bf16.mxu1 %vm100_vm0, %v451_v19 }
  0x2a   :  { %210 = vmatpush1.bf16.msra.mxu0 %v561_v2  ;;  %262 = vmatpush1.bf16.msra.mxu1 %v561_v2 }
  0x2b   :  { %211 = vmatprep.subr.bf16.mxu0 %v520_v0  ;;  %263 = vmatprep.subr.bf16.mxu1 %v520_v0 }
  0x2e   :  { %212 = vmatpush1.bf16.msra.mxu0 %v570_v3  ;;  %264 = vmatpush1.bf16.msra.mxu1 %v570_v3 }
  0x2f   :  { %213 = vmatprep.subr.bf16.mxu0 %v520_v0  ;;  %265 = vmatprep.subr.bf16.mxu1 %v520_v0 }
  0x32   :  { %214 = vmatpush1.bf16.msra.mxu0 %v498_v6  ;;  %266 = vmatpush1.bf16.msra.mxu1 %v498_v6 }
  0x33   :  { %215 = vmatprep.subr.bf16.mxu0 %v520_v0  ;;  %267 = vmatprep.subr.bf16.mxu1 %v520_v0 }
  0x36   :  { %216 = vmatpush1.bf16.msra.mxu0 %v499_v9  ;;  %268 = vmatpush1.bf16.msra.mxu1 %v499_v9 }
  0x37   :  { %217 = vmatprep.subr.bf16.mxu0 %v520_v0  ;;  %269 = vmatprep.subr.bf16.mxu1 %v520_v0 }
  0x3a   :  { %218 = vmatpush1.bf16.msra.mxu0 %v500_v10  ;;  %270 = vmatpush1.bf16.msra.mxu1 %v500_v10 }
  0x3b   :  { %219 = vmatprep.subr.bf16.mxu0 %v520_v0  ;;  %271 = vmatprep.subr.bf16.mxu1 %v520_v0 }
  0x3e   :  { %220 = vmatpush1.bf16.msra.mxu0 %v501_v11  ;;  %272 = vmatpush1.bf16.msra.mxu1 %v501_v11 }
  0x3f   :  { %221 = vmatprep.subr.bf16.mxu0 %v520_v0  ;;  %273 = vmatprep.subr.bf16.mxu1 %v520_v0 }
  0x42   :  { %222 = vmatpush1.bf16.msra.mxu0 %v502_v12  ;;  %274 = vmatpush1.bf16.msra.mxu1 %v502_v12 }
  0x43   :  { %223 = vmatprep.subr.bf16.mxu0 %v520_v0  ;;  %275 = vmatprep.subr.bf16.mxu1 %v520_v0 }
  0x46   :  { %224 = vmatpush1.bf16.msra.mxu0 %v503_v13  ;;  %276 = vmatpush1.bf16.msra.mxu1 %v503_v13 }
  0x47   :  { %472 = vmatprep.subr.bf16.mxu0 %v521_v22 }
  0x49   :  { %240 = vmatmul.mubr.bf16.vlgmr.msra.gmra.mrb[4].mxu0 %v446_v20  ;;  %292 = vmatmul.mubr.bf16.vlgmr.msra.gmra.mrb[4].mxu1 %v450_v21 }
  0x4a   :  { %473 = vmatpush3.bf16.msra.mxu0 %v512_v23  ;;  %488 = vmatprep.mubr.msk.bf16.mxu0 %vm522_vm1, %v521_v22 }
  0x4b   :  { %474 = vmatprep.subr.bf16.mxu0 %v521_v22 }
  0x4e   :  { %475 = vmatpush3.bf16.msra.mxu0 %v513_v24 }
  0x4f   :  { %476 = vmatprep.subr.bf16.mxu0 %v521_v22 }
  0x52   :  { %477 = vmatpush3.bf16.msra.mxu0 %v514_v25 }
  0x53   :  { %478 = vmatprep.subr.bf16.mxu0 %v521_v22 }
  0x56   :  { %479 = vmatpush3.bf16.msra.mxu0 %v515_v26 }
  0x57   :  { %480 = vmatprep.subr.bf16.mxu0 %v521_v22 }
  0x5a   :  { %481 = vmatpush3.bf16.msra.mxu0 %v516_v27 }
  0x5b   :  { %482 = vmatprep.subr.bf16.mxu0 %v521_v22 }
  0x5e   :  { %483 = vmatpush3.bf16.msra.mxu0 %v517_v28 }
  0x5f   :  { %484 = vmatprep.subr.bf16.mxu0 %v521_v22 }
  0x62   :  { %485 = vmatpush3.bf16.msra.mxu0 %v518_v29 }
  0x63   :  { %486 = vmatprep.subr.bf16.mxu0 %v521_v22 }
  0x66   :  { %487 = vmatpush3.bf16.msra.mxu0 %v519_v30 }
  0xf8   :  { %v138_v31 = vpop.f32.mrb[0].mxu0  ;;  %v189_v32 = vpop.f32.mrb[0].mxu1 }
  0xf9   :  { %v195_v33 = vmax.f32 %v138_v31, %v189_v32  ;;  %v140_v34 = vpop.f32.mrb[1].mxu0  ;;  %v191_v35 = vpop.f32.mrb[1].mxu1 }
  0xfa   :  { %v141_v36 = vpop.f32.mrb[2].mxu0  ;;  %v192_v37 = vpop.f32.mrb[2].mxu1 }
  0xfb   :  { %v142_v38 = vpop.f32.mrb[3].mxu0  ;;  %v193_v39 = vpop.f32.mrb[3].mxu1 }
 0x11c   :  { %v241_v40 = vpop.f32.mrb[4].mxu0  ;;  %v293_v41 = vpop.f32.mrb[4].mxu1 }
 0x11d   :  { %v247_v42 = vmax.f32 %v195_v33, %v241_v40  ;;  %v243_v43 = vpop.f32.mrb[5].mxu0  ;;  %v295_v44 = vpop.f32.mrb[5].mxu1 }
 0x11e   :  { %v244_v46 = vpop.f32.mrb[6].mxu0  ;;  %v296_v47 = vpop.f32.mrb[6].mxu1 }
 0x11f   :  { %v299_v48 = vmax.f32 %v247_v42, %v293_v41  ;;  %v245_v49 = vpop.f32.mrb[7].mxu0  ;;  %v297_v50 = vpop.f32.mrb[7].mxu1 }
 0x121   :  { %v307_v51 = vadd.f32 %v453_v45, %v299_v48 }
 0x123   :  { %v308_v52 = vmax.f32 %v307_v51, 0.0 }
 0x125   :  { %v326_v53 = vpack.c.bf16 %v308_v52, %v308_v52 }
 0x127   :  { %489 = vmatmul.mubr.bf16.vlgmr.msra.gmra.mrb[8].mxu0 %v326_v53 }
 0x1fa   :  { %v415_v55 = vpop.f32.mrb[8].mxu0 }
 0x1fb   :  { %v416_v56 = vadd.f32 %v454_v54, %v415_v55  ;;  %v490_v57 = vpop.f32.mrb[9].mxu0 }
 0x1fc   :  { %v418_v58 = vpop.f32.mrb[10].mxu0 }
 0x1fd   :  { %v421_v59 = vmax.f32 %v416_v56, 0.0  ;;  %v491_v60 = vpop.f32.mrb[11].mxu0 }
 0x1ff   :  { %v422_v61 = vpack.c.bf16 %v421_v59, %v421_v59 }
 0x201   :  { %424 = vst.msk [vmem:[%s682_s5] sm:$0xf] %vm423_vm2, %v422_v61 }

// kernel: forward.9
= control target key start
LH: loop header
LB: loop body
LE: loop exit
PB: predicated region body
PF: predicated region fallthrough
CT: control target
= control target key end

     0   :  { %v3365_v1 = vmov 0   ;;  %vm255_vm0 = vcmask 261120   ;;  %s4769_s1 = inlined_call_operand.vmem [shape: bf16[288,256], index: 1, kind: input, shape index: {}]   ;;  %s4770_s0 = inlined_call_operand.vmem [shape: bf16[4,8,288], index: 0, kind: input, shape index: {}]   ;;  %s4771_s3 = inlined_call_operand.vmem [shape: bf16[256,256], index: 3, kind: input, shape index: {}]   ;;  %s4772_s5 = inlined_call_operand.vmem [shape: bf16[256,2048], index: 5, kind: input, shape index: {}]   ;;  %s4773_s2 = inlined_call_operand.vmem [shape: f32[1,256], index: 2, kind: input, shape index: {}]   ;;  %s4774_s4 = inlined_call_operand.vmem [shape: f32[1,256], index: 4, kind: input, shape index: {}]   ;;  %s4775_s6 = inlined_call_operand.vmem [shape: f32[1,2048], index: 6, kind: input, shape index: {}]   ;;  %s4776_s7 = inlined_call_operand.vmem [shape: f32[8,2048], index: 7, kind: output, shape index: {}]  }
   0x1   :  { %v3409_v0 = vld [vmem:[%s4769_s1 + $0x4] ss:$8 sps:$4 sm:$0xff]   ;;  %332 = vmatprep.mubr.bf16.mxu1 %v3365_v1  ;;  %v3421_v3 = vld [vmem:[%s4769_s1] ss:$8 sps:$4 sm:$0xff]   ;;  %v3432_v5 = vld [vmem:[%s4769_s1 + $0x14] ss:$8 sps:$4 sm:$0xff]  }
   0x2   :  { %v3415_v2 = vld [vmem:[%s4769_s1 + $0x104] ss:$8 sps:$4 sm:$0xff]   ;;  %259 = vmatprep.subr.bf16.mxu0 %v3409_v0  ;;  %v3426_v4 = vld [vmem:[%s4769_s1 + $0x100] ss:$8 sps:$4 sm:$0xff]   ;;  %v3439_v6 = vld [vmem:[%s4769_s1 + $0x114] ss:$8 sps:$4 sm:$0xff]  }
   0x3   :  { %300 = vmatprep.subr.bf16.mxu1 %v3415_v2  ;;  %260 = vmatpush1.bf16.msra.mxu0 %v3421_v3  ;;  %v3444_v7 = vld [vmem:[%s4769_s1 + $0x10] ss:$8 sps:$4 sm:$0xff]   ;;  %v3456_v9 = vld [vmem:[%s4769_s1 + $0x24] ss:$8 sps:$4 sm:$0xff]   ;;  %v3265_v10 = vld [vmem:[%s4770_s0 + $0x8] ss:$0 sps:$4 sm:$0xff]  }
   0x4   :  { %301 = vmatpush1.bf16.msra.mxu1 %v3426_v4  ;;  %261 = vmatprep.subr.bf16.mxu0 %v3432_v5  ;;  %v3450_v8 = vld [vmem:[%s4769_s1 + $0x110] ss:$8 sps:$4 sm:$0xff]   ;;  %v3466_v11 = vld [vmem:[%s4769_s1 + $0x20] ss:$8 sps:$4 sm:$0xff]   ;;  %v3473_v12 = vld [vmem:[%s4769_s1 + $0x34] ss:$8 sps:$4 sm:$0xff]  }
   0x5   :  { %302 = vmatprep.subr.bf16.mxu1 %v3439_v6  ;;  %v3481_v13 = vld [vmem:[%s4769_s1 + $0x30] ss:$8 sps:$4 sm:$0xff]   ;;  %v3488_v14 = vld [vmem:[%s4769_s1 + $0x44] ss:$8 sps:$4 sm:$0xff]   ;;  %v3495_v15 = vld [vmem:[%s4769_s1 + $0x40] ss:$8 sps:$4 sm:$0xff]  }
   0x6   :  { %v3502_v16 = vld [vmem:[%s4769_s1 + $0x54] ss:$8 sps:$4 sm:$0xff]   ;;  %v3509_v17 = vld [vmem:[%s4769_s1 + $0x50] ss:$8 sps:$4 sm:$0xff]   ;;  %v3516_v18 = vld [vmem:[%s4769_s1 + $0x64] ss:$8 sps:$4 sm:$0xff]  }
   0x7   :  { %262 = vmatpush1.bf16.msra.mxu0 %v3444_v7  ;;  %v3523_v19 = vld [vmem:[%s4769_s1 + $0x60] ss:$8 sps:$4 sm:$0xff]   ;;  %v3535_v21 = vld [vmem:[%s4769_s1 + $0x74] ss:$8 sps:$4 sm:$0xff]   ;;  %v3542_v23 = vld [vmem:[%s4770_s0 + $0xc] sm:$0xff] }
   0x8   :  { %303 = vmatpush1.bf16.msra.mxu1 %v3450_v8  ;;  %263 = vmatprep.subr.bf16.mxu0 %v3456_v9  ;;  %v3528_v20 = vld [vmem:[%s4770_s0] sm:$0xff]  ;;  %v2935_v24 = vcombine.high %v3542_v23, %v3542_v23  ;;  %v3551_v25 = vld [vmem:[%s4769_s1 + $0x70] ss:$8 sps:$4 sm:$0xff]   ;;  %v3572_v28 = vld [vmem:[%s4769_s1 + $0x94] ss:$8 sps:$4 sm:$0xff]   ;;  %v2934_v45 = vcombine.low %v3542_v23, %v3542_v23 }
   0x9   :  { %357 = vmatprep.subr.bf16.mxu1 %v3409_v0  ;;  %v2893_v22 = vcombine.high %v3528_v20, %v3528_v20  ;;  %v3558_v26 = vld [vmem:[%s4769_s1 + $0x84] ss:$8 sps:$4 sm:$0xff]   ;;  %v3565_v27 = vld [vmem:[%s4769_s1 + $0x80] ss:$8 sps:$4 sm:$0xff]   ;;  %v3579_v29 = vld [vmem:[%s4769_s1 + $0x90] ss:$8 sps:$4 sm:$0xff]   ;;  %v2892_v42 = vcombine.low %v3528_v20, %v3528_v20 }
   0xa   :  { %v3586_v30 = vld [vmem:[%s4769_s1 + $0xa4] ss:$8 sps:$4 sm:$0xff]   ;;  %v3593_v31 = vld [vmem:[%s4769_s1 + $0xa0] ss:$8 sps:$4 sm:$0xff]   ;;  %v3600_v32 = vld [vmem:[%s4769_s1 + $0xb4] ss:$8 sps:$4 sm:$0xff]  }
   0xb   :  { %2931 = vmatmul.mubr.msk.bf16.vlgmr.msra.gmra.mrb[0].mxu1 %vm255_vm0, %v3265_v10  ;;  %264 = vmatpush1.bf16.msra.mxu0 %v3466_v11  ;;  %v3607_v33 = vld [vmem:[%s4769_s1 + $0xb0] ss:$8 sps:$4 sm:$0xff]   ;;  %v3614_v34 = vld [vmem:[%s4769_s1 + $0xc4] ss:$8 sps:$4 sm:$0xff]   ;;  %v3621_v35 = vld [vmem:[%s4769_s1 + $0xc0] ss:$8 sps:$4 sm:$0xff]  }
   0xc   :  { %358 = vmatpush1.bf16.msra.mxu1 %v3421_v3  ;;  %265 = vmatprep.subr.bf16.mxu0 %v3473_v12  ;;  %v3628_v36 = vld [vmem:[%s4769_s1 + $0xd4] ss:$8 sps:$4 sm:$0xff]   ;;  %v3635_v37 = vld [vmem:[%s4769_s1 + $0xd0] ss:$8 sps:$4 sm:$0xff]   ;;  %v3642_v38 = vld [vmem:[%s4769_s1 + $0xe4] ss:$8 sps:$4 sm:$0xff]  }
   0xd   :  { %359 = vmatprep.subr.bf16.mxu1 %v3432_v5  ;;  %291 = vmatprep.mubr.bf16.mxu0 %v2893_v22  ;;  %v3649_v39 = vld [vmem:[%s4769_s1 + $0xe0] ss:$8 sps:$4 sm:$0xff]   ;;  %v3656_v40 = vld [vmem:[%s4769_s1 + $0xf4] ss:$8 sps:$4 sm:$0xff]   ;;  %v3663_v41 = vld [vmem:[%s4769_s1 + $0xf0] ss:$8 sps:$4 sm:$0xff]  }
   0xe   :  { %389 = vmatprep.mubr.bf16.mxu1 %v2935_v24  ;;  %v3672_v43 = vld [vmem:[%s4770_s0 + $0x18] sm:$0xff]  ;;  %v3310_v46 = vld [vmem:[%s4770_s0 + $0x14] ss:$0 sps:$4 sm:$0xff]   ;;  %v3311_v47 = vld [vmem:[%s4770_s0 + $0x20] ss:$0 sps:$4 sm:$0xff]  }
   0xf   :  { %266 = vmatpush1.bf16.msra.mxu0 %v3481_v13  ;;  %v2941_v44 = vcombine.high %v3672_v43, %v3672_v43  ;;  %v2944_v48 = vld [vmem:[%s4770_s0 + $0x24] sm:$0xff]  ;;  %v2940_v50 = vcombine.low %v3672_v43, %v3672_v43  ;;  %v3316_v52 = vld [vmem:[%s4770_s0 + $0x2c] ss:$0 sps:$4 sm:$0xff]   ;;  %v3322_v55 = vld [vmem:[%s4771_s3 + $0x14] ss:$8 sps:$4 sm:$0xff]  }
  0x10   :  { %360 = vmatpush1.bf16.msra.mxu1 %v3444_v7  ;;  %267 = vmatprep.subr.bf16.mxu0 %v3488_v14  ;;  %v2947_v49 = vcombine.high %v2944_v48, %v2944_v48  ;;  %v2946_v51 = vcombine.low %v2944_v48, %v2944_v48  ;;  %v3317_v53 = vld [vmem:[%s4771_s3] ss:$8 sps:$4 sm:$0xff]   ;;  %v3319_v54 = vld [vmem:[%s4771_s3 + $0x4] ss:$8 sps:$4 sm:$0xff]   ;;  %v3320_v56 = vld [vmem:[%s4771_s3 + $0x10] ss:$8 sps:$4 sm:$0xff]  }
  0x11   :  { %361 = vmatprep.subr.bf16.mxu1 %v3456_v9  ;;  %v3325_v57 = vld [vmem:[%s4771_s3 + $0x24] ss:$8 sps:$4 sm:$0xff]   ;;  %v3323_v58 = vld [vmem:[%s4771_s3 + $0x20] ss:$8 sps:$4 sm:$0xff]   ;;  %v3328_v59 = vld [vmem:[%s4771_s3 + $0x34] ss:$8 sps:$4 sm:$0xff]  }
  0x12   :  { %v3326_v60 = vld [vmem:[%s4771_s3 + $0x30] ss:$8 sps:$4 sm:$0xff]   ;;  %v3331_v61 = vld [vmem:[%s4771_s3 + $0x44] ss:$8 sps:$4 sm:$0xff]   ;;  %v3329_v62 = vld [vmem:[%s4771_s3 + $0x40] ss:$8 sps:$4 sm:$0xff]  }
  0x13   :  { %268 = vmatpush1.bf16.msra.mxu0 %v3495_v15  ;;  %v3334_v63 = vld [vmem:[%s4771_s3 + $0x54] ss:$8 sps:$4 sm:$0xff]   ;;  %v3341_v10 = vld [vmem:[%s4771_s3 + $0x80] ss:$8 sps:$4 sm:$0xff]   ;;  %v3356_v20 = vld [vmem:[%s4771_s3 + $0xd0] ss:$8 sps:$4 sm:$0xff]  }
  0x14   :  { %362 = vmatpush1.bf16.msra.mxu1 %v3466_v11  ;;  %269 = vmatprep.subr.bf16.mxu0 %v3502_v16  ;;  %v3359_v22 = vld [vmem:[%s4771_s3 + $0xe0] ss:$8 sps:$4 sm:$0xff]   ;;  %v3364_v23 = vld [vmem:[%s4771_s3 + $0xf4] ss:$8 sps:$4 sm:$0xff]   ;;  %v3362_v24 = vld [vmem:[%s4771_s3 + $0xf0] ss:$8 sps:$4 sm:$0xff]  }
  0x15   :  { %363 = vmatprep.subr.bf16.mxu1 %v3473_v12 }
  0x17   :  { %270 = vmatpush1.bf16.msra.mxu0 %v3509_v17 }
  0x18   :  { %364 = vmatpush1.bf16.msra.mxu1 %v3481_v13  ;;  %271 = vmatprep.subr.bf16.mxu0 %v3516_v18 }
  0x19   :  { %365 = vmatprep.subr.bf16.mxu1 %v3488_v14 }
  0x1b   :  { %272 = vmatpush1.bf16.msra.mxu0 %v3523_v19 }
  0x1c   :  { %366 = vmatpush1.bf16.msra.mxu1 %v3495_v15  ;;  %273 = vmatprep.subr.bf16.mxu0 %v3535_v21 }
  0x1d   :  { %367 = vmatprep.subr.bf16.mxu1 %v3502_v16 }
  0x1f   :  { %274 = vmatpush1.bf16.msra.mxu0 %v3551_v25 }
  0x20   :  { %368 = vmatpush1.bf16.msra.mxu1 %v3509_v17  ;;  %275 = vmatprep.subr.bf16.mxu0 %v3558_v26 }
  0x21   :  { %369 = vmatprep.subr.bf16.mxu1 %v3516_v18 }
  0x23   :  { %276 = vmatpush1.bf16.msra.mxu0 %v3565_v27 }
  0x24   :  { %370 = vmatpush1.bf16.msra.mxu1 %v3523_v19  ;;  %277 = vmatprep.subr.bf16.mxu0 %v3572_v28 }
  0x25   :  { %371 = vmatprep.subr.bf16.mxu1 %v3535_v21 }
  0x27   :  { %278 = vmatpush1.bf16.msra.mxu0 %v3579_v29 }
  0x28   :  { %372 = vmatpush1.bf16.msra.mxu1 %v3551_v25  ;;  %279 = vmatprep.subr.bf16.mxu0 %v3586_v30 }
  0x29   :  { %373 = vmatprep.subr.bf16.mxu1 %v3558_v26 }
  0x2b   :  { %280 = vmatpush1.bf16.msra.mxu0 %v3593_v31 }
  0x2c   :  { %374 = vmatpush1.bf16.msra.mxu1 %v3565_v27  ;;  %281 = vmatprep.subr.bf16.mxu0 %v3600_v32 }
  0x2d   :  { %375 = vmatprep.subr.bf16.mxu1 %v3572_v28 }
  0x2f   :  { %282 = vmatpush1.bf16.msra.mxu0 %v3607_v33 }
  0x30   :  { %376 = vmatpush1.bf16.msra.mxu1 %v3579_v29  ;;  %283 = vmatprep.subr.bf16.mxu0 %v3614_v34 }
  0x31   :  { %377 = vmatprep.subr.bf16.mxu1 %v3586_v30 }
  0x33   :  { %284 = vmatpush1.bf16.msra.mxu0 %v3621_v35 }
  0x34   :  { %378 = vmatpush1.bf16.msra.mxu1 %v3593_v31  ;;  %285 = vmatprep.subr.bf16.mxu0 %v3628_v36 }
  0x35   :  { %379 = vmatprep.subr.bf16.mxu1 %v3600_v32 }
  0x37   :  { %286 = vmatpush1.bf16.msra.mxu0 %v3635_v37 }
  0x38   :  { %380 = vmatpush1.bf16.msra.mxu1 %v3607_v33  ;;  %287 = vmatprep.subr.bf16.mxu0 %v3642_v38 }
  0x39   :  { %381 = vmatprep.subr.bf16.mxu1 %v3614_v34 }
  0x3b   :  { %288 = vmatpush1.bf16.msra.mxu0 %v3649_v39 }
  0x3c   :  { %382 = vmatpush1.bf16.msra.mxu1 %v3621_v35  ;;  %289 = vmatprep.subr.bf16.mxu0 %v3656_v40 }
  0x3d   :  { %383 = vmatprep.subr.bf16.mxu1 %v3628_v36 }
  0x3f   :  { %290 = vmatpush1.bf16.msra.mxu0 %v3663_v41 }
  0x40   :  { %384 = vmatpush1.bf16.msra.mxu1 %v3635_v37  ;;  %457 = vmatprep.subr.bf16.mxu0 %v3409_v0 }
  0x41   :  { %385 = vmatprep.subr.bf16.mxu1 %v3642_v38 }
  0x42   :  { %292 = vmatmul.mubr.bf16.vlgmr.msra.gmra.mrb[0].mxu0 %v2892_v42  ;;  %v962_v42 = vld [vmem:[%s4772_s5 + $0x1c0] sm:$0xff] }
  0x43   :  { %458 = vmatpush1.bf16.msra.mxu0 %v3421_v3  ;;  %489 = vmatprep.mubr.bf16.mxu0 %v2941_v44 }
  0x44   :  { %386 = vmatpush1.bf16.msra.mxu1 %v3649_v39  ;;  %459 = vmatprep.subr.bf16.mxu0 %v3432_v5 }
  0x45   :  { %387 = vmatprep.subr.bf16.mxu1 %v3656_v40 }
  0x47   :  { %460 = vmatpush1.bf16.msra.mxu0 %v3444_v7 }
  0x48   :  { %388 = vmatpush1.bf16.msra.mxu1 %v3663_v41  ;;  %461 = vmatprep.subr.bf16.mxu0 %v3456_v9 }
  0x49   :  { %398 = vmatprep.subr.bf16.mxu1 %v3415_v2 }
  0x4b   :  { %390 = vmatmul.mubr.bf16.vlgmr.msra.gmra.mrb[4].mxu1 %v2934_v45  ;;  %462 = vmatpush1.bf16.msra.mxu0 %v3466_v11 }
  0x4c   :  { %399 = vmatpush1.bf16.msra.mxu1 %v3426_v4  ;;  %463 = vmatprep.subr.bf16.mxu0 %v3473_v12 }
  0x4d   :  { %400 = vmatprep.subr.bf16.mxu1 %v3439_v6  ;;  %430 = vmatprep.mubr.bf16.mxu1 %v3365_v1 }
  0x4f   :  { %464 = vmatpush1.bf16.msra.mxu0 %v3481_v13 }
  0x50   :  { %401 = vmatpush1.bf16.msra.mxu1 %v3450_v8  ;;  %465 = vmatprep.subr.bf16.mxu0 %v3488_v14 }
  0x51   :  { %498 = vmatprep.subr.bf16.mxu1 %v3415_v2 }
  0x53   :  { %466 = vmatpush1.bf16.msra.mxu0 %v3495_v15 }
  0x54   :  { %467 = vmatprep.subr.bf16.mxu0 %v3502_v16 }
  0x57   :  { %2937 = vmatmul.mubr.msk.bf16.vlgmr.msra.gmra.mrb[4].mxu1 %vm255_vm0, %v3310_v46  ;;  %468 = vmatpush1.bf16.msra.mxu0 %v3509_v17  ;;  %v970_v46 = vld [vmem:[%s4772_s5 + $0x200] sm:$0xff] }
  0x58   :  { %499 = vmatpush1.bf16.msra.mxu1 %v3426_v4  ;;  %469 = vmatprep.subr.bf16.mxu0 %v3516_v18 }
  0x59   :  { %500 = vmatprep.subr.bf16.mxu1 %v3439_v6  ;;  %530 = vmatprep.mubr.bf16.mxu1 %v3365_v1 }
  0x5b   :  { %470 = vmatpush1.bf16.msra.mxu0 %v3523_v19 }
  0x5c   :  { %501 = vmatpush1.bf16.msra.mxu1 %v3450_v8  ;;  %471 = vmatprep.subr.bf16.mxu0 %v3535_v21 }
  0x5d   :  { %557 = vmatprep.subr.bf16.mxu1 %v3409_v0  ;;  %v3332_v0 = vld [vmem:[%s4771_s3 + $0x50] ss:$8 sps:$4 sm:$0xff]  }
  0x5f   :  { %2943 = vmatmul.mubr.msk.bf16.vlgmr.msra.gmra.mrb[8].mxu1 %vm255_vm0, %v3311_v47  ;;  %472 = vmatpush1.bf16.msra.mxu0 %v3551_v25  ;;  %v978_v47 = vld [vmem:[%s4772_s5 + $0x240] sm:$0xff] }
  0x60   :  { %558 = vmatpush1.bf16.msra.mxu1 %v3421_v3  ;;  %473 = vmatprep.subr.bf16.mxu0 %v3558_v26  ;;  %v3335_v3 = vld [vmem:[%s4771_s3 + $0x60] ss:$8 sps:$4 sm:$0xff]  }
  0x61   :  { %559 = vmatprep.subr.bf16.mxu1 %v3432_v5  ;;  %589 = vmatprep.mubr.bf16.mxu1 %v2947_v49  ;;  %v3340_v5 = vld [vmem:[%s4771_s3 + $0x74] ss:$8 sps:$4 sm:$0xff]  }
  0x63   :  { %474 = vmatpush1.bf16.msra.mxu0 %v3565_v27 }
  0x64   :  { %560 = vmatpush1.bf16.msra.mxu1 %v3444_v7  ;;  %475 = vmatprep.subr.bf16.mxu0 %v3572_v28 }
  0x65   :  { %561 = vmatprep.subr.bf16.mxu1 %v3456_v9  ;;  %v3343_v9 = vld [vmem:[%s4771_s3 + $0x84] ss:$8 sps:$4 sm:$0xff]  }
  0x67   :  { %476 = vmatpush1.bf16.msra.mxu0 %v3579_v29 }
  0x68   :  { %562 = vmatpush1.bf16.msra.mxu1 %v3466_v11  ;;  %477 = vmatprep.subr.bf16.mxu0 %v3586_v30  ;;  %v3346_v11 = vld [vmem:[%s4771_s3 + $0x94] ss:$8 sps:$4 sm:$0xff]  }
  0x69   :  { %563 = vmatprep.subr.bf16.mxu1 %v3473_v12  ;;  %v3344_v12 = vld [vmem:[%s4771_s3 + $0x90] ss:$8 sps:$4 sm:$0xff]  }
  0x6b   :  { %478 = vmatpush1.bf16.msra.mxu0 %v3593_v31 }
  0x6c   :  { %564 = vmatpush1.bf16.msra.mxu1 %v3481_v13  ;;  %479 = vmatprep.subr.bf16.mxu0 %v3600_v32  ;;  %v3349_v13 = vld [vmem:[%s4771_s3 + $0xa4] ss:$8 sps:$4 sm:$0xff]  }
  0x6d   :  { %565 = vmatprep.subr.bf16.mxu1 %v3488_v14  ;;  %v3347_v14 = vld [vmem:[%s4771_s3 + $0xa0] ss:$8 sps:$4 sm:$0xff]  }
  0x6f   :  { %480 = vmatpush1.bf16.msra.mxu0 %v3607_v33 }
  0x70   :  { %566 = vmatpush1.bf16.msra.mxu1 %v3495_v15  ;;  %481 = vmatprep.subr.bf16.mxu0 %v3614_v34  ;;  %v3352_v15 = vld [vmem:[%s4771_s3 + $0xb4] ss:$8 sps:$4 sm:$0xff]  }
  0x71   :  { %567 = vmatprep.subr.bf16.mxu1 %v3502_v16  ;;  %v3350_v16 = vld [vmem:[%s4771_s3 + $0xb0] ss:$8 sps:$4 sm:$0xff]  }
  0x73   :  { %482 = vmatpush1.bf16.msra.mxu0 %v3621_v35 }
  0x74   :  { %568 = vmatpush1.bf16.msra.mxu1 %v3509_v17  ;;  %483 = vmatprep.subr.bf16.mxu0 %v3628_v36  ;;  %v3355_v17 = vld [vmem:[%s4771_s3 + $0xc4] ss:$8 sps:$4 sm:$0xff]  }
  0x75   :  { %569 = vmatprep.subr.bf16.mxu1 %v3516_v18  ;;  %v3353_v18 = vld [vmem:[%s4771_s3 + $0xc0] ss:$8 sps:$4 sm:$0xff]  }
  0x77   :  { %484 = vmatpush1.bf16.msra.mxu0 %v3635_v37 }
  0x78   :  { %570 = vmatpush1.bf16.msra.mxu1 %v3523_v19  ;;  %485 = vmatprep.subr.bf16.mxu0 %v3642_v38  ;;  %v3358_v19 = vld [vmem:[%s4771_s3 + $0xd4] ss:$8 sps:$4 sm:$0xff]  }
  0x79   :  { %571 = vmatprep.subr.bf16.mxu1 %v3535_v21  ;;  %v3361_v21 = vld [vmem:[%s4771_s3 + $0xe4] ss:$8 sps:$4 sm:$0xff]  }
  0x7b   :  { %486 = vmatpush1.bf16.msra.mxu0 %v3649_v39 }
  0x7c   :  { %572 = vmatpush1.bf16.msra.mxu1 %v3551_v25  ;;  %487 = vmatprep.subr.bf16.mxu0 %v3656_v40  ;;  %v906_v25 = vld [vmem:[%s4772_s5] sm:$0xff] }
  0x7d   :  { %573 = vmatprep.subr.bf16.mxu1 %v3558_v26  ;;  %v914_v26 = vld [vmem:[%s4772_s5 + $0x40] sm:$0xff] }
  0x7f   :  { %488 = vmatpush1.bf16.msra.mxu0 %v3663_v41 }
  0x80   :  { %574 = vmatpush1.bf16.msra.mxu1 %v3565_v27  ;;  %863 = vmatprep.subr.bf16.mxu0 %v3319_v54  ;;  %v3889_v27 = vld [vmem:[%s4772_s5 + $0x8] sm:$0xff]  ;;  %v3046_v54 = vcombine.low %v970_v46, %v978_v47 }
  0x81   :  { %575 = vmatprep.subr.bf16.mxu1 %v3572_v28  ;;  %v2982_v28 = vcombine.low %v906_v25, %v914_v26 }
  0x82   :  { %490 = vmatmul.mubr.bf16.vlgmr.msra.gmra.mrb[4].mxu0 %v2940_v50  ;;  %v3047_v50 = vcombine.high %v970_v46, %v978_v47 }
  0x83   :  { %864 = vmatpush1.bf16.msra.mxu0 %v3317_v53 }
  0x84   :  { %576 = vmatpush1.bf16.msra.mxu1 %v3579_v29  ;;  %865 = vmatprep.subr.bf16.mxu0 %v3322_v55  ;;  %v2983_v29 = vcombine.high %v906_v25, %v914_v26  ;;  %v986_v55 = vld [vmem:[%s4772_s5 + $0x280] sm:$0xff] }
  0x85   :  { %577 = vmatprep.subr.bf16.mxu1 %v3586_v30  ;;  %v3894_v30 = vld [vmem:[%s4772_s5 + $0x48] sm:$0xff] }
  0x87   :  { %866 = vmatpush1.bf16.msra.mxu0 %v3320_v56  ;;  %v994_v56 = vld [vmem:[%s4772_s5 + $0x2c0] sm:$0xff] }
  0x88   :  { %578 = vmatpush1.bf16.msra.mxu1 %v3593_v31  ;;  %867 = vmatprep.subr.bf16.mxu0 %v3325_v57  ;;  %v922_v31 = vld [vmem:[%s4772_s5 + $0x80] sm:$0xff]  ;;  %v3063_v57 = vcombine.high %v986_v55, %v994_v56 }
  0x89   :  { %579 = vmatprep.subr.bf16.mxu1 %v3600_v32  ;;  %v930_v32 = vld [vmem:[%s4772_s5 + $0xc0] sm:$0xff] }
  0x8b   :  { %868 = vmatpush1.bf16.msra.mxu0 %v3323_v58  ;;  %v3062_v58 = vcombine.low %v986_v55, %v994_v56 }
  0x8c   :  { %580 = vmatpush1.bf16.msra.mxu1 %v3607_v33  ;;  %869 = vmatprep.subr.bf16.mxu0 %v3328_v59  ;;  %v2984_v33 = vcombine.low %v3889_v27, %v3894_v30  ;;  %v1002_v59 = vld [vmem:[%s4772_s5 + $0x300] sm:$0xff] }
  0x8d   :  { %581 = vmatprep.subr.bf16.mxu1 %v3614_v34  ;;  %v2985_v34 = vcombine.high %v3889_v27, %v3894_v30  ;;  %v971_v27 = vld [vmem:[%s4772_s5 + $0x208] sm:$0xff] }
  0x8e   :  { %v979_v30 = vld [vmem:[%s4772_s5 + $0x248] sm:$0xff] }
  0x8f   :  { %870 = vmatpush1.bf16.msra.mxu0 %v3326_v60  ;;  %v1010_v60 = vld [vmem:[%s4772_s5 + $0x340] sm:$0xff] }
  0x90   :  { %582 = vmatpush1.bf16.msra.mxu1 %v3621_v35  ;;  %871 = vmatprep.subr.bf16.mxu0 %v3331_v61  ;;  %v2999_v35 = vcombine.high %v922_v31, %v930_v32  ;;  %v3079_v61 = vcombine.high %v1002_v59, %v1010_v60 }
  0x91   :  { %583 = vmatprep.subr.bf16.mxu1 %v3628_v36  ;;  %v2998_v36 = vcombine.low %v922_v31, %v930_v32  ;;  %v1098_v31 = vld [vmem:[%s4772_s5 + $0x600] sm:$0xff] }
  0x92   :  { %v1106_v32 = vld [vmem:[%s4772_s5 + $0x640] sm:$0xff] }
  0x93   :  { %872 = vmatpush1.bf16.msra.mxu0 %v3329_v62  ;;  %v3078_v62 = vcombine.low %v1002_v59, %v1010_v60 }
  0x94   :  { %584 = vmatpush1.bf16.msra.mxu1 %v3635_v37  ;;  %873 = vmatprep.subr.bf16.mxu0 %v3334_v63  ;;  %v938_v37 = vld [vmem:[%s4772_s5 + $0x100] sm:$0xff] }
  0x95   :  { %585 = vmatprep.subr.bf16.mxu1 %v3642_v38  ;;  %v946_v38 = vld [vmem:[%s4772_s5 + $0x140] sm:$0xff] }
  0x96   :  { %v1018_v63 = vld [vmem:[%s4772_s5 + $0x380] sm:$0xff] }
  0x97   :  { %874 = vmatpush1.bf16.msra.mxu0 %v3332_v0  ;;  %v1026_v0 = vld [vmem:[%s4772_s5 + $0x3c0] sm:$0xff] }
  0x98   :  { %586 = vmatpush1.bf16.msra.mxu1 %v3649_v39  ;;  %v3015_v39 = vcombine.high %v938_v37, %v946_v38 }
  0x99   :  { %587 = vmatprep.subr.bf16.mxu1 %v3656_v40  ;;  %v3014_v40 = vcombine.low %v938_v37, %v946_v38  ;;  %v1122_v37 = vld [vmem:[%s4772_s5 + $0x6c0] sm:$0xff] }
  0x9c   :  { %588 = vmatpush1.bf16.msra.mxu1 %v3663_v41  ;;  %v954_v41 = vld [vmem:[%s4772_s5 + $0x180] sm:$0xff] }
  0x9d   :  { %598 = vmatprep.subr.bf16.mxu1 %v3415_v2  ;;  %v3031_v43 = vcombine.high %v954_v41, %v962_v42  ;;  %v3030_v45 = vcombine.low %v954_v41, %v962_v42 }
  0x9f   :  { %590 = vmatmul.mubr.bf16.vlgmr.msra.gmra.mrb[12].mxu1 %v2946_v51 }
  0xa0   :  { %599 = vmatpush1.bf16.msra.mxu1 %v3426_v4  ;;  %630 = vmatprep.mubr.bf16.mxu1 %v3365_v1  ;;  %v3337_v1 = vld [vmem:[%s4771_s3 + $0x64] ss:$8 sps:$4 sm:$0xff]  }
  0xa1   :  { %600 = vmatprep.subr.bf16.mxu1 %v3439_v6  ;;  %875 = vmatprep.subr.bf16.mxu0 %v3337_v1  ;;  %v3095_v1 = vcombine.high %v1018_v63, %v1026_v0 }
  0xa2   :  { %876 = vmatpush1.bf16.msra.mxu0 %v3335_v3  ;;  %v1034_v3 = vld [vmem:[%s4772_s5 + $0x400] sm:$0xff] }
  0xa3   :  { %877 = vmatprep.subr.bf16.mxu0 %v3340_v5 }
  0xa4   :  { %601 = vmatpush1.bf16.msra.mxu1 %v3450_v8  ;;  %v3338_v8 = vld [vmem:[%s4771_s3 + $0x70] ss:$8 sps:$4 sm:$0xff]  }
  0xa5   :  { %2528 = vmatprep.subr.bf16.mxu1 %v2983_v29 }
  0xa6   :  { %878 = vmatpush1.bf16.msra.mxu0 %v3338_v8  ;;  %v1050_v8 = vld [vmem:[%s4772_s5 + $0x480] sm:$0xff] }
  0xa7   :  { %879 = vmatprep.subr.bf16.mxu0 %v3343_v9  ;;  %v1058_v9 = vld [vmem:[%s4772_s5 + $0x4c0] sm:$0xff] }
  0xaa   :  { %880 = vmatpush1.bf16.msra.mxu0 %v3341_v10 }
  0xab   :  { %2949 = vmatmul.mubr.msk.bf16.vlgmr.msra.gmra.mrb[12].mxu1 %vm255_vm0, %v3316_v52  ;;  %881 = vmatprep.subr.bf16.mxu0 %v3346_v11 }
  0xac   :  { %2529 = vmatpush1.bf16.msra.mxu1 %v2982_v28 }
  0xad   :  { %2530 = vmatprep.subr.bf16.mxu1 %v2999_v35  ;;  %v3174_v35 = vcombine.low %v1098_v31, %v1106_v32 }
  0xae   :  { %882 = vmatpush1.bf16.msra.mxu0 %v3344_v12  ;;  %v3127_v12 = vcombine.high %v1050_v8, %v1058_v9 }
  0xaf   :  { %883 = vmatprep.subr.bf16.mxu0 %v3349_v13 }
  0xb0   :  { %2531 = vmatpush1.bf16.msra.mxu1 %v2998_v36  ;;  %v1114_v36 = vld [vmem:[%s4772_s5 + $0x680] sm:$0xff] }
  0xb1   :  { %2532 = vmatprep.subr.bf16.mxu1 %v3015_v39  ;;  %v3191_v38 = vcombine.high %v1114_v36, %v1122_v37  ;;  %v3190_v39 = vcombine.low %v1114_v36, %v1122_v37 }
  0xb2   :  { %884 = vmatpush1.bf16.msra.mxu0 %v3347_v14 }
  0xb3   :  { %885 = vmatprep.subr.bf16.mxu0 %v3352_v15 }
  0xb4   :  { %2533 = vmatpush1.bf16.msra.mxu1 %v3014_v40 }
  0xb5   :  { %2534 = vmatprep.subr.bf16.mxu1 %v3031_v43 }
  0xb6   :  { %886 = vmatpush1.bf16.msra.mxu0 %v3350_v16  ;;  %v3126_v16 = vcombine.low %v1050_v8, %v1058_v9 }
  0xb7   :  { %887 = vmatprep.subr.bf16.mxu0 %v3355_v17  ;;  %v1066_v17 = vld [vmem:[%s4772_s5 + $0x500] sm:$0xff] }
  0xb8   :  { %2535 = vmatpush1.bf16.msra.mxu1 %v3030_v45 }
  0xb9   :  { %2536 = vmatprep.subr.bf16.mxu1 %v3047_v50 }
  0xba   :  { %888 = vmatpush1.bf16.msra.mxu0 %v3353_v18  ;;  %v1074_v18 = vld [vmem:[%s4772_s5 + $0x540] sm:$0xff] }
  0xbb   :  { %889 = vmatprep.subr.bf16.mxu0 %v3358_v19  ;;  %v3143_v19 = vcombine.high %v1066_v17, %v1074_v18 }
  0xbc   :  { %2537 = vmatpush1.bf16.msra.mxu1 %v3046_v54 }
  0xbd   :  { %2538 = vmatprep.subr.bf16.mxu1 %v3063_v57 }
  0xbe   :  { %890 = vmatpush1.bf16.msra.mxu0 %v3356_v20 }
  0xbf   :  { %891 = vmatprep.subr.bf16.mxu0 %v3361_v21  ;;  %v3142_v21 = vcombine.low %v1066_v17, %v1074_v18  ;;  %v3048_v17 = vcombine.low %v971_v27, %v979_v30 }
  0xc0   :  { %2539 = vmatpush1.bf16.msra.mxu1 %v3062_v58 }
  0xc1   :  { %2540 = vmatprep.subr.bf16.mxu1 %v3079_v61 }
  0xc2   :  { %892 = vmatpush1.bf16.msra.mxu0 %v3359_v22  ;;  %v1082_v22 = vld [vmem:[%s4772_s5 + $0x580] sm:$0xff] }
  0xc3   :  { %893 = vmatprep.subr.bf16.mxu0 %v3364_v23  ;;  %v1090_v23 = vld [vmem:[%s4772_s5 + $0x5c0] sm:$0xff] }
  0xc4   :  { %2541 = vmatpush1.bf16.msra.mxu1 %v3078_v62  ;;  %v3159_v25 = vcombine.high %v1082_v22, %v1090_v23  ;;  %v3158_v29 = vcombine.low %v1082_v22, %v1090_v23  ;;  %v1019_v23 = vld [vmem:[%s4772_s5 + $0x388] sm:$0xff] }
  0xc5   :  { %2542 = vmatprep.subr.bf16.mxu1 %v3095_v1  ;;  %v923_v1 = vld [vmem:[%s4772_s5 + $0x88] sm:$0xff] }
  0xc6   :  { %894 = vmatpush1.bf16.msra.mxu0 %v3362_v24 }
  0xc7   :  { %2569 = vmatprep.subr.bf16.mxu0 %v2985_v34  ;;  %v3175_v34 = vcombine.high %v1098_v31, %v1106_v32 }
  0xde   :  { %v3819_v2 = vpop.f32.mrb[0].mxu1 }
  0xdf   :  { %v3824_v4 = vpop.f32.mrb[1].mxu1 }
  0xe0   :  { %v338_v6 = vpop.f32.mrb[2].mxu1 }
  0xe1   :  { %v339_v7 = vpop.f32.mrb[3].mxu1 }
 0x115   :  { %v293_v44 = vpop.f32.mrb[0].mxu0 }
 0x116   :  { %v3925_v48 = vadd.f32 %v3819_v2, %v293_v44  ;;  %v295_v49 = vpop.f32.mrb[1].mxu0  ;;  %v3094_v2 = vcombine.low %v1018_v63, %v1026_v0 }
 0x117   :  { %v3928_v51 = vadd.f32 %v3824_v4, %v295_v49  ;;  %v297_v52 = vpop.f32.mrb[2].mxu0  ;;  %v1042_v4 = vld [vmem:[%s4772_s5 + $0x440] sm:$0xff] }
 0x118   :  { %v298_v53 = vpop.f32.mrb[3].mxu0  ;;  %v3111_v5 = vcombine.high %v1034_v3, %v1042_v4  ;;  %2543 = vmatpush1.bf16.msra.mxu1 %v3094_v2  ;;  %v3110_v7 = vcombine.low %v1034_v3, %v1042_v4  ;;  %v931_v2 = vld [vmem:[%s4772_s5 + $0xc8] sm:$0xff] }
 0x119   :  { %v3000_v8 = vcombine.low %v923_v1, %v931_v2 }
 0x11a   :  { %2544 = vmatprep.subr.bf16.mxu1 %v3111_v5  ;;  %v3001_v5 = vcombine.high %v923_v1, %v931_v2  ;;  %v1146_v2 = vld [vmem:[%s4772_s5 + $0x780] sm:$0xff] }
 0x11c   :  { %2545 = vmatpush1.bf16.msra.mxu1 %v3110_v7  ;;  %v947_v7 = vld [vmem:[%s4772_s5 + $0x148] sm:$0xff] }
 0x11d   :  { %2546 = vmatprep.subr.bf16.mxu1 %v3127_v12 }
 0x120   :  { %2547 = vmatpush1.bf16.msra.mxu1 %v3126_v16  ;;  %v995_v16 = vld [vmem:[%s4772_s5 + $0x2c8] sm:$0xff] }
 0x121   :  { %2548 = vmatprep.subr.bf16.mxu1 %v3143_v19  ;;  %v1003_v19 = vld [vmem:[%s4772_s5 + $0x308] sm:$0xff] }
 0x124   :  { %2549 = vmatpush1.bf16.msra.mxu1 %v3142_v21 }
 0x125   :  { %2550 = vmatprep.subr.bf16.mxu1 %v3159_v25 }
 0x128   :  { %2551 = vmatpush1.bf16.msra.mxu1 %v3158_v29  ;;  %v1043_v29 = vld [vmem:[%s4772_s5 + $0x448] sm:$0xff] }
 0x129   :  { %2552 = vmatprep.subr.bf16.mxu1 %v3175_v34  ;;  %v1051_v34 = vld [vmem:[%s4772_s5 + $0x488] sm:$0xff] }
 0x12a   :  { %v432_v6 = vpop.f32.mrb[4].mxu1 }
 0x12b   :  { %v439_v10 = vmax.f32 %v3925_v48, %v432_v6  ;;  %v434_v11 = vpop.f32.mrb[5].mxu1  ;;  %v643_v48 = vlaneseq  ;;  %v939_v6 = vld [vmem:[%s4772_s5 + $0x108] sm:$0xff] }
 0x12c   :  { %v440_v13 = vmax.f32 %v3928_v51, %v434_v11  ;;  %v436_v14 = vpop.f32.mrb[6].mxu1  ;;  %2553 = vmatpush1.bf16.msra.mxu1 %v3174_v35  ;;  %v641_v51 = vld [vmem:[%s4773_s2] sm:$0x3]  ;;  %v3017_v9 = vcombine.high %v939_v6, %v947_v7  ;;  %v963_v11 = vld [vmem:[%s4772_s5 + $0x1c8] sm:$0xff]  ;;  %v3016_v12 = vcombine.low %v939_v6, %v947_v7 }
 0x12d   :  { %v437_v15 = vpop.f32.mrb[7].mxu1  ;;  %2554 = vmatprep.subr.bf16.mxu1 %v3191_v38  ;;  %v3986_v49 = vshrl.u32 %v643_v48, 7  ;;  %v3049_v14 = vcombine.high %v971_v27, %v979_v30  ;;  %v1059_v35 = vld [vmem:[%s4772_s5 + $0x4c8] sm:$0xff]  ;;  %v917_v27 = vld [vmem:[%s4772_s5 + $0x58] sm:$0xff] }
 0x12e   :  { %v987_v15 = vld [vmem:[%s4772_s5 + $0x288] sm:$0xff]  ;;  %v3129_v37 = vcombine.high %v1051_v34, %v1059_v35 }
 0x12f   :  { %v3989_v50 = vsub.s32 0, %v3986_v49  ;;  %v3995_v52 = vsub.s32 1, %v3986_v49  ;;  %v3065_v18 = vcombine.high %v987_v15, %v995_v16  ;;  %v3064_v21 = vcombine.low %v987_v15, %v995_v16  ;;  %v1067_v38 = vld [vmem:[%s4772_s5 + $0x508] sm:$0xff]  ;;  %v689_v15 = vld [vmem:[%s4774_s4] sm:$0x3] }
 0x130   :  { %2555 = vmatpush1.bf16.msra.mxu1 %v3190_v39  ;;  %v1075_v39 = vld [vmem:[%s4772_s5 + $0x548] sm:$0xff] }
 0x131   :  { %v646_v53 = vrot.slane %v641_v51, %v3989_v50  ;;  %v650_v55 = vrot.slane %v641_v51, %v3995_v52  ;;  %v1155_v6 = vld [vmem:[%s4772_s5 + $0x7c8] sm:$0xff]  ;;  %v696_v16 = vrot.slane %v689_v15, %v3989_v50 }
 0x132   :  { %v532_v20 = vpop.f32.mrb[8].mxu1 }
 0x133   :  { %v534_v24 = vpop.f32.mrb[9].mxu1 }
 0x134   :  { %v536_v26 = vpop.f32.mrb[10].mxu1 }
 0x135   :  { %v537_v28 = vpop.f32.mrb[11].mxu1 }
 0x136   :  { %v1035_v28 = vld [vmem:[%s4772_s5 + $0x408] sm:$0xff] }
 0x137   :  { %v3113_v32 = vcombine.high %v1035_v28, %v1043_v29  ;;  %v3112_v36 = vcombine.low %v1035_v28, %v1043_v29  ;;  %v932_v28 = vld [vmem:[%s4772_s5 + $0xd0] sm:$0xff]  ;;  %v925_v29 = vld [vmem:[%s4772_s5 + $0x98] sm:$0xff] }
 0x155   :  { %v491_v40 = vpop.f32.mrb[4].mxu0 }
 0x156   :  { %v533_v41 = vadd.f32 %v532_v20, %v491_v40  ;;  %v493_v42 = vpop.f32.mrb[5].mxu0  ;;  %v1011_v20 = vld [vmem:[%s4772_s5 + $0x348] sm:$0xff]  ;;  %v3128_v40 = vcombine.low %v1051_v34, %v1059_v35  ;;  %v940_v35 = vld [vmem:[%s4772_s5 + $0x110] sm:$0xff] }
 0x157   :  { %v535_v43 = vadd.f32 %v534_v24, %v493_v42  ;;  %v495_v44 = vpop.f32.mrb[6].mxu0  ;;  %v3081_v22 = vcombine.high %v1003_v19, %v1011_v20  ;;  %v1027_v24 = vld [vmem:[%s4772_s5 + $0x3c8] sm:$0xff]  ;;  %v3080_v25 = vcombine.low %v1003_v19, %v1011_v20 }
 0x158   :  { %v496_v45 = vpop.f32.mrb[7].mxu0  ;;  %v539_v46 = vmax.f32 %v439_v10, %v533_v41  ;;  %v955_v10 = vld [vmem:[%s4772_s5 + $0x188] sm:$0xff]  ;;  %v3097_v26 = vcombine.high %v1019_v23, %v1027_v24  ;;  %v3096_v31 = vcombine.low %v1019_v23, %v1027_v24  ;;  %v3145_v41 = vcombine.high %v1067_v38, %v1075_v39 }
 0x159   :  { %v540_v47 = vmax.f32 %v440_v13, %v535_v43  ;;  %v3033_v13 = vcombine.high %v955_v10, %v963_v11  ;;  %v1083_v42 = vld [vmem:[%s4772_s5 + $0x588] sm:$0xff]  ;;  %v3144_v44 = vcombine.low %v1067_v38, %v1075_v39  ;;  %v948_v38 = vld [vmem:[%s4772_s5 + $0x150] sm:$0xff]  ;;  %v941_v39 = vld [vmem:[%s4772_s5 + $0x118] sm:$0xff] }
 0x15a   :  { %v1091_v43 = vld [vmem:[%s4772_s5 + $0x5c8] sm:$0xff] }
 0x15b   :  { %v3161_v45 = vcombine.high %v1083_v42, %v1091_v43  ;;  %v3160_v48 = vcombine.low %v1083_v42, %v1091_v43  ;;  %v3019_v43 = vcombine.high %v940_v35, %v948_v38 }
 0x17e   :  { %v632_v54 = vpop.f32.mrb[12].mxu1 }
 0x17f   :  { %v639_v56 = vmax.f32 %v539_v46, %v632_v54  ;;  %v634_v57 = vpop.f32.mrb[13].mxu1  ;;  %v1099_v46 = vld [vmem:[%s4772_s5 + $0x608] sm:$0xff] }
 0x180   :  { %v640_v58 = vmax.f32 %v540_v47, %v634_v57  ;;  %v636_v59 = vpop.f32.mrb[14].mxu1  ;;  %v1107_v47 = vld [vmem:[%s4772_s5 + $0x648] sm:$0xff] }
 0x181   :  { %v653_v60 = vadd.f32 %v646_v53, %v639_v56  ;;  %v637_v61 = vpop.f32.mrb[15].mxu1  ;;  %v3177_v51 = vcombine.high %v1099_v46, %v1107_v47  ;;  %v1115_v53 = vld [vmem:[%s4772_s5 + $0x688] sm:$0xff]  ;;  %v1138_v59 = vld [vmem:[%s4772_s5 + $0x740] sm:$0xff] }
 0x182   :  { %v654_v62 = vadd.f32 %v650_v55, %v640_v58  ;;  %v1123_v54 = vld [vmem:[%s4772_s5 + $0x6c8] sm:$0xff]  ;;  %v3176_v55 = vcombine.low %v1099_v46, %v1107_v47  ;;  %v1130_v58 = vld [vmem:[%s4772_s5 + $0x700] sm:$0xff]  ;;  %v964_v46 = vld [vmem:[%s4772_s5 + $0x1d0] sm:$0xff] }
 0x183   :  { %v655_v63 = vmax.f32 %v653_v60, 0.0  ;;  %v3193_v56 = vcombine.high %v1115_v53, %v1123_v54  ;;  %v3192_v57 = vcombine.low %v1115_v53, %v1123_v54  ;;  %v1131_v60 = vld [vmem:[%s4772_s5 + $0x708] sm:$0xff]  ;;  %v3207_v61 = vcombine.high %v1130_v58, %v1138_v59  ;;  %v957_v47 = vld [vmem:[%s4772_s5 + $0x198] sm:$0xff] }
 0x184   :  { %v656_v0 = vmax.f32 %v654_v62, 0.0  ;;  %v1139_v62 = vld [vmem:[%s4772_s5 + $0x748] sm:$0xff] }
 0x185   :  { %v690_v4 = vpack.c.bf16 %v655_v63, %v655_v63  ;;  %v3206_v63 = vcombine.low %v1130_v58, %v1138_v59  ;;  %v3209_v1 = vcombine.high %v1131_v60, %v1139_v62  ;;  %2556 = vmatprep.subr.bf16.mxu1 %v3207_v61  ;;  %v973_v58 = vld [vmem:[%s4772_s5 + $0x218] sm:$0xff] }
 0x186   :  { %v691_v3 = vpack.c.bf16 %v656_v0, %v656_v0  ;;  %v3208_v0 = vcombine.low %v1131_v60, %v1139_v62  ;;  %v981_v59 = vld [vmem:[%s4772_s5 + $0x258] sm:$0xff] }
 0x187   :  { %2557 = vmatpush1.bf16.msra.mxu1 %v3206_v63  ;;  %v3053_v63 = vcombine.high %v973_v58, %v981_v59 }
 0x188   :  { %895 = vmatprep.mubr.bf16.mxu0 %v691_v3  ;;  %v1154_v3 = vld [vmem:[%s4772_s5 + $0x7c0] sm:$0xff] }
 0x189   :  { %896 = vmatmul.mubr.bf16.vlgmr.msra.gmra.mrb[8].mxu0 %v690_v4  ;;  %v1147_v4 = vld [vmem:[%s4772_s5 + $0x788] sm:$0xff]  ;;  %v3222_v7 = vcombine.low %v1146_v2, %v1154_v3 }
 0x18a   :  { %2570 = vmatpush1.bf16.msra.mxu0 %v2984_v33  ;;  %v3032_v33 = vcombine.low %v955_v10, %v963_v11  ;;  %v908_v10 = vld [vmem:[%s4772_s5 + $0x10] sm:$0xff] }
 0x18b   :  { %2571 = vmatprep.subr.bf16.mxu0 %v3001_v5  ;;  %v3223_v5 = vcombine.high %v1146_v2, %v1154_v3  ;;  %v916_v11 = vld [vmem:[%s4772_s5 + $0x50] sm:$0xff]  ;;  %v989_v2 = vld [vmem:[%s4772_s5 + $0x298] sm:$0xff] }
 0x18c   :  { %v2986_v30 = vcombine.low %v908_v10, %v916_v11  ;;  %v997_v3 = vld [vmem:[%s4772_s5 + $0x2d8] sm:$0xff] }
 0x18d   :  { %2558 = vmatprep.subr.bf16.mxu1 %v3223_v5  ;;  %v3052_v5 = vcombine.low %v973_v58, %v981_v59 }
 0x18e   :  { %2572 = vmatpush1.bf16.msra.mxu0 %v3000_v8  ;;  %v3224_v8 = vcombine.low %v1147_v4, %v1155_v6  ;;  %2559 = vmatpush1.bf16.msra.mxu1 %v3222_v7  ;;  %v3069_v7 = vcombine.high %v989_v2, %v997_v3 }
 0x18f   :  { %2573 = vmatprep.subr.bf16.mxu0 %v3017_v9  ;;  %v3225_v9 = vcombine.high %v1147_v4, %v1155_v6 }
 0x192   :  { %2574 = vmatpush1.bf16.msra.mxu0 %v3016_v12  ;;  %v909_v12 = vld [vmem:[%s4772_s5 + $0x18] sm:$0xff] }
 0x193   :  { %2575 = vmatprep.subr.bf16.mxu0 %v3033_v13  ;;  %v2987_v13 = vcombine.high %v908_v10, %v916_v11  ;;  %v1005_v10 = vld [vmem:[%s4772_s5 + $0x318] sm:$0xff] }
 0x194   :  { %v1013_v11 = vld [vmem:[%s4772_s5 + $0x358] sm:$0xff] }
 0x195   :  { %2610 = vmatprep.subr.bf16.mxu1 %v2987_v13  ;;  %v3068_v13 = vcombine.low %v989_v2, %v997_v3 }
 0x196   :  { %2576 = vmatpush1.bf16.msra.mxu0 %v3032_v33  ;;  %v2988_v33 = vcombine.low %v909_v12, %v917_v27 }
 0x197   :  { %2577 = vmatprep.subr.bf16.mxu0 %v3049_v14  ;;  %v2989_v14 = vcombine.high %v909_v12, %v917_v27 }
 0x19a   :  { %2578 = vmatpush1.bf16.msra.mxu0 %v3048_v17  ;;  %v700_v17 = vrot.slane %v689_v15, %v3995_v52  ;;  %v1021_v15 = vld [vmem:[%s4772_s5 + $0x398] sm:$0xff] }
 0x19b   :  { %2579 = vmatprep.subr.bf16.mxu0 %v3065_v18 }
 0x19e   :  { %2580 = vmatpush1.bf16.msra.mxu0 %v3064_v21 }
 0x19f   :  { %2581 = vmatprep.subr.bf16.mxu0 %v3081_v22 }
 0x1a2   :  { %2582 = vmatpush1.bf16.msra.mxu0 %v3080_v25 }
 0x1a3   :  { %2583 = vmatprep.subr.bf16.mxu0 %v3097_v26  ;;  %v924_v26 = vld [vmem:[%s4772_s5 + $0x90] sm:$0xff] }
 0x1a6   :  { %2584 = vmatpush1.bf16.msra.mxu0 %v3096_v31  ;;  %v933_v31 = vld [vmem:[%s4772_s5 + $0xd8] sm:$0xff] }
 0x1a7   :  { %2585 = vmatprep.subr.bf16.mxu0 %v3113_v32  ;;  %v3004_v42 = vcombine.low %v925_v29, %v933_v31 }
 0x1aa   :  { %2586 = vmatpush1.bf16.msra.mxu0 %v3112_v36  ;;  %v3003_v36 = vcombine.high %v924_v26, %v932_v28 }
 0x1ab   :  { %2587 = vmatprep.subr.bf16.mxu0 %v3129_v37  ;;  %v3005_v37 = vcombine.high %v925_v29, %v933_v31  ;;  %v1052_v31 = vld [vmem:[%s4772_s5 + $0x490] sm:$0xff] }
 0x1ae   :  { %2588 = vmatpush1.bf16.msra.mxu0 %v3128_v40  ;;  %v949_v40 = vld [vmem:[%s4772_s5 + $0x158] sm:$0xff] }
 0x1af   :  { %2589 = vmatprep.subr.bf16.mxu0 %v3145_v41  ;;  %v3002_v41 = vcombine.low %v924_v26, %v932_v28  ;;  %v3020_v53 = vcombine.low %v941_v39, %v949_v40 }
 0x1b2   :  { %2590 = vmatpush1.bf16.msra.mxu0 %v3144_v44  ;;  %v3021_v44 = vcombine.high %v941_v39, %v949_v40 }
 0x1b3   :  { %2591 = vmatprep.subr.bf16.mxu0 %v3161_v45  ;;  %v956_v45 = vld [vmem:[%s4772_s5 + $0x190] sm:$0xff] }
 0x1b4   :  { %v3035_v54 = vcombine.high %v956_v45, %v964_v46  ;;  %v3034_v60 = vcombine.low %v956_v45, %v964_v46  ;;  %v1077_v45 = vld [vmem:[%s4772_s5 + $0x558] sm:$0xff] }
 0x1b6   :  { %2592 = vmatpush1.bf16.msra.mxu0 %v3160_v48  ;;  %v965_v48 = vld [vmem:[%s4772_s5 + $0x1d8] sm:$0xff] }
 0x1b7   :  { %2593 = vmatprep.subr.bf16.mxu0 %v3177_v51  ;;  %v3018_v51 = vcombine.low %v940_v35, %v948_v38  ;;  %v3036_v61 = vcombine.low %v957_v47, %v965_v48  ;;  %v1060_v35 = vld [vmem:[%s4772_s5 + $0x4d0] sm:$0xff] }
 0x1b8   :  { %v3131_v40 = vcombine.high %v1052_v31, %v1060_v35  ;;  %v3130_v46 = vcombine.low %v1052_v31, %v1060_v35  ;;  %v919_v31 = vld [vmem:[%s4772_s5 + $0x68] sm:$0xff] }
 0x1ba   :  { %2594 = vmatpush1.bf16.msra.mxu0 %v3176_v55  ;;  %v3037_v55 = vcombine.high %v957_v47, %v965_v48 }
 0x1bb   :  { %2595 = vmatprep.subr.bf16.mxu0 %v3193_v56  ;;  %v972_v56 = vld [vmem:[%s4772_s5 + $0x210] sm:$0xff] }
 0x1be   :  { %2596 = vmatpush1.bf16.msra.mxu0 %v3192_v57  ;;  %v980_v57 = vld [vmem:[%s4772_s5 + $0x250] sm:$0xff] }
 0x1bf   :  { %2597 = vmatprep.subr.bf16.mxu0 %v3209_v1  ;;  %v3051_v62 = vcombine.high %v972_v56, %v980_v57  ;;  %v996_v1 = vld [vmem:[%s4772_s5 + $0x2d0] sm:$0xff]  ;;  %v3050_v4 = vcombine.low %v972_v56, %v980_v57  ;;  %v1093_v56 = vld [vmem:[%s4772_s5 + $0x5d8] sm:$0xff] }
 0x1c2   :  { %2598 = vmatpush1.bf16.msra.mxu0 %v3208_v0  ;;  %v988_v0 = vld [vmem:[%s4772_s5 + $0x290] sm:$0xff] }
 0x1c3   :  { %2599 = vmatprep.subr.bf16.mxu0 %v3225_v9  ;;  %v3067_v6 = vcombine.high %v988_v0, %v996_v1  ;;  %v1012_v9 = vld [vmem:[%s4772_s5 + $0x350] sm:$0xff]  ;;  %v3066_v12 = vcombine.low %v988_v0, %v996_v1  ;;  %v1109_v0 = vld [vmem:[%s4772_s5 + $0x658] sm:$0xff] }
 0x1c6   :  { %2600 = vmatpush1.bf16.msra.mxu0 %v3224_v8  ;;  %v1004_v8 = vld [vmem:[%s4772_s5 + $0x310] sm:$0xff] }
 0x1c7   :  { %2651 = vmatprep.subr.bf16.mxu0 %v2989_v14  ;;  %v3083_v27 = vcombine.high %v1004_v8, %v1012_v9  ;;  %v1028_v14 = vld [vmem:[%s4772_s5 + $0x3d0] sm:$0xff] }
 0x25c   :  { %v897_v18 = vpop.f32.mrb[8].mxu0 }
 0x25d   :  { %v898_v19 = vadd.f32 %v897_v18, %v696_v16  ;;  %v899_v20 = vpop.f32.mrb[9].mxu0  ;;  %v1029_v16 = vld [vmem:[%s4772_s5 + $0x3d8] sm:$0xff]  ;;  %v3084_v18 = vcombine.low %v1005_v10, %v1013_v11 }
 0x25e   :  { %v900_v21 = vadd.f32 %v899_v20, %v700_v17  ;;  %v901_v22 = vpop.f32.mrb[10].mxu0  ;;  %v3082_v17 = vcombine.low %v1004_v8, %v1012_v9  ;;  %v3101_v20 = vcombine.high %v1021_v15, %v1029_v16  ;;  %v3100_v26 = vcombine.low %v1021_v15, %v1029_v16  ;;  %v1125_v8 = vld [vmem:[%s4772_s5 + $0x6d8] sm:$0xff] }
 0x25f   :  { %v904_v23 = vmax.f32 %v898_v19, 0.0  ;;  %v902_v24 = vpop.f32.mrb[11].mxu0  ;;  %v1044_v22 = vld [vmem:[%s4772_s5 + $0x450] sm:$0xff] }
 0x260   :  { %v905_v25 = vmax.f32 %v900_v21, 0.0  ;;  %v1036_v21 = vld [vmem:[%s4772_s5 + $0x410] sm:$0xff]  ;;  %v1045_v24 = vld [vmem:[%s4772_s5 + $0x458] sm:$0xff] }
 0x261   :  { %v4135_v34 = vpack.c.bf16 %v904_v23, %v904_v23  ;;  %v1037_v23 = vld [vmem:[%s4772_s5 + $0x418] sm:$0xff]  ;;  %v3115_v28 = vcombine.high %v1036_v21, %v1044_v22  ;;  %v3114_v38 = vcombine.low %v1036_v21, %v1044_v22 }
 0x262   :  { %v4133_v32 = vpack.c.bf16 %v905_v25, %v905_v25  ;;  %v3117_v29 = vcombine.high %v1037_v23, %v1045_v24  ;;  %v3116_v39 = vcombine.low %v1037_v23, %v1045_v24  ;;  %v1157_v21 = vld [vmem:[%s4772_s5 + $0x7d8] sm:$0xff] }
 0x264   :  { %2560 = vmatprep.mubr.bf16.mxu1 %v4133_v32  ;;  %2601 = vmatprep.mubr.bf16.mxu0 %v4133_v32 }
 0x265   :  { %2561 = vmatmul.mubr.bf16.vlgmr.msra.gmra.mrb[16].mxu1 %v4135_v34  ;;  %2602 = vmatmul.mubr.bf16.vlgmr.msra.gmra.mrb[12].mxu0 %v4135_v34 }
 0x266   :  { %2611 = vmatpush1.bf16.msra.mxu1 %v2986_v30  ;;  %2652 = vmatpush1.bf16.msra.mxu0 %v2988_v33  ;;  %v3085_v30 = vcombine.high %v1005_v10, %v1013_v11  ;;  %v1020_v33 = vld [vmem:[%s4772_s5 + $0x390] sm:$0xff] }
 0x267   :  { %2642 = vmatprep.mubr.bf16.mxu1 %v4133_v32  ;;  %2683 = vmatprep.mubr.bf16.mxu0 %v4133_v32  ;;  %v3099_v19 = vcombine.high %v1020_v33, %v1028_v14  ;;  %v3098_v25 = vcombine.low %v1020_v33, %v1028_v14  ;;  %v1141_v33 = vld [vmem:[%s4772_s5 + $0x758] sm:$0xff] }
 0x268   :  { %2612 = vmatprep.subr.bf16.mxu1 %v3003_v36  ;;  %2653 = vmatprep.subr.bf16.mxu0 %v3005_v37  ;;  %v1053_v36 = vld [vmem:[%s4772_s5 + $0x498] sm:$0xff] }
 0x269   :  { %v1061_v37 = vld [vmem:[%s4772_s5 + $0x4d8] sm:$0xff] }
 0x26a   :  { %2613 = vmatpush1.bf16.msra.mxu1 %v3002_v41  ;;  %2654 = vmatpush1.bf16.msra.mxu0 %v3004_v42  ;;  %v3133_v41 = vcombine.high %v1053_v36, %v1061_v37  ;;  %v1068_v42 = vld [vmem:[%s4772_s5 + $0x510] sm:$0xff]  ;;  %v3132_v47 = vcombine.low %v1053_v36, %v1061_v37 }
 0x26b   :  { %2614 = vmatprep.subr.bf16.mxu1 %v3019_v43  ;;  %2655 = vmatprep.subr.bf16.mxu0 %v3021_v44  ;;  %v1076_v43 = vld [vmem:[%s4772_s5 + $0x550] sm:$0xff]  ;;  %v1069_v44 = vld [vmem:[%s4772_s5 + $0x518] sm:$0xff] }
 0x26c   :  { %v3147_v48 = vcombine.high %v1068_v42, %v1076_v43  ;;  %v3146_v57 = vcombine.low %v1068_v42, %v1076_v43  ;;  %v3148_v58 = vcombine.low %v1069_v44, %v1077_v45  ;;  %v935_v42 = vld [vmem:[%s4772_s5 + $0xe8] sm:$0xff] }
 0x26e   :  { %2615 = vmatpush1.bf16.msra.mxu1 %v3018_v51  ;;  %2656 = vmatpush1.bf16.msra.mxu0 %v3020_v53  ;;  %v3149_v51 = vcombine.high %v1069_v44, %v1077_v45  ;;  %v1084_v53 = vld [vmem:[%s4772_s5 + $0x590] sm:$0xff] }
 0x26f   :  { %2616 = vmatprep.subr.bf16.mxu1 %v3035_v54  ;;  %2657 = vmatprep.subr.bf16.mxu0 %v3037_v55  ;;  %v1092_v54 = vld [vmem:[%s4772_s5 + $0x5d0] sm:$0xff]  ;;  %v1085_v55 = vld [vmem:[%s4772_s5 + $0x598] sm:$0xff] }
 0x270   :  { %v3163_v59 = vcombine.high %v1084_v53, %v1092_v54  ;;  %v3162_v1 = vcombine.low %v1084_v53, %v1092_v54  ;;  %v3164_v2 = vcombine.low %v1085_v55, %v1093_v56  ;;  %v951_v53 = vld [vmem:[%s4772_s5 + $0x168] sm:$0xff] }
 0x272   :  { %2617 = vmatpush1.bf16.msra.mxu1 %v3034_v60  ;;  %2658 = vmatpush1.bf16.msra.mxu0 %v3036_v61  ;;  %v3165_v60 = vcombine.high %v1085_v55, %v1093_v56  ;;  %v1100_v61 = vld [vmem:[%s4772_s5 + $0x610] sm:$0xff] }
 0x273   :  { %2618 = vmatprep.subr.bf16.mxu1 %v3051_v62  ;;  %2659 = vmatprep.subr.bf16.mxu0 %v3053_v63  ;;  %v1108_v62 = vld [vmem:[%s4772_s5 + $0x650] sm:$0xff]  ;;  %v1101_v63 = vld [vmem:[%s4772_s5 + $0x618] sm:$0xff] }
 0x274   :  { %v3179_v3 = vcombine.high %v1100_v61, %v1108_v62  ;;  %v3178_v9 = vcombine.low %v1100_v61, %v1108_v62  ;;  %v3180_v10 = vcombine.low %v1101_v63, %v1109_v0  ;;  %v967_v61 = vld [vmem:[%s4772_s5 + $0x1e8] sm:$0xff] }
 0x276   :  { %2619 = vmatpush1.bf16.msra.mxu1 %v3050_v4  ;;  %2660 = vmatpush1.bf16.msra.mxu0 %v3052_v5  ;;  %v3181_v4 = vcombine.high %v1101_v63, %v1109_v0  ;;  %v1116_v5 = vld [vmem:[%s4772_s5 + $0x690] sm:$0xff] }
 0x277   :  { %2620 = vmatprep.subr.bf16.mxu1 %v3067_v6  ;;  %2661 = vmatprep.subr.bf16.mxu0 %v3069_v7  ;;  %v1124_v6 = vld [vmem:[%s4772_s5 + $0x6d0] sm:$0xff]  ;;  %v1117_v7 = vld [vmem:[%s4772_s5 + $0x698] sm:$0xff] }
 0x278   :  { %v3195_v11 = vcombine.high %v1116_v5, %v1124_v6  ;;  %v3194_v14 = vcombine.low %v1116_v5, %v1124_v6  ;;  %v3196_v15 = vcombine.low %v1117_v7, %v1125_v8  ;;  %v983_v5 = vld [vmem:[%s4772_s5 + $0x268] sm:$0xff] }
 0x27a   :  { %2621 = vmatpush1.bf16.msra.mxu1 %v3066_v12  ;;  %2662 = vmatpush1.bf16.msra.mxu0 %v3068_v13  ;;  %v3197_v12 = vcombine.high %v1117_v7, %v1125_v8  ;;  %v1132_v13 = vld [vmem:[%s4772_s5 + $0x710] sm:$0xff] }
 0x27b   :  { %2622 = vmatprep.subr.bf16.mxu1 %v3083_v27  ;;  %2663 = vmatprep.subr.bf16.mxu0 %v3085_v30  ;;  %v1140_v27 = vld [vmem:[%s4772_s5 + $0x750] sm:$0xff]  ;;  %v1133_v30 = vld [vmem:[%s4772_s5 + $0x718] sm:$0xff] }
 0x27c   :  { %v3211_v16 = vcombine.high %v1132_v13, %v1140_v27  ;;  %v3210_v22 = vcombine.low %v1132_v13, %v1140_v27  ;;  %v3212_v23 = vcombine.low %v1133_v30, %v1141_v33  ;;  %v999_v13 = vld [vmem:[%s4772_s5 + $0x2e8] sm:$0xff] }
 0x27e   :  { %2623 = vmatpush1.bf16.msra.mxu1 %v3082_v17  ;;  %2664 = vmatpush1.bf16.msra.mxu0 %v3084_v18  ;;  %v3213_v17 = vcombine.high %v1133_v30, %v1141_v33  ;;  %v1148_v18 = vld [vmem:[%s4772_s5 + $0x790] sm:$0xff] }
 0x27f   :  { %2624 = vmatprep.subr.bf16.mxu1 %v3099_v19  ;;  %2665 = vmatprep.subr.bf16.mxu0 %v3101_v20  ;;  %v1156_v19 = vld [vmem:[%s4772_s5 + $0x7d0] sm:$0xff]  ;;  %v1149_v20 = vld [vmem:[%s4772_s5 + $0x798] sm:$0xff] }
 0x280   :  { %v3227_v24 = vcombine.high %v1148_v18, %v1156_v19  ;;  %v3226_v35 = vcombine.low %v1148_v18, %v1156_v19  ;;  %v3228_v36 = vcombine.low %v1149_v20, %v1157_v21  ;;  %v1015_v18 = vld [vmem:[%s4772_s5 + $0x368] sm:$0xff] }
 0x282   :  { %2625 = vmatpush1.bf16.msra.mxu1 %v3098_v25  ;;  %2666 = vmatpush1.bf16.msra.mxu0 %v3100_v26  ;;  %v3229_v25 = vcombine.high %v1149_v20, %v1157_v21  ;;  %v910_v26 = vld [vmem:[%s4772_s5 + $0x20] sm:$0xff] }
 0x283   :  { %2626 = vmatprep.subr.bf16.mxu1 %v3115_v28  ;;  %2667 = vmatprep.subr.bf16.mxu0 %v3117_v29  ;;  %v918_v28 = vld [vmem:[%s4772_s5 + $0x60] sm:$0xff]  ;;  %v911_v29 = vld [vmem:[%s4772_s5 + $0x28] sm:$0xff] }
 0x284   :  { %v2991_v37 = vcombine.high %v910_v26, %v918_v28  ;;  %v2990_v43 = vcombine.low %v910_v26, %v918_v28  ;;  %v2992_v44 = vcombine.low %v911_v29, %v919_v31  ;;  %v1031_v26 = vld [vmem:[%s4772_s5 + $0x3e8] sm:$0xff] }
 0x286   :  { %2627 = vmatpush1.bf16.msra.mxu1 %v3114_v38  ;;  %2668 = vmatpush1.bf16.msra.mxu0 %v3116_v39  ;;  %v2993_v38 = vcombine.high %v911_v29, %v919_v31  ;;  %v926_v39 = vld [vmem:[%s4772_s5 + $0xa0] sm:$0xff] }
 0x287   :  { %2628 = vmatprep.subr.bf16.mxu1 %v3131_v40  ;;  %2669 = vmatprep.subr.bf16.mxu0 %v3133_v41  ;;  %v934_v40 = vld [vmem:[%s4772_s5 + $0xe0] sm:$0xff]  ;;  %v927_v41 = vld [vmem:[%s4772_s5 + $0xa8] sm:$0xff] }
 0x288   :  { %v3007_v45 = vcombine.high %v926_v39, %v934_v40  ;;  %v3006_v54 = vcombine.low %v926_v39, %v934_v40  ;;  %v3008_v55 = vcombine.low %v927_v41, %v935_v42  ;;  %v1047_v39 = vld [vmem:[%s4772_s5 + $0x468] sm:$0xff] }
 0x28a   :  { %2629 = vmatpush1.bf16.msra.mxu1 %v3130_v46  ;;  %2670 = vmatpush1.bf16.msra.mxu0 %v3132_v47  ;;  %v3009_v46 = vcombine.high %v927_v41, %v935_v42  ;;  %v942_v47 = vld [vmem:[%s4772_s5 + $0x120] sm:$0xff] }
 0x28b   :  { %2630 = vmatprep.subr.bf16.mxu1 %v3147_v48  ;;  %2671 = vmatprep.subr.bf16.mxu0 %v3149_v51  ;;  %v950_v48 = vld [vmem:[%s4772_s5 + $0x160] sm:$0xff]  ;;  %v943_v51 = vld [vmem:[%s4772_s5 + $0x128] sm:$0xff] }
 0x28c   :  { %v3023_v56 = vcombine.high %v942_v47, %v950_v48  ;;  %v3022_v62 = vcombine.low %v942_v47, %v950_v48  ;;  %v3024_v63 = vcombine.low %v943_v51, %v951_v53  ;;  %v1063_v47 = vld [vmem:[%s4772_s5 + $0x4e8] sm:$0xff] }
 0x28e   :  { %2631 = vmatpush1.bf16.msra.mxu1 %v3146_v57  ;;  %2672 = vmatpush1.bf16.msra.mxu0 %v3148_v58  ;;  %v3025_v57 = vcombine.high %v943_v51, %v951_v53  ;;  %v958_v58 = vld [vmem:[%s4772_s5 + $0x1a0] sm:$0xff] }
 0x28f   :  { %2632 = vmatprep.subr.bf16.mxu1 %v3163_v59  ;;  %2673 = vmatprep.subr.bf16.mxu0 %v3165_v60  ;;  %v966_v59 = vld [vmem:[%s4772_s5 + $0x1e0] sm:$0xff]  ;;  %v959_v60 = vld [vmem:[%s4772_s5 + $0x1a8] sm:$0xff] }
 0x290   :  { %v3039_v0 = vcombine.high %v958_v58, %v966_v59  ;;  %v3038_v6 = vcombine.low %v958_v58, %v966_v59  ;;  %v3040_v7 = vcombine.low %v959_v60, %v967_v61  ;;  %v1079_v58 = vld [vmem:[%s4772_s5 + $0x568] sm:$0xff] }
 0x292   :  { %2633 = vmatpush1.bf16.msra.mxu1 %v3162_v1  ;;  %2674 = vmatpush1.bf16.msra.mxu0 %v3164_v2  ;;  %v3041_v1 = vcombine.high %v959_v60, %v967_v61  ;;  %v974_v2 = vld [vmem:[%s4772_s5 + $0x220] sm:$0xff] }
 0x293   :  { %2634 = vmatprep.subr.bf16.mxu1 %v3179_v3  ;;  %2675 = vmatprep.subr.bf16.mxu0 %v3181_v4  ;;  %v982_v3 = vld [vmem:[%s4772_s5 + $0x260] sm:$0xff]  ;;  %v975_v4 = vld [vmem:[%s4772_s5 + $0x228] sm:$0xff] }
 0x294   :  { %v3055_v8 = vcombine.high %v974_v2, %v982_v3  ;;  %v3054_v27 = vcombine.low %v974_v2, %v982_v3  ;;  %v3056_v30 = vcombine.low %v975_v4, %v983_v5  ;;  %v1095_v2 = vld [vmem:[%s4772_s5 + $0x5e8] sm:$0xff] }
 0x296   :  { %2635 = vmatpush1.bf16.msra.mxu1 %v3178_v9  ;;  %2676 = vmatpush1.bf16.msra.mxu0 %v3180_v10  ;;  %v3057_v9 = vcombine.high %v975_v4, %v983_v5  ;;  %v990_v10 = vld [vmem:[%s4772_s5 + $0x2a0] sm:$0xff] }
 0x297   :  { %2636 = vmatprep.subr.bf16.mxu1 %v3195_v11  ;;  %2677 = vmatprep.subr.bf16.mxu0 %v3197_v12  ;;  %v998_v11 = vld [vmem:[%s4772_s5 + $0x2e0] sm:$0xff]  ;;  %v991_v12 = vld [vmem:[%s4772_s5 + $0x2a8] sm:$0xff] }
 0x298   :  { %v3071_v33 = vcombine.high %v990_v10, %v998_v11  ;;  %v3070_v19 = vcombine.low %v990_v10, %v998_v11  ;;  %v3072_v20 = vcombine.low %v991_v12, %v999_v13  ;;  %v1111_v10 = vld [vmem:[%s4772_s5 + $0x668] sm:$0xff] }
 0x29a   :  { %2637 = vmatpush1.bf16.msra.mxu1 %v3194_v14  ;;  %2678 = vmatpush1.bf16.msra.mxu0 %v3196_v15  ;;  %v3073_v14 = vcombine.high %v991_v12, %v999_v13  ;;  %v1006_v15 = vld [vmem:[%s4772_s5 + $0x320] sm:$0xff] }
 0x29b   :  { %2638 = vmatprep.subr.bf16.mxu1 %v3211_v16  ;;  %2679 = vmatprep.subr.bf16.mxu0 %v3213_v17  ;;  %v1014_v16 = vld [vmem:[%s4772_s5 + $0x360] sm:$0xff]  ;;  %v1007_v17 = vld [vmem:[%s4772_s5 + $0x328] sm:$0xff] }
 0x29c   :  { %v3087_v21 = vcombine.high %v1006_v15, %v1014_v16  ;;  %v3086_v28 = vcombine.low %v1006_v15, %v1014_v16  ;;  %v3088_v29 = vcombine.low %v1007_v17, %v1015_v18  ;;  %v1127_v15 = vld [vmem:[%s4772_s5 + $0x6e8] sm:$0xff] }
 0x29e   :  { %2639 = vmatpush1.bf16.msra.mxu1 %v3210_v22  ;;  %2680 = vmatpush1.bf16.msra.mxu0 %v3212_v23  ;;  %v3089_v22 = vcombine.high %v1007_v17, %v1015_v18  ;;  %v1022_v23 = vld [vmem:[%s4772_s5 + $0x3a0] sm:$0xff] }
 0x29f   :  { %2640 = vmatprep.subr.bf16.mxu1 %v3227_v24  ;;  %2681 = vmatprep.subr.bf16.mxu0 %v3229_v25  ;;  %v1030_v24 = vld [vmem:[%s4772_s5 + $0x3e0] sm:$0xff]  ;;  %v1023_v25 = vld [vmem:[%s4772_s5 + $0x3a8] sm:$0xff] }
 0x2a0   :  { %v3103_v31 = vcombine.high %v1022_v23, %v1030_v24  ;;  %v3102_v40 = vcombine.low %v1022_v23, %v1030_v24  ;;  %v3104_v41 = vcombine.low %v1023_v25, %v1031_v26  ;;  %v1143_v23 = vld [vmem:[%s4772_s5 + $0x768] sm:$0xff] }
 0x2a2   :  { %2641 = vmatpush1.bf16.msra.mxu1 %v3226_v35  ;;  %2682 = vmatpush1.bf16.msra.mxu0 %v3228_v36  ;;  %v3105_v35 = vcombine.high %v1023_v25, %v1031_v26  ;;  %v1038_v36 = vld [vmem:[%s4772_s5 + $0x420] sm:$0xff] }
 0x2a3   :  { %2692 = vmatprep.subr.bf16.mxu1 %v2991_v37  ;;  %2733 = vmatprep.subr.bf16.mxu0 %v2993_v38  ;;  %v1046_v37 = vld [vmem:[%s4772_s5 + $0x460] sm:$0xff]  ;;  %v1039_v38 = vld [vmem:[%s4772_s5 + $0x428] sm:$0xff] }
 0x2a4   :  { %v3119_v42 = vcombine.high %v1038_v36, %v1046_v37  ;;  %v3118_v48 = vcombine.low %v1038_v36, %v1046_v37  ;;  %v3120_v51 = vcombine.low %v1039_v38, %v1047_v39  ;;  %v1159_v36 = vld [vmem:[%s4772_s5 + $0x7e8] sm:$0xff] }
 0x2a5   :  { %2643 = vmatmul.mubr.bf16.vlgmr.msra.gmra.mrb[20].mxu1 %v4135_v34  ;;  %2684 = vmatmul.mubr.bf16.vlgmr.msra.gmra.mrb[16].mxu0 %v4135_v34 }
 0x2a6   :  { %2693 = vmatpush1.bf16.msra.mxu1 %v2990_v43  ;;  %2724 = vmatprep.mubr.bf16.mxu1 %v4133_v32  ;;  %v3121_v43 = vcombine.high %v1039_v38, %v1047_v39 }
 0x2a7   :  { %2734 = vmatpush1.bf16.msra.mxu0 %v2992_v44  ;;  %2765 = vmatprep.mubr.bf16.mxu0 %v4133_v32  ;;  %v1054_v44 = vld [vmem:[%s4772_s5 + $0x4a0] sm:$0xff] }
 0x2a8   :  { %2694 = vmatprep.subr.bf16.mxu1 %v3007_v45  ;;  %2735 = vmatprep.subr.bf16.mxu0 %v3009_v46  ;;  %v1062_v45 = vld [vmem:[%s4772_s5 + $0x4e0] sm:$0xff]  ;;  %v1055_v46 = vld [vmem:[%s4772_s5 + $0x4a8] sm:$0xff] }
 0x2a9   :  { %v3135_v53 = vcombine.high %v1054_v44, %v1062_v45  ;;  %v3134_v59 = vcombine.low %v1054_v44, %v1062_v45  ;;  %v3136_v60 = vcombine.low %v1055_v46, %v1063_v47  ;;  %v921_v44 = vld [vmem:[%s4772_s5 + $0x78] sm:$0xff] }
 0x2aa   :  { %2695 = vmatpush1.bf16.msra.mxu1 %v3006_v54  ;;  %v3137_v54 = vcombine.high %v1055_v46, %v1063_v47 }
 0x2ab   :  { %2736 = vmatpush1.bf16.msra.mxu0 %v3008_v55  ;;  %2696 = vmatprep.subr.bf16.mxu1 %v3023_v56  ;;  %v1070_v55 = vld [vmem:[%s4772_s5 + $0x520] sm:$0xff] }
 0x2ac   :  { %2737 = vmatprep.subr.bf16.mxu0 %v3025_v57  ;;  %v1078_v56 = vld [vmem:[%s4772_s5 + $0x560] sm:$0xff]  ;;  %v1071_v57 = vld [vmem:[%s4772_s5 + $0x528] sm:$0xff] }
 0x2ad   :  { %v3151_v61 = vcombine.high %v1070_v55, %v1078_v56  ;;  %v3150_v3 = vcombine.low %v1070_v55, %v1078_v56  ;;  %v3152_v4 = vcombine.low %v1071_v57, %v1079_v58  ;;  %v929_v55 = vld [vmem:[%s4772_s5 + $0xb8] sm:$0xff] }
 0x2ae   :  { %2697 = vmatpush1.bf16.msra.mxu1 %v3022_v62  ;;  %v3153_v62 = vcombine.high %v1071_v57, %v1079_v58  ;;  %v937_v56 = vld [vmem:[%s4772_s5 + $0xf8] sm:$0xff] }
 0x2af   :  { %2738 = vmatpush1.bf16.msra.mxu0 %v3024_v63  ;;  %2698 = vmatprep.subr.bf16.mxu1 %v3039_v0  ;;  %v1086_v63 = vld [vmem:[%s4772_s5 + $0x5a0] sm:$0xff] }
 0x2b0   :  { %2739 = vmatprep.subr.bf16.mxu0 %v3041_v1  ;;  %v1094_v0 = vld [vmem:[%s4772_s5 + $0x5e0] sm:$0xff]  ;;  %v1087_v1 = vld [vmem:[%s4772_s5 + $0x5a8] sm:$0xff] }
 0x2b1   :  { %v3167_v5 = vcombine.high %v1086_v63, %v1094_v0  ;;  %v3166_v11 = vcombine.low %v1086_v63, %v1094_v0  ;;  %v3168_v12 = vcombine.low %v1087_v1, %v1095_v2  ;;  %v953_v63 = vld [vmem:[%s4772_s5 + $0x178] sm:$0xff] }
 0x2b2   :  { %2699 = vmatpush1.bf16.msra.mxu1 %v3038_v6  ;;  %v3169_v6 = vcombine.high %v1087_v1, %v1095_v2  ;;  %v3012_v1 = vcombine.low %v929_v55, %v937_v56 }
 0x2b3   :  { %2740 = vmatpush1.bf16.msra.mxu0 %v3040_v7  ;;  %2700 = vmatprep.subr.bf16.mxu1 %v3055_v8  ;;  %v1102_v7 = vld [vmem:[%s4772_s5 + $0x620] sm:$0xff] }
 0x2b4   :  { %2741 = vmatprep.subr.bf16.mxu0 %v3057_v9  ;;  %v1110_v8 = vld [vmem:[%s4772_s5 + $0x660] sm:$0xff]  ;;  %v1103_v9 = vld [vmem:[%s4772_s5 + $0x628] sm:$0xff] }
 0x2b5   :  { %v3183_v13 = vcombine.high %v1102_v7, %v1110_v8  ;;  %v3182_v16 = vcombine.low %v1102_v7, %v1110_v8  ;;  %v3184_v17 = vcombine.low %v1103_v9, %v1111_v10  ;;  %v969_v7 = vld [vmem:[%s4772_s5 + $0x1f8] sm:$0xff] }
 0x2b6   :  { %2701 = vmatpush1.bf16.msra.mxu1 %v3054_v27  ;;  %v3185_v27 = vcombine.high %v1103_v9, %v1111_v10 }
 0x2b7   :  { %2742 = vmatpush1.bf16.msra.mxu0 %v3056_v30  ;;  %2702 = vmatprep.subr.bf16.mxu1 %v3071_v33  ;;  %v1118_v30 = vld [vmem:[%s4772_s5 + $0x6a0] sm:$0xff] }
 0x2b8   :  { %2743 = vmatprep.subr.bf16.mxu0 %v3073_v14  ;;  %v1126_v33 = vld [vmem:[%s4772_s5 + $0x6e0] sm:$0xff]  ;;  %v1119_v14 = vld [vmem:[%s4772_s5 + $0x6a8] sm:$0xff] }
 0x2b9   :  { %v3199_v18 = vcombine.high %v1118_v30, %v1126_v33  ;;  %v3198_v24 = vcombine.low %v1118_v30, %v1126_v33  ;;  %v3200_v25 = vcombine.low %v1119_v14, %v1127_v15 }
 0x2ba   :  { %2703 = vmatpush1.bf16.msra.mxu1 %v3070_v19  ;;  %v3201_v19 = vcombine.high %v1119_v14, %v1127_v15 }
 0x2bb   :  { %2744 = vmatpush1.bf16.msra.mxu0 %v3072_v20  ;;  %2704 = vmatprep.subr.bf16.mxu1 %v3087_v21  ;;  %v1134_v20 = vld [vmem:[%s4772_s5 + $0x720] sm:$0xff] }
 0x2bc   :  { %2745 = vmatprep.subr.bf16.mxu0 %v3089_v22  ;;  %v1142_v21 = vld [vmem:[%s4772_s5 + $0x760] sm:$0xff]  ;;  %v1135_v22 = vld [vmem:[%s4772_s5 + $0x728] sm:$0xff] }
 0x2bd   :  { %v3215_v26 = vcombine.high %v1134_v20, %v1142_v21  ;;  %v3214_v37 = vcombine.low %v1134_v20, %v1142_v21  ;;  %v3216_v38 = vcombine.low %v1135_v22, %v1143_v23 }
 0x2be   :  { %2705 = vmatpush1.bf16.msra.mxu1 %v3086_v28  ;;  %v3217_v28 = vcombine.high %v1135_v22, %v1143_v23 }
 0x2bf   :  { %2746 = vmatpush1.bf16.msra.mxu0 %v3088_v29  ;;  %2706 = vmatprep.subr.bf16.mxu1 %v3103_v31  ;;  %v1150_v29 = vld [vmem:[%s4772_s5 + $0x7a0] sm:$0xff] }
 0x2c0   :  { %2747 = vmatprep.subr.bf16.mxu0 %v3105_v35  ;;  %v1158_v31 = vld [vmem:[%s4772_s5 + $0x7e0] sm:$0xff]  ;;  %v1151_v35 = vld [vmem:[%s4772_s5 + $0x7a8] sm:$0xff] }
 0x2c1   :  { %v3231_v39 = vcombine.high %v1150_v29, %v1158_v31  ;;  %v3230_v45 = vcombine.low %v1150_v29, %v1158_v31  ;;  %v3232_v46 = vcombine.low %v1151_v35, %v1159_v36 }
 0x2c2   :  { %2707 = vmatpush1.bf16.msra.mxu1 %v3102_v40  ;;  %v3233_v40 = vcombine.high %v1151_v35, %v1159_v36 }
 0x2c3   :  { %2748 = vmatpush1.bf16.msra.mxu0 %v3104_v41  ;;  %2708 = vmatprep.subr.bf16.mxu1 %v3119_v42  ;;  %v912_v41 = vld [vmem:[%s4772_s5 + $0x30] sm:$0xff] }
 0x2c4   :  { %2749 = vmatprep.subr.bf16.mxu0 %v3121_v43  ;;  %v920_v42 = vld [vmem:[%s4772_s5 + $0x70] sm:$0xff]  ;;  %v913_v43 = vld [vmem:[%s4772_s5 + $0x38] sm:$0xff] }
 0x2c5   :  { %v2995_v47 = vcombine.high %v912_v41, %v920_v42  ;;  %v2996_v57 = vcombine.low %v913_v43, %v921_v44 }
 0x2c6   :  { %2709 = vmatpush1.bf16.msra.mxu1 %v3118_v48  ;;  %v2997_v48 = vcombine.high %v913_v43, %v921_v44 }
 0x2c7   :  { %2750 = vmatpush1.bf16.msra.mxu0 %v3120_v51  ;;  %2710 = vmatprep.subr.bf16.mxu1 %v3135_v53  ;;  %v928_v51 = vld [vmem:[%s4772_s5 + $0xb0] sm:$0xff] }
 0x2c8   :  { %2751 = vmatprep.subr.bf16.mxu0 %v3137_v54  ;;  %v936_v53 = vld [vmem:[%s4772_s5 + $0xf0] sm:$0xff]  ;;  %v2994_v54 = vcombine.low %v912_v41, %v920_v42 }
 0x2c9   :  { %v3011_v58 = vcombine.high %v928_v51, %v936_v53  ;;  %v3010_v0 = vcombine.low %v928_v51, %v936_v53 }
 0x2ca   :  { %2711 = vmatpush1.bf16.msra.mxu1 %v3134_v59  ;;  %v944_v59 = vld [vmem:[%s4772_s5 + $0x130] sm:$0xff] }
 0x2cb   :  { %2752 = vmatpush1.bf16.msra.mxu0 %v3136_v60  ;;  %2712 = vmatprep.subr.bf16.mxu1 %v3151_v61  ;;  %v952_v60 = vld [vmem:[%s4772_s5 + $0x170] sm:$0xff]  ;;  %v3013_v61 = vcombine.high %v929_v55, %v937_v56 }
 0x2cc   :  { %2753 = vmatprep.subr.bf16.mxu0 %v3153_v62  ;;  %v945_v62 = vld [vmem:[%s4772_s5 + $0x138] sm:$0xff]  ;;  %v3027_v2 = vcombine.high %v944_v59, %v952_v60  ;;  %v1056_v56 = vld [vmem:[%s4772_s5 + $0x4b0] sm:$0xff] }
 0x2cd   :  { %v3028_v8 = vcombine.low %v945_v62, %v953_v63 }
 0x2ce   :  { %2713 = vmatpush1.bf16.msra.mxu1 %v3150_v3  ;;  %v3029_v3 = vcombine.high %v945_v62, %v953_v63 }
 0x2cf   :  { %2754 = vmatpush1.bf16.msra.mxu0 %v3152_v4  ;;  %2714 = vmatprep.subr.bf16.mxu1 %v3167_v5  ;;  %v960_v4 = vld [vmem:[%s4772_s5 + $0x1b0] sm:$0xff] }
 0x2d0   :  { %2755 = vmatprep.subr.bf16.mxu0 %v3169_v6  ;;  %v968_v5 = vld [vmem:[%s4772_s5 + $0x1f0] sm:$0xff]  ;;  %v961_v6 = vld [vmem:[%s4772_s5 + $0x1b8] sm:$0xff] }
 0x2d1   :  { %v3043_v9 = vcombine.high %v960_v4, %v968_v5  ;;  %v3045_v10 = vcombine.high %v961_v6, %v969_v7  ;;  %v3042_v30 = vcombine.low %v960_v4, %v968_v5  ;;  %v3044_v33 = vcombine.low %v961_v6, %v969_v7 }
 0x2d2   :  { %2715 = vmatpush1.bf16.msra.mxu1 %v3166_v11  ;;  %v976_v11 = vld [vmem:[%s4772_s5 + $0x230] sm:$0xff] }
 0x2d3   :  { %2756 = vmatpush1.bf16.msra.mxu0 %v3168_v12  ;;  %2716 = vmatprep.subr.bf16.mxu1 %v3183_v13  ;;  %v984_v12 = vld [vmem:[%s4772_s5 + $0x270] sm:$0xff]  ;;  %v977_v13 = vld [vmem:[%s4772_s5 + $0x238] sm:$0xff] }
 0x2d4   :  { %2757 = vmatprep.subr.bf16.mxu0 %v3185_v27  ;;  %v985_v27 = vld [vmem:[%s4772_s5 + $0x278] sm:$0xff]  ;;  %v3059_v14 = vcombine.high %v976_v11, %v984_v12  ;;  %v3058_v20 = vcombine.low %v976_v11, %v984_v12 }
 0x2d5   :  { %v3061_v15 = vcombine.high %v977_v13, %v985_v27  ;;  %v3060_v21 = vcombine.low %v977_v13, %v985_v27 }
 0x2d6   :  { %2717 = vmatpush1.bf16.msra.mxu1 %v3182_v16  ;;  %v992_v16 = vld [vmem:[%s4772_s5 + $0x2b0] sm:$0xff] }
 0x2d7   :  { %2758 = vmatpush1.bf16.msra.mxu0 %v3184_v17  ;;  %2718 = vmatprep.subr.bf16.mxu1 %v3199_v18  ;;  %v1000_v17 = vld [vmem:[%s4772_s5 + $0x2f0] sm:$0xff]  ;;  %v993_v18 = vld [vmem:[%s4772_s5 + $0x2b8] sm:$0xff] }
 0x2d8   :  { %2759 = vmatprep.subr.bf16.mxu0 %v3201_v19  ;;  %v1001_v19 = vld [vmem:[%s4772_s5 + $0x2f8] sm:$0xff]  ;;  %v3075_v22 = vcombine.high %v992_v16, %v1000_v17  ;;  %v3074_v29 = vcombine.low %v992_v16, %v1000_v17 }
 0x2d9   :  { %v3077_v23 = vcombine.high %v993_v18, %v1001_v19  ;;  %v3076_v31 = vcombine.low %v993_v18, %v1001_v19 }
 0x2da   :  { %2719 = vmatpush1.bf16.msra.mxu1 %v3198_v24  ;;  %v1008_v24 = vld [vmem:[%s4772_s5 + $0x330] sm:$0xff] }
 0x2db   :  { %2760 = vmatpush1.bf16.msra.mxu0 %v3200_v25  ;;  %2720 = vmatprep.subr.bf16.mxu1 %v3215_v26  ;;  %v1016_v25 = vld [vmem:[%s4772_s5 + $0x370] sm:$0xff]  ;;  %v1009_v26 = vld [vmem:[%s4772_s5 + $0x338] sm:$0xff] }
 0x2dc   :  { %2761 = vmatprep.subr.bf16.mxu0 %v3217_v28  ;;  %v1017_v28 = vld [vmem:[%s4772_s5 + $0x378] sm:$0xff]  ;;  %v3091_v35 = vcombine.high %v1008_v24, %v1016_v25  ;;  %v3090_v41 = vcombine.low %v1008_v24, %v1016_v25 }
 0x2dd   :  { %v3093_v36 = vcombine.high %v1009_v26, %v1017_v28  ;;  %v3092_v42 = vcombine.low %v1009_v26, %v1017_v28 }
 0x2de   :  { %2721 = vmatpush1.bf16.msra.mxu1 %v3214_v37  ;;  %v1024_v37 = vld [vmem:[%s4772_s5 + $0x3b0] sm:$0xff] }
 0x2df   :  { %2762 = vmatpush1.bf16.msra.mxu0 %v3216_v38  ;;  %2722 = vmatprep.subr.bf16.mxu1 %v3231_v39  ;;  %v1032_v38 = vld [vmem:[%s4772_s5 + $0x3f0] sm:$0xff]  ;;  %v1025_v39 = vld [vmem:[%s4772_s5 + $0x3b8] sm:$0xff] }
 0x2e0   :  { %2763 = vmatprep.subr.bf16.mxu0 %v3233_v40  ;;  %v1033_v40 = vld [vmem:[%s4772_s5 + $0x3f8] sm:$0xff]  ;;  %v3107_v43 = vcombine.high %v1024_v37, %v1032_v38  ;;  %v3106_v51 = vcombine.low %v1024_v37, %v1032_v38 }
 0x2e1   :  { %v3109_v44 = vcombine.high %v1025_v39, %v1033_v40  ;;  %v3108_v53 = vcombine.low %v1025_v39, %v1033_v40 }
 0x2e2   :  { %2723 = vmatpush1.bf16.msra.mxu1 %v3230_v45  ;;  %v1040_v45 = vld [vmem:[%s4772_s5 + $0x430] sm:$0xff] }
 0x2e3   :  { %2764 = vmatpush1.bf16.msra.mxu0 %v3232_v46  ;;  %2774 = vmatprep.subr.bf16.mxu1 %v2995_v47  ;;  %v1048_v46 = vld [vmem:[%s4772_s5 + $0x470] sm:$0xff]  ;;  %v1041_v47 = vld [vmem:[%s4772_s5 + $0x438] sm:$0xff] }
 0x2e4   :  { %2815 = vmatprep.subr.bf16.mxu0 %v2997_v48  ;;  %v1049_v48 = vld [vmem:[%s4772_s5 + $0x478] sm:$0xff] }
 0x2e5   :  { %2725 = vmatmul.mubr.bf16.vlgmr.msra.gmra.mrb[24].mxu1 %v4135_v34  ;;  %v3125_v55 = vcombine.high %v1041_v47, %v1049_v48 }
 0x2e6   :  { %2766 = vmatmul.mubr.bf16.vlgmr.msra.gmra.mrb[20].mxu0 %v4135_v34  ;;  %2775 = vmatpush1.bf16.msra.mxu1 %v2994_v54  ;;  %v3123_v54 = vcombine.high %v1040_v45, %v1048_v46 }
 0x2e7   :  { %2806 = vmatprep.mubr.bf16.mxu1 %v4133_v32  ;;  %2816 = vmatpush1.bf16.msra.mxu0 %v2996_v57  ;;  %v1064_v57 = vld [vmem:[%s4772_s5 + $0x4f0] sm:$0xff] }
 0x2e8   :  { %2847 = vmatprep.mubr.bf16.mxu0 %v4133_v32  ;;  %2776 = vmatprep.subr.bf16.mxu1 %v3011_v58  ;;  %v3026_v32 = vcombine.low %v944_v59, %v952_v60  ;;  %v1057_v58 = vld [vmem:[%s4772_s5 + $0x4b8] sm:$0xff]  ;;  %v3122_v60 = vcombine.low %v1040_v45, %v1048_v46  ;;  %v3139_v62 = vcombine.high %v1056_v56, %v1064_v57 }
 0x2e9   :  { %2817 = vmatprep.subr.bf16.mxu0 %v3013_v61  ;;  %v1065_v59 = vld [vmem:[%s4772_s5 + $0x4f8] sm:$0xff]  ;;  %v3124_v61 = vcombine.low %v1041_v47, %v1049_v48  ;;  %v3138_v4 = vcombine.low %v1056_v56, %v1064_v57  ;;  %v1182_v56 = vsub.s32 3, %v3986_v49 }
 0x2ea   :  { %2777 = vmatpush1.bf16.msra.mxu1 %v3010_v0  ;;  %v3141_v63 = vcombine.high %v1057_v58, %v1065_v59  ;;  %v1072_v0 = vld [vmem:[%s4772_s5 + $0x530] sm:$0xff]  ;;  %v3140_v5 = vcombine.low %v1057_v58, %v1065_v59 }
 0x2eb   :  { %2818 = vmatpush1.bf16.msra.mxu0 %v3012_v1  ;;  %2778 = vmatprep.subr.bf16.mxu1 %v3027_v2  ;;  %v1080_v1 = vld [vmem:[%s4772_s5 + $0x570] sm:$0xff]  ;;  %v1073_v2 = vld [vmem:[%s4772_s5 + $0x538] sm:$0xff] }
 0x2ec   :  { %2819 = vmatprep.subr.bf16.mxu0 %v3029_v3  ;;  %v1081_v3 = vld [vmem:[%s4772_s5 + $0x578] sm:$0xff]  ;;  %v3155_v6 = vcombine.high %v1072_v0, %v1080_v1  ;;  %v3154_v11 = vcombine.low %v1072_v0, %v1080_v1 }
 0x2ed   :  { %v3157_v7 = vcombine.high %v1073_v2, %v1081_v3  ;;  %v3156_v12 = vcombine.low %v1073_v2, %v1081_v3 }
 0x2ee   :  { %2779 = vmatpush1.bf16.msra.mxu1 %v3026_v32  ;;  %v1088_v32 = vld [vmem:[%s4772_s5 + $0x5b0] sm:$0xff] }
 0x2ef   :  { %2820 = vmatpush1.bf16.msra.mxu0 %v3028_v8  ;;  %2780 = vmatprep.subr.bf16.mxu1 %v3043_v9  ;;  %v1096_v8 = vld [vmem:[%s4772_s5 + $0x5f0] sm:$0xff]  ;;  %v1089_v9 = vld [vmem:[%s4772_s5 + $0x5b8] sm:$0xff] }
 0x2f0   :  { %2821 = vmatprep.subr.bf16.mxu0 %v3045_v10  ;;  %v1097_v10 = vld [vmem:[%s4772_s5 + $0x5f8] sm:$0xff]  ;;  %v3171_v13 = vcombine.high %v1088_v32, %v1096_v8  ;;  %v3170_v16 = vcombine.low %v1088_v32, %v1096_v8 }
 0x2f1   :  { %v3173_v27 = vcombine.high %v1089_v9, %v1097_v10  ;;  %v3172_v17 = vcombine.low %v1089_v9, %v1097_v10 }
 0x2f2   :  { %2781 = vmatpush1.bf16.msra.mxu1 %v3042_v30  ;;  %v1104_v30 = vld [vmem:[%s4772_s5 + $0x630] sm:$0xff] }
 0x2f3   :  { %2822 = vmatpush1.bf16.msra.mxu0 %v3044_v33  ;;  %2782 = vmatprep.subr.bf16.mxu1 %v3059_v14  ;;  %v1112_v33 = vld [vmem:[%s4772_s5 + $0x670] sm:$0xff]  ;;  %v1105_v14 = vld [vmem:[%s4772_s5 + $0x638] sm:$0xff] }
 0x2f4   :  { %2823 = vmatprep.subr.bf16.mxu0 %v3061_v15  ;;  %v1113_v15 = vld [vmem:[%s4772_s5 + $0x678] sm:$0xff]  ;;  %v3187_v18 = vcombine.high %v1104_v30, %v1112_v33  ;;  %v3186_v24 = vcombine.low %v1104_v30, %v1112_v33 }
 0x2f5   :  { %v3189_v19 = vcombine.high %v1105_v14, %v1113_v15  ;;  %v3188_v25 = vcombine.low %v1105_v14, %v1113_v15 }
 0x2f6   :  { %2783 = vmatpush1.bf16.msra.mxu1 %v3058_v20  ;;  %v1120_v20 = vld [vmem:[%s4772_s5 + $0x6b0] sm:$0xff] }
 0x2f7   :  { %2824 = vmatpush1.bf16.msra.mxu0 %v3060_v21  ;;  %2784 = vmatprep.subr.bf16.mxu1 %v3075_v22  ;;  %v1128_v21 = vld [vmem:[%s4772_s5 + $0x6f0] sm:$0xff]  ;;  %v1121_v22 = vld [vmem:[%s4772_s5 + $0x6b8] sm:$0xff] }
 0x2f8   :  { %2825 = vmatprep.subr.bf16.mxu0 %v3077_v23  ;;  %v1129_v23 = vld [vmem:[%s4772_s5 + $0x6f8] sm:$0xff]  ;;  %v3203_v26 = vcombine.high %v1120_v20, %v1128_v21  ;;  %v3202_v37 = vcombine.low %v1120_v20, %v1128_v21 }
 0x2f9   :  { %v3205_v28 = vcombine.high %v1121_v22, %v1129_v23  ;;  %v3204_v38 = vcombine.low %v1121_v22, %v1129_v23 }
 0x2fa   :  { %2785 = vmatpush1.bf16.msra.mxu1 %v3074_v29  ;;  %v1136_v29 = vld [vmem:[%s4772_s5 + $0x730] sm:$0xff] }
 0x2fb   :  { %2826 = vmatpush1.bf16.msra.mxu0 %v3076_v31  ;;  %2786 = vmatprep.subr.bf16.mxu1 %v3091_v35  ;;  %v1144_v31 = vld [vmem:[%s4772_s5 + $0x770] sm:$0xff]  ;;  %v1137_v35 = vld [vmem:[%s4772_s5 + $0x738] sm:$0xff] }
 0x2fc   :  { %2827 = vmatprep.subr.bf16.mxu0 %v3093_v36  ;;  %v1145_v36 = vld [vmem:[%s4772_s5 + $0x778] sm:$0xff]  ;;  %v3219_v39 = vcombine.high %v1136_v29, %v1144_v31  ;;  %v3218_v45 = vcombine.low %v1136_v29, %v1144_v31 }
 0x2fd   :  { %v3221_v40 = vcombine.high %v1137_v35, %v1145_v36  ;;  %v3220_v46 = vcombine.low %v1137_v35, %v1145_v36  ;;  %v1163_v36 = vld [vmem:[%s4775_s6 + $0x8] sm:$0xff] }
 0x2fe   :  { %2787 = vmatpush1.bf16.msra.mxu1 %v3090_v41  ;;  %v1152_v41 = vld [vmem:[%s4772_s5 + $0x7b0] sm:$0xff] }
 0x2ff   :  { %2828 = vmatpush1.bf16.msra.mxu0 %v3092_v42  ;;  %2788 = vmatprep.subr.bf16.mxu1 %v3107_v43  ;;  %v1160_v42 = vld [vmem:[%s4772_s5 + $0x7f0] sm:$0xff]  ;;  %v1153_v43 = vld [vmem:[%s4772_s5 + $0x7b8] sm:$0xff] }
 0x300   :  { %2829 = vmatprep.subr.bf16.mxu0 %v3109_v44  ;;  %v1161_v44 = vld [vmem:[%s4772_s5 + $0x7f8] sm:$0xff]  ;;  %v3235_v47 = vcombine.high %v1152_v41, %v1160_v42 }
 0x301   :  { %v3237_v48 = vcombine.high %v1153_v43, %v1161_v44 }
 0x302   :  { %2789 = vmatpush1.bf16.msra.mxu1 %v3106_v51  ;;  %v3234_v51 = vcombine.low %v1152_v41, %v1160_v42 }
 0x303   :  { %2830 = vmatpush1.bf16.msra.mxu0 %v3108_v53  ;;  %2790 = vmatprep.subr.bf16.mxu1 %v3123_v54  ;;  %v3236_v53 = vcombine.low %v1153_v43, %v1161_v44  ;;  %v1178_v54 = vsub.s32 2, %v3986_v49 }
 0x304   :  { %2831 = vmatprep.subr.bf16.mxu0 %v3125_v55  ;;  %v1162_v55 = vld [vmem:[%s4775_s6] sm:$0xff] }
 0x305   :  { %v1171_v57 = vrot.slane %v1162_v55, %v3989_v50  ;;  %v1179_v58 = vrot.slane %v1162_v55, %v1178_v54  ;;  %v1175_v59 = vrot.slane %v1162_v55, %v3995_v52 }
 0x306   :  { %2791 = vmatpush1.bf16.msra.mxu1 %v3122_v60  ;;  %v1183_v60 = vrot.slane %v1162_v55, %v1182_v56 }
 0x307   :  { %2832 = vmatpush1.bf16.msra.mxu0 %v3124_v61  ;;  %2792 = vmatprep.subr.bf16.mxu1 %v3139_v62 }
 0x308   :  { %2833 = vmatprep.subr.bf16.mxu0 %v3141_v63 }
 0x30a   :  { %2793 = vmatpush1.bf16.msra.mxu1 %v3138_v4 }
 0x30b   :  { %2834 = vmatpush1.bf16.msra.mxu0 %v3140_v5  ;;  %2794 = vmatprep.subr.bf16.mxu1 %v3155_v6 }
 0x30c   :  { %2835 = vmatprep.subr.bf16.mxu0 %v3157_v7 }
 0x30e   :  { %2795 = vmatpush1.bf16.msra.mxu1 %v3154_v11  ;;  %v1186_v11 = vsub.s32 4, %v3986_v49 }
 0x30f   :  { %2836 = vmatpush1.bf16.msra.mxu0 %v3156_v12  ;;  %2796 = vmatprep.subr.bf16.mxu1 %v3171_v13  ;;  %v1194_v12 = vsub.s32 6, %v3986_v49  ;;  %v1190_v13 = vsub.s32 5, %v3986_v49 }
 0x310   :  { %2837 = vmatprep.subr.bf16.mxu0 %v3173_v27  ;;  %v1198_v27 = vsub.s32 7, %v3986_v49  ;;  %v1187_v30 = vrot.slane %v1162_v55, %v1186_v11 }
 0x311   :  { %v1195_v33 = vrot.slane %v1162_v55, %v1194_v12  ;;  %v1191_v14 = vrot.slane %v1162_v55, %v1190_v13 }
 0x312   :  { %2797 = vmatpush1.bf16.msra.mxu1 %v3170_v16  ;;  %v1199_v15 = vrot.slane %v1162_v55, %v1198_v27 }
 0x313   :  { %2838 = vmatpush1.bf16.msra.mxu0 %v3172_v17  ;;  %2798 = vmatprep.subr.bf16.mxu1 %v3187_v18 }
 0x314   :  { %2839 = vmatprep.subr.bf16.mxu0 %v3189_v19 }
 0x316   :  { %2799 = vmatpush1.bf16.msra.mxu1 %v3186_v24 }
 0x317   :  { %2840 = vmatpush1.bf16.msra.mxu0 %v3188_v25  ;;  %2800 = vmatprep.subr.bf16.mxu1 %v3203_v26 }
 0x318   :  { %2841 = vmatprep.subr.bf16.mxu0 %v3205_v28 }
 0x31a   :  { %2801 = vmatpush1.bf16.msra.mxu1 %v3202_v37  ;;  %v1203_v37 = vrot.slane %v1163_v36, %v3989_v50 }
 0x31b   :  { %2842 = vmatpush1.bf16.msra.mxu0 %v3204_v38  ;;  %2802 = vmatprep.subr.bf16.mxu1 %v3219_v39  ;;  %v1211_v38 = vrot.slane %v1163_v36, %v1178_v54  ;;  %v1207_v39 = vrot.slane %v1163_v36, %v3995_v52  ;;  %v1219_v52 = vrot.slane %v1163_v36, %v1186_v11 }
 0x31c   :  { %2843 = vmatprep.subr.bf16.mxu0 %v3221_v40  ;;  %v1215_v40 = vrot.slane %v1163_v36, %v1182_v56  ;;  %v1227_v54 = vrot.slane %v1163_v36, %v1194_v12  ;;  %v1223_v56 = vrot.slane %v1163_v36, %v1190_v13 }
 0x31e   :  { %2803 = vmatpush1.bf16.msra.mxu1 %v3218_v45 }
 0x31f   :  { %2844 = vmatpush1.bf16.msra.mxu0 %v3220_v46  ;;  %2804 = vmatprep.subr.bf16.mxu1 %v3235_v47 }
 0x320   :  { %2845 = vmatprep.subr.bf16.mxu0 %v3237_v48 }
 0x322   :  { %2805 = vmatpush1.bf16.msra.mxu1 %v3234_v51 }
 0x323   :  { %2846 = vmatpush1.bf16.msra.mxu0 %v3236_v53 }
 0x325   :  { %2807 = vmatmul.mubr.bf16.vlgmr.msra.gmra.mrb[28].mxu1 %v4135_v34 }
 0x326   :  { %2848 = vmatmul.mubr.bf16.vlgmr.msra.gmra.mrb[24].mxu0 %v4135_v34 }
 0x338   :  { %v2562_v61 = vpop.f32.mrb[16].mxu1  ;;  %v2603_v62 = vpop.f32.mrb[12].mxu0 }
 0x339   :  { %v2563_v63 = vadd.f32 %v2562_v61, %v1171_v57  ;;  %v2604_v0 = vadd.f32 %v2603_v62, %v1179_v58  ;;  %v2564_v1 = vpop.f32.mrb[17].mxu1  ;;  %v2605_v34 = vpop.f32.mrb[13].mxu0  ;;  %v1231_v61 = vrot.slane %v1163_v36, %v1198_v27 }
 0x33a   :  { %v2565_v2 = vadd.f32 %v2564_v1, %v1175_v59  ;;  %v2606_v3 = vadd.f32 %v2605_v34, %v1183_v60  ;;  %v2566_v4 = vpop.f32.mrb[18].mxu1  ;;  %v2607_v5 = vpop.f32.mrb[14].mxu0 }
 0x33b   :  { %v2856_v6 = vmax.f32 %v2563_v63, 0.0  ;;  %v2858_v7 = vmax.f32 %v2604_v0, 0.0  ;;  %v2567_v32 = vpop.f32.mrb[19].mxu1  ;;  %v2608_v8 = vpop.f32.mrb[15].mxu0 }
 0x33c   :  { %v2857_v9 = vmax.f32 %v2565_v2, 0.0  ;;  %v2859_v10 = vmax.f32 %v2606_v3, 0.0 }
 0x33d   :  { %2872 = vst [vmem:[%s4776_s7] sm:$0xff] %v2856_v6  ;;  %2874 = vst [vmem:[%s4776_s7 + $0x10] sm:$0xff] %v2858_v7 }
 0x33e   :  { %2873 = vst [vmem:[%s4776_s7 + $0x8] sm:$0xff] %v2857_v9  ;;  %2875 = vst [vmem:[%s4776_s7 + $0x18] sm:$0xff] %v2859_v10 }
 0x378   :  { %v2644_v16 = vpop.f32.mrb[20].mxu1  ;;  %v2685_v17 = vpop.f32.mrb[16].mxu0 }
 0x379   :  { %v2645_v18 = vadd.f32 %v2644_v16, %v1187_v30  ;;  %v2686_v19 = vadd.f32 %v2685_v17, %v1195_v33  ;;  %v2646_v20 = vpop.f32.mrb[21].mxu1  ;;  %v2687_v21 = vpop.f32.mrb[17].mxu0 }
 0x37a   :  { %v2647_v22 = vadd.f32 %v2646_v20, %v1191_v14  ;;  %v2688_v23 = vadd.f32 %v2687_v21, %v1199_v15  ;;  %v2648_v24 = vpop.f32.mrb[22].mxu1  ;;  %v2689_v25 = vpop.f32.mrb[18].mxu0 }
 0x37b   :  { %v2860_v26 = vmax.f32 %v2645_v18, 0.0  ;;  %v2862_v28 = vmax.f32 %v2686_v19, 0.0  ;;  %v2649_v29 = vpop.f32.mrb[23].mxu1  ;;  %v2690_v31 = vpop.f32.mrb[19].mxu0 }
 0x37c   :  { %v2861_v35 = vmax.f32 %v2647_v22, 0.0  ;;  %v2863_v49 = vmax.f32 %v2688_v23, 0.0 }
 0x37d   :  { %2876 = vst [vmem:[%s4776_s7 + $0x20] sm:$0xff] %v2860_v26  ;;  %2878 = vst [vmem:[%s4776_s7 + $0x30] sm:$0xff] %v2862_v28 }
 0x37e   :  { %2877 = vst [vmem:[%s4776_s7 + $0x28] sm:$0xff] %v2861_v35  ;;  %2879 = vst [vmem:[%s4776_s7 + $0x38] sm:$0xff] %v2863_v49 }
 0x3b8   :  { %v2726_v41 = vpop.f32.mrb[24].mxu1 }
 0x3b9   :  { %v2727_v42 = vadd.f32 %v2726_v41, %v1203_v37  ;;  %v2767_v43 = vpop.f32.mrb[20].mxu0  ;;  %v2728_v44 = vpop.f32.mrb[25].mxu1 }
 0x3ba   :  { %v2768_v45 = vadd.f32 %v2767_v43, %v1211_v38  ;;  %v2729_v46 = vadd.f32 %v2728_v44, %v1207_v39  ;;  %v2769_v47 = vpop.f32.mrb[21].mxu0  ;;  %v2730_v48 = vpop.f32.mrb[26].mxu1 }
 0x3bb   :  { %v2864_v51 = vmax.f32 %v2727_v42, 0.0  ;;  %v2770_v53 = vadd.f32 %v2769_v47, %v1215_v40  ;;  %v2771_v55 = vpop.f32.mrb[22].mxu0  ;;  %v2731_v57 = vpop.f32.mrb[27].mxu1 }
 0x3bc   :  { %v2866_v58 = vmax.f32 %v2768_v45, 0.0  ;;  %v2865_v59 = vmax.f32 %v2729_v46, 0.0  ;;  %v2772_v60 = vpop.f32.mrb[23].mxu0 }
 0x3bd   :  { %2880 = vst [vmem:[%s4776_s7 + $0x40] sm:$0xff] %v2864_v51  ;;  %v2867_v50 = vmax.f32 %v2770_v53, 0.0 }
 0x3be   :  { %2882 = vst [vmem:[%s4776_s7 + $0x50] sm:$0xff] %v2866_v58  ;;  %2881 = vst [vmem:[%s4776_s7 + $0x48] sm:$0xff] %v2865_v59 }
 0x3bf   :  { %2883 = vst [vmem:[%s4776_s7 + $0x58] sm:$0xff] %v2867_v50 }
 0x3f8   :  { %v2808_v62 = vpop.f32.mrb[28].mxu1 }
 0x3f9   :  { %v2809_v63 = vadd.f32 %v2808_v62, %v1219_v52  ;;  %v2849_v0 = vpop.f32.mrb[24].mxu0  ;;  %v2810_v1 = vpop.f32.mrb[29].mxu1 }
 0x3fa   :  { %v2850_v34 = vadd.f32 %v2849_v0, %v1227_v54  ;;  %v2811_v2 = vadd.f32 %v2810_v1, %v1223_v56  ;;  %v2851_v3 = vpop.f32.mrb[25].mxu0  ;;  %v2812_v4 = vpop.f32.mrb[30].mxu1 }
 0x3fb   :  { %v2868_v5 = vmax.f32 %v2809_v63, 0.0  ;;  %v2852_v6 = vadd.f32 %v2851_v3, %v1231_v61  ;;  %v2853_v7 = vpop.f32.mrb[26].mxu0  ;;  %v2813_v32 = vpop.f32.mrb[31].mxu1 }
 0x3fc   :  { %v2870_v8 = vmax.f32 %v2850_v34, 0.0  ;;  %v2869_v9 = vmax.f32 %v2811_v2, 0.0  ;;  %v2854_v10 = vpop.f32.mrb[27].mxu0 }
 0x3fd   :  { %2884 = vst [vmem:[%s4776_s7 + $0x60] sm:$0xff] %v2868_v5  ;;  %v2871_v11 = vmax.f32 %v2852_v6, 0.0 }
 0x3fe   :  { %2886 = vst [vmem:[%s4776_s7 + $0x70] sm:$0xff] %v2870_v8  ;;  %2885 = vst [vmem:[%s4776_s7 + $0x68] sm:$0xff] %v2869_v9 }
 0x3ff   :  { %2887 = vst [vmem:[%s4776_s7 + $0x78] sm:$0xff] %v2871_v11 }

</bundles_post_ra>
